<compile_context>
chip_gen: v5e
topology: v5e:2x2
jax: 0.10.0
libtpu: 0.0.40
codegen_flags: <defaults>
</compile_context>

<pallas_src>
import jax
import jax.numpy as jnp
from jax.experimental import pallas as pl
from jax.experimental.pallas import tpu as pltpu


_GROUPS = 4
_EPS = 1e-5
_WPAD = 8   # left zero margin on the W (sublane) axis -> tile-aligned interior stores


# ----------------------------------------------------------------------------
# In-kernel helpers (trace-time functions operating on refs / values)
# ----------------------------------------------------------------------------

def _zero_ring(pad_ref, H, W):
    """Zero only the border cells of the 3x3 read window (rows 0/H+1, cols
    _WPAD-1/_WPAD+W). The interior is fully rewritten before every conv."""
    Bp, _Hp, _Wp, C = pad_ref.shape
    dt = pad_ref.dtype
    W0 = _WPAD - 1
    pad_ref[:, 0:1, W0:W0 + W + 2, :] = jnp.zeros((Bp, 1, W + 2, C), dt)
    pad_ref[:, H + 1:H + 2, W0:W0 + W + 2, :] = jnp.zeros((Bp, 1, W + 2, C), dt)
    pad_ref[:, 1:H + 1, W0:W0 + 1, :] = jnp.zeros((Bp, H, 1, C), dt)
    pad_ref[:, 1:H + 1, W0 + W + 1:W0 + W + 2, :] = jnp.zeros((Bp, H, 1, C), dt)


def _im2col_9(pad_ref, B, H, W):
    """Build the 3x3 im2col operand [B*H*W, 9*C] (bf16) from the padded scratch.

    pad_ref: [B, H+2, W+2*_WPAD, C] f32; interior at rows 1..H, cols
             _WPAD.._WPAD+W-1; zero ring around it.
    """
    C = pad_ref.shape[-1]
    W0 = _WPAD - 1
    xp = pad_ref[...]
    cols = []
    for kh in range(3):
        for kw in range(3):
            s = jax.lax.slice(xp, (0, kh, W0 + kw, 0),
                              (B, kh + H, W0 + kw + W, C))
            cols.append(s.reshape(B * H * W, C))
    return jnp.concatenate(cols, axis=-1).astype(jnp.bfloat16)   # [M, 9*C]


def _group_sum_bcast(v, gsz):
    """v: [B, C] f32 -> per-group sums broadcast back per channel, [B, C].
    Pure VPU/XLU (lane slices + lane reductions); no MXU."""
    B, C = v.shape
    parts = []
    for g in range(C // gsz):
        sg = jnp.sum(v[:, g * gsz:(g + 1) * gsz], axis=-1, keepdims=True)  # [B,1]
        parts.append(jnp.broadcast_to(sg, (B, gsz)))
    return jnp.concatenate(parts, axis=-1)


def _groupnorm(x2d, gamma, beta, B, HW):
    """Per-sample GroupNorm on folded activations x2d [B*HW, C] (f32 stats)."""
    C = x2d.shape[-1]
    gsz = C // _GROUPS
    inv_cnt = 1.0 / float(HW * gsz)
    x3 = x2d.reshape(B, HW, C)
    s = jnp.sum(x3, axis=1)                                  # [B, C]
    mean_c = _group_sum_bcast(s, gsz) * inv_cnt              # [B, C]
    d = x3 - mean_c[:, None, :]
    ss = jnp.sum(d * d, axis=1)                              # [B, C]
    var_c = _group_sum_bcast(ss, gsz) * inv_cnt
    inv_c = jax.lax.rsqrt(var_c + _EPS)                      # [B, C]
    a = gamma * inv_c                                        # [1,C]*[B,C] -> [B,C]
    return (d * a[:, None, :] + beta).reshape(B * HW, C)


# ----------------------------------------------------------------------------
# Fused generator kernel (one grid step == B batch samples)
# ----------------------------------------------------------------------------

def _generator_kernel(x_ref, w1_ref, b1_ref,
                      r1w1_ref, r1g1_ref, r1be1_ref, r1w2_ref, r1g2_ref, r1be2_ref,
                      r2w1_ref, r2g1_ref, r2be1_ref, r2w2_ref, r2g2_ref, r2be2_ref,
                      wd2_ref, bd2_ref,
                      o_ref,
                      pad_in_ref, pad_mid_ref):
    B, H, W, _Cin = x_ref.shape
    Cmid = r1w1_ref.shape[-1]            # 32
    C4 = wd2_ref.shape[-1]               # 4 * Cout = 12
    HW = H * W

    # Zero only the border ring that the 3x3 window reads (once per step).
    _zero_ring(pad_in_ref, H, W)
    _zero_ring(pad_mid_ref, H, W)

    # ---- stage 1: spectral_norm(ConvT 64->32, k3, s1, p1) + ReLU ------------
    pad_in_ref[:, 1:H + 1, _WPAD:_WPAD + W, :] = x_ref[...]
    h = jnp.dot(_im2col_9(pad_in_ref, B, H, W), w1_ref[...],
                preferred_element_type=jnp.float32) + b1_ref[...]
    h = jnp.maximum(h, 0.0)                                  # [B*HW, 32] f32

    # ---- two ResidualBlock(32, 32), identity shortcut ------------------------
    blocks = ((r1w1_ref, r1g1_ref, r1be1_ref, r1w2_ref, r1g2_ref, r1be2_ref),
              (r2w1_ref, r2g1_ref, r2be1_ref, r2w2_ref, r2g2_ref, r2be2_ref))
    for wa, ga, ba, wb, gb, bb in blocks:
        pad_mid_ref[:, 1:H + 1, _WPAD:_WPAD + W, :] = h.reshape(B, H, W, Cmid)
        t = jnp.dot(_im2col_9(pad_mid_ref, B, H, W), wa[...],
                    preferred_element_type=jnp.float32)
        t = jnp.maximum(_groupnorm(t, ga[...], ba[...], B, HW), 0.0)
        pad_mid_ref[:, 1:H + 1, _WPAD:_WPAD + W, :] = t.reshape(B, H, W, Cmid)
        t = jnp.dot(_im2col_9(pad_mid_ref, B, H, W), wb[...],
                    preferred_element_type=jnp.float32)
        h = _groupnorm(t, gb[...], bb[...], B, HW) + h       # no ReLU after add

    # ---- stage 4: spectral_norm(ConvT 32->3, k4, s2, p1) + Tanh --------------
    # ONE matmul: [M, 9*Cmid] @ [9*Cmid, 4*Cout], parity-packed weight.
    pad_mid_ref[:, 1:H + 1, _WPAD:_WPAD + W, :] = h.reshape(B, H, W, Cmid)
    im = _im2col_9(pad_mid_ref, B, H, W)
    y = jnp.tanh(jnp.dot(im, wd2_ref[...],
                         preferred_element_type=jnp.float32) + bd2_ref[...])
    # o_ref[b, a*W+w, (ph*2+pw)*Cout + c] == final_nhwc[n, 2a+ph, 2w+pw, c]
    o_ref[...] = y.reshape(B, HW, C4).astype(o_ref.dtype)


# ----------------------------------------------------------------------------
# pallas_call wrapper
# ----------------------------------------------------------------------------

def _choose_samples_per_step(N, HW, target_m=256):
    """Fold enough samples per step to fill the MXU M dimension (~256 rows)."""
    B = min(N, max(1, -(-target_m // HW)))
    while N % B:
        B -= 1
    return B


def generator_forward(x_nchw, kp):
    N, Cin, H, W = x_nchw.shape
    Cmid = kp["r1_w1"].shape[-1]
    C4 = kp["wd2"].shape[-1]          # 4 * Cout
    Cout = C4 // 4
    HW = H * W
    x = jnp.transpose(x_nchw, (0, 2, 3, 1))                   # NCHW -> NHWC

    B = _choose_samples_per_step(N, HW)
    steps = N // B

    inputs = [x, kp["w1"], kp["b1"],
              kp["r1_w1"], kp["r1_g1"], kp["r1_b1"],
              kp["r1_w2"], kp["r1_g2"], kp["r1_b2"],
              kp["r2_w1"], kp["r2_g1"], kp["r2_b1"],
              kp["r2_w2"], kp["r2_g2"], kp["r2_b2"],
              kp["wd2"], kp["b2"]]

    def full_spec(a):
        # whole array resident in VMEM; same block every step -> fetched once
        return pl.BlockSpec(a.shape, lambda s, _nd=a.ndim: (0,) * _nd)

    in_specs = ([pl.BlockSpec((B, H, W, Cin), lambda s: (s, 0, 0, 0))]
                + [full_spec(a) for a in inputs[1:]])

    flops = 2 * N * HW * (9 * Cin * Cmid + 4 * 9 * Cmid * Cmid + 9 * Cmid * C4)
    weight_bytes = sum(int(a.size) * a.dtype.itemsize for a in inputs[1:])
    cost = pl.CostEstimate(
        flops=int(flops),
        transcendentals=int(N * HW * C4),
        bytes_accessed=int(x.size) * 4 + weight_bytes + N * HW * C4 * 4)

    out = pl.pallas_call(
        _generator_kernel,
        out_shape=jax.ShapeDtypeStruct((N, HW, C4), jnp.float32),
        grid_spec=pltpu.PrefetchScalarGridSpec(
            num_scalar_prefetch=0,
            grid=(steps,),
            in_specs=in_specs,
            out_specs=pl.BlockSpec((B, HW, C4), lambda s: (s, 0, 0)),
            scratch_shapes=[
                pltpu.VMEM((B, H + 2, W + 2 * _WPAD, Cin), jnp.float32),
                pltpu.VMEM((B, H + 2, W + 2 * _WPAD, Cmid), jnp.float32)]),
        compiler_params=pltpu.CompilerParams(
            dimension_semantics=("parallel",)),
        cost_estimate=cost,
    )(*inputs)

    # One transpose does the parity interleave AND NHWC->NCHW together:
    # out6[n, a, b, ph, pw, c] -> y[n, c, 2a+ph, 2b+pw]
    y = out.reshape(N, H, W, 2, 2, Cout)
    y = jnp.transpose(y, (0, 5, 1, 3, 2, 4)).reshape(N, Cout, 2 * H, 2 * W)
    return y


# ----------------------------------------------------------------------------
# Parameters (deterministic, synthetic) + spectral-norm / im2col preprocessing
# ----------------------------------------------------------------------------

def _spectral_normalize(w, key, n_iters=30, eps=1e-12):
    # spectral_norm on a ConvTranspose2d weight [Cin, Cout, kh, kw] (dim=0):
    # divide by the top singular value of the [Cin, Cout*kh*kw] matricization.
    # TODO(synk): PyTorch runs one power iteration per forward with a stored u;
    # here sigma is computed once (deterministically) at parameter setup.
    wm = w.reshape(w.shape[0], -1)
    u = jax.random.normal(key, (wm.shape[0],), dtype=jnp.float32)
    u = u / (jnp.linalg.norm(u) + eps)
    v = None
    for _ in range(n_iters):
        v = wm.T @ u
        v = v / (jnp.linalg.norm(v) + eps)
        u = wm @ v
        u = u / (jnp.linalg.norm(u) + eps)
    sigma = u @ (wm @ v)
    return w / sigma


def init_reference_params(key):
    ks = jax.random.split(key, 8)
    s = 0.1

    # spectral_norm(ConvTranspose2d(64, 32, k=3, s=1, p=1, bias=True))
    w_d1_t = s * jax.random.normal(ks[0], (64, 32, 3, 3), jnp.float32)
    w_d1_t = _spectral_normalize(w_d1_t, ks[1])
    b_d1 = s * jax.random.normal(ks[2], (32,), jnp.float32)
    w_d1_hwio = jnp.transpose(w_d1_t, (2, 3, 0, 1))            # [3,3,64,32]

    def resblock(k):
        k1, k2, k3, k4, k5, k6 = jax.random.split(k, 6)
        return dict(
            w1=s * jax.random.normal(k1, (3, 3, 32, 32), jnp.float32),   # HWIO, bias=False
            w2=s * jax.random.normal(k2, (3, 3, 32, 32), jnp.float32),
            g1=1.0 + 0.1 * jax.random.normal(k3, (32,), jnp.float32),
            be1=0.1 * jax.random.normal(k4, (32,), jnp.float32),
            g2=1.0 + 0.1 * jax.random.normal(k5, (32,), jnp.float32),
            be2=0.1 * jax.random.normal(k6, (32,), jnp.float32))

    res1 = resblock(ks[3])
    res2 = resblock(ks[4])

    # spectral_norm(ConvTranspose2d(32, 3, k=4, s=2, p=1, bias=True))
    w_d2_t = s * jax.random.normal(ks[5], (32, 3, 4, 4), jnp.float32)
    w_d2_t = _spectral_normalize(w_d2_t, ks[6])
    b_d2 = s * jax.random.normal(ks[7], (3,), jnp.float32)
    w_d2_hwio = jnp.transpose(w_d2_t, (2, 3, 0, 1))            # [4,4,32,3]

    return dict(w_d1_hwio=w_d1_hwio, b_d1=b_d1, res1=res1, res2=res2,
                w_d2_hwio=w_d2_hwio, b_d2=b_d2)


def _pack_deconv_k4s2(w_hwio):
    """[4,4,Cmid,Cout] ConvT(k4,s2,p1) weight -> zero-padded [9*Cmid, 4*Cout]
    im2col weight so ALL four output parities come from ONE matmul.

    With xpad[i] = x[i-1] (zero pad 1), per axis:
      parity 0: out[2a]   = xpad[a+0]@K[3] + xpad[a+1]@K[1]
      parity 1: out[2a+1] = xpad[a+1]@K[2] + xpad[a+2]@K[0]
    Rows ordered (dh, dw, cin) to match _im2col_9; cols ordered (ph, pw, cout).
    """
    _kh, _kw, ci, co = w_hwio.shape
    taps = {0: {0: 3, 1: 1}, 1: {1: 2, 2: 0}}                  # shift -> kernel tap
    row_blocks = []
    for dh in range(3):
        for dw in range(3):
            cols = []
            for ph in (0, 1):
                for pw in (0, 1):
                    if dh in taps[ph] and dw in taps[pw]:
                        cols.append(w_hwio[taps[ph][dh], taps[pw][dw]])   # [ci, co]
                    else:
                        cols.append(jnp.zeros((ci, co), w_hwio.dtype))
            row_blocks.append(jnp.concatenate(cols, axis=-1))             # [ci, 4*co]
    return jnp.concatenate(row_blocks, axis=0).astype(jnp.bfloat16)       # [9*ci, 4*co]


def pack_kernel_params(R):
    """Reference (HWIO, f32) params -> kernel-ready im2col / parity-packed bf16."""
    bf = jnp.bfloat16

    def im2col_w(w_hwio):                          # [3,3,Ci,Co] -> [9*Ci, Co]
        kh, kw, ci, co = w_hwio.shape
        return w_hwio.reshape(kh * kw * ci, co).astype(bf)

    def row(v):
        return v.reshape(1, -1).astype(jnp.float32)

    # stride-1 ConvT == plain conv with the spatially-flipped kernel
    w1 = im2col_w(R["w_d1_hwio"][::-1, ::-1, :, :])

    # k4/s2 deconv: single parity-packed weight, bias tiled over 4 parities
    wd2 = _pack_deconv_k4s2(R["w_d2_hwio"])
    b2 = row(jnp.tile(R["b_d2"], 4))

    kp = dict(w1=w1, b1=row(R["b_d1"]), wd2=wd2, b2=b2)
    for name, blk in (("r1", R["res1"]), ("r2", R["res2"])):
        kp[name + "_w1"] = im2col_w(blk["w1"])
        kp[name + "_w2"] = im2col_w(blk["w2"])
        kp[name + "_g1"] = row(blk["g1"])
        kp[name + "_b1"] = row(blk["be1"])
        kp[name + "_g2"] = row(blk["g2"])
        kp[name + "_b2"] = row(blk["be2"])
    return kp


# ----------------------------------------------------------------------------
# Pure-JAX references (structure-independent check of the Pallas kernel)
# ----------------------------------------------------------------------------

def _ref_conv3x3(x, w):
    return jax.lax.conv_general_dilated(
        x, w, (1, 1), ((1, 1), (1, 1)),
        dimension_numbers=("NHWC", "HWIO", "NHWC"),
        preferred_element_type=jnp.float32)


def _ref_groupnorm(x, gamma, beta, groups, eps=_EPS):
    N, H, W, C = x.shape
    xg = x.reshape(N, H, W, groups, C // groups)
    mean = xg.mean(axis=(1, 2, 4), keepdims=True)
    var = ((xg - mean) ** 2).mean(axis=(1, 2, 4), keepdims=True)
    y = ((xg - mean) / jnp.sqrt(var + eps)).reshape(N, H, W, C)
    return y * gamma + beta


def _ref_deconv(x, w_hwio, b, stride, pad, K):
    w_flip = w_hwio[::-1, ::-1, :, :]
    y = jax.lax.conv_general_dilated(
        x, w_flip, (1, 1),
        ((K - 1 - pad, K - 1 - pad), (K - 1 - pad, K - 1 - pad)),
        lhs_dilation=(stride, stride),
        dimension_numbers=("NHWC", "HWIO", "NHWC"),
        preferred_element_type=jnp.float32)
    return y + b[None, None, None, :]


def reference_forward(x_nchw, R, *, bf16_matmul_operands=False):
    """bf16_matmul_operands=True mirrors the kernel's mixed precision exactly."""
    cast = ((lambda a: a.astype(jnp.bfloat16)) if bf16_matmul_operands
            else (lambda a: a))
    x = jnp.transpose(x_nchw, (0, 2, 3, 1))
    h = jnp.maximum(
        _ref_deconv(cast(x), cast(R["w_d1_hwio"]), R["b_d1"], 1, 1, 3), 0.0)
    for blk in (R["res1"], R["res2"]):
        t = _ref_conv3x3(cast(h), cast(blk["w1"]))
        t = jnp.maximum(_ref_groupnorm(t, blk["g1"], blk["be1"], _GROUPS), 0.0)
        t = _ref_conv3x3(cast(t), cast(blk["w2"]))
        h = _ref_groupnorm(t, blk["g2"], blk["be2"], _GROUPS) + h
    y = jnp.tanh(_ref_deconv(cast(h), cast(R["w_d2_hwio"]), R["b_d2"], 2, 1, 4))
    return jnp.transpose(y, (0, 3, 1, 2))


# ----------------------------------------------------------------------------

if __name__ == "__main__":
    root = jax.random.PRNGKey(0)
    R = init_reference_params(root)
    KP = pack_kernel_params(R)

    # PyTorch-style input: NCHW, 64 input channels, small spatial size.
    x = jax.random.normal(jax.random.fold_in(root, 123), (2, 64, 8, 8),
                          dtype=jnp.float32)

    fwd = jax.jit(generator_forward)
    y = jax.block_until_ready(fwd(x, KP))
    assert y.shape == (2, 3, 16, 16), y.shape

    # Strict check against a reference using the same bf16-operand / f32-accum
    # policy (validates the conv/deconv tap decomposition and GroupNorm math);
    # looser check against the all-f32 reference (bounds bf16 rounding drift).
    y_ref_bf16 = reference_forward(x, R, bf16_matmul_operands=True)
    y_ref_f32 = reference_forward(x, R, bf16_matmul_operands=False)
    err_strict = float(jnp.max(jnp.abs(y - y_ref_bf16)))
    err_f32 = float(jnp.max(jnp.abs(y - y_ref_f32)))

    if not bool(jnp.all(jnp.isfinite(y))) or err_strict > 5e-3 or err_f32 > 5e-2:
        raise SystemExit(
            f"mismatch vs reference: strict={err_strict:.3e} f32={err_f32:.3e}")

    print("KERNEL_OK")
</pallas_src>

<mosaic_0001>
module attributes {stable_mosaic.version = 11 : i64} {
  func.func @_generator_kernel(%arg0: i32, %arg1: memref<2x8x8x64xf32, #tpu.memory_space<vmem>>, %arg2: memref<576x32xbf16, #tpu.memory_space<vmem>>, %arg3: memref<1x32xf32, #tpu.memory_space<vmem>>, %arg4: memref<288x32xbf16, #tpu.memory_space<vmem>>, %arg5: memref<1x32xf32, #tpu.memory_space<vmem>>, %arg6: memref<1x32xf32, #tpu.memory_space<vmem>>, %arg7: memref<288x32xbf16, #tpu.memory_space<vmem>>, %arg8: memref<1x32xf32, #tpu.memory_space<vmem>>, %arg9: memref<1x32xf32, #tpu.memory_space<vmem>>, %arg10: memref<288x32xbf16, #tpu.memory_space<vmem>>, %arg11: memref<1x32xf32, #tpu.memory_space<vmem>>, %arg12: memref<1x32xf32, #tpu.memory_space<vmem>>, %arg13: memref<288x32xbf16, #tpu.memory_space<vmem>>, %arg14: memref<1x32xf32, #tpu.memory_space<vmem>>, %arg15: memref<1x32xf32, #tpu.memory_space<vmem>>, %arg16: memref<288x12xbf16, #tpu.memory_space<vmem>>, %arg17: memref<1x12xf32, #tpu.memory_space<vmem>>, %arg18: memref<2x64x12xf32, #tpu.memory_space<vmem>>, %arg19: memref<2x10x24x64xf32, #tpu.memory_space<vmem>>, %arg20: memref<2x10x24x32xf32, #tpu.memory_space<vmem>>) attributes {dimension_semantics = [#tpu.dimension_semantics<parallel>], iteration_bounds = array<i64: 1>, scalar_prefetch = 0 : i64, scratch_operands = 2 : i64, tpu.core_type = #tpu.core_type<tc>, window_params = [{transform_indices = @transform_0, window_bounds = array<i64: 2, 8, 8, 64>}, {pipeline_mode = #tpu.pipeline_mode<synchronous>, transform_indices = @transform_1, window_bounds = array<i64: 576, 32>}, {pipeline_mode = #tpu.pipeline_mode<synchronous>, transform_indices = @transform_2, window_bounds = array<i64: 1, 32>}, {pipeline_mode = #tpu.pipeline_mode<synchronous>, transform_indices = @transform_3, window_bounds = array<i64: 288, 32>}, {pipeline_mode = #tpu.pipeline_mode<synchronous>, transform_indices = @transform_4, window_bounds = array<i64: 1, 32>}, {pipeline_mode = #tpu.pipeline_mode<synchronous>, transform_indices = @transform_5, window_bounds = array<i64: 1, 32>}, {pipeline_mode = #tpu.pipeline_mode<synchronous>, transform_indices = @transform_6, window_bounds = array<i64: 288, 32>}, {pipeline_mode = #tpu.pipeline_mode<synchronous>, transform_indices = @transform_7, window_bounds = array<i64: 1, 32>}, {pipeline_mode = #tpu.pipeline_mode<synchronous>, transform_indices = @transform_8, window_bounds = array<i64: 1, 32>}, {pipeline_mode = #tpu.pipeline_mode<synchronous>, transform_indices = @transform_9, window_bounds = array<i64: 288, 32>}, {pipeline_mode = #tpu.pipeline_mode<synchronous>, transform_indices = @transform_10, window_bounds = array<i64: 1, 32>}, {pipeline_mode = #tpu.pipeline_mode<synchronous>, transform_indices = @transform_11, window_bounds = array<i64: 1, 32>}, {pipeline_mode = #tpu.pipeline_mode<synchronous>, transform_indices = @transform_12, window_bounds = array<i64: 288, 32>}, {pipeline_mode = #tpu.pipeline_mode<synchronous>, transform_indices = @transform_13, window_bounds = array<i64: 1, 32>}, {pipeline_mode = #tpu.pipeline_mode<synchronous>, transform_indices = @transform_14, window_bounds = array<i64: 1, 32>}, {pipeline_mode = #tpu.pipeline_mode<synchronous>, transform_indices = @transform_15, window_bounds = array<i64: 288, 12>}, {pipeline_mode = #tpu.pipeline_mode<synchronous>, transform_indices = @transform_16, window_bounds = array<i64: 1, 12>}, {transform_indices = @transform_17, window_bounds = array<i64: 2, 64, 12>}]} {
    %cst = arith.constant 0.000000e+00 : f32
    %0 = vector.broadcast %cst : f32 to vector<2x1x10x64xf32>
    %c0 = arith.constant 0 : index
    %c0_0 = arith.constant 0 : index
    %c7 = arith.constant 7 : index
    %c0_1 = arith.constant 0 : index
    %1 = vector.load %arg19[%c0, %c0_0, %c7, %c0_1] : memref<2x10x24x64xf32, #tpu.memory_space<vmem>>, vector<2x1x10x64xf32>
    tpu.vector_store %arg19[%c0, %c0_0, %c7, %c0_1], %0 {strides = array<i32>} : memref<2x10x24x64xf32, #tpu.memory_space<vmem>>, vector<2x1x10x64xf32>,
    %cst_2 = arith.constant 0.000000e+00 : f32
    %2 = vector.broadcast %cst_2 : f32 to vector<2x1x10x64xf32>
    %c0_3 = arith.constant 0 : index
    %c9 = arith.constant 9 : index
    %c7_4 = arith.constant 7 : index
    %c0_5 = arith.constant 0 : index
    %3 = vector.load %arg19[%c0_3, %c9, %c7_4, %c0_5] : memref<2x10x24x64xf32, #tpu.memory_space<vmem>>, vector<2x1x10x64xf32>
    tpu.vector_store %arg19[%c0_3, %c9, %c7_4, %c0_5], %2 {strides = array<i32>} : memref<2x10x24x64xf32, #tpu.memory_space<vmem>>, vector<2x1x10x64xf32>,
    %cst_6 = arith.constant 0.000000e+00 : f32
    %4 = vector.broadcast %cst_6 : f32 to vector<2x8x1x64xf32>
    %c0_7 = arith.constant 0 : index
    %c1 = arith.constant 1 : index
    %c7_8 = arith.constant 7 : index
    %c0_9 = arith.constant 0 : index
    %5 = vector.load %arg19[%c0_7, %c1, %c7_8, %c0_9] : memref<2x10x24x64xf32, #tpu.memory_space<vmem>>, vector<2x8x1x64xf32>
    tpu.vector_store %arg19[%c0_7, %c1, %c7_8, %c0_9], %4 {strides = array<i32>} : memref<2x10x24x64xf32, #tpu.memory_space<vmem>>, vector<2x8x1x64xf32>,
    %cst_10 = arith.constant 0.000000e+00 : f32
    %6 = vector.broadcast %cst_10 : f32 to vector<2x8x1x64xf32>
    %c0_11 = arith.constant 0 : index
    %c1_12 = arith.constant 1 : index
    %c16 = arith.constant 16 : index
    %c0_13 = arith.constant 0 : index
    %7 = vector.load %arg19[%c0_11, %c1_12, %c16, %c0_13] : memref<2x10x24x64xf32, #tpu.memory_space<vmem>>, vector<2x8x1x64xf32>
    tpu.vector_store %arg19[%c0_11, %c1_12, %c16, %c0_13], %6 {strides = array<i32>} : memref<2x10x24x64xf32, #tpu.memory_space<vmem>>, vector<2x8x1x64xf32>,
    %cst_14 = arith.constant 0.000000e+00 : f32
    %8 = vector.broadcast %cst_14 : f32 to vector<2x1x10x32xf32>
    %c0_15 = arith.constant 0 : index
    %c0_16 = arith.constant 0 : index
    %c7_17 = arith.constant 7 : index
    %c0_18 = arith.constant 0 : index
    %9 = vector.load %arg20[%c0_15, %c0_16, %c7_17, %c0_18] : memref<2x10x24x32xf32, #tpu.memory_space<vmem>>, vector<2x1x10x32xf32>
    tpu.vector_store %arg20[%c0_15, %c0_16, %c7_17, %c0_18], %8 {strides = array<i32>} : memref<2x10x24x32xf32, #tpu.memory_space<vmem>>, vector<2x1x10x32xf32>,
    %cst_19 = arith.constant 0.000000e+00 : f32
    %10 = vector.broadcast %cst_19 : f32 to vector<2x1x10x32xf32>
    %c0_20 = arith.constant 0 : index
    %c9_21 = arith.constant 9 : index
    %c7_22 = arith.constant 7 : index
    %c0_23 = arith.constant 0 : index
    %11 = vector.load %arg20[%c0_20, %c9_21, %c7_22, %c0_23] : memref<2x10x24x32xf32, #tpu.memory_space<vmem>>, vector<2x1x10x32xf32>
    tpu.vector_store %arg20[%c0_20, %c9_21, %c7_22, %c0_23], %10 {strides = array<i32>} : memref<2x10x24x32xf32, #tpu.memory_space<vmem>>, vector<2x1x10x32xf32>,
    %cst_24 = arith.constant 0.000000e+00 : f32
    %12 = vector.broadcast %cst_24 : f32 to vector<2x8x1x32xf32>
    %c0_25 = arith.constant 0 : index
    %c1_26 = arith.constant 1 : index
    %c7_27 = arith.constant 7 : index
    %c0_28 = arith.constant 0 : index
    %13 = vector.load %arg20[%c0_25, %c1_26, %c7_27, %c0_28] : memref<2x10x24x32xf32, #tpu.memory_space<vmem>>, vector<2x8x1x32xf32>
    tpu.vector_store %arg20[%c0_25, %c1_26, %c7_27, %c0_28], %12 {strides = array<i32>} : memref<2x10x24x32xf32, #tpu.memory_space<vmem>>, vector<2x8x1x32xf32>,
    %cst_29 = arith.constant 0.000000e+00 : f32
    %14 = vector.broadcast %cst_29 : f32 to vector<2x8x1x32xf32>
    %c0_30 = arith.constant 0 : index
    %c1_31 = arith.constant 1 : index
    %c16_32 = arith.constant 16 : index
    %c0_33 = arith.constant 0 : index
    %15 = vector.load %arg20[%c0_30, %c1_31, %c16_32, %c0_33] : memref<2x10x24x32xf32, #tpu.memory_space<vmem>>, vector<2x8x1x32xf32>
    tpu.vector_store %arg20[%c0_30, %c1_31, %c16_32, %c0_33], %14 {strides = array<i32>} : memref<2x10x24x32xf32, #tpu.memory_space<vmem>>, vector<2x8x1x32xf32>,
    %c0_34 = arith.constant 0 : index
    %c0_35 = arith.constant 0 : index
    %c0_36 = arith.constant 0 : index
    %c0_37 = arith.constant 0 : index
    %16 = vector.load %arg1[%c0_34, %c0_35, %c0_36, %c0_37] : memref<2x8x8x64xf32, #tpu.memory_space<vmem>>, vector<2x8x8x64xf32>
    %c0_38 = arith.constant 0 : index
    %c1_39 = arith.constant 1 : index
    %c8 = arith.constant 8 : index
    %c0_40 = arith.constant 0 : index
    %17 = vector.load %arg19[%c0_38, %c1_39, %c8, %c0_40] : memref<2x10x24x64xf32, #tpu.memory_space<vmem>>, vector<2x8x8x64xf32>
    tpu.vector_store %arg19[%c0_38, %c1_39, %c8, %c0_40], %16 {strides = array<i32>} : memref<2x10x24x64xf32, #tpu.memory_space<vmem>>, vector<2x8x8x64xf32>,
    %c0_41 = arith.constant 0 : index
    %c0_42 = arith.constant 0 : index
    %c0_43 = arith.constant 0 : index
    %c0_44 = arith.constant 0 : index
    %18 = vector.load %arg19[%c0_41, %c0_42, %c0_43, %c0_44] : memref<2x10x24x64xf32, #tpu.memory_space<vmem>>, vector<2x10x24x64xf32>
    %19 = vector.extract_strided_slice %18 {offsets = [0, 0, 7, 0], sizes = [2, 8, 8, 64], strides = [1, 1, 1, 1]} : vector<2x10x24x64xf32> to vector<2x8x8x64xf32>
    %20 = vector.shape_cast %19 : vector<2x8x8x64xf32> to vector<128x64xf32>
    %21 = vector.extract_strided_slice %18 {offsets = [0, 0, 8, 0], sizes = [2, 8, 8, 64], strides = [1, 1, 1, 1]} : vector<2x10x24x64xf32> to vector<2x8x8x64xf32>
    %22 = vector.shape_cast %21 : vector<2x8x8x64xf32> to vector<128x64xf32>
    %23 = vector.extract_strided_slice %18 {offsets = [0, 0, 9, 0], sizes = [2, 8, 8, 64], strides = [1, 1, 1, 1]} : vector<2x10x24x64xf32> to vector<2x8x8x64xf32>
    %24 = vector.shape_cast %23 : vector<2x8x8x64xf32> to vector<128x64xf32>
    %25 = vector.extract_strided_slice %18 {offsets = [0, 1, 7, 0], sizes = [2, 8, 8, 64], strides = [1, 1, 1, 1]} : vector<2x10x24x64xf32> to vector<2x8x8x64xf32>
    %26 = vector.shape_cast %25 : vector<2x8x8x64xf32> to vector<128x64xf32>
    %27 = vector.extract_strided_slice %18 {offsets = [0, 1, 8, 0], sizes = [2, 8, 8, 64], strides = [1, 1, 1, 1]} : vector<2x10x24x64xf32> to vector<2x8x8x64xf32>
    %28 = vector.shape_cast %27 : vector<2x8x8x64xf32> to vector<128x64xf32>
    %29 = vector.extract_strided_slice %18 {offsets = [0, 1, 9, 0], sizes = [2, 8, 8, 64], strides = [1, 1, 1, 1]} : vector<2x10x24x64xf32> to vector<2x8x8x64xf32>
    %30 = vector.shape_cast %29 : vector<2x8x8x64xf32> to vector<128x64xf32>
    %31 = vector.extract_strided_slice %18 {offsets = [0, 2, 7, 0], sizes = [2, 8, 8, 64], strides = [1, 1, 1, 1]} : vector<2x10x24x64xf32> to vector<2x8x8x64xf32>
    %32 = vector.shape_cast %31 : vector<2x8x8x64xf32> to vector<128x64xf32>
    %33 = vector.extract_strided_slice %18 {offsets = [0, 2, 8, 0], sizes = [2, 8, 8, 64], strides = [1, 1, 1, 1]} : vector<2x10x24x64xf32> to vector<2x8x8x64xf32>
    %34 = vector.shape_cast %33 : vector<2x8x8x64xf32> to vector<128x64xf32>
    %35 = vector.extract_strided_slice %18 {offsets = [0, 2, 9, 0], sizes = [2, 8, 8, 64], strides = [1, 1, 1, 1]} : vector<2x10x24x64xf32> to vector<2x8x8x64xf32>
    %36 = vector.shape_cast %35 : vector<2x8x8x64xf32> to vector<128x64xf32>
    %37 = tpu.concatenate %20, %22, %24, %26, %28, %30, %32, %34, %36 in 1 : vector<128x64xf32>, vector<128x64xf32>, vector<128x64xf32>, vector<128x64xf32>, vector<128x64xf32>, vector<128x64xf32>, vector<128x64xf32>, vector<128x64xf32>, vector<128x64xf32> -> vector<128x576xf32>
    %38 = arith.truncf %37 : vector<128x576xf32> to vector<128x576xbf16>
    %c0_45 = arith.constant 0 : index
    %c0_46 = arith.constant 0 : index
    %39 = vector.load %arg2[%c0_45, %c0_46] : memref<576x32xbf16, #tpu.memory_space<vmem>>, vector<576x32xbf16>
    %cst_47 = arith.constant dense<0.000000e+00> : vector<128x32xf32>
    %40 = tpu.matmul %38, %39, %cst_47 {dimension_numbers = #tpu.dot_dimension_numbers<[1], [0], [0], [1], [0, 0, 1, 1], [], []>} : vector<128x576xbf16>, vector<576x32xbf16>, vector<128x32xf32> -> vector<128x32xf32>
    %c0_48 = arith.constant 0 : index
    %c0_49 = arith.constant 0 : index
    %41 = vector.load %arg3[%c0_48, %c0_49] : memref<1x32xf32, #tpu.memory_space<vmem>>, vector<1x32xf32>
    %42 = vector.broadcast %41 : vector<1x32xf32> to vector<128x32xf32>
    %43 = arith.addf %40, %42 : vector<128x32xf32>
    %cst_50 = arith.constant 0.000000e+00 : f32
    %44 = vector.broadcast %cst_50 : f32 to vector<128x32xf32>
    %45 = arith.maximumf %43, %44 : vector<128x32xf32>
    %46 = vector.shape_cast %45 : vector<128x32xf32> to vector<2x8x8x32xf32>
    %c0_51 = arith.constant 0 : index
    %c1_52 = arith.constant 1 : index
    %c8_53 = arith.constant 8 : index
    %c0_54 = arith.constant 0 : index
    %47 = vector.load %arg20[%c0_51, %c1_52, %c8_53, %c0_54] : memref<2x10x24x32xf32, #tpu.memory_space<vmem>>, vector<2x8x8x32xf32>
    tpu.vector_store %arg20[%c0_51, %c1_52, %c8_53, %c0_54], %46 {strides = array<i32>} : memref<2x10x24x32xf32, #tpu.memory_space<vmem>>, vector<2x8x8x32xf32>,
    %c0_55 = arith.constant 0 : index
    %c0_56 = arith.constant 0 : index
    %c0_57 = arith.constant 0 : index
    %c0_58 = arith.constant 0 : index
    %48 = vector.load %arg20[%c0_55, %c0_56, %c0_57, %c0_58] : memref<2x10x24x32xf32, #tpu.memory_space<vmem>>, vector<2x10x24x32xf32>
    %49 = vector.extract_strided_slice %48 {offsets = [0, 0, 7, 0], sizes = [2, 8, 8, 32], strides = [1, 1, 1, 1]} : vector<2x10x24x32xf32> to vector<2x8x8x32xf32>
    %50 = vector.shape_cast %49 : vector<2x8x8x32xf32> to vector<128x32xf32>
    %51 = vector.extract_strided_slice %48 {offsets = [0, 0, 8, 0], sizes = [2, 8, 8, 32], strides = [1, 1, 1, 1]} : vector<2x10x24x32xf32> to vector<2x8x8x32xf32>
    %52 = vector.shape_cast %51 : vector<2x8x8x32xf32> to vector<128x32xf32>
    %53 = vector.extract_strided_slice %48 {offsets = [0, 0, 9, 0], sizes = [2, 8, 8, 32], strides = [1, 1, 1, 1]} : vector<2x10x24x32xf32> to vector<2x8x8x32xf32>
    %54 = vector.shape_cast %53 : vector<2x8x8x32xf32> to vector<128x32xf32>
    %55 = vector.extract_strided_slice %48 {offsets = [0, 1, 7, 0], sizes = [2, 8, 8, 32], strides = [1, 1, 1, 1]} : vector<2x10x24x32xf32> to vector<2x8x8x32xf32>
    %56 = vector.shape_cast %55 : vector<2x8x8x32xf32> to vector<128x32xf32>
    %57 = vector.extract_strided_slice %48 {offsets = [0, 1, 8, 0], sizes = [2, 8, 8, 32], strides = [1, 1, 1, 1]} : vector<2x10x24x32xf32> to vector<2x8x8x32xf32>
    %58 = vector.shape_cast %57 : vector<2x8x8x32xf32> to vector<128x32xf32>
    %59 = vector.extract_strided_slice %48 {offsets = [0, 1, 9, 0], sizes = [2, 8, 8, 32], strides = [1, 1, 1, 1]} : vector<2x10x24x32xf32> to vector<2x8x8x32xf32>
    %60 = vector.shape_cast %59 : vector<2x8x8x32xf32> to vector<128x32xf32>
    %61 = vector.extract_strided_slice %48 {offsets = [0, 2, 7, 0], sizes = [2, 8, 8, 32], strides = [1, 1, 1, 1]} : vector<2x10x24x32xf32> to vector<2x8x8x32xf32>
    %62 = vector.shape_cast %61 : vector<2x8x8x32xf32> to vector<128x32xf32>
    %63 = vector.extract_strided_slice %48 {offsets = [0, 2, 8, 0], sizes = [2, 8, 8, 32], strides = [1, 1, 1, 1]} : vector<2x10x24x32xf32> to vector<2x8x8x32xf32>
    %64 = vector.shape_cast %63 : vector<2x8x8x32xf32> to vector<128x32xf32>
    %65 = vector.extract_strided_slice %48 {offsets = [0, 2, 9, 0], sizes = [2, 8, 8, 32], strides = [1, 1, 1, 1]} : vector<2x10x24x32xf32> to vector<2x8x8x32xf32>
    %66 = vector.shape_cast %65 : vector<2x8x8x32xf32> to vector<128x32xf32>
    %67 = tpu.concatenate %50, %52, %54, %56, %58, %60, %62, %64, %66 in 1 : vector<128x32xf32>, vector<128x32xf32>, vector<128x32xf32>, vector<128x32xf32>, vector<128x32xf32>, vector<128x32xf32>, vector<128x32xf32>, vector<128x32xf32>, vector<128x32xf32> -> vector<128x288xf32>
    %68 = arith.truncf %67 : vector<128x288xf32> to vector<128x288xbf16>
    %c0_59 = arith.constant 0 : index
    %c0_60 = arith.constant 0 : index
    %69 = vector.load %arg4[%c0_59, %c0_60] : memref<288x32xbf16, #tpu.memory_space<vmem>>, vector<288x32xbf16>
    %cst_61 = arith.constant dense<0.000000e+00> : vector<128x32xf32>
    %70 = tpu.matmul %68, %69, %cst_61 {dimension_numbers = #tpu.dot_dimension_numbers<[1], [0], [0], [1], [0, 0, 1, 1], [], []>} : vector<128x288xbf16>, vector<288x32xbf16>, vector<128x32xf32> -> vector<128x32xf32>
    %c0_62 = arith.constant 0 : index
    %c0_63 = arith.constant 0 : index
    %71 = vector.load %arg5[%c0_62, %c0_63] : memref<1x32xf32, #tpu.memory_space<vmem>>, vector<1x32xf32>
    %c0_64 = arith.constant 0 : index
    %c0_65 = arith.constant 0 : index
    %72 = vector.load %arg6[%c0_64, %c0_65] : memref<1x32xf32, #tpu.memory_space<vmem>>, vector<1x32xf32>
    %73 = vector.shape_cast %70 : vector<128x32xf32> to vector<2x64x32xf32>
    %cst_66 = arith.constant dense<0.000000e+00> : vector<2x32xf32>
    %74 = vector.multi_reduction <add>, %73, %cst_66 [1] : vector<2x64x32xf32> to vector<2x32xf32>
    %75 = vector.extract_strided_slice %74 {offsets = [0, 0], sizes = [2, 8], strides = [1, 1]} : vector<2x32xf32> to vector<2x8xf32>
    %cst_67 = arith.constant dense<0.000000e+00> : vector<2xf32>
    %76 = vector.multi_reduction <add>, %75, %cst_67 [1] : vector<2x8xf32> to vector<2xf32>
    %77 = vector.shape_cast %76 : vector<2xf32> to vector<2x1xf32>
    %78 = vector.shape_cast %77 : vector<2x1xf32> to vector<2x1xf32>
    %79 = vector.broadcast %78 : vector<2x1xf32> to vector<2x8xf32>
    %80 = vector.extract_strided_slice %74 {offsets = [0, 8], sizes = [2, 8], strides = [1, 1]} : vector<2x32xf32> to vector<2x8xf32>
    %cst_68 = arith.constant dense<0.000000e+00> : vector<2xf32>
    %81 = vector.multi_reduction <add>, %80, %cst_68 [1] : vector<2x8xf32> to vector<2xf32>
    %82 = vector.shape_cast %81 : vector<2xf32> to vector<2x1xf32>
    %83 = vector.shape_cast %82 : vector<2x1xf32> to vector<2x1xf32>
    %84 = vector.broadcast %83 : vector<2x1xf32> to vector<2x8xf32>
    %85 = vector.extract_strided_slice %74 {offsets = [0, 16], sizes = [2, 8], strides = [1, 1]} : vector<2x32xf32> to vector<2x8xf32>
    %cst_69 = arith.constant dense<0.000000e+00> : vector<2xf32>
    %86 = vector.multi_reduction <add>, %85, %cst_69 [1] : vector<2x8xf32> to vector<2xf32>
    %87 = vector.shape_cast %86 : vector<2xf32> to vector<2x1xf32>
    %88 = vector.shape_cast %87 : vector<2x1xf32> to vector<2x1xf32>
    %89 = vector.broadcast %88 : vector<2x1xf32> to vector<2x8xf32>
    %90 = vector.extract_strided_slice %74 {offsets = [0, 24], sizes = [2, 8], strides = [1, 1]} : vector<2x32xf32> to vector<2x8xf32>
    %cst_70 = arith.constant dense<0.000000e+00> : vector<2xf32>
    %91 = vector.multi_reduction <add>, %90, %cst_70 [1] : vector<2x8xf32> to vector<2xf32>
    %92 = vector.shape_cast %91 : vector<2xf32> to vector<2x1xf32>
    %93 = vector.shape_cast %92 : vector<2x1xf32> to vector<2x1xf32>
    %94 = vector.broadcast %93 : vector<2x1xf32> to vector<2x8xf32>
    %95 = tpu.concatenate %79, %84, %89, %94 in 1 : vector<2x8xf32>, vector<2x8xf32>, vector<2x8xf32>, vector<2x8xf32> -> vector<2x32xf32>
    %cst_71 = arith.constant 0.001953125 : f32
    %96 = vector.broadcast %cst_71 : f32 to vector<2x32xf32>
    %97 = arith.mulf %95, %96 : vector<2x32xf32>
    %98 = vector.shape_cast %97 : vector<2x32xf32> to vector<2x1x32xf32>
    %99 = vector.broadcast %98 : vector<2x1x32xf32> to vector<2x64x32xf32>
    %100 = arith.subf %73, %99 : vector<2x64x32xf32>
    %101 = arith.mulf %100, %100 : vector<2x64x32xf32>
    %cst_72 = arith.constant dense<0.000000e+00> : vector<2x32xf32>
    %102 = vector.multi_reduction <add>, %101, %cst_72 [1] : vector<2x64x32xf32> to vector<2x32xf32>
    %103 = vector.extract_strided_slice %102 {offsets = [0, 0], sizes = [2, 8], strides = [1, 1]} : vector<2x32xf32> to vector<2x8xf32>
    %cst_73 = arith.constant dense<0.000000e+00> : vector<2xf32>
    %104 = vector.multi_reduction <add>, %103, %cst_73 [1] : vector<2x8xf32> to vector<2xf32>
    %105 = vector.shape_cast %104 : vector<2xf32> to vector<2x1xf32>
    %106 = vector.shape_cast %105 : vector<2x1xf32> to vector<2x1xf32>
    %107 = vector.broadcast %106 : vector<2x1xf32> to vector<2x8xf32>
    %108 = vector.extract_strided_slice %102 {offsets = [0, 8], sizes = [2, 8], strides = [1, 1]} : vector<2x32xf32> to vector<2x8xf32>
    %cst_74 = arith.constant dense<0.000000e+00> : vector<2xf32>
    %109 = vector.multi_reduction <add>, %108, %cst_74 [1] : vector<2x8xf32> to vector<2xf32>
    %110 = vector.shape_cast %109 : vector<2xf32> to vector<2x1xf32>
    %111 = vector.shape_cast %110 : vector<2x1xf32> to vector<2x1xf32>
    %112 = vector.broadcast %111 : vector<2x1xf32> to vector<2x8xf32>
    %113 = vector.extract_strided_slice %102 {offsets = [0, 16], sizes = [2, 8], strides = [1, 1]} : vector<2x32xf32> to vector<2x8xf32>
    %cst_75 = arith.constant dense<0.000000e+00> : vector<2xf32>
    %114 = vector.multi_reduction <add>, %113, %cst_75 [1] : vector<2x8xf32> to vector<2xf32>
    %115 = vector.shape_cast %114 : vector<2xf32> to vector<2x1xf32>
    %116 = vector.shape_cast %115 : vector<2x1xf32> to vector<2x1xf32>
    %117 = vector.broadcast %116 : vector<2x1xf32> to vector<2x8xf32>
    %118 = vector.extract_strided_slice %102 {offsets = [0, 24], sizes = [2, 8], strides = [1, 1]} : vector<2x32xf32> to vector<2x8xf32>
    %cst_76 = arith.constant dense<0.000000e+00> : vector<2xf32>
    %119 = vector.multi_reduction <add>, %118, %cst_76 [1] : vector<2x8xf32> to vector<2xf32>
    %120 = vector.shape_cast %119 : vector<2xf32> to vector<2x1xf32>
    %121 = vector.shape_cast %120 : vector<2x1xf32> to vector<2x1xf32>
    %122 = vector.broadcast %121 : vector<2x1xf32> to vector<2x8xf32>
    %123 = tpu.concatenate %107, %112, %117, %122 in 1 : vector<2x8xf32>, vector<2x8xf32>, vector<2x8xf32>, vector<2x8xf32> -> vector<2x32xf32>
    %cst_77 = arith.constant 0.001953125 : f32
    %124 = vector.broadcast %cst_77 : f32 to vector<2x32xf32>
    %125 = arith.mulf %123, %124 : vector<2x32xf32>
    %cst_78 = arith.constant 9.99999974E-6 : f32
    %126 = vector.broadcast %cst_78 : f32 to vector<2x32xf32>
    %127 = arith.addf %125, %126 : vector<2x32xf32>
    %128 = math.rsqrt %127 : vector<2x32xf32>
    %129 = vector.broadcast %71 : vector<1x32xf32> to vector<2x32xf32>
    %130 = arith.mulf %129, %128 : vector<2x32xf32>
    %131 = vector.shape_cast %130 : vector<2x32xf32> to vector<2x1x32xf32>
    %132 = vector.broadcast %131 : vector<2x1x32xf32> to vector<2x64x32xf32>
    %133 = arith.mulf %100, %132 : vector<2x64x32xf32>
    %134 = vector.shape_cast %72 : vector<1x32xf32> to vector<1x1x32xf32>
    %135 = vector.broadcast %134 : vector<1x1x32xf32> to vector<2x64x32xf32>
    %136 = arith.addf %133, %135 : vector<2x64x32xf32>
    %137 = vector.shape_cast %136 : vector<2x64x32xf32> to vector<128x32xf32>
    %cst_79 = arith.constant 0.000000e+00 : f32
    %138 = vector.broadcast %cst_79 : f32 to vector<128x32xf32>
    %139 = arith.maximumf %137, %138 : vector<128x32xf32>
    %140 = vector.shape_cast %139 : vector<128x32xf32> to vector<2x8x8x32xf32>
    %c0_80 = arith.constant 0 : index
    %c1_81 = arith.constant 1 : index
    %c8_82 = arith.constant 8 : index
    %c0_83 = arith.constant 0 : index
    %141 = vector.load %arg20[%c0_80, %c1_81, %c8_82, %c0_83] : memref<2x10x24x32xf32, #tpu.memory_space<vmem>>, vector<2x8x8x32xf32>
    tpu.vector_store %arg20[%c0_80, %c1_81, %c8_82, %c0_83], %140 {strides = array<i32>} : memref<2x10x24x32xf32, #tpu.memory_space<vmem>>, vector<2x8x8x32xf32>,
    %c0_84 = arith.constant 0 : index
    %c0_85 = arith.constant 0 : index
    %c0_86 = arith.constant 0 : index
    %c0_87 = arith.constant 0 : index
    %142 = vector.load %arg20[%c0_84, %c0_85, %c0_86, %c0_87] : memref<2x10x24x32xf32, #tpu.memory_space<vmem>>, vector<2x10x24x32xf32>
    %143 = vector.extract_strided_slice %142 {offsets = [0, 0, 7, 0], sizes = [2, 8, 8, 32], strides = [1, 1, 1, 1]} : vector<2x10x24x32xf32> to vector<2x8x8x32xf32>
    %144 = vector.shape_cast %143 : vector<2x8x8x32xf32> to vector<128x32xf32>
    %145 = vector.extract_strided_slice %142 {offsets = [0, 0, 8, 0], sizes = [2, 8, 8, 32], strides = [1, 1, 1, 1]} : vector<2x10x24x32xf32> to vector<2x8x8x32xf32>
    %146 = vector.shape_cast %145 : vector<2x8x8x32xf32> to vector<128x32xf32>
    %147 = vector.extract_strided_slice %142 {offsets = [0, 0, 9, 0], sizes = [2, 8, 8, 32], strides = [1, 1, 1, 1]} : vector<2x10x24x32xf32> to vector<2x8x8x32xf32>
    %148 = vector.shape_cast %147 : vector<2x8x8x32xf32> to vector<128x32xf32>
    %149 = vector.extract_strided_slice %142 {offsets = [0, 1, 7, 0], sizes = [2, 8, 8, 32], strides = [1, 1, 1, 1]} : vector<2x10x24x32xf32> to vector<2x8x8x32xf32>
    %150 = vector.shape_cast %149 : vector<2x8x8x32xf32> to vector<128x32xf32>
    %151 = vector.extract_strided_slice %142 {offsets = [0, 1, 8, 0], sizes = [2, 8, 8, 32], strides = [1, 1, 1, 1]} : vector<2x10x24x32xf32> to vector<2x8x8x32xf32>
    %152 = vector.shape_cast %151 : vector<2x8x8x32xf32> to vector<128x32xf32>
    %153 = vector.extract_strided_slice %142 {offsets = [0, 1, 9, 0], sizes = [2, 8, 8, 32], strides = [1, 1, 1, 1]} : vector<2x10x24x32xf32> to vector<2x8x8x32xf32>
    %154 = vector.shape_cast %153 : vector<2x8x8x32xf32> to vector<128x32xf32>
    %155 = vector.extract_strided_slice %142 {offsets = [0, 2, 7, 0], sizes = [2, 8, 8, 32], strides = [1, 1, 1, 1]} : vector<2x10x24x32xf32> to vector<2x8x8x32xf32>
    %156 = vector.shape_cast %155 : vector<2x8x8x32xf32> to vector<128x32xf32>
    %157 = vector.extract_strided_slice %142 {offsets = [0, 2, 8, 0], sizes = [2, 8, 8, 32], strides = [1, 1, 1, 1]} : vector<2x10x24x32xf32> to vector<2x8x8x32xf32>
    %158 = vector.shape_cast %157 : vector<2x8x8x32xf32> to vector<128x32xf32>
    %159 = vector.extract_strided_slice %142 {offsets = [0, 2, 9, 0], sizes = [2, 8, 8, 32], strides = [1, 1, 1, 1]} : vector<2x10x24x32xf32> to vector<2x8x8x32xf32>
    %160 = vector.shape_cast %159 : vector<2x8x8x32xf32> to vector<128x32xf32>
    %161 = tpu.concatenate %144, %146, %148, %150, %152, %154, %156, %158, %160 in 1 : vector<128x32xf32>, vector<128x32xf32>, vector<128x32xf32>, vector<128x32xf32>, vector<128x32xf32>, vector<128x32xf32>, vector<128x32xf32>, vector<128x32xf32>, vector<128x32xf32> -> vector<128x288xf32>
    %162 = arith.truncf %161 : vector<128x288xf32> to vector<128x288xbf16>
    %c0_88 = arith.constant 0 : index
    %c0_89 = arith.constant 0 : index
    %163 = vector.load %arg7[%c0_88, %c0_89] : memref<288x32xbf16, #tpu.memory_space<vmem>>, vector<288x32xbf16>
    %cst_90 = arith.constant dense<0.000000e+00> : vector<128x32xf32>
    %164 = tpu.matmul %162, %163, %cst_90 {dimension_numbers = #tpu.dot_dimension_numbers<[1], [0], [0], [1], [0, 0, 1, 1], [], []>} : vector<128x288xbf16>, vector<288x32xbf16>, vector<128x32xf32> -> vector<128x32xf32>
    %c0_91 = arith.constant 0 : index
    %c0_92 = arith.constant 0 : index
    %165 = vector.load %arg8[%c0_91, %c0_92] : memref<1x32xf32, #tpu.memory_space<vmem>>, vector<1x32xf32>
    %c0_93 = arith.constant 0 : index
    %c0_94 = arith.constant 0 : index
    %166 = vector.load %arg9[%c0_93, %c0_94] : memref<1x32xf32, #tpu.memory_space<vmem>>, vector<1x32xf32>
    %167 = vector.shape_cast %164 : vector<128x32xf32> to vector<2x64x32xf32>
    %cst_95 = arith.constant dense<0.000000e+00> : vector<2x32xf32>
    %168 = vector.multi_reduction <add>, %167, %cst_95 [1] : vector<2x64x32xf32> to vector<2x32xf32>
    %169 = vector.extract_strided_slice %168 {offsets = [0, 0], sizes = [2, 8], strides = [1, 1]} : vector<2x32xf32> to vector<2x8xf32>
    %cst_96 = arith.constant dense<0.000000e+00> : vector<2xf32>
    %170 = vector.multi_reduction <add>, %169, %cst_96 [1] : vector<2x8xf32> to vector<2xf32>
    %171 = vector.shape_cast %170 : vector<2xf32> to vector<2x1xf32>
    %172 = vector.shape_cast %171 : vector<2x1xf32> to vector<2x1xf32>
    %173 = vector.broadcast %172 : vector<2x1xf32> to vector<2x8xf32>
    %174 = vector.extract_strided_slice %168 {offsets = [0, 8], sizes = [2, 8], strides = [1, 1]} : vector<2x32xf32> to vector<2x8xf32>
    %cst_97 = arith.constant dense<0.000000e+00> : vector<2xf32>
    %175 = vector.multi_reduction <add>, %174, %cst_97 [1] : vector<2x8xf32> to vector<2xf32>
    %176 = vector.shape_cast %175 : vector<2xf32> to vector<2x1xf32>
    %177 = vector.shape_cast %176 : vector<2x1xf32> to vector<2x1xf32>
    %178 = vector.broadcast %177 : vector<2x1xf32> to vector<2x8xf32>
    %179 = vector.extract_strided_slice %168 {offsets = [0, 16], sizes = [2, 8], strides = [1, 1]} : vector<2x32xf32> to vector<2x8xf32>
    %cst_98 = arith.constant dense<0.000000e+00> : vector<2xf32>
    %180 = vector.multi_reduction <add>, %179, %cst_98 [1] : vector<2x8xf32> to vector<2xf32>
    %181 = vector.shape_cast %180 : vector<2xf32> to vector<2x1xf32>
    %182 = vector.shape_cast %181 : vector<2x1xf32> to vector<2x1xf32>
    %183 = vector.broadcast %182 : vector<2x1xf32> to vector<2x8xf32>
    %184 = vector.extract_strided_slice %168 {offsets = [0, 24], sizes = [2, 8], strides = [1, 1]} : vector<2x32xf32> to vector<2x8xf32>
    %cst_99 = arith.constant dense<0.000000e+00> : vector<2xf32>
    %185 = vector.multi_reduction <add>, %184, %cst_99 [1] : vector<2x8xf32> to vector<2xf32>
    %186 = vector.shape_cast %185 : vector<2xf32> to vector<2x1xf32>
    %187 = vector.shape_cast %186 : vector<2x1xf32> to vector<2x1xf32>
    %188 = vector.broadcast %187 : vector<2x1xf32> to vector<2x8xf32>
    %189 = tpu.concatenate %173, %178, %183, %188 in 1 : vector<2x8xf32>, vector<2x8xf32>, vector<2x8xf32>, vector<2x8xf32> -> vector<2x32xf32>
    %cst_100 = arith.constant 0.001953125 : f32
    %190 = vector.broadcast %cst_100 : f32 to vector<2x32xf32>
    %191 = arith.mulf %189, %190 : vector<2x32xf32>
    %192 = vector.shape_cast %191 : vector<2x32xf32> to vector<2x1x32xf32>
    %193 = vector.broadcast %192 : vector<2x1x32xf32> to vector<2x64x32xf32>
    %194 = arith.subf %167, %193 : vector<2x64x32xf32>
    %195 = arith.mulf %194, %194 : vector<2x64x32xf32>
    %cst_101 = arith.constant dense<0.000000e+00> : vector<2x32xf32>
    %196 = vector.multi_reduction <add>, %195, %cst_101 [1] : vector<2x64x32xf32> to vector<2x32xf32>
    %197 = vector.extract_strided_slice %196 {offsets = [0, 0], sizes = [2, 8], strides = [1, 1]} : vector<2x32xf32> to vector<2x8xf32>
    %cst_102 = arith.constant dense<0.000000e+00> : vector<2xf32>
    %198 = vector.multi_reduction <add>, %197, %cst_102 [1] : vector<2x8xf32> to vector<2xf32>
    %199 = vector.shape_cast %198 : vector<2xf32> to vector<2x1xf32>
    %200 = vector.shape_cast %199 : vector<2x1xf32> to vector<2x1xf32>
    %201 = vector.broadcast %200 : vector<2x1xf32> to vector<2x8xf32>
    %202 = vector.extract_strided_slice %196 {offsets = [0, 8], sizes = [2, 8], strides = [1, 1]} : vector<2x32xf32> to vector<2x8xf32>
    %cst_103 = arith.constant dense<0.000000e+00> : vector<2xf32>
    %203 = vector.multi_reduction <add>, %202, %cst_103 [1] : vector<2x8xf32> to vector<2xf32>
    %204 = vector.shape_cast %203 : vector<2xf32> to vector<2x1xf32>
    %205 = vector.shape_cast %204 : vector<2x1xf32> to vector<2x1xf32>
    %206 = vector.broadcast %205 : vector<2x1xf32> to vector<2x8xf32>
    %207 = vector.extract_strided_slice %196 {offsets = [0, 16], sizes = [2, 8], strides = [1, 1]} : vector<2x32xf32> to vector<2x8xf32>
    %cst_104 = arith.constant dense<0.000000e+00> : vector<2xf32>
    %208 = vector.multi_reduction <add>, %207, %cst_104 [1] : vector<2x8xf32> to vector<2xf32>
    %209 = vector.shape_cast %208 : vector<2xf32> to vector<2x1xf32>
    %210 = vector.shape_cast %209 : vector<2x1xf32> to vector<2x1xf32>
    %211 = vector.broadcast %210 : vector<2x1xf32> to vector<2x8xf32>
    %212 = vector.extract_strided_slice %196 {offsets = [0, 24], sizes = [2, 8], strides = [1, 1]} : vector<2x32xf32> to vector<2x8xf32>
    %cst_105 = arith.constant dense<0.000000e+00> : vector<2xf32>
    %213 = vector.multi_reduction <add>, %212, %cst_105 [1] : vector<2x8xf32> to vector<2xf32>
    %214 = vector.shape_cast %213 : vector<2xf32> to vector<2x1xf32>
    %215 = vector.shape_cast %214 : vector<2x1xf32> to vector<2x1xf32>
    %216 = vector.broadcast %215 : vector<2x1xf32> to vector<2x8xf32>
    %217 = tpu.concatenate %201, %206, %211, %216 in 1 : vector<2x8xf32>, vector<2x8xf32>, vector<2x8xf32>, vector<2x8xf32> -> vector<2x32xf32>
    %cst_106 = arith.constant 0.001953125 : f32
    %218 = vector.broadcast %cst_106 : f32 to vector<2x32xf32>
    %219 = arith.mulf %217, %218 : vector<2x32xf32>
    %cst_107 = arith.constant 9.99999974E-6 : f32
    %220 = vector.broadcast %cst_107 : f32 to vector<2x32xf32>
    %221 = arith.addf %219, %220 : vector<2x32xf32>
    %222 = math.rsqrt %221 : vector<2x32xf32>
    %223 = vector.broadcast %165 : vector<1x32xf32> to vector<2x32xf32>
    %224 = arith.mulf %223, %222 : vector<2x32xf32>
    %225 = vector.shape_cast %224 : vector<2x32xf32> to vector<2x1x32xf32>
    %226 = vector.broadcast %225 : vector<2x1x32xf32> to vector<2x64x32xf32>
    %227 = arith.mulf %194, %226 : vector<2x64x32xf32>
    %228 = vector.shape_cast %166 : vector<1x32xf32> to vector<1x1x32xf32>
    %229 = vector.broadcast %228 : vector<1x1x32xf32> to vector<2x64x32xf32>
    %230 = arith.addf %227, %229 : vector<2x64x32xf32>
    %231 = vector.shape_cast %230 : vector<2x64x32xf32> to vector<128x32xf32>
    %232 = arith.addf %231, %45 : vector<128x32xf32>
    %233 = vector.shape_cast %232 : vector<128x32xf32> to vector<2x8x8x32xf32>
    %c0_108 = arith.constant 0 : index
    %c1_109 = arith.constant 1 : index
    %c8_110 = arith.constant 8 : index
    %c0_111 = arith.constant 0 : index
    %234 = vector.load %arg20[%c0_108, %c1_109, %c8_110, %c0_111] : memref<2x10x24x32xf32, #tpu.memory_space<vmem>>, vector<2x8x8x32xf32>
    tpu.vector_store %arg20[%c0_108, %c1_109, %c8_110, %c0_111], %233 {strides = array<i32>} : memref<2x10x24x32xf32, #tpu.memory_space<vmem>>, vector<2x8x8x32xf32>,
    %c0_112 = arith.constant 0 : index
    %c0_113 = arith.constant 0 : index
    %c0_114 = arith.constant 0 : index
    %c0_115 = arith.constant 0 : index
    %235 = vector.load %arg20[%c0_112, %c0_113, %c0_114, %c0_115] : memref<2x10x24x32xf32, #tpu.memory_space<vmem>>, vector<2x10x24x32xf32>
    %236 = vector.extract_strided_slice %235 {offsets = [0, 0, 7, 0], sizes = [2, 8, 8, 32], strides = [1, 1, 1, 1]} : vector<2x10x24x32xf32> to vector<2x8x8x32xf32>
    %237 = vector.shape_cast %236 : vector<2x8x8x32xf32> to vector<128x32xf32>
    %238 = vector.extract_strided_slice %235 {offsets = [0, 0, 8, 0], sizes = [2, 8, 8, 32], strides = [1, 1, 1, 1]} : vector<2x10x24x32xf32> to vector<2x8x8x32xf32>
    %239 = vector.shape_cast %238 : vector<2x8x8x32xf32> to vector<128x32xf32>
    %240 = vector.extract_strided_slice %235 {offsets = [0, 0, 9, 0], sizes = [2, 8, 8, 32], strides = [1, 1, 1, 1]} : vector<2x10x24x32xf32> to vector<2x8x8x32xf32>
    %241 = vector.shape_cast %240 : vector<2x8x8x32xf32> to vector<128x32xf32>
    %242 = vector.extract_strided_slice %235 {offsets = [0, 1, 7, 0], sizes = [2, 8, 8, 32], strides = [1, 1, 1, 1]} : vector<2x10x24x32xf32> to vector<2x8x8x32xf32>
    %243 = vector.shape_cast %242 : vector<2x8x8x32xf32> to vector<128x32xf32>
    %244 = vector.extract_strided_slice %235 {offsets = [0, 1, 8, 0], sizes = [2, 8, 8, 32], strides = [1, 1, 1, 1]} : vector<2x10x24x32xf32> to vector<2x8x8x32xf32>
    %245 = vector.shape_cast %244 : vector<2x8x8x32xf32> to vector<128x32xf32>
    %246 = vector.extract_strided_slice %235 {offsets = [0, 1, 9, 0], sizes = [2, 8, 8, 32], strides = [1, 1, 1, 1]} : vector<2x10x24x32xf32> to vector<2x8x8x32xf32>
    %247 = vector.shape_cast %246 : vector<2x8x8x32xf32> to vector<128x32xf32>
    %248 = vector.extract_strided_slice %235 {offsets = [0, 2, 7, 0], sizes = [2, 8, 8, 32], strides = [1, 1, 1, 1]} : vector<2x10x24x32xf32> to vector<2x8x8x32xf32>
    %249 = vector.shape_cast %248 : vector<2x8x8x32xf32> to vector<128x32xf32>
    %250 = vector.extract_strided_slice %235 {offsets = [0, 2, 8, 0], sizes = [2, 8, 8, 32], strides = [1, 1, 1, 1]} : vector<2x10x24x32xf32> to vector<2x8x8x32xf32>
    %251 = vector.shape_cast %250 : vector<2x8x8x32xf32> to vector<128x32xf32>
    %252 = vector.extract_strided_slice %235 {offsets = [0, 2, 9, 0], sizes = [2, 8, 8, 32], strides = [1, 1, 1, 1]} : vector<2x10x24x32xf32> to vector<2x8x8x32xf32>
    %253 = vector.shape_cast %252 : vector<2x8x8x32xf32> to vector<128x32xf32>
    %254 = tpu.concatenate %237, %239, %241, %243, %245, %247, %249, %251, %253 in 1 : vector<128x32xf32>, vector<128x32xf32>, vector<128x32xf32>, vector<128x32xf32>, vector<128x32xf32>, vector<128x32xf32>, vector<128x32xf32>, vector<128x32xf32>, vector<128x32xf32> -> vector<128x288xf32>
    %255 = arith.truncf %254 : vector<128x288xf32> to vector<128x288xbf16>
    %c0_116 = arith.constant 0 : index
    %c0_117 = arith.constant 0 : index
    %256 = vector.load %arg10[%c0_116, %c0_117] : memref<288x32xbf16, #tpu.memory_space<vmem>>, vector<288x32xbf16>
    %cst_118 = arith.constant dense<0.000000e+00> : vector<128x32xf32>
    %257 = tpu.matmul %255, %256, %cst_118 {dimension_numbers = #tpu.dot_dimension_numbers<[1], [0], [0], [1], [0, 0, 1, 1], [], []>} : vector<128x288xbf16>, vector<288x32xbf16>, vector<128x32xf32> -> vector<128x32xf32>
    %c0_119 = arith.constant 0 : index
    %c0_120 = arith.constant 0 : index
    %258 = vector.load %arg11[%c0_119, %c0_120] : memref<1x32xf32, #tpu.memory_space<vmem>>, vector<1x32xf32>
    %c0_121 = arith.constant 0 : index
    %c0_122 = arith.constant 0 : index
    %259 = vector.load %arg12[%c0_121, %c0_122] : memref<1x32xf32, #tpu.memory_space<vmem>>, vector<1x32xf32>
    %260 = vector.shape_cast %257 : vector<128x32xf32> to vector<2x64x32xf32>
    %cst_123 = arith.constant dense<0.000000e+00> : vector<2x32xf32>
    %261 = vector.multi_reduction <add>, %260, %cst_123 [1] : vector<2x64x32xf32> to vector<2x32xf32>
    %262 = vector.extract_strided_slice %261 {offsets = [0, 0], sizes = [2, 8], strides = [1, 1]} : vector<2x32xf32> to vector<2x8xf32>
    %cst_124 = arith.constant dense<0.000000e+00> : vector<2xf32>
    %263 = vector.multi_reduction <add>, %262, %cst_124 [1] : vector<2x8xf32> to vector<2xf32>
    %264 = vector.shape_cast %263 : vector<2xf32> to vector<2x1xf32>
    %265 = vector.shape_cast %264 : vector<2x1xf32> to vector<2x1xf32>
    %266 = vector.broadcast %265 : vector<2x1xf32> to vector<2x8xf32>
    %267 = vector.extract_strided_slice %261 {offsets = [0, 8], sizes = [2, 8], strides = [1, 1]} : vector<2x32xf32> to vector<2x8xf32>
    %cst_125 = arith.constant dense<0.000000e+00> : vector<2xf32>
    %268 = vector.multi_reduction <add>, %267, %cst_125 [1] : vector<2x8xf32> to vector<2xf32>
    %269 = vector.shape_cast %268 : vector<2xf32> to vector<2x1xf32>
    %270 = vector.shape_cast %269 : vector<2x1xf32> to vector<2x1xf32>
    %271 = vector.broadcast %270 : vector<2x1xf32> to vector<2x8xf32>
    %272 = vector.extract_strided_slice %261 {offsets = [0, 16], sizes = [2, 8], strides = [1, 1]} : vector<2x32xf32> to vector<2x8xf32>
    %cst_126 = arith.constant dense<0.000000e+00> : vector<2xf32>
    %273 = vector.multi_reduction <add>, %272, %cst_126 [1] : vector<2x8xf32> to vector<2xf32>
    %274 = vector.shape_cast %273 : vector<2xf32> to vector<2x1xf32>
    %275 = vector.shape_cast %274 : vector<2x1xf32> to vector<2x1xf32>
    %276 = vector.broadcast %275 : vector<2x1xf32> to vector<2x8xf32>
    %277 = vector.extract_strided_slice %261 {offsets = [0, 24], sizes = [2, 8], strides = [1, 1]} : vector<2x32xf32> to vector<2x8xf32>
    %cst_127 = arith.constant dense<0.000000e+00> : vector<2xf32>
    %278 = vector.multi_reduction <add>, %277, %cst_127 [1] : vector<2x8xf32> to vector<2xf32>
    %279 = vector.shape_cast %278 : vector<2xf32> to vector<2x1xf32>
    %280 = vector.shape_cast %279 : vector<2x1xf32> to vector<2x1xf32>
    %281 = vector.broadcast %280 : vector<2x1xf32> to vector<2x8xf32>
    %282 = tpu.concatenate %266, %271, %276, %281 in 1 : vector<2x8xf32>, vector<2x8xf32>, vector<2x8xf32>, vector<2x8xf32> -> vector<2x32xf32>
    %cst_128 = arith.constant 0.001953125 : f32
    %283 = vector.broadcast %cst_128 : f32 to vector<2x32xf32>
    %284 = arith.mulf %282, %283 : vector<2x32xf32>
    %285 = vector.shape_cast %284 : vector<2x32xf32> to vector<2x1x32xf32>
    %286 = vector.broadcast %285 : vector<2x1x32xf32> to vector<2x64x32xf32>
    %287 = arith.subf %260, %286 : vector<2x64x32xf32>
    %288 = arith.mulf %287, %287 : vector<2x64x32xf32>
    %cst_129 = arith.constant dense<0.000000e+00> : vector<2x32xf32>
    %289 = vector.multi_reduction <add>, %288, %cst_129 [1] : vector<2x64x32xf32> to vector<2x32xf32>
    %290 = vector.extract_strided_slice %289 {offsets = [0, 0], sizes = [2, 8], strides = [1, 1]} : vector<2x32xf32> to vector<2x8xf32>
    %cst_130 = arith.constant dense<0.000000e+00> : vector<2xf32>
    %291 = vector.multi_reduction <add>, %290, %cst_130 [1] : vector<2x8xf32> to vector<2xf32>
    %292 = vector.shape_cast %291 : vector<2xf32> to vector<2x1xf32>
    %293 = vector.shape_cast %292 : vector<2x1xf32> to vector<2x1xf32>
    %294 = vector.broadcast %293 : vector<2x1xf32> to vector<2x8xf32>
    %295 = vector.extract_strided_slice %289 {offsets = [0, 8], sizes = [2, 8], strides = [1, 1]} : vector<2x32xf32> to vector<2x8xf32>
    %cst_131 = arith.constant dense<0.000000e+00> : vector<2xf32>
    %296 = vector.multi_reduction <add>, %295, %cst_131 [1] : vector<2x8xf32> to vector<2xf32>
    %297 = vector.shape_cast %296 : vector<2xf32> to vector<2x1xf32>
    %298 = vector.shape_cast %297 : vector<2x1xf32> to vector<2x1xf32>
    %299 = vector.broadcast %298 : vector<2x1xf32> to vector<2x8xf32>
    %300 = vector.extract_strided_slice %289 {offsets = [0, 16], sizes = [2, 8], strides = [1, 1]} : vector<2x32xf32> to vector<2x8xf32>
    %cst_132 = arith.constant dense<0.000000e+00> : vector<2xf32>
    %301 = vector.multi_reduction <add>, %300, %cst_132 [1] : vector<2x8xf32> to vector<2xf32>
    %302 = vector.shape_cast %301 : vector<2xf32> to vector<2x1xf32>
    %303 = vector.shape_cast %302 : vector<2x1xf32> to vector<2x1xf32>
    %304 = vector.broadcast %303 : vector<2x1xf32> to vector<2x8xf32>
    %305 = vector.extract_strided_slice %289 {offsets = [0, 24], sizes = [2, 8], strides = [1, 1]} : vector<2x32xf32> to vector<2x8xf32>
    %cst_133 = arith.constant dense<0.000000e+00> : vector<2xf32>
    %306 = vector.multi_reduction <add>, %305, %cst_133 [1] : vector<2x8xf32> to vector<2xf32>
    %307 = vector.shape_cast %306 : vector<2xf32> to vector<2x1xf32>
    %308 = vector.shape_cast %307 : vector<2x1xf32> to vector<2x1xf32>
    %309 = vector.broadcast %308 : vector<2x1xf32> to vector<2x8xf32>
    %310 = tpu.concatenate %294, %299, %304, %309 in 1 : vector<2x8xf32>, vector<2x8xf32>, vector<2x8xf32>, vector<2x8xf32> -> vector<2x32xf32>
    %cst_134 = arith.constant 0.001953125 : f32
    %311 = vector.broadcast %cst_134 : f32 to vector<2x32xf32>
    %312 = arith.mulf %310, %311 : vector<2x32xf32>
    %cst_135 = arith.constant 9.99999974E-6 : f32
    %313 = vector.broadcast %cst_135 : f32 to vector<2x32xf32>
    %314 = arith.addf %312, %313 : vector<2x32xf32>
    %315 = math.rsqrt %314 : vector<2x32xf32>
    %316 = vector.broadcast %258 : vector<1x32xf32> to vector<2x32xf32>
    %317 = arith.mulf %316, %315 : vector<2x32xf32>
    %318 = vector.shape_cast %317 : vector<2x32xf32> to vector<2x1x32xf32>
    %319 = vector.broadcast %318 : vector<2x1x32xf32> to vector<2x64x32xf32>
    %320 = arith.mulf %287, %319 : vector<2x64x32xf32>
    %321 = vector.shape_cast %259 : vector<1x32xf32> to vector<1x1x32xf32>
    %322 = vector.broadcast %321 : vector<1x1x32xf32> to vector<2x64x32xf32>
    %323 = arith.addf %320, %322 : vector<2x64x32xf32>
    %324 = vector.shape_cast %323 : vector<2x64x32xf32> to vector<128x32xf32>
    %cst_136 = arith.constant 0.000000e+00 : f32
    %325 = vector.broadcast %cst_136 : f32 to vector<128x32xf32>
    %326 = arith.maximumf %324, %325 : vector<128x32xf32>
    %327 = vector.shape_cast %326 : vector<128x32xf32> to vector<2x8x8x32xf32>
    %c0_137 = arith.constant 0 : index
    %c1_138 = arith.constant 1 : index
    %c8_139 = arith.constant 8 : index
    %c0_140 = arith.constant 0 : index
    %328 = vector.load %arg20[%c0_137, %c1_138, %c8_139, %c0_140] : memref<2x10x24x32xf32, #tpu.memory_space<vmem>>, vector<2x8x8x32xf32>
    tpu.vector_store %arg20[%c0_137, %c1_138, %c8_139, %c0_140], %327 {strides = array<i32>} : memref<2x10x24x32xf32, #tpu.memory_space<vmem>>, vector<2x8x8x32xf32>,
    %c0_141 = arith.constant 0 : index
    %c0_142 = arith.constant 0 : index
    %c0_143 = arith.constant 0 : index
    %c0_144 = arith.constant 0 : index
    %329 = vector.load %arg20[%c0_141, %c0_142, %c0_143, %c0_144] : memref<2x10x24x32xf32, #tpu.memory_space<vmem>>, vector<2x10x24x32xf32>
    %330 = vector.extract_strided_slice %329 {offsets = [0, 0, 7, 0], sizes = [2, 8, 8, 32], strides = [1, 1, 1, 1]} : vector<2x10x24x32xf32> to vector<2x8x8x32xf32>
    %331 = vector.shape_cast %330 : vector<2x8x8x32xf32> to vector<128x32xf32>
    %332 = vector.extract_strided_slice %329 {offsets = [0, 0, 8, 0], sizes = [2, 8, 8, 32], strides = [1, 1, 1, 1]} : vector<2x10x24x32xf32> to vector<2x8x8x32xf32>
    %333 = vector.shape_cast %332 : vector<2x8x8x32xf32> to vector<128x32xf32>
    %334 = vector.extract_strided_slice %329 {offsets = [0, 0, 9, 0], sizes = [2, 8, 8, 32], strides = [1, 1, 1, 1]} : vector<2x10x24x32xf32> to vector<2x8x8x32xf32>
    %335 = vector.shape_cast %334 : vector<2x8x8x32xf32> to vector<128x32xf32>
    %336 = vector.extract_strided_slice %329 {offsets = [0, 1, 7, 0], sizes = [2, 8, 8, 32], strides = [1, 1, 1, 1]} : vector<2x10x24x32xf32> to vector<2x8x8x32xf32>
    %337 = vector.shape_cast %336 : vector<2x8x8x32xf32> to vector<128x32xf32>
    %338 = vector.extract_strided_slice %329 {offsets = [0, 1, 8, 0], sizes = [2, 8, 8, 32], strides = [1, 1, 1, 1]} : vector<2x10x24x32xf32> to vector<2x8x8x32xf32>
    %339 = vector.shape_cast %338 : vector<2x8x8x32xf32> to vector<128x32xf32>
    %340 = vector.extract_strided_slice %329 {offsets = [0, 1, 9, 0], sizes = [2, 8, 8, 32], strides = [1, 1, 1, 1]} : vector<2x10x24x32xf32> to vector<2x8x8x32xf32>
    %341 = vector.shape_cast %340 : vector<2x8x8x32xf32> to vector<128x32xf32>
    %342 = vector.extract_strided_slice %329 {offsets = [0, 2, 7, 0], sizes = [2, 8, 8, 32], strides = [1, 1, 1, 1]} : vector<2x10x24x32xf32> to vector<2x8x8x32xf32>
    %343 = vector.shape_cast %342 : vector<2x8x8x32xf32> to vector<128x32xf32>
    %344 = vector.extract_strided_slice %329 {offsets = [0, 2, 8, 0], sizes = [2, 8, 8, 32], strides = [1, 1, 1, 1]} : vector<2x10x24x32xf32> to vector<2x8x8x32xf32>
    %345 = vector.shape_cast %344 : vector<2x8x8x32xf32> to vector<128x32xf32>
    %346 = vector.extract_strided_slice %329 {offsets = [0, 2, 9, 0], sizes = [2, 8, 8, 32], strides = [1, 1, 1, 1]} : vector<2x10x24x32xf32> to vector<2x8x8x32xf32>
    %347 = vector.shape_cast %346 : vector<2x8x8x32xf32> to vector<128x32xf32>
    %348 = tpu.concatenate %331, %333, %335, %337, %339, %341, %343, %345, %347 in 1 : vector<128x32xf32>, vector<128x32xf32>, vector<128x32xf32>, vector<128x32xf32>, vector<128x32xf32>, vector<128x32xf32>, vector<128x32xf32>, vector<128x32xf32>, vector<128x32xf32> -> vector<128x288xf32>
    %349 = arith.truncf %348 : vector<128x288xf32> to vector<128x288xbf16>
    %c0_145 = arith.constant 0 : index
    %c0_146 = arith.constant 0 : index
    %350 = vector.load %arg13[%c0_145, %c0_146] : memref<288x32xbf16, #tpu.memory_space<vmem>>, vector<288x32xbf16>
    %cst_147 = arith.constant dense<0.000000e+00> : vector<128x32xf32>
    %351 = tpu.matmul %349, %350, %cst_147 {dimension_numbers = #tpu.dot_dimension_numbers<[1], [0], [0], [1], [0, 0, 1, 1], [], []>} : vector<128x288xbf16>, vector<288x32xbf16>, vector<128x32xf32> -> vector<128x32xf32>
    %c0_148 = arith.constant 0 : index
    %c0_149 = arith.constant 0 : index
    %352 = vector.load %arg14[%c0_148, %c0_149] : memref<1x32xf32, #tpu.memory_space<vmem>>, vector<1x32xf32>
    %c0_150 = arith.constant 0 : index
    %c0_151 = arith.constant 0 : index
    %353 = vector.load %arg15[%c0_150, %c0_151] : memref<1x32xf32, #tpu.memory_space<vmem>>, vector<1x32xf32>
    %354 = vector.shape_cast %351 : vector<128x32xf32> to vector<2x64x32xf32>
    %cst_152 = arith.constant dense<0.000000e+00> : vector<2x32xf32>
    %355 = vector.multi_reduction <add>, %354, %cst_152 [1] : vector<2x64x32xf32> to vector<2x32xf32>
    %356 = vector.extract_strided_slice %355 {offsets = [0, 0], sizes = [2, 8], strides = [1, 1]} : vector<2x32xf32> to vector<2x8xf32>
    %cst_153 = arith.constant dense<0.000000e+00> : vector<2xf32>
    %357 = vector.multi_reduction <add>, %356, %cst_153 [1] : vector<2x8xf32> to vector<2xf32>
    %358 = vector.shape_cast %357 : vector<2xf32> to vector<2x1xf32>
    %359 = vector.shape_cast %358 : vector<2x1xf32> to vector<2x1xf32>
    %360 = vector.broadcast %359 : vector<2x1xf32> to vector<2x8xf32>
    %361 = vector.extract_strided_slice %355 {offsets = [0, 8], sizes = [2, 8], strides = [1, 1]} : vector<2x32xf32> to vector<2x8xf32>
    %cst_154 = arith.constant dense<0.000000e+00> : vector<2xf32>
    %362 = vector.multi_reduction <add>, %361, %cst_154 [1] : vector<2x8xf32> to vector<2xf32>
    %363 = vector.shape_cast %362 : vector<2xf32> to vector<2x1xf32>
    %364 = vector.shape_cast %363 : vector<2x1xf32> to vector<2x1xf32>
    %365 = vector.broadcast %364 : vector<2x1xf32> to vector<2x8xf32>
    %366 = vector.extract_strided_slice %355 {offsets = [0, 16], sizes = [2, 8], strides = [1, 1]} : vector<2x32xf32> to vector<2x8xf32>
    %cst_155 = arith.constant dense<0.000000e+00> : vector<2xf32>
    %367 = vector.multi_reduction <add>, %366, %cst_155 [1] : vector<2x8xf32> to vector<2xf32>
    %368 = vector.shape_cast %367 : vector<2xf32> to vector<2x1xf32>
    %369 = vector.shape_cast %368 : vector<2x1xf32> to vector<2x1xf32>
    %370 = vector.broadcast %369 : vector<2x1xf32> to vector<2x8xf32>
    %371 = vector.extract_strided_slice %355 {offsets = [0, 24], sizes = [2, 8], strides = [1, 1]} : vector<2x32xf32> to vector<2x8xf32>
    %cst_156 = arith.constant dense<0.000000e+00> : vector<2xf32>
    %372 = vector.multi_reduction <add>, %371, %cst_156 [1] : vector<2x8xf32> to vector<2xf32>
    %373 = vector.shape_cast %372 : vector<2xf32> to vector<2x1xf32>
    %374 = vector.shape_cast %373 : vector<2x1xf32> to vector<2x1xf32>
    %375 = vector.broadcast %374 : vector<2x1xf32> to vector<2x8xf32>
    %376 = tpu.concatenate %360, %365, %370, %375 in 1 : vector<2x8xf32>, vector<2x8xf32>, vector<2x8xf32>, vector<2x8xf32> -> vector<2x32xf32>
    %cst_157 = arith.constant 0.001953125 : f32
    %377 = vector.broadcast %cst_157 : f32 to vector<2x32xf32>
    %378 = arith.mulf %376, %377 : vector<2x32xf32>
    %379 = vector.shape_cast %378 : vector<2x32xf32> to vector<2x1x32xf32>
    %380 = vector.broadcast %379 : vector<2x1x32xf32> to vector<2x64x32xf32>
    %381 = arith.subf %354, %380 : vector<2x64x32xf32>
    %382 = arith.mulf %381, %381 : vector<2x64x32xf32>
    %cst_158 = arith.constant dense<0.000000e+00> : vector<2x32xf32>
    %383 = vector.multi_reduction <add>, %382, %cst_158 [1] : vector<2x64x32xf32> to vector<2x32xf32>
    %384 = vector.extract_strided_slice %383 {offsets = [0, 0], sizes = [2, 8], strides = [1, 1]} : vector<2x32xf32> to vector<2x8xf32>
    %cst_159 = arith.constant dense<0.000000e+00> : vector<2xf32>
    %385 = vector.multi_reduction <add>, %384, %cst_159 [1] : vector<2x8xf32> to vector<2xf32>
    %386 = vector.shape_cast %385 : vector<2xf32> to vector<2x1xf32>
    %387 = vector.shape_cast %386 : vector<2x1xf32> to vector<2x1xf32>
    %388 = vector.broadcast %387 : vector<2x1xf32> to vector<2x8xf32>
    %389 = vector.extract_strided_slice %383 {offsets = [0, 8], sizes = [2, 8], strides = [1, 1]} : vector<2x32xf32> to vector<2x8xf32>
    %cst_160 = arith.constant dense<0.000000e+00> : vector<2xf32>
    %390 = vector.multi_reduction <add>, %389, %cst_160 [1] : vector<2x8xf32> to vector<2xf32>
    %391 = vector.shape_cast %390 : vector<2xf32> to vector<2x1xf32>
    %392 = vector.shape_cast %391 : vector<2x1xf32> to vector<2x1xf32>
    %393 = vector.broadcast %392 : vector<2x1xf32> to vector<2x8xf32>
    %394 = vector.extract_strided_slice %383 {offsets = [0, 16], sizes = [2, 8], strides = [1, 1]} : vector<2x32xf32> to vector<2x8xf32>
    %cst_161 = arith.constant dense<0.000000e+00> : vector<2xf32>
    %395 = vector.multi_reduction <add>, %394, %cst_161 [1] : vector<2x8xf32> to vector<2xf32>
    %396 = vector.shape_cast %395 : vector<2xf32> to vector<2x1xf32>
    %397 = vector.shape_cast %396 : vector<2x1xf32> to vector<2x1xf32>
    %398 = vector.broadcast %397 : vector<2x1xf32> to vector<2x8xf32>
    %399 = vector.extract_strided_slice %383 {offsets = [0, 24], sizes = [2, 8], strides = [1, 1]} : vector<2x32xf32> to vector<2x8xf32>
    %cst_162 = arith.constant dense<0.000000e+00> : vector<2xf32>
    %400 = vector.multi_reduction <add>, %399, %cst_162 [1] : vector<2x8xf32> to vector<2xf32>
    %401 = vector.shape_cast %400 : vector<2xf32> to vector<2x1xf32>
    %402 = vector.shape_cast %401 : vector<2x1xf32> to vector<2x1xf32>
    %403 = vector.broadcast %402 : vector<2x1xf32> to vector<2x8xf32>
    %404 = tpu.concatenate %388, %393, %398, %403 in 1 : vector<2x8xf32>, vector<2x8xf32>, vector<2x8xf32>, vector<2x8xf32> -> vector<2x32xf32>
    %cst_163 = arith.constant 0.001953125 : f32
    %405 = vector.broadcast %cst_163 : f32 to vector<2x32xf32>
    %406 = arith.mulf %404, %405 : vector<2x32xf32>
    %cst_164 = arith.constant 9.99999974E-6 : f32
    %407 = vector.broadcast %cst_164 : f32 to vector<2x32xf32>
    %408 = arith.addf %406, %407 : vector<2x32xf32>
    %409 = math.rsqrt %408 : vector<2x32xf32>
    %410 = vector.broadcast %352 : vector<1x32xf32> to vector<2x32xf32>
    %411 = arith.mulf %410, %409 : vector<2x32xf32>
    %412 = vector.shape_cast %411 : vector<2x32xf32> to vector<2x1x32xf32>
    %413 = vector.broadcast %412 : vector<2x1x32xf32> to vector<2x64x32xf32>
    %414 = arith.mulf %381, %413 : vector<2x64x32xf32>
    %415 = vector.shape_cast %353 : vector<1x32xf32> to vector<1x1x32xf32>
    %416 = vector.broadcast %415 : vector<1x1x32xf32> to vector<2x64x32xf32>
    %417 = arith.addf %414, %416 : vector<2x64x32xf32>
    %418 = vector.shape_cast %417 : vector<2x64x32xf32> to vector<128x32xf32>
    %419 = arith.addf %418, %232 : vector<128x32xf32>
    %420 = vector.shape_cast %419 : vector<128x32xf32> to vector<2x8x8x32xf32>
    %c0_165 = arith.constant 0 : index
    %c1_166 = arith.constant 1 : index
    %c8_167 = arith.constant 8 : index
    %c0_168 = arith.constant 0 : index
    %421 = vector.load %arg20[%c0_165, %c1_166, %c8_167, %c0_168] : memref<2x10x24x32xf32, #tpu.memory_space<vmem>>, vector<2x8x8x32xf32>
    tpu.vector_store %arg20[%c0_165, %c1_166, %c8_167, %c0_168], %420 {strides = array<i32>} : memref<2x10x24x32xf32, #tpu.memory_space<vmem>>, vector<2x8x8x32xf32>,
    %c0_169 = arith.constant 0 : index
    %c0_170 = arith.constant 0 : index
    %c0_171 = arith.constant 0 : index
    %c0_172 = arith.constant 0 : index
    %422 = vector.load %arg20[%c0_169, %c0_170, %c0_171, %c0_172] : memref<2x10x24x32xf32, #tpu.memory_space<vmem>>, vector<2x10x24x32xf32>
    %423 = vector.extract_strided_slice %422 {offsets = [0, 0, 7, 0], sizes = [2, 8, 8, 32], strides = [1, 1, 1, 1]} : vector<2x10x24x32xf32> to vector<2x8x8x32xf32>
    %424 = vector.shape_cast %423 : vector<2x8x8x32xf32> to vector<128x32xf32>
    %425 = vector.extract_strided_slice %422 {offsets = [0, 0, 8, 0], sizes = [2, 8, 8, 32], strides = [1, 1, 1, 1]} : vector<2x10x24x32xf32> to vector<2x8x8x32xf32>
    %426 = vector.shape_cast %425 : vector<2x8x8x32xf32> to vector<128x32xf32>
    %427 = vector.extract_strided_slice %422 {offsets = [0, 0, 9, 0], sizes = [2, 8, 8, 32], strides = [1, 1, 1, 1]} : vector<2x10x24x32xf32> to vector<2x8x8x32xf32>
    %428 = vector.shape_cast %427 : vector<2x8x8x32xf32> to vector<128x32xf32>
    %429 = vector.extract_strided_slice %422 {offsets = [0, 1, 7, 0], sizes = [2, 8, 8, 32], strides = [1, 1, 1, 1]} : vector<2x10x24x32xf32> to vector<2x8x8x32xf32>
    %430 = vector.shape_cast %429 : vector<2x8x8x32xf32> to vector<128x32xf32>
    %431 = vector.extract_strided_slice %422 {offsets = [0, 1, 8, 0], sizes = [2, 8, 8, 32], strides = [1, 1, 1, 1]} : vector<2x10x24x32xf32> to vector<2x8x8x32xf32>
    %432 = vector.shape_cast %431 : vector<2x8x8x32xf32> to vector<128x32xf32>
    %433 = vector.extract_strided_slice %422 {offsets = [0, 1, 9, 0], sizes = [2, 8, 8, 32], strides = [1, 1, 1, 1]} : vector<2x10x24x32xf32> to vector<2x8x8x32xf32>
    %434 = vector.shape_cast %433 : vector<2x8x8x32xf32> to vector<128x32xf32>
    %435 = vector.extract_strided_slice %422 {offsets = [0, 2, 7, 0], sizes = [2, 8, 8, 32], strides = [1, 1, 1, 1]} : vector<2x10x24x32xf32> to vector<2x8x8x32xf32>
    %436 = vector.shape_cast %435 : vector<2x8x8x32xf32> to vector<128x32xf32>
    %437 = vector.extract_strided_slice %422 {offsets = [0, 2, 8, 0], sizes = [2, 8, 8, 32], strides = [1, 1, 1, 1]} : vector<2x10x24x32xf32> to vector<2x8x8x32xf32>
    %438 = vector.shape_cast %437 : vector<2x8x8x32xf32> to vector<128x32xf32>
    %439 = vector.extract_strided_slice %422 {offsets = [0, 2, 9, 0], sizes = [2, 8, 8, 32], strides = [1, 1, 1, 1]} : vector<2x10x24x32xf32> to vector<2x8x8x32xf32>
    %440 = vector.shape_cast %439 : vector<2x8x8x32xf32> to vector<128x32xf32>
    %441 = tpu.concatenate %424, %426, %428, %430, %432, %434, %436, %438, %440 in 1 : vector<128x32xf32>, vector<128x32xf32>, vector<128x32xf32>, vector<128x32xf32>, vector<128x32xf32>, vector<128x32xf32>, vector<128x32xf32>, vector<128x32xf32>, vector<128x32xf32> -> vector<128x288xf32>
    %442 = arith.truncf %441 : vector<128x288xf32> to vector<128x288xbf16>
    %c0_173 = arith.constant 0 : index
    %c0_174 = arith.constant 0 : index
    %443 = vector.load %arg16[%c0_173, %c0_174] : memref<288x12xbf16, #tpu.memory_space<vmem>>, vector<288x12xbf16>
    %cst_175 = arith.constant dense<0.000000e+00> : vector<128x12xf32>
    %444 = tpu.matmul %442, %443, %cst_175 {dimension_numbers = #tpu.dot_dimension_numbers<[1], [0], [0], [1], [0, 0, 1, 1], [], []>} : vector<128x288xbf16>, vector<288x12xbf16>, vector<128x12xf32> -> vector<128x12xf32>
    %c0_176 = arith.constant 0 : index
    %c0_177 = arith.constant 0 : index
    %445 = vector.load %arg17[%c0_176, %c0_177] : memref<1x12xf32, #tpu.memory_space<vmem>>, vector<1x12xf32>
    %446 = vector.broadcast %445 : vector<1x12xf32> to vector<128x12xf32>
    %447 = arith.addf %444, %446 : vector<128x12xf32>
    %448 = math.tanh %447 : vector<128x12xf32>
    %449 = vector.shape_cast %448 : vector<128x12xf32> to vector<2x64x12xf32>
    %c0_178 = arith.constant 0 : index
    %c0_179 = arith.constant 0 : index
    %c0_180 = arith.constant 0 : index
    %450 = vector.load %arg18[%c0_178, %c0_179, %c0_180] : memref<2x64x12xf32, #tpu.memory_space<vmem>>, vector<2x64x12xf32>
    tpu.vector_store %arg18[%c0_178, %c0_179, %c0_180], %449 {strides = array<i32>} : memref<2x64x12xf32, #tpu.memory_space<vmem>>, vector<2x64x12xf32>,
    return
  }
  func.func @transform_0(%arg0: i32) -> (i32, i32, i32, i32) {
    %c0_i32 = arith.constant 0 : i32
    %c0_i32_0 = arith.constant 0 : i32
    %c0_i32_1 = arith.constant 0 : i32
    %c0_i32_2 = arith.constant 0 : i32
    return %arg0, %c0_i32, %c0_i32_0, %c0_i32_1 : i32, i32, i32, i32
  }
  func.func @transform_1(%arg0: i32) -> (i32, i32) {
    %c0_i32 = arith.constant 0 : i32
    %c0_i32_0 = arith.constant 0 : i32
    %c0_i32_1 = arith.constant 0 : i32
    return %c0_i32, %c0_i32_0 : i32, i32
  }
  func.func @transform_2(%arg0: i32) -> (i32, i32) {
    %c0_i32 = arith.constant 0 : i32
    %c0_i32_0 = arith.constant 0 : i32
    %c0_i32_1 = arith.constant 0 : i32
    return %c0_i32, %c0_i32_0 : i32, i32
  }
  func.func @transform_3(%arg0: i32) -> (i32, i32) {
    %c0_i32 = arith.constant 0 : i32
    %c0_i32_0 = arith.constant 0 : i32
    %c0_i32_1 = arith.constant 0 : i32
    return %c0_i32, %c0_i32_0 : i32, i32
  }
  func.func @transform_4(%arg0: i32) -> (i32, i32) {
    %c0_i32 = arith.constant 0 : i32
    %c0_i32_0 = arith.constant 0 : i32
    %c0_i32_1 = arith.constant 0 : i32
    return %c0_i32, %c0_i32_0 : i32, i32
  }
  func.func @transform_5(%arg0: i32) -> (i32, i32) {
    %c0_i32 = arith.constant 0 : i32
    %c0_i32_0 = arith.constant 0 : i32
    %c0_i32_1 = arith.constant 0 : i32
    return %c0_i32, %c0_i32_0 : i32, i32
  }
  func.func @transform_6(%arg0: i32) -> (i32, i32) {
    %c0_i32 = arith.constant 0 : i32
    %c0_i32_0 = arith.constant 0 : i32
    %c0_i32_1 = arith.constant 0 : i32
    return %c0_i32, %c0_i32_0 : i32, i32
  }
  func.func @transform_7(%arg0: i32) -> (i32, i32) {
    %c0_i32 = arith.constant 0 : i32
    %c0_i32_0 = arith.constant 0 : i32
    %c0_i32_1 = arith.constant 0 : i32
    return %c0_i32, %c0_i32_0 : i32, i32
  }
  func.func @transform_8(%arg0: i32) -> (i32, i32) {
    %c0_i32 = arith.constant 0 : i32
    %c0_i32_0 = arith.constant 0 : i32
    %c0_i32_1 = arith.constant 0 : i32
    return %c0_i32, %c0_i32_0 : i32, i32
  }
  func.func @transform_9(%arg0: i32) -> (i32, i32) {
    %c0_i32 = arith.constant 0 : i32
    %c0_i32_0 = arith.constant 0 : i32
    %c0_i32_1 = arith.constant 0 : i32
    return %c0_i32, %c0_i32_0 : i32, i32
  }
  func.func @transform_10(%arg0: i32) -> (i32, i32) {
    %c0_i32 = arith.constant 0 : i32
    %c0_i32_0 = arith.constant 0 : i32
    %c0_i32_1 = arith.constant 0 : i32
    return %c0_i32, %c0_i32_0 : i32, i32
  }
  func.func @transform_11(%arg0: i32) -> (i32, i32) {
    %c0_i32 = arith.constant 0 : i32
    %c0_i32_0 = arith.constant 0 : i32
    %c0_i32_1 = arith.constant 0 : i32
    return %c0_i32, %c0_i32_0 : i32, i32
  }
  func.func @transform_12(%arg0: i32) -> (i32, i32) {
    %c0_i32 = arith.constant 0 : i32
    %c0_i32_0 = arith.constant 0 : i32
    %c0_i32_1 = arith.constant 0 : i32
    return %c0_i32, %c0_i32_0 : i32, i32
  }
  func.func @transform_13(%arg0: i32) -> (i32, i32) {
    %c0_i32 = arith.constant 0 : i32
    %c0_i32_0 = arith.constant 0 : i32
    %c0_i32_1 = arith.constant 0 : i32
    return %c0_i32, %c0_i32_0 : i32, i32
  }
  func.func @transform_14(%arg0: i32) -> (i32, i32) {
    %c0_i32 = arith.constant 0 : i32
    %c0_i32_0 = arith.constant 0 : i32
    %c0_i32_1 = arith.constant 0 : i32
    return %c0_i32, %c0_i32_0 : i32, i32
  }
  func.func @transform_15(%arg0: i32) -> (i32, i32) {
    %c0_i32 = arith.constant 0 : i32
    %c0_i32_0 = arith.constant 0 : i32
    %c0_i32_1 = arith.constant 0 : i32
    return %c0_i32, %c0_i32_0 : i32, i32
  }
  func.func @transform_16(%arg0: i32) -> (i32, i32) {
    %c0_i32 = arith.constant 0 : i32
    %c0_i32_0 = arith.constant 0 : i32
    %c0_i32_1 = arith.constant 0 : i32
    return %c0_i32, %c0_i32_0 : i32, i32
  }
  func.func @transform_17(%arg0: i32) -> (i32, i32, i32) {
    %c0_i32 = arith.constant 0 : i32
    %c0_i32_0 = arith.constant 0 : i32
    %c0_i32_1 = arith.constant 0 : i32
    return %arg0, %c0_i32, %c0_i32_0 : i32, i32, i32
  }
}

</mosaic_0001>

<bundles_post_ra>
// kernel: generator_forward.1
= control target key start
LH: loop header
LB: loop body
LE: loop exit
PB: predicated region body
PF: predicated region fallthrough
CT: control target
= control target key end

     0   :  { %vm57_vm0 = vcmask 523264   ;;  %vm59_vm1 = vcmask 517120   ;;  %v14201_v0 = vmov 0.0   ;;  %s9468_s24 = smov 64   ;;  %vm69_vm2 = vcmask 516096   ;;  %s9469_s28 = smov 32   ;;  %s14181_s0 = inlined_call_operand.vmem [shape: f32[2,8,8,64], index: 0, kind: input, shape index: {}]   ;;  %s14182_s1 = inlined_call_operand.vmem [shape: bf16[576,32], index: 1, kind: input, shape index: {}]   ;;  %s14183_s2 = inlined_call_operand.vmem [shape: f32[1,32], index: 2, kind: input, shape index: {}]   ;;  %s14184_s3 = inlined_call_operand.vmem [shape: bf16[288,32], index: 3, kind: input, shape index: {}]   ;;  %s14185_s4 = inlined_call_operand.vmem [shape: f32[1,32], index: 4, kind: input, shape index: {}]   ;;  %s14186_s5 = inlined_call_operand.vmem [shape: f32[1,32], index: 5, kind: input, shape index: {}]   ;;  %s14187_s6 = inlined_call_operand.vmem [shape: bf16[288,32], index: 6, kind: input, shape index: {}]   ;;  %s14188_s7 = inlined_call_operand.vmem [shape: f32[1,32], index: 7, kind: input, shape index: {}]   ;;  %s14189_s8 = inlined_call_operand.vmem [shape: f32[1,32], index: 8, kind: input, shape index: {}]   ;;  %s14190_s9 = inlined_call_operand.vmem [shape: bf16[288,32], index: 9, kind: input, shape index: {}]   ;;  %s14191_s10 = inlined_call_operand.vmem [shape: f32[1,32], index: 10, kind: input, shape index: {}]   ;;  %s14192_s11 = inlined_call_operand.vmem [shape: f32[1,32], index: 11, kind: input, shape index: {}]   ;;  %s14193_s12 = inlined_call_operand.vmem [shape: bf16[288,32], index: 12, kind: input, shape index: {}]   ;;  %s14194_s13 = inlined_call_operand.vmem [shape: f32[1,32], index: 13, kind: input, shape index: {}]   ;;  %s14195_s14 = inlined_call_operand.vmem [shape: f32[1,32], index: 14, kind: input, shape index: {}]   ;;  %s14196_s15 = inlined_call_operand.vmem [shape: bf16[288,12], index: 15, kind: input, shape index: {}]   ;;  %s14197_s16 = inlined_call_operand.vmem [shape: f32[1,12], index: 16, kind: input, shape index: {}]   ;;  %s14198_s17 = inlined_call_operand.vmem [shape: f32[2,64,12], index: 17, kind: output, shape index: {}]  }
   0x1   :  { %14239 = sst [smem:[#allocation14_spill]] %s14181_s0  ;;  %58 = vst.msk [vmem:[#allocation2 + $0x7] sm:$0xff] %vm57_vm0, %v14201_v0  ;;  %vm271_vm3 = vcmask 1040384   ;;  %vm352_vm4 = vcmask 1046528   ;;  %vm102_vm5 = vcmask 261120   ;;  %vm114_vm6 = vcmask 253952  }
   0x2   :  { %14240 = sst [smem:[#allocation15_spill]] %s14182_s1  ;;  %60 = vst.msk [vmem:[#allocation2 + $0xf] sm:$0x3] %vm59_vm1, %v14201_v0  ;;  %vm104_vm7 = vcmask 254976   ;;  %vm1888_vm8 = vcmask 785408   ;;  %vm2338_vm9 = vcmask 1041409  }
   0x3   :  { %s14241_s26 = sld [smem:[#allocation14_spill]]  ;;  %61 = vst.msk [vmem:[#allocation2 + $0xf7] sm:$0xff] %vm57_vm0, %v14201_v0  ;;  %s9472_s25 = smov 112   ;;  %vm2341_vm10 = vcmask 58368   ;;  %vm2363_vm11 = vcmask 64512   ;;  %vm2365_vm12 = vcmask 130048  }
   0x4   :  { %62 = vst.msk [vmem:[#allocation2 + $0xff] sm:$0x3] %vm59_vm1, %v14201_v0  ;;  %s14242_s30 = sld [smem:[#allocation15_spill]]  ;;  %s9473_s27 = smov 120   ;;  %vm2367_vm13 = vcmask 195584  }
   0x5   :  { %64 = vst.msk [vmem:[#allocation2 + $0xdf] sm:$0xff] %vm57_vm0, %v14201_v0 }
   0x6   :  { %65 = vst.msk [vmem:[#allocation2 + $0xe7] sm:$0x3] %vm59_vm1, %v14201_v0 }
   0x7   :  { %66 = vst.msk [vmem:[#allocation2 + $0x1cf] sm:$0xff] %vm57_vm0, %v14201_v0 }
   0x8   :  { %67 = vst.msk [vmem:[#allocation2 + $0x1d7] sm:$0x3] %vm59_vm1, %v14201_v0 }
   0x9   :  { %v147_v1 = vld [vmem:[%s14241_s26] sm:$0xff]  ;;  %v148_v2 = vld [vmem:[%s14241_s26 + $0x8] sm:$0xff]  ;;  %v149_v3 = vld [vmem:[%s14241_s26 + $0x10] sm:$0xff]  ;;  %70 = vst.msk [vmem:[#allocation2 + $0x1f] sm:$0x1] %vm69_vm2, %v14201_v0 }
   0xa   :  { %163 = vst.msk [vmem:[#allocation2 + $0x20] sm:$0xff] %vm57_vm0, %v147_v1  ;;  %v9585_v4 = vld [vmem:[#allocation2 + $0x8] sm:$0xff]  ;;  %v150_v5 = vld [vmem:[%s14241_s26 + $0x18] sm:$0xff]  ;;  %v151_v7 = vld [vmem:[%s14241_s26 + $0x20] sm:$0xff] }
   0xb   :  { %164 = vst.msk [vmem:[#allocation2 + $0x38] sm:$0xff] %vm57_vm0, %v148_v2  ;;  %v158_v9 = vld [vmem:[%s14241_s26 + $0x58] sm:$0xff]  ;;  %v159_v10 = vld [vmem:[%s14241_s26 + $0x60] sm:$0xff]  ;;  %v152_v11 = vld [vmem:[%s14241_s26 + $0x28] sm:$0xff] }
   0xc   :  { %165 = vst.msk [vmem:[#allocation2 + $0x50] sm:$0xff] %vm57_vm0, %v149_v3  ;;  %v153_v12 = vld [vmem:[%s14241_s26 + $0x30] sm:$0xff]  ;;  %v155_v39 = vld [vmem:[%s14241_s26 + $0x40] sm:$0xff]  ;;  %v160_v41 = vld [vmem:[%s14241_s26 + $0x68] sm:$0xff] }
   0xd   :  { %166 = vst.msk [vmem:[#allocation2 + $0x68] sm:$0xff] %vm57_vm0, %v150_v5  ;;  %v161_v43 = vld [vmem:[%s14241_s26 + $0x70] sm:$0xff]  ;;  %v156_v45 = vld [vmem:[%s14241_s26 + $0x48] sm:$0xff]  ;;  %v154_v48 = vld [vmem:[%s14241_s26 + $0x38] sm:$0xff] }
   0xe   :  { %167 = vst.msk [vmem:[#allocation2 + $0x80] sm:$0xff] %vm57_vm0, %v151_v7  ;;  %v157_v47 = vld [vmem:[%s14241_s26 + $0x50] sm:$0xff]  ;;  %v7957_v49 = vld [vmem:[%s14242_s30 + $0x38] sm:$0xff]  ;;  %v9775_v3 = vld [vmem:[#allocation2 + $0xe0] sm:$0xff] }
   0xf   :  { %174 = vst.msk [vmem:[#allocation2 + $0x158] sm:$0xff] %vm57_vm0, %v158_v9  ;;  %v9759_v50 = vld [vmem:[#allocation2 + $0xf8] sm:$0xff]  ;;  %1019 = vmatpush.bf16.msra.mxu0 %v7957_v49  ;;  %v7956_v5 = vld [vmem:[%s14242_s30 + $0x30] sm:$0xff] }
  0x10   :  { %175 = vst.msk [vmem:[#allocation2 + $0x170] sm:$0xff] %vm57_vm0, %v159_v10  ;;  %v182_v24 = vld [vmem:[#allocation2 + $0x18] sm:$0xff] }
  0x11   :  { %v9591_v6 = vld [vmem:[#allocation2 + $0x20] sm:$0xff]  ;;  %168 = vst.msk [vmem:[#allocation2 + $0x98] sm:$0xff] %vm57_vm0, %v152_v11  ;;  %v275_v26 = vrot.slane %v182_v24, 7  ;;  %v7981_v9 = vld [vmem:[%s14242_s30 + $0xf8] sm:$0xff] }
  0x12   :  { %v8083_v8 = vpack.i.bf16 %v9591_v6, %v9585_v4  ;;  %v9618_v13 = vld [vmem:[#allocation2 + $0x38] sm:$0xff]  ;;  %169 = vst.msk [vmem:[#allocation2 + $0xb0] sm:$0xff] %vm57_vm0, %v153_v12  ;;  %v276_v27 = vrot.slane %v9591_v6, 7  ;;  %1166 = vmatpush.bf16.msra.mxu3 %v7981_v9 }
  0x13   :  { %v9621_v14 = vld [vmem:[#allocation2 + $0x50] sm:$0xff]  ;;  %71 = vst.msk [vmem:[#allocation2 + $0x37] sm:$0x1] %vm69_vm2, %v14201_v0  ;;  %v279_v28 = vrot.slane %v9618_v13, 7  ;;  %1020 = vmatpush.bf16.msra.mxu0 %v7956_v5 }
  0x14   :  { %8084 = vrot.lane.b32.xlu0 %v8083_v8, %s9468_s24  ;;  %v8088_v15 = vpack.i.bf16 %v9621_v14, %v9618_v13  ;;  %v9627_v16 = vld [vmem:[#allocation2 + $0x68] sm:$0xff]  ;;  %72 = vst.msk [vmem:[#allocation2 + $0x4f] sm:$0x1] %vm69_vm2, %v14201_v0  ;;  %v9673_v31 = vsel %vm271_vm3, %v275_v26, %v276_v27  ;;  %v362_v58 = vrot.slane %v9621_v14, 1  ;;  %v7980_v27 = vld [vmem:[%s14242_s30 + $0xf0] sm:$0xff] }
  0x15   :  { %v9631_v17 = vld [vmem:[#allocation2 + $0x80] sm:$0xff]  ;;  %73 = vst.msk [vmem:[#allocation2 + $0x67] sm:$0x1] %vm69_vm2, %v14201_v0  ;;  %v365_v54 = vrot.slane %v9627_v16, 1 }
  0x16   :  { %v8093_v18 = vpack.i.bf16 %v9631_v17, %v9627_v16  ;;  %v9640_v19 = vld [vmem:[#allocation2 + $0x158] sm:$0xff]  ;;  %74 = vst.msk [vmem:[#allocation2 + $0x7f] sm:$0x1] %vm69_vm2, %v14201_v0  ;;  %v368_v34 = vrot.slane %v9631_v17, 1  ;;  %1167 = vmatpush.bf16.msra.mxu3 %v7980_v27 }
  0x17   :  { %v9642_v20 = vld [vmem:[#allocation2 + $0x170] sm:$0xff]  ;;  %75 = vst.msk [vmem:[#allocation2 + $0x97] sm:$0x1] %vm69_vm2, %v14201_v0 }
  0x18   :  { %8094 = vrot.lane.b32.xlu1 %v8093_v18, %s9468_s24  ;;  %v9649_v21 = vld [vmem:[#allocation2 + $0x98] sm:$0xff]  ;;  %76 = vst.msk [vmem:[#allocation2 + $0xaf] sm:$0x1] %vm69_vm2, %v14201_v0  ;;  %v8113_v23 = vpack.i.bf16 %v9642_v20, %v9640_v19 }
  0x19   :  { %v9651_v22 = vld [vmem:[#allocation2 + $0xb0] sm:$0xff]  ;;  %77 = vst.msk [vmem:[#allocation2 + $0xc7] sm:$0x1] %vm69_vm2, %v14201_v0  ;;  %v371_v36 = vrot.slane %v9649_v21, 1 }
  0x1a   :  { %v185_v25 = vld [vmem:[#allocation2 + $0x30] sm:$0xff]  ;;  %78 = vst.msk [vmem:[#allocation2 + $0x10f] sm:$0x1] %vm69_vm2, %v14201_v0  ;;  %v8098_v29 = vpack.i.bf16 %v9651_v22, %v9649_v21  ;;  %v294_v27 = vrot.slane %v9651_v22, 7 }
  0x1b   :  { %v278_v30 = vrot.slane %v185_v25, 7  ;;  %79 = vst.msk [vmem:[#allocation2 + $0x127] sm:$0x1] %vm69_vm2, %v14201_v0 }
  0x1c   :  { %8089 = vrot.lane.b32.xlu0 %v8088_v15, %s9468_s24  ;;  %80 = vst.msk [vmem:[#allocation2 + $0x13f] sm:$0x1] %vm69_vm2, %v14201_v0 }
  0x1d   :  { %81 = vst.msk [vmem:[#allocation2 + $0x157] sm:$0x1] %vm69_vm2, %v14201_v0  ;;  %v9676_v32 = vsel %vm271_vm3, %v278_v30, %v279_v28 }
  0x1e   :  { %82 = vst.msk [vmem:[#allocation2 + $0x16f] sm:$0x1] %vm69_vm2, %v14201_v0  ;;  %v8128_v33 = vpack.i.bf16 %v9676_v32, %v9673_v31  ;;  %v197_v30 = vld [vmem:[#allocation2 + $0x90] sm:$0xff] }
  0x1f   :  { %83 = vst.msk [vmem:[#allocation2 + $0x187] sm:$0x1] %vm69_vm2, %v14201_v0 }
  0x20   :  { %8099 = vrot.lane.b32.xlu1 %v8098_v29, %s9468_s24  ;;  %84 = vst.msk [vmem:[#allocation2 + $0x19f] sm:$0x1] %vm69_vm2, %v14201_v0  ;;  %v194_v29 = vld [vmem:[#allocation2 + $0x78] sm:$0xff]  ;;  %v203_v5 = vld [vmem:[#allocation2 + $0xc0] sm:$0xff] }
  0x21   :  { %85 = vst.msk [vmem:[#allocation2 + $0x1b7] sm:$0x1] %vm69_vm2, %v14201_v0  ;;  %v212_v61 = vld [vmem:[#allocation2 + $0x108] sm:$0xff] }
  0x22   :  { %86 = vst.msk [vmem:[#allocation2 + $0x28] sm:$0x1] %vm69_vm2, %v14201_v0  ;;  %v215_v62 = vld [vmem:[#allocation2 + $0x120] sm:$0xff]  ;;  %v299_v11 = vrot.slane %v212_v61, 7 }
  0x23   :  { %87 = vst.msk [vmem:[#allocation2 + $0x40] sm:$0x1] %vm69_vm2, %v14201_v0  ;;  %v302_v15 = vrot.slane %v215_v62, 7  ;;  %v7978_v62 = vld [vmem:[%s14242_s30 + $0xe0] sm:$0xff] }
  0x24   :  { %8114 = vrot.lane.b32.xlu0 %v8113_v23, %s9468_s24  ;;  %88 = vst.msk [vmem:[#allocation2 + $0x58] sm:$0x1] %vm69_vm2, %v14201_v0  ;;  %v7955_v23 = vld [vmem:[%s14242_s30 + $0x28] sm:$0xff] }
  0x25   :  { %89 = vst.msk [vmem:[#allocation2 + $0x70] sm:$0x1] %vm69_vm2, %v14201_v0  ;;  %1021 = vmatpush.bf16.msra.mxu0 %v7955_v23  ;;  %v7952_v23 = vld [vmem:[%s14242_s30 + $0x10] sm:$0xff] }
  0x26   :  { %90 = vst.msk [vmem:[#allocation2 + $0x88] sm:$0x1] %vm69_vm2, %v14201_v0 }
  0x27   :  { %91 = vst.msk [vmem:[#allocation2 + $0xa0] sm:$0x1] %vm69_vm2, %v14201_v0 }
  0x28   :  { %92 = vst.msk [vmem:[#allocation2 + $0xb8] sm:$0x1] %vm69_vm2, %v14201_v0 }
  0x29   :  { %93 = vst.msk [vmem:[#allocation2 + $0xd0] sm:$0x1] %vm69_vm2, %v14201_v0  ;;  %v184_v1 = vld [vmem:[#allocation2 + $0x28] sm:$0xff] }
  0x2a   :  { %94 = vst.msk [vmem:[#allocation2 + $0x118] sm:$0x1] %vm69_vm2, %v14201_v0  ;;  %v187_v2 = vld [vmem:[#allocation2 + $0x40] sm:$0xff] }
  0x2b   :  { %95 = vst.msk [vmem:[#allocation2 + $0x130] sm:$0x1] %vm69_vm2, %v14201_v0  ;;  %v190_v51 = vld [vmem:[#allocation2 + $0x58] sm:$0xff] }
  0x2c   :  { %8129 = vrot.lane.b32.xlu0 %v8128_v33, %s9468_s24  ;;  %96 = vst.msk [vmem:[#allocation2 + $0x148] sm:$0x1] %vm69_vm2, %v14201_v0  ;;  %v193_v52 = vld [vmem:[#allocation2 + $0x70] sm:$0xff]  ;;  %v363_v59 = vrot.slane %v190_v51, 1  ;;  %v356_v33 = vrot.slane %v9591_v6, 1 }
  0x2d   :  { %97 = vst.msk [vmem:[#allocation2 + $0x160] sm:$0x1] %vm69_vm2, %v14201_v0  ;;  %v196_v35 = vld [vmem:[#allocation2 + $0x88] sm:$0xff]  ;;  %v366_v60 = vrot.slane %v193_v52, 1 }
  0x2e   :  { %98 = vst.msk [vmem:[#allocation2 + $0x178] sm:$0x1] %vm69_vm2, %v14201_v0  ;;  %v199_v37 = vld [vmem:[#allocation2 + $0xa0] sm:$0xff]  ;;  %v369_v38 = vrot.slane %v196_v35, 1  ;;  %v9796_v24 = vsel %vm352_vm4, %v362_v58, %v363_v59  ;;  %v359_v35 = vrot.slane %v9618_v13, 1  ;;  %v7953_v59 = vld [vmem:[%s14242_s30 + $0x18] sm:$0xff] }
  0x2f   :  { %99 = vst.msk [vmem:[#allocation2 + $0x190] sm:$0x1] %vm69_vm2, %v14201_v0  ;;  %v372_v40 = vrot.slane %v199_v37, 1  ;;  %v9799_v25 = vsel %vm352_vm4, %v365_v54, %v366_v60  ;;  %v7965_v54 = vld [vmem:[%s14242_s30 + $0x78] sm:$0xff]  ;;  %v191_v58 = vld [vmem:[#allocation2 + $0x60] sm:$0xff] }
  0x30   :  { %100 = vst.msk [vmem:[#allocation2 + $0x1a8] sm:$0x1] %vm69_vm2, %v14201_v0  ;;  %v9729_v42 = vsel %vm352_vm4, %v368_v34, %v369_v38  ;;  %v357_v34 = vrot.slane %v184_v1, 1  ;;  %v8133_v37 = vpack.i.bf16 %v9799_v25, %v9796_v24  ;;  %1068 = vmatpush.bf16.msra.mxu1 %v7965_v54 }
  0x31   :  { %101 = vst.msk [vmem:[#allocation2 + $0x1c0] sm:$0x1] %vm69_vm2, %v14201_v0  ;;  %v9737_v44 = vsel %vm352_vm4, %v371_v36, %v372_v40  ;;  %v360_v36 = vrot.slane %v187_v2, 1  ;;  %v7954_v40 = vld [vmem:[%s14242_s30 + $0x20] sm:$0xff]  ;;  %v200_v2 = vld [vmem:[#allocation2 + $0xa8] sm:$0xff] }
  0x32   :  { %171 = vst.msk [vmem:[#allocation2 + $0x110] sm:$0xff] %vm57_vm0, %v155_v39  ;;  %v8143_v46 = vpack.i.bf16 %v9737_v44, %v9729_v42  ;;  %v9832_v49 = vsel %vm352_vm4, %v356_v33, %v357_v34  ;;  %1022 = vmatpush.bf16.msra.mxu0 %v7954_v40 }
  0x33   :  { %176 = vst.msk [vmem:[#allocation2 + $0x188] sm:$0xff] %vm57_vm0, %v160_v41  ;;  %v287_v41 = vrot.slane %v194_v29, 7  ;;  %v9835_v51 = vsel %vm352_vm4, %v359_v35, %v360_v36  ;;  %v202_v35 = vld [vmem:[#allocation2 + $0xb8] sm:$0xff]  ;;  %v205_v36 = vld [vmem:[#allocation2 + $0xd0] sm:$0xff] }
  0x34   :  { %177 = vst.msk [vmem:[#allocation2 + $0x1a0] sm:$0xff] %vm57_vm0, %v161_v43  ;;  %8144 = vrot.lane.b32.xlu0 %v8143_v46, %s9468_s24  ;;  %v288_v43 = vrot.slane %v9631_v17, 7  ;;  %v291_v46 = vrot.slane %v9649_v21, 7  ;;  %v8123_v1 = vpack.i.bf16 %v9835_v51, %v9832_v49  ;;  %v430_v54 = vrot.slane %v205_v36, 1 }
  0x35   :  { %172 = vst.msk [vmem:[#allocation2 + $0x128] sm:$0xff] %vm57_vm0, %v156_v45  ;;  %v290_v45 = vrot.slane %v197_v30, 7  ;;  %v7977_v30 = vld [vmem:[%s14242_s30 + $0xd8] sm:$0xff] }
  0x36   :  { %173 = vst.msk [vmem:[#allocation2 + $0x140] sm:$0xff] %vm57_vm0, %v157_v47  ;;  %v7979_v47 = vld [vmem:[%s14242_s30 + $0xe8] sm:$0xff]  ;;  %v9847_v60 = vsel %vm271_vm3, %v287_v41, %v288_v43  ;;  %1023 = vmatpush.bf16.msra.mxu0 %v7953_v59  ;;  %v226_v36 = vld [vmem:[#allocation2 + $0x178] sm:$0xff] }
  0x37   :  { %170 = vst.msk [vmem:[#allocation2 + $0xc8] sm:$0xff] %vm57_vm0, %v154_v48  ;;  %v7973_v48 = vld [vmem:[%s14242_s30 + $0xb8] sm:$0xff]  ;;  %v9850_v61 = vsel %vm271_vm3, %v290_v45, %v291_v46  ;;  %1168 = vmatpush.bf16.msra.mxu3 %v7979_v47  ;;  %v220_v45 = vld [vmem:[#allocation2 + $0x148] sm:$0xff]  ;;  %v223_v46 = vld [vmem:[#allocation2 + $0x160] sm:$0xff]  ;;  %v374_v47 = vrot.slane %v9651_v22, 1 }
  0x38   :  { %1117 = vmatpush.bf16.msra.mxu2 %v7973_v48  ;;  %v375_v48 = vrot.slane %v202_v35, 1  ;;  %v387_v59 = vrot.slane %v220_v45, 1  ;;  %v232_v0 = vld [vmem:[#allocation2 + $0x1a8] sm:$0xff] }
  0x39   :  { %v9762_v53 = vld [vmem:[#allocation2 + $0x110] sm:$0xff] }
  0x3a   :  { %v8103_v55 = vpack.i.bf16 %v9762_v53, %v9759_v50  ;;  %v9767_v56 = vld [vmem:[#allocation2 + $0x188] sm:$0xff]  ;;  %v300_v12 = vrot.slane %v9762_v53, 7  ;;  %1024 = vmatpush.bf16.msra.mxu0 %v7952_v23 }
  0x3b   :  { %v9769_v57 = vld [vmem:[#allocation2 + $0x1a0] sm:$0xff]  ;;  %1169 = vmatpush.bf16.msra.mxu3 %v7978_v62  ;;  %v389_v62 = vrot.slane %v9640_v19, 1  ;;  %v395_v45 = vrot.slane %v9767_v56, 1 }
  0x3c   :  { %14243 = vst [vmem:[#allocation4_spill] sm:$0xff] %v9769_v57  ;;  %8104 = vrot.lane.b32.xlu2 %v8103_v55, %s9468_s24  ;;  %v8118_v63 = vpack.i.bf16 %v9769_v57, %v9767_v56  ;;  %v9780_v7 = vld [vmem:[#allocation2 + $0x128] sm:$0xff]  ;;  %v9814_v38 = vsel %vm271_vm3, %v299_v11, %v300_v12  ;;  %v282_v11 = vrot.slane %v9621_v14, 7  ;;  %v284_v12 = vrot.slane %v191_v58, 7 }
  0x3d   :  { %v9782_v8 = vld [vmem:[#allocation2 + $0x140] sm:$0xff]  ;;  %v303_v18 = vrot.slane %v9780_v7, 7  ;;  %v188_v55 = vld [vmem:[#allocation2 + $0x48] sm:$0xff] }
  0x3e   :  { %8119 = vrot.lane.b32.xlu1 %v8118_v63, %s9468_s24  ;;  %v9788_v10 = vld [vmem:[#allocation2 + $0xc8] sm:$0xff]  ;;  %v8108_v28 = vpack.i.bf16 %v9782_v8, %v9780_v7  ;;  %v7972_v63 = vld [vmem:[%s14242_s30 + $0xb0] sm:$0xff]  ;;  %v281_v9 = vrot.slane %v188_v55, 7  ;;  %v386_v58 = vrot.slane %v9782_v8, 1 }
  0x3f   :  { %v8158_v26 = vpack.i.bf16 %v9775_v3, %v9788_v10  ;;  %v9817_v39 = vsel %vm271_vm3, %v302_v15, %v303_v18  ;;  %v285_v15 = vrot.slane %v9627_v16, 7  ;;  %v8148_v18 = vpack.i.bf16 %v9850_v61, %v9847_v60  ;;  %1118 = vmatpush.bf16.msra.mxu2 %v7972_v63  ;;  %1170 = vmatpush.bf16.msra.mxu3 %v7977_v30 }
  0x40   :  { %v8173_v52 = vpack.i.bf16 %v9817_v39, %v9814_v38  ;;  %v422_v29 = vrot.slane %v9788_v10, 7  ;;  %v9875_v33 = vsel %vm271_vm3, %v281_v9, %v282_v11  ;;  %v390_v63 = vrot.slane %v223_v46, 1  ;;  %v217_v9 = vld [vmem:[#allocation2 + $0x130] sm:$0xff]  ;;  %v7950_v46 = vld [vmem:[%s14242_s30] sm:$0xff] }
  0x41   :  { %8159 = vrot.lane.b32.xlu0 %v8158_v26, %s9468_s24  ;;  %v293_v26 = vrot.slane %v200_v2, 7  ;;  %v9878_v34 = vsel %vm271_vm3, %v284_v12, %v285_v15  ;;  %v9907_v11 = vsel %vm352_vm4, %v386_v58, %v387_v59 }
  0x42   :  { %v8138_v43 = vpack.i.bf16 %v9878_v34, %v9875_v33  ;;  %v9910_v12 = vsel %vm352_vm4, %v389_v62, %v390_v63  ;;  %v224_v63 = vld [vmem:[#allocation2 + $0x168] sm:$0xff] }
  0x43   :  { %v9885_v40 = vsel %vm271_vm3, %v293_v26, %v294_v27  ;;  %v383_v26 = vrot.slane %v9780_v7, 1  ;;  %v384_v27 = vrot.slane %v217_v9, 1  ;;  %v311_v9 = vrot.slane %v224_v63, 7  ;;  %v162_v63 = vld [vmem:[%s14241_s26 + $0x78] sm:$0xff] }
  0x44   :  { %8109 = vrot.lane.b32.xlu2 %v8108_v28, %s9468_s24  ;;  %v421_v28 = vrot.slane %v203_v5, 7  ;;  %v214_v5 = vld [vmem:[#allocation2 + $0x118] sm:$0xff]  ;;  %178 = vst.msk [vmem:[#allocation2 + $0x1b8] sm:$0xff] %vm57_vm0, %v162_v63 }
  0x45   :  { %v381_v23 = vrot.slane %v214_v5, 1  ;;  %v9923_v30 = vsel %vm352_vm4, %v383_v26, %v384_v27  ;;  %v227_v5 = vld [vmem:[#allocation2 + $0x180] sm:$0xff]  ;;  %v7985_v26 = vld [vmem:[%s14242_s30 + $0x118] sm:$0xff] }
  0x46   :  { %8134 = vrot.lane.b32.xlu1 %v8133_v37, %s9468_s24  ;;  %v7951_v37 = vld [vmem:[%s14242_s30 + $0x8] sm:$0xff]  ;;  %v9888_v41 = vsel %vm271_vm3, %v421_v28, %v422_v29  ;;  %v8178_v28 = vpack.i.bf16 %v9910_v12, %v9907_v11 }
  0x47   :  { %v8163_v55 = vpack.i.bf16 %v9888_v41, %v9885_v40  ;;  %1025 = vmatpush.bf16.msra.mxu0 %v7951_v37  ;;  %v229_v37 = vld [vmem:[#allocation2 + $0x190] sm:$0xff] }
  0x49   :  { %8174 = vrot.lane.b32.xlu0 %v8173_v52, %s9468_s24  ;;  %v429_v52 = vrot.slane %v9788_v10, 1 }
  0x4b   :  { %v9903_v2 = vsel %vm352_vm4, %v429_v52, %v430_v54  ;;  %v7964_v52 = vld [vmem:[%s14242_s30 + $0x70] sm:$0xff]  ;;  %v7971_v54 = vld [vmem:[%s14242_s30 + $0xa8] sm:$0xff]  ;;  %1026 = vmatpush.bf16.msra.mxu0 %v7950_v46  ;;  %v7962_v46 = vld [vmem:[%s14242_s30 + $0x60] sm:$0xff] }
  0x4c   :  { %8124 = vrot.lane.b32.xlu2 %v8123_v1, %s9468_s24  ;;  %v9900_v1 = vsel %vm352_vm4, %v374_v47, %v375_v48  ;;  %14244 = vst [vmem:[#allocation5_spill] sm:$0xff] %v9903_v2  ;;  %v393_v47 = vrot.slane %v226_v36, 1  ;;  %v396_v48 = vrot.slane %v229_v37, 1  ;;  %1069 = vmatpush.bf16.msra.mxu1 %v7964_v52  ;;  %v7970_v36 = vld [vmem:[%s14242_s30 + $0xa0] sm:$0xff]  ;;  %v10016_v63 = vld [vmem:[#allocation2 + $0x1b8] sm:$0xff] }
  0x4d   :  { %v8153_v15 = vpack.i.bf16 %v9903_v2, %v9900_v1  ;;  %1119 = vmatpush.bf16.msra.mxu2 %v7971_v54  ;;  %v7974_v54 = vld [vmem:[%s14242_s30 + $0xc0] sm:$0xff] }
  0x4e   :  { %8149 = vrot.lane.b32.xlu1 %v8148_v18, %s9468_s24  ;;  %v380_v18 = vrot.slane %v9762_v53, 1  ;;  %v9946_v59 = vsel %vm352_vm4, %v395_v45, %v396_v48  ;;  %v7975_v45 = vld [vmem:[%s14242_s30 + $0xc8] sm:$0xff]  ;;  %v273_v48 = vrot.slane %v9585_v4, 7 }
  0x4f   :  { %1219 = vmatpush.bf16.msrb.mxu0 %v7985_v26 }
  0x50   :  { %v9920_v29 = vsel %vm352_vm4, %v380_v18, %v381_v23  ;;  %v314_v18 = vrot.slane %v227_v5, 7  ;;  %v315_v23 = vrot.slane %v9767_v56, 7 }
  0x51   :  { %v8168_v35 = vpack.i.bf16 %v9923_v30, %v9920_v29  ;;  %1120 = vmatpush.bf16.msra.mxu2 %v7970_v36 }
  0x54   :  { %8139 = vrot.lane.b32.xlu2 %v8138_v43, %s9468_s24  ;;  %v392_v43 = vrot.slane %v9642_v20, 1 }
  0x56   :  { %8164 = vrot.lane.b32.xlu1 %v8163_v55, %s9468_s24  ;;  %v7976_v55 = vld [vmem:[%s14242_s30 + $0xd0] sm:$0xff]  ;;  %v9943_v58 = vsel %vm352_vm4, %v392_v43, %v393_v47  ;;  %v179_v43 = vld [vmem:[#allocation2] sm:$0xff]  ;;  %v7969_v47 = vld [vmem:[%s14242_s30 + $0x98] sm:$0xff] }
  0x57   :  { %v8188_v62 = vpack.i.bf16 %v9946_v59, %v9943_v58  ;;  %1171 = vmatpush.bf16.msra.mxu3 %v7976_v55  ;;  %v272_v52 = vrot.slane %v179_v43, 7  ;;  %v218_v55 = vld [vmem:[#allocation2 + $0x138] sm:$0xff]  ;;  %1121 = vmatpush.bf16.msra.mxu2 %v7969_v47  ;;  %v7968_v43 = vld [vmem:[%s14242_s30 + $0x90] sm:$0xff] }
  0x58   :  { %v305_v5 = vrot.slane %v218_v55, 7  ;;  %v7967_v55 = vld [vmem:[%s14242_s30 + $0x88] sm:$0xff] }
  0x59   :  { %8189 = vrot.lane.b32.xlu0 %v8188_v62, %s9468_s24  ;;  %v221_v62 = vld [vmem:[#allocation2 + $0x150] sm:$0xff]  ;;  %v274_v26 = vsel %vm271_vm3, %v272_v52, %v273_v48 }
  0x5a   :  { %v7960_v48 = vld [vmem:[%s14242_s30 + $0x50] sm:$0xff] }
  0x5b   :  { %1172 = vmatpush.bf16.msra.mxu3 %v7975_v45  ;;  %1122 = vmatpush.bf16.msra.mxu2 %v7968_v43 }
  0x5c   :  { %8154 = vrot.lane.b32.xlu2 %v8153_v15, %s9468_s24  ;;  %v312_v15 = vrot.slane %v9642_v20, 7 }
  0x5e   :  { %8179 = vrot.lane.b32.xlu1 %v8178_v28, %s9468_s24  ;;  %v9958_v27 = vsel %vm271_vm3, %v311_v9, %v312_v15  ;;  %v9961_v28 = vsel %vm271_vm3, %v314_v18, %v315_v23  ;;  %v306_v9 = vrot.slane %v9782_v8, 7  ;;  %v308_v15 = vrot.slane %v221_v62, 7 }
  0x5f   :  { %v8193_v37 = vpack.i.bf16 %v9961_v28, %v9958_v27  ;;  %v309_v18 = vrot.slane %v9640_v19, 7  ;;  %1173 = vmatpush.bf16.msra.mxu3 %v7974_v54  ;;  %1123 = vmatpush.bf16.msra.mxu2 %v7967_v55 }
  0x61   :  { %v9996_v36 = vsel %vm271_vm3, %v308_v15, %v309_v18  ;;  %v10018_v15 = vld [vmem:[#allocation2 + $0x1d0] sm:$0xff] }
  0x64   :  { %8169 = vrot.lane.b32.xlu2 %v8168_v35, %s9468_s24  ;;  %v7963_v35 = vld [vmem:[%s14242_s30 + $0x68] sm:$0xff] }
  0x65   :  { %1070 = vmatpush.bf16.msra.mxu1 %v7963_v35  ;;  %v9993_v35 = vsel %vm271_vm3, %v305_v5, %v306_v9  ;;  %v230_v5 = vld [vmem:[#allocation2 + $0x198] sm:$0xff]  ;;  %v233_v9 = vld [vmem:[#allocation2 + $0x1b0] sm:$0xff] }
  0x66   :  { %8194 = vrot.lane.b32.xlu1 %v8193_v37, %s9468_s24  ;;  %v7961_v37 = vld [vmem:[%s14242_s30 + $0x58] sm:$0xff]  ;;  %v8183_v47 = vpack.i.bf16 %v9996_v36, %v9993_v35  ;;  %v317_v18 = vrot.slane %v230_v5, 7 }
  0x69   :  { %1071 = vmatpush.bf16.msra.mxu1 %v7962_v46 }
  0x6c   :  { %8184 = vrot.lane.b32.xlu2 %v8183_v47, %s9468_s24  ;;  %v7959_v47 = vld [vmem:[%s14242_s30 + $0x48] sm:$0xff] }
  0x6d   :  { %1072 = vmatpush.bf16.msra.mxu1 %v7961_v37  ;;  %v8203_v37 = vpack.i.bf16 %v10018_v15, %v10016_v63 }
  0x6f   :  { %8204 = vrot.lane.b32.xlu0 %v8203_v37, %s9468_s24 }
  0x71   :  { %1073 = vmatpush.bf16.msra.mxu1 %v7960_v48  ;;  %v7966_v48 = vld [vmem:[%s14242_s30 + $0x80] sm:$0xff] }
  0x72   :  { %1124 = vmatpush.bf16.msra.mxu2 %v7966_v48 }
  0x75   :  { %1074 = vmatpush.bf16.msra.mxu1 %v7959_v47 }
  0x86   :  { %v8085_v23 = vpop.permute.xlu0 %8084 }
  0x87   :  { %v8087_v45 = vunpack.i.h.bf16 %v8085_v23  ;;  %v8086_v46 = vunpack.i.l.bf16 %v8085_v23  ;;  %v318_v23 = vrot.slane %v9769_v57, 7 }
  0x89   :  { %v617_v52 = vsel %vm57_vm0, %v274_v26, %v8086_v46  ;;  %v618_v54 = vsel %vm57_vm0, %v9673_v31, %v8087_v45  ;;  %v424_v31 = vrot.slane %v233_v9, 7  ;;  %v425_v26 = vrot.slane %v10016_v63, 7 }
  0x8a   :  { %v669_v62 = vpack.c.bf16 %v618_v54, %v617_v52  ;;  %v10025_v45 = vsel %vm271_vm3, %v317_v18, %v318_v23  ;;  %v7958_v18 = vld [vmem:[%s14242_s30 + $0x40] sm:$0xff] }
  0x8b   :  { %v10028_v46 = vsel %vm271_vm3, %v424_v31, %v425_v26  ;;  %1075 = vmatpush.bf16.msra.mxu1 %v7958_v18  ;;  %v8095_v31 = vpop.permute.xlu1 %8094  ;;  %v181_v26 = vld [vmem:[#allocation2 + $0x10] sm:$0xff] }
  0x8c   :  { %1027 = vmatmul.bf16.vlgmr.msra.gmra.mxu0 %v669_v62  ;;  %v8208_v55 = vpack.i.bf16 %v10028_v46, %v10025_v45  ;;  %v8097_v37 = vunpack.i.h.bf16 %v8095_v31  ;;  %v354_v47 = vrot.slane %v181_v26, 1  ;;  %v398_v26 = vrot.slane %v9769_v57, 1 }
  0x8e   :  { %v8090_v43 = vpop.permute.xlu0 %8089  ;;  %8209 = vrot.lane.b32.xlu1 %v8208_v55, %s9468_s24  ;;  %v622_v48 = vsel %vm57_vm0, %v9847_v60, %v8097_v37  ;;  %v399_v60 = vrot.slane %v232_v0, 1  ;;  %v432_v37 = vrot.slane %v10016_v63, 1 }
  0x8f   :  { %v8092_v52 = vunpack.i.h.bf16 %v8090_v43  ;;  %v8091_v54 = vunpack.i.l.bf16 %v8090_v43  ;;  %v8096_v43 = vunpack.i.l.bf16 %v8095_v31 }
  0x91   :  { %v619_v62 = vsel %vm57_vm0, %v9676_v32, %v8091_v54  ;;  %v620_v5 = vsel %vm57_vm0, %v9875_v33, %v8092_v52  ;;  %v353_v32 = vrot.slane %v9585_v4, 1  ;;  %v621_v33 = vsel %vm57_vm0, %v9878_v34, %v8096_v43  ;;  %v235_v4 = vld [vmem:[#allocation2 + $0x1c0] sm:$0xff]  ;;  %v238_v34 = vld [vmem:[#allocation2 + $0x1d8] sm:$0xff] }
  0x92   :  { %v672_v9 = vpack.c.bf16 %v620_v5, %v619_v62  ;;  %v454_v62 = vrot.slane %v10018_v15, 1  ;;  %v676_v31 = vpack.c.bf16 %v622_v48, %v621_v33  ;;  %v433_v43 = vrot.slane %v235_v4, 1 }
  0x93   :  { %v355_v55 = vsel %vm352_vm4, %v353_v32, %v354_v47  ;;  %v10067_v48 = vsel %vm352_vm4, %v398_v26, %v399_v60 }
  0x94   :  { %1174 = vmatmul.bf16.vlgmr.msra.gmra.mxu3 %v672_v9  ;;  %v10070_v2 = vsel %vm352_vm4, %v432_v37, %v433_v43 }
  0x95   :  { %v8198_v0 = vpack.i.bf16 %v10070_v2, %v10067_v48 }
  0x96   :  { %v10047_v23 = vpop.permute.xlu0 %8114  ;;  %v10054_v52 = vpop.permute.xlu2 %8104 }
  0x97   :  { %8199 = vrot.lane.b32.xlu2 %v8198_v0, %s9468_s24 }
  0x9c   :  { %1032 = vmatmul.bf16.gmra.mxu0 %v672_v9  ;;  %v7984_v9 = vld [vmem:[%s14242_s30 + $0x110] sm:$0xff] }
  0x9d   :  { %1220 = vmatpush.bf16.msrb.mxu0 %v7984_v9 }
  0x9e   :  { %v8130_v54 = vpop.permute.xlu0 %8129 }
  0x9f   :  { %v8132_v5 = vunpack.i.h.bf16 %v8130_v54  ;;  %v8131_v18 = vunpack.i.l.bf16 %v8130_v54  ;;  %v455_v54 = vrot.slane %v238_v34, 1 }
  0xa1   :  { %v633_v32 = vsel %vm57_vm0, %v355_v55, %v8131_v18  ;;  %v634_v47 = vsel %vm57_vm0, %v9832_v49, %v8132_v5  ;;  %v10073_v57 = vsel %vm352_vm4, %v454_v62, %v455_v54  ;;  %v10079_v55 = vpop.permute.xlu2 %8109  ;;  %v8100_v5 = vpop.permute.xlu1 %8099 }
  0xa2   :  { %v670_v33 = vpack.c.bf16 %v634_v47, %v633_v32  ;;  %v702_v49 = vpack.c.bf16 %v10073_v57, %v10070_v2  ;;  %v8102_v18 = vunpack.i.h.bf16 %v8100_v5  ;;  %v8101_v4 = vunpack.i.l.bf16 %v8100_v5 }
  0xa4   :  { %1076 = vmatmul.bf16.vlgmr.msra.gmra.mxu1 %v670_v33  ;;  %1179 = vmatmul.bf16.gmra.mxu3 %v676_v31  ;;  %v623_v62 = vsel %vm57_vm0, %v9850_v61, %v8101_v4  ;;  %v624_v34 = vsel %vm57_vm0, %v9885_v40, %v8102_v18  ;;  %v7983_v61 = vld [vmem:[%s14242_s30 + $0x108] sm:$0xff]  ;;  %v440_v40 = vrot.slane %v9775_v3, 7 }
  0xa5   :  { %v680_v32 = vpack.c.bf16 %v624_v34, %v623_v62  ;;  %1221 = vmatpush.bf16.msrb.mxu0 %v7983_v61 }
  0xa6   :  { %v8145_v47 = vpop.permute.xlu0 %8144 }
  0xa9   :  { %v8125_v9 = vpop.permute.xlu2 %8124 }
  0xaa   :  { %v8127_v26 = vunpack.i.h.bf16 %v8125_v9  ;;  %v8126_v60 = vunpack.i.l.bf16 %v8125_v9 }
  0xac   :  { %1037 = vmatmul.bf16.gmra.mxu0 %v676_v31  ;;  %v649_v37 = vsel %vm57_vm0, %v9591_v6, %v8126_v60  ;;  %v650_v43 = vsel %vm57_vm0, %v9618_v13, %v8127_v26  ;;  %v206_v31 = vld [vmem:[#allocation2 + $0xd8] sm:$0xff] }
  0xad   :  { %v671_v54 = vpack.c.bf16 %v650_v43, %v649_v37  ;;  %v439_v18 = vrot.slane %v206_v31, 7  ;;  %v209_v37 = vld [vmem:[#allocation2 + $0xf0] sm:$0xff]  ;;  %v297_v31 = vrot.slane %v9759_v50, 7 }
  0xaf   :  { %1125 = vmatmul.bf16.vlgmr.msra.gmra.mxu2 %v671_v54  ;;  %v441_v34 = vsel %vm271_vm3, %v439_v18, %v440_v40  ;;  %v8106_v40 = vunpack.i.l.bf16 %v10054_v52 }
  0xb0   :  { %v10094_v6 = vpop.permute.xlu1 %8119 }
  0xb1   :  { %v8140_v33 = vpop.permute.xlu2 %8139 }
  0xb2   :  { %v8142_v0 = vunpack.i.h.bf16 %v8140_v33  ;;  %v8141_v5 = vunpack.i.l.bf16 %v8140_v33  ;;  %v296_v33 = vrot.slane %v209_v37, 7 }
  0xb3   :  { %v8160_v62 = vpop.permute.xlu0 %8159 }
  0xb4   :  { %1184 = vmatmul.bf16.gmra.mxu3 %v680_v32  ;;  %v635_v13 = vsel %vm57_vm0, %v9835_v51, %v8141_v5  ;;  %v636_v4 = vsel %vm57_vm0, %v9796_v24, %v8142_v0  ;;  %v8162_v26 = vunpack.i.h.bf16 %v8160_v62  ;;  %v8161_v60 = vunpack.i.l.bf16 %v8160_v62 }
  0xb5   :  { %v674_v9 = vpack.c.bf16 %v636_v4, %v635_v13  ;;  %v8107_v4 = vunpack.i.h.bf16 %v10054_v52 }
  0xb6   :  { %v665_v43 = vsel %vm57_vm0, %v9888_v41, %v8161_v60  ;;  %v666_v54 = vsel %vm57_vm0, %v441_v34, %v8162_v26  ;;  %v298_v41 = vsel %vm271_vm3, %v296_v33, %v297_v31 }
  0xb7   :  { %1081 = vmatmul.bf16.gmra.mxu1 %v674_v9  ;;  %v684_v13 = vpack.c.bf16 %v666_v54, %v665_v43  ;;  %v625_v62 = vsel %vm57_vm0, %v298_v41, %v8106_v40  ;;  %v626_v34 = vsel %vm57_vm0, %v9814_v38, %v8107_v4  ;;  %v8112_v43 = vunpack.i.h.bf16 %v10079_v55 }
  0xb8   :  { %v8135_v61 = vpop.permute.xlu1 %8134  ;;  %v686_v52 = vpack.c.bf16 %v626_v34, %v625_v62  ;;  %v8147_v54 = vunpack.i.h.bf16 %v8145_v47  ;;  %v8116_v41 = vunpack.i.l.bf16 %v10047_v23 }
  0xb9   :  { %v8137_v5 = vunpack.i.h.bf16 %v8135_v61  ;;  %v8136_v0 = vunpack.i.l.bf16 %v8135_v61 }
  0xbb   :  { %v651_v18 = vsel %vm57_vm0, %v9621_v14, %v8136_v0  ;;  %v8111_v14 = vunpack.i.l.bf16 %v10079_v55 }
  0xbc   :  { %1042 = vmatmul.bf16.gmra.mxu0 %v680_v32  ;;  %v652_v32 = vsel %vm57_vm0, %v9627_v16, %v8137_v5  ;;  %v8146_v16 = vunpack.i.l.bf16 %v8145_v47  ;;  %v628_v5 = vsel %vm57_vm0, %v9993_v35, %v8112_v43  ;;  %v654_v47 = vsel %vm57_vm0, %v9649_v21, %v8147_v54 }
  0xbd   :  { %v675_v9 = vpack.c.bf16 %v652_v32, %v651_v18  ;;  %v627_v38 = vsel %vm57_vm0, %v9817_v39, %v8111_v14  ;;  %v7982_v39 = vld [vmem:[%s14242_s30 + $0x100] sm:$0xff]  ;;  %v8155_v32 = vpop.permute.xlu2 %8154  ;;  %v8117_v21 = vunpack.i.h.bf16 %v10047_v23  ;;  %v377_v23 = vrot.slane %v9759_v50, 1  ;;  %v8175_v14 = vpop.permute.xlu0 %8174  ;;  %s9470_s30 = smov 96  }
  0xbe   :  { %v653_v55 = vsel %vm57_vm0, %v9631_v17, %v8146_v16  ;;  %1222 = vmatpush.bf16.msrb.mxu0 %v7982_v39  ;;  %v8157_v62 = vunpack.i.h.bf16 %v8155_v32  ;;  %v8156_v34 = vunpack.i.l.bf16 %v8155_v32  ;;  %v8121_v50 = vunpack.i.l.bf16 %v10094_v6 }
  0xbf   :  { %1130 = vmatmul.bf16.gmra.mxu2 %v675_v9  ;;  %v679_v4 = vpack.c.bf16 %v654_v47, %v653_v55 }
  0xc0   :  { %v8150_v26 = vpop.permute.xlu1 %8149  ;;  %v656_v43 = vsel %vm57_vm0, %v9788_v10, %v8157_v62  ;;  %v8122_v10 = vunpack.i.h.bf16 %v10094_v6  ;;  %v443_v62 = vrot.slane %v10018_v15, 7 }
  0xc1   :  { %v8152_v60 = vunpack.i.h.bf16 %v8150_v26  ;;  %v8151_v37 = vunpack.i.l.bf16 %v8150_v26  ;;  %v211_v26 = vld [vmem:[#allocation2 + $0x100] sm:$0xff] }
  0xc2   :  { %v378_v54 = vrot.slane %v211_v26, 1  ;;  %v236_v26 = vld [vmem:[#allocation2 + $0x1c8] sm:$0xff] }
  0xc3   :  { %v637_v31 = vsel %vm57_vm0, %v9799_v25, %v8151_v37  ;;  %v638_v33 = vsel %vm57_vm0, %v9729_v42, %v8152_v60  ;;  %v629_v60 = vsel %vm57_vm0, %v9996_v36, %v8116_v41  ;;  %v630_v37 = vsel %vm57_vm0, %v9958_v27, %v8117_v21 }
  0xc4   :  { %1189 = vmatmul.bf16.gmra.mxu3 %v684_v13  ;;  %v678_v61 = vpack.c.bf16 %v638_v33, %v637_v31  ;;  %v689_v13 = vpack.c.bf16 %v628_v5, %v627_v38  ;;  %v693_v16 = vpack.c.bf16 %v630_v37, %v629_v60  ;;  %v8177_v33 = vunpack.i.h.bf16 %v8175_v14 }
  0xc5   :  { %v379_v38 = vsel %vm352_vm4, %v377_v23, %v378_v54  ;;  %v8170_v36 = vpop.permute.xlu2 %8169 }
  0xc6   :  { %v8172_v55 = vunpack.i.h.bf16 %v8170_v36  ;;  %v8171_v47 = vunpack.i.l.bf16 %v8170_v36 }
  0xc7   :  { %1086 = vmatmul.bf16.gmra.mxu1 %v678_v61  ;;  %v8176_v61 = vunpack.i.l.bf16 %v8175_v14 }
  0xc8   :  { %v8165_v0 = vpop.permute.xlu1 %8164 }
  0xc9   :  { %v8167_v40 = vunpack.i.h.bf16 %v8165_v0  ;;  %v8166_v18 = vunpack.i.l.bf16 %v8165_v0  ;;  %v641_v27 = vsel %vm57_vm0, %v379_v38, %v8176_v61  ;;  %v631_v0 = vsel %vm57_vm0, %v9961_v28, %v8121_v50 }
  0xca   :  { %v673_v61 = vpack.c.bf16 %v9796_v24, %v9835_v51 }
  0xcb   :  { %v639_v35 = vsel %vm57_vm0, %v9737_v44, %v8166_v18  ;;  %v640_v17 = vsel %vm57_vm0, %v9900_v1, %v8167_v40  ;;  %v8190_v21 = vpop.permute.xlu0 %8189 }
  0xcc   :  { %1047 = vmatmul.bf16.gmra.mxu0 %v686_v52  ;;  %v682_v9 = vpack.c.bf16 %v640_v17, %v639_v35  ;;  %v655_v52 = vsel %vm57_vm0, %v9651_v22, %v8156_v34  ;;  %v642_v22 = vsel %vm57_vm0, %v9920_v29, %v8177_v33  ;;  %v658_v29 = vsel %vm57_vm0, %v9780_v7, %v8172_v55 }
  0xcd   :  { %v683_v31 = vpack.c.bf16 %v656_v43, %v655_v52  ;;  %v687_v5 = vpack.c.bf16 %v642_v22, %v641_v27  ;;  %v8185_v40 = vpop.permute.xlu2 %8184  ;;  %v442_v52 = vrot.slane %v236_v26, 7  ;;  %v8192_v22 = vunpack.i.h.bf16 %v8190_v21 }
  0xce   :  { %v8187_v39 = vunpack.i.h.bf16 %v8185_v40  ;;  %v8186_v35 = vunpack.i.l.bf16 %v8185_v40  ;;  %v8191_v36 = vunpack.i.l.bf16 %v8190_v21 }
  0xcf   :  { %1135 = vmatmul.bf16.gmra.mxu2 %v679_v4  ;;  %v657_v4 = vsel %vm57_vm0, %v9762_v53, %v8171_v47 }
  0xd0   :  { %v688_v6 = vpack.c.bf16 %v658_v29, %v657_v4  ;;  %v643_v17 = vsel %vm57_vm0, %v9923_v30, %v8186_v35  ;;  %v644_v28 = vsel %vm57_vm0, %v9907_v11, %v8187_v39 }
  0xd1   :  { %v691_v32 = vpack.c.bf16 %v644_v28, %v643_v17  ;;  %v208_v28 = vld [vmem:[#allocation2 + $0xe8] sm:$0xff] }
  0xd2   :  { %v452_v21 = vrot.slane %v208_v28, 1 }
  0xd4   :  { %1194 = vmatmul.bf16.gmra.mxu3 %v689_v13 }
  0xd7   :  { %1091 = vmatmul.bf16.gmra.mxu1 %v682_v9 }
  0xdc   :  { %1052 = vmatmul.bf16.gmra.mxu0 %v689_v13  ;;  %v632_v13 = vsel %vm57_vm0, %v10025_v45, %v8122_v10  ;;  %v8180_v45 = vpop.permute.xlu1 %8179  ;;  %v662_v10 = vsel %vm57_vm0, %v9767_v56, %v8192_v22 }
  0xdd   :  { %v697_v18 = vpack.c.bf16 %v632_v13, %v631_v0  ;;  %v8182_v53 = vunpack.i.h.bf16 %v8180_v45  ;;  %v8181_v41 = vunpack.i.l.bf16 %v8180_v45  ;;  %v451_v45 = vrot.slane %v9775_v3, 1 }
  0xdf   :  { %1140 = vmatmul.bf16.gmra.mxu2 %v683_v31  ;;  %v659_v7 = vsel %vm57_vm0, %v9782_v8, %v8181_v41  ;;  %v660_v9 = vsel %vm57_vm0, %v9640_v19, %v8182_v53  ;;  %v453_v53 = vsel %vm352_vm4, %v451_v45, %v452_v21 }
  0xe0   :  { %v692_v60 = vpack.c.bf16 %v660_v9, %v659_v7 }
  0xe1   :  { %v8205_v37 = vpop.permute.xlu0 %8204 }
  0xe2   :  { %v8207_v14 = vunpack.i.h.bf16 %v8205_v37  ;;  %v8206_v54 = vunpack.i.l.bf16 %v8205_v37 }
  0xe4   :  { %1199 = vmatmul.bf16.gmra.mxu3 %v693_v16  ;;  %v8195_v34 = vpop.permute.xlu1 %8194  ;;  %v667_v31 = vsel %vm57_vm0, %v10028_v46, %v8206_v54  ;;  %v661_v46 = vsel %vm57_vm0, %v9642_v20, %v8191_v36  ;;  %v677_v20 = vpack.c.bf16 %v9729_v42, %v9799_v25  ;;  %v681_v42 = vpack.c.bf16 %v9900_v1, %v9737_v44 }
  0xe5   :  { %v8197_v43 = vunpack.i.h.bf16 %v8195_v34  ;;  %v8196_v23 = vunpack.i.l.bf16 %v8195_v34  ;;  %v690_v44 = vpack.c.bf16 %v9907_v11, %v9923_v30  ;;  %v698_v11 = vpack.c.bf16 %v10067_v48, %v9946_v59 }
  0xe7   :  { %1096 = vmatmul.bf16.gmra.mxu1 %v687_v5  ;;  %v645_v15 = vsel %vm57_vm0, %v9910_v12, %v8196_v23  ;;  %v646_v33 = vsel %vm57_vm0, %v9943_v58, %v8197_v43  ;;  %v696_v5 = vpack.c.bf16 %v662_v10, %v661_v46 }
  0xe8   :  { %v695_v38 = vpack.c.bf16 %v646_v33, %v645_v15 }
  0xec   :  { %1057 = vmatmul.bf16.gmra.mxu0 %v693_v16  ;;  %v444_v16 = vsel %vm271_vm3, %v442_v52, %v443_v62  ;;  %v694_v62 = vpack.c.bf16 %v9943_v58, %v9910_v12 }
  0xed   :  { %v668_v8 = vsel %vm57_vm0, %v444_v16, %v8207_v14 }
  0xee   :  { %v701_v19 = vpack.c.bf16 %v668_v8, %v667_v31  ;;  %v10245_v31 = vld [vmem:[%s14183_s2] ss:$0 sm:$0xff] }
  0xef   :  { %1145 = vmatmul.bf16.gmra.mxu2 %v688_v6 }
  0xf1   :  { %v8200_v13 = vpop.permute.xlu2 %8199 }
  0xf2   :  { %v8202_v56 = vunpack.i.h.bf16 %v8200_v13  ;;  %v8201_v40 = vunpack.i.l.bf16 %v8200_v13 }
  0xf4   :  { %1204 = vmatmul.bf16.gmra.mxu3 %v697_v18  ;;  %v664_v39 = vsel %vm57_vm0, %v10016_v63, %v8202_v56  ;;  %v14246_v63 = vld [vmem:[#allocation5_spill] sm:$0xff] }
  0xf5   :  { %v685_v41 = vpack.c.bf16 %v453_v53, %v14246_v63  ;;  %v8000_v63 = vld [vmem:[%s14184_s3 + $0x70] sm:$0xff] }
  0xf7   :  { %1101 = vmatmul.bf16.gmra.mxu1 %v691_v32 }
  0xfc   :  { %1062 = vmatmul.bf16.gmra.mxu0 %v697_v18  ;;  %v14245_v18 = vld [vmem:[#allocation4_spill] sm:$0xff] }
  0xfd   :  { %v663_v6 = vsel %vm57_vm0, %v14245_v18, %v8201_v40  ;;  %v7993_v18 = vld [vmem:[%s14184_s3 + $0x38] sm:$0xff] }
  0xfe   :  { %v700_v35 = vpack.c.bf16 %v664_v39, %v663_v6  ;;  %2145 = vmatpush.bf16.msrb.mxu1 %v7993_v18 }
  0xff   :  { %1150 = vmatmul.bf16.gmra.mxu2 %v692_v60 }
 0x100   :  { %v8210_v50 = vpop.permute.xlu1 %8209 }
 0x101   :  { %v8212_v47 = vunpack.i.h.bf16 %v8210_v50  ;;  %v8211_v24 = vunpack.i.l.bf16 %v8210_v50 }
 0x103   :  { %v647_v51 = vsel %vm57_vm0, %v9946_v59, %v8211_v24  ;;  %v648_v0 = vsel %vm57_vm0, %v10067_v48, %v8212_v47  ;;  %v14247_v59 = vmov 0.0  }
 0x104   :  { %1209 = vmatmul.bf16.gmra.mxu3 %v701_v19  ;;  %v699_v4 = vpack.c.bf16 %v648_v0, %v647_v51  ;;  %103 = vst.msk [vmem:[#allocation3 + $0x7] sm:$0xff] %vm102_vm5, %v14247_v59 }
 0x105   :  { %106 = vst.msk [vmem:[#allocation3 + $0xf7] sm:$0xff] %vm102_vm5, %v14247_v59 }
 0x106   :  { %109 = vst.msk [vmem:[#allocation3 + $0xdf] sm:$0xff] %vm102_vm5, %v14247_v59 }
 0x107   :  { %1106 = vmatmul.bf16.gmra.mxu1 %v695_v38  ;;  %111 = vst.msk [vmem:[#allocation3 + $0x1cf] sm:$0xff] %vm102_vm5, %v14247_v59 }
 0x108   :  { %131 = vst.msk [vmem:[#allocation3 + $0x28] sm:$0x1] %vm114_vm6, %v14247_v59 }
 0x109   :  { %v10180_v27 = vpop.f32.mrf.mxu0  ;;  %132 = vst.msk [vmem:[#allocation3 + $0x40] sm:$0x1] %vm114_vm6, %v14247_v59 }
 0x10a   :  { %v1029_v19 = vadd.f32 %v10245_v31, %v10180_v27  ;;  %115 = vst.msk [vmem:[#allocation3 + $0x1f] sm:$0x1] %vm114_vm6, %v14247_v59 }
 0x10b   :  { %116 = vst.msk [vmem:[#allocation3 + $0x37] sm:$0x1] %vm114_vm6, %v14247_v59 }
 0x10c   :  { %7542 = vmatmul.msk.bf16.vlgmr.msrb.gmra.mxu0 %vm57_vm0, %v673_v61  ;;  %117 = vst.msk [vmem:[#allocation3 + $0x4f] sm:$0x1] %vm114_vm6, %v14247_v59 }
 0x10d   :  { %118 = vst.msk [vmem:[#allocation3 + $0x67] sm:$0x1] %vm114_vm6, %v14247_v59 }
 0x10e   :  { %119 = vst.msk [vmem:[#allocation3 + $0x7f] sm:$0x1] %vm114_vm6, %v14247_v59 }
 0x10f   :  { %1155 = vmatmul.bf16.gmra.mxu2 %v696_v5  ;;  %120 = vst.msk [vmem:[#allocation3 + $0x97] sm:$0x1] %vm114_vm6, %v14247_v59  ;;  %v1301_v28 = vld [vmem:[#allocation3 + $0x28] sm:$0xff] }
 0x110   :  { %121 = vst.msk [vmem:[#allocation3 + $0xaf] sm:$0x1] %vm114_vm6, %v14247_v59  ;;  %v1304_v53 = vld [vmem:[#allocation3 + $0x40] sm:$0xff] }
 0x111   :  { %v10187_v55 = vpop.f32.mrf.mxu0  ;;  %122 = vst.msk [vmem:[#allocation3 + $0xc7] sm:$0x1] %vm114_vm6, %v14247_v59 }
 0x112   :  { %v1031_v2 = vadd.f32 %v10245_v31, %v10187_v55  ;;  %123 = vst.msk [vmem:[#allocation3 + $0x10f] sm:$0x1] %vm114_vm6, %v14247_v59 }
 0x113   :  { %124 = vst.msk [vmem:[#allocation3 + $0x127] sm:$0x1] %vm114_vm6, %v14247_v59 }
 0x114   :  { %125 = vst.msk [vmem:[#allocation3 + $0x13f] sm:$0x1] %vm114_vm6, %v14247_v59 }
 0x115   :  { %126 = vst.msk [vmem:[#allocation3 + $0x157] sm:$0x1] %vm114_vm6, %v14247_v59 }
 0x116   :  { %127 = vst.msk [vmem:[#allocation3 + $0x16f] sm:$0x1] %vm114_vm6, %v14247_v59 }
 0x117   :  { %1111 = vmatmul.bf16.gmra.mxu1 %v699_v4  ;;  %v1175_v30 = vpop.f32.mrf.mxu3  ;;  %128 = vst.msk [vmem:[#allocation3 + $0x187] sm:$0x1] %vm114_vm6, %v14247_v59  ;;  %v8003_v4 = vld [vmem:[%s14184_s3 + $0x88] sm:$0xff] }
 0x118   :  { %129 = vst.msk [vmem:[#allocation3 + $0x19f] sm:$0x1] %vm114_vm6, %v14247_v59  ;;  %2249 = vmatpush.bf16.msrb.mxu3 %v8003_v4 }
 0x119   :  { %v10195_v29 = vpop.f32.mrf.mxu0  ;;  %130 = vst.msk [vmem:[#allocation3 + $0x1b7] sm:$0x1] %vm114_vm6, %v14247_v59 }
 0x11a   :  { %v1034_v55 = vadd.f32 %v10245_v31, %v10195_v29  ;;  %v8001_v29 = vld [vmem:[%s14184_s3 + $0x78] sm:$0xff]  ;;  %133 = vst.msk [vmem:[#allocation3 + $0x58] sm:$0x1] %vm114_vm6, %v14247_v59 }
 0x11b   :  { %2194 = vmatpush.bf16.msrb.mxu2 %v8001_v29  ;;  %134 = vst.msk [vmem:[#allocation3 + $0x70] sm:$0x1] %vm114_vm6, %v14247_v59 }
 0x11c   :  { %7543 = vmatmul.msk.bf16.gmra.mxu0 %vm57_vm0, %v677_v20  ;;  %135 = vst.msk [vmem:[#allocation3 + $0x88] sm:$0x1] %vm114_vm6, %v14247_v59 }
 0x11d   :  { %136 = vst.msk [vmem:[#allocation3 + $0xa0] sm:$0x1] %vm114_vm6, %v14247_v59 }
 0x11e   :  { %137 = vst.msk [vmem:[#allocation3 + $0xb8] sm:$0x1] %vm114_vm6, %v14247_v59 }
 0x11f   :  { %1160 = vmatmul.bf16.gmra.mxu2 %v700_v35  ;;  %v1177_v58 = vpop.f32.mrf.mxu3  ;;  %v8002_v35 = vld [vmem:[%s14184_s3 + $0x80] sm:$0xff]  ;;  %138 = vst.msk [vmem:[#allocation3 + $0xd0] sm:$0x1] %vm114_vm6, %v14247_v59 }
 0x120   :  { %2250 = vmatpush.bf16.msrb.mxu3 %v8002_v35  ;;  %2195 = vmatpush.bf16.msrb.mxu2 %v8000_v63  ;;  %139 = vst.msk [vmem:[#allocation3 + $0x118] sm:$0x1] %vm114_vm6, %v14247_v59 }
 0x121   :  { %v10202_v17 = vpop.f32.mrf.mxu0  ;;  %v1077_v26 = vpop.f32.mrf.mxu1  ;;  %140 = vst.msk [vmem:[#allocation3 + $0x130] sm:$0x1] %vm114_vm6, %v14247_v59 }
 0x122   :  { %v1078_v15 = vadd.f32 %v1077_v26, %v1029_v19  ;;  %v1036_v6 = vadd.f32 %v10245_v31, %v10202_v17  ;;  %141 = vst.msk [vmem:[#allocation3 + $0x148] sm:$0x1] %vm114_vm6, %v14247_v59 }
 0x123   :  { %142 = vst.msk [vmem:[#allocation3 + $0x160] sm:$0x1] %vm114_vm6, %v14247_v59 }
 0x124   :  { %143 = vst.msk [vmem:[#allocation3 + $0x178] sm:$0x1] %vm114_vm6, %v14247_v59 }
 0x125   :  { %144 = vst.msk [vmem:[#allocation3 + $0x190] sm:$0x1] %vm114_vm6, %v14247_v59 }
 0x126   :  { %145 = vst.msk [vmem:[#allocation3 + $0x1a8] sm:$0x1] %vm114_vm6, %v14247_v59 }
 0x127   :  { %v1180_v8 = vpop.f32.mrf.mxu3  ;;  %146 = vst.msk [vmem:[#allocation3 + $0x1c0] sm:$0x1] %vm114_vm6, %v14247_v59 }
 0x128   :  { %105 = vst.msk [vmem:[#allocation3 + $0xf] sm:$0x3] %vm104_vm7, %v14247_v59 }
 0x129   :  { %v10206_v25 = vpop.f32.mrf.mxu0  ;;  %v1079_v52 = vpop.f32.mrf.mxu1  ;;  %107 = vst.msk [vmem:[#allocation3 + $0xff] sm:$0x3] %vm104_vm7, %v14247_v59 }
 0x12a   :  { %v1080_v27 = vadd.f32 %v1079_v52, %v1031_v2  ;;  %v1307_v2 = vld [vmem:[#allocation3 + $0x58] sm:$0xff]  ;;  %110 = vst.msk [vmem:[#allocation3 + $0xe7] sm:$0x3] %vm104_vm7, %v14247_v59 }
 0x12b   :  { %112 = vst.msk [vmem:[#allocation3 + $0x1d7] sm:$0x3] %vm104_vm7, %v14247_v59 }
 0x12c   :  { %7544 = vmatmul.msk.bf16.gmra.mxu0 %vm57_vm0, %v681_v42 }
 0x12f   :  { %v10277_v38 = vpop.f32.mrf.mxu3  ;;  %v10480_v59 = vld [vmem:[#allocation3 + $0x8] sm:$0xff] }
 0x131   :  { %v10210_v32 = vpop.f32.mrf.mxu0 }
 0x132   :  { %v1126_v37 = vpop.f32.mrf.mxu2 }
 0x133   :  { %v1127_v57 = vadd.f32 %v1126_v37, %v1078_v15  ;;  %v1302_v15 = vld [vmem:[#allocation3 + $0x30] sm:$0xff] }
 0x134   :  { %v1082_v12 = vpop.f32.mrf.mxu1 }
 0x135   :  { %v1176_v22 = vadd.f32 %v1175_v30, %v1127_v57  ;;  %v1083_v47 = vadd.f32 %v1082_v12, %v1034_v55  ;;  %v1475_v30 = vrot.slane %v1304_v53, 1 }
 0x137   :  { %v10309_v0 = vpop.f32.mrf.mxu3 }
 0x139   :  { %v10214_v7 = vpop.f32.mrf.mxu0 }
 0x13a   :  { %v1128_v23 = vpop.f32.mrf.mxu2 }
 0x13b   :  { %v1129_v50 = vadd.f32 %v1128_v23, %v1080_v27  ;;  %v1039_v23 = vadd.f32 %v10245_v31, %v10206_v25 }
 0x13c   :  { %7545 = vmatmul.msk.bf16.gmra.mxu0 %vm57_vm0, %v685_v41  ;;  %v1084_v48 = vpop.f32.mrf.mxu1 }
 0x13d   :  { %v1178_v51 = vadd.f32 %v1177_v58, %v1129_v50  ;;  %v1085_v42 = vadd.f32 %v1084_v48, %v1036_v6 }
 0x13f   :  { %v10361_v26 = vpop.f32.mrf.mxu3 }
 0x141   :  { %v10217_v9 = vpop.f32.mrf.mxu0 }
 0x142   :  { %v1131_v54 = vpop.f32.mrf.mxu2 }
 0x143   :  { %v1132_v56 = vadd.f32 %v1131_v54, %v1083_v47  ;;  %v1478_v47 = vrot.slane %v1307_v2, 1  ;;  %v1298_v2 = vld [vmem:[#allocation3 + $0x10] sm:$0xff] }
 0x145   :  { %v1181_v17 = vadd.f32 %v1180_v8, %v1132_v56 }
 0x147   :  { %v10416_v4 = vpop.f32.mrf.mxu3 }
 0x149   :  { %v10221_v1 = vpop.f32.mrf.mxu0 }
 0x14a   :  { %v10261_v33 = vpop.f32.mrf.mxu2 }
 0x14c   :  { %7546 = vmatmul.msk.bf16.gmra.mxu0 %vm57_vm0, %v690_v44 }
 0x151   :  { %v10224_v3 = vpop.f32.mrf.mxu0 }
 0x152   :  { %v10289_v10 = vpop.f32.mrf.mxu2 }
 0x159   :  { %v10228_v34 = vpop.f32.mrf.mxu0 }
 0x15a   :  { %v10333_v39 = vpop.f32.mrf.mxu2 }
 0x15c   :  { %7547 = vmatmul.msk.bf16.gmra.mxu0 %vm57_vm0, %v694_v62  ;;  %v1134_v62 = vadd.f32 %v10261_v33, %v1085_v42 }
 0x15e   :  { %v1183_v25 = vadd.f32 %v10277_v38, %v1134_v62  ;;  %v7992_v38 = vld [vmem:[%s14184_s3 + $0x30] sm:$0xff] }
 0x15f   :  { %2146 = vmatpush.bf16.msrb.mxu1 %v7992_v38  ;;  %v1192_v38 = vpop.f32.mrf.mxu3 }
 0x161   :  { %v10231_v60 = vpop.f32.mrf.mxu0 }
 0x162   :  { %v10380_v48 = vpop.f32.mrf.mxu2 }
 0x169   :  { %v10235_v43 = vpop.f32.mrf.mxu0 }
 0x16c   :  { %7548 = vmatmul.msk.bf16.gmra.mxu0 %vm57_vm0, %v698_v11  ;;  %v1472_v11 = vrot.slane %v1301_v28, 1 }
 0x171   :  { %v10238_v14 = vpop.f32.mrf.mxu0 }
 0x179   :  { %v10240_v16 = vpop.f32.mrf.mxu0 }
 0x17c   :  { %7549 = vmatmul.msk.bf16.gmra.mxu0 %vm57_vm0, %v702_v49  ;;  %v10273_v49 = vpop.f32.mrf.mxu1 }
 0x17d   :  { %v1088_v54 = vadd.f32 %v10273_v49, %v1039_v23  ;;  %v1305_v49 = vld [vmem:[#allocation3 + $0x48] sm:$0xff]  ;;  %v1310_v23 = vld [vmem:[#allocation3 + $0x70] sm:$0xff] }
 0x181   :  { %v10263_v61 = vpop.f32.mrf.mxu0 }
 0x184   :  { %v10305_v24 = vpop.f32.mrf.mxu1 }
 0x189   :  { %v1224_v36 = vpop.f32.mrf.mxu0 }
 0x18a   :  { %v10285_v46 = vadd.f32 %v1224_v36, %v1176_v22  ;;  %v1137_v22 = vadd.f32 %v10289_v10, %v1088_v54  ;;  %v1394_v36 = vrot.slane %v1302_v15, 7  ;;  %v1397_v10 = vrot.slane %v1305_v49, 7 }
 0x18c   :  { %14248 = vst [vmem:[#allocation4_spill] sm:$0xff] %v10285_v46  ;;  %v14205_v5 = vmax.f32 %v10285_v46, 0.0  ;;  %v10354_v41 = vpop.f32.mrf.mxu1  ;;  %v1186_v42 = vadd.f32 %v10309_v0, %v1137_v22 }
 0x18e   :  { %1280 = vst.msk [vmem:[#allocation3 + $0x20] sm:$0xff] %vm102_vm5, %v14205_v5 }
 0x191   :  { %v1226_v13 = vpop.f32.mrf.mxu0 }
 0x192   :  { %v10313_v20 = vadd.f32 %v1226_v13, %v1178_v51  ;;  %v1041_v13 = vadd.f32 %v10245_v31, %v10210_v32  ;;  %v1299_v32 = vld [vmem:[#allocation3 + $0x18] sm:$0xff] }
 0x193   :  { %v1391_v62 = vrot.slane %v1299_v32, 7  ;;  %v1313_v32 = vld [vmem:[#allocation3 + $0x88] sm:$0xff] }
 0x194   :  { %v14217_v40 = vmax.f32 %v10313_v20, 0.0  ;;  %v10408_v50 = vpop.f32.mrf.mxu1  ;;  %v1090_v35 = vadd.f32 %v10305_v24, %v1041_v13  ;;  %v10448_v24 = vpop.f32.mrf.mxu2  ;;  %v1308_v13 = vld [vmem:[#allocation3 + $0x60] sm:$0xff] }
 0x195   :  { %v10347_v21 = vld [vmem:[#allocation3 + $0x20] sm:$0xff] }
 0x196   :  { %1281 = vst.msk [vmem:[#allocation3 + $0x38] sm:$0xff] %vm102_vm5, %v14217_v40  ;;  %v1471_v52 = vrot.slane %v10347_v21, 1 }
 0x198   :  { %v10386_v8 = vsel %vm352_vm4, %v1471_v52, %v1472_v11  ;;  %v1392_v52 = vrot.slane %v10347_v21, 7  ;;  %v7999_v11 = vld [vmem:[%s14184_s3 + $0x68] sm:$0xff] }
 0x199   :  { %v1229_v45 = vpop.f32.mrf.mxu0  ;;  %2196 = vmatpush.bf16.msrb.mxu2 %v7999_v11  ;;  %v1484_v11 = vrot.slane %v1313_v32, 1  ;;  %v1316_v32 = vld [vmem:[#allocation3 + $0xa0] sm:$0xff] }
 0x19a   :  { %v10356_v44 = vadd.f32 %v1229_v45, %v1181_v17  ;;  %v10471_v15 = vsel %vm271_vm3, %v1391_v62, %v1392_v52  ;;  %v1400_v62 = vrot.slane %v1308_v13, 7 }
 0x19c   :  { %v14216_v37 = vmax.f32 %v10356_v44, 0.0 }
 0x19d   :  { %v10371_v12 = vld [vmem:[#allocation3 + $0x38] sm:$0xff] }
 0x19e   :  { %1282 = vst.msk [vmem:[#allocation3 + $0x50] sm:$0xff] %vm102_vm5, %v14216_v37  ;;  %v1474_v58 = vrot.slane %v10371_v12, 1  ;;  %v1395_v51 = vrot.slane %v10371_v12, 7 }
 0x1a0   :  { %v10389_v19 = vsel %vm352_vm4, %v1474_v58, %v1475_v30  ;;  %v10441_v28 = vsel %vm271_vm3, %v1394_v36, %v1395_v51  ;;  %v1139_v58 = vadd.f32 %v10333_v39, %v1090_v35  ;;  %v1468_v36 = vrot.slane %v10480_v59, 1  ;;  %v1311_v35 = vld [vmem:[#allocation3 + $0x78] sm:$0xff] }
 0x1a1   :  { %v1231_v33 = vpop.f32.mrf.mxu0  ;;  %v8213_v57 = vpack.i.bf16 %v10389_v19, %v10386_v8  ;;  %v8238_v39 = vpack.i.bf16 %v10441_v28, %v10471_v15  ;;  %v1469_v51 = vrot.slane %v1298_v2, 1 }
 0x1a2   :  { %v10400_v27 = vadd.f32 %v1231_v33, %v1183_v25  ;;  %v1044_v25 = vadd.f32 %v10245_v31, %v10214_v7  ;;  %v1481_v7 = vrot.slane %v1310_v23, 1 }
 0x1a3   :  { %8214 = vrot.lane.b32.xlu2 %v8213_v57, %s9469_s28  ;;  %v10475_v57 = vpop.f32.mrf.mxu1 }
 0x1a4   :  { %v14215_v55 = vmax.f32 %v10400_v27, 0.0  ;;  %v1093_v22 = vadd.f32 %v10354_v41, %v1044_v25  ;;  %v7991_v41 = vld [vmem:[%s14184_s3 + $0x28] sm:$0xff]  ;;  %v1046_v25 = vadd.f32 %v10245_v31, %v10217_v9 }
 0x1a5   :  { %v10420_v29 = vld [vmem:[#allocation3 + $0x50] sm:$0xff]  ;;  %2147 = vmatpush.bf16.msrb.mxu1 %v7991_v41 }
 0x1a6   :  { %1283 = vst.msk [vmem:[#allocation3 + $0x68] sm:$0xff] %vm102_vm5, %v14215_v55  ;;  %v10427_v56 = vpack.i.bf16 %v10420_v29, %v10371_v12  ;;  %v1477_v18 = vrot.slane %v10420_v29, 1  ;;  %v1398_v6 = vrot.slane %v10420_v29, 7  ;;  %v1341_v55 = vld [vmem:[#allocation3 + $0x168] sm:$0xff] }
 0x1a7   :  { %v1427_v46 = vrot.slane %v1341_v55, 7 }
 0x1a8   :  { %8224 = vrot.lane.b32.xlu1 %v10427_v56, %s9470_s30  ;;  %v10438_v17 = vsel %vm352_vm4, %v1477_v18, %v1478_v47  ;;  %v10444_v45 = vsel %vm271_vm3, %v1397_v10, %v1398_v6  ;;  %v8218_v47 = vpack.i.bf16 %v10347_v21, %v10480_v59  ;;  %v1188_v10 = vadd.f32 %v10361_v26, %v1139_v58 }
 0x1a9   :  { %v1234_v0 = vpop.f32.mrf.mxu0  ;;  %v1955_v53 = vpack.c.bf16 %v10438_v17, %v10389_v19  ;;  %v8228_v63 = vpack.i.bf16 %v10444_v45, %v10441_v28  ;;  %v1470_v6 = vsel %vm352_vm4, %v1468_v36, %v1469_v51  ;;  %v1142_v26 = vadd.f32 %v10380_v48, %v1093_v22 }
 0x1aa   :  { %v10460_v30 = vadd.f32 %v1234_v0, %v1186_v42  ;;  %v8233_v0 = vpack.i.bf16 %v10386_v8, %v1470_v6  ;;  %v1403_v58 = vrot.slane %v1311_v35, 7 }
 0x1ab   :  { %7622 = vmatmul.msk.bf16.vlgmr.msrb.gmra.mxu3 %vm102_vm5, %v1955_v53  ;;  %8229 = vrot.lane.b32.xlu0 %v8228_v63, %s9468_s24  ;;  %v1146_v63 = vpop.f32.mrf.mxu2  ;;  %v1099_v9 = vpop.f32.mrf.mxu1  ;;  %v1191_v22 = vadd.f32 %v10416_v4, %v1142_v26  ;;  %v7998_v4 = vld [vmem:[%s14184_s3 + $0x60] sm:$0xff] }
 0x1ac   :  { %v14210_v54 = vmax.f32 %v10460_v30, 0.0  ;;  %8219 = vrot.lane.b32.xlu2 %v8218_v47, %s9469_s28  ;;  %2197 = vmatpush.bf16.msrb.mxu2 %v7998_v4 }
 0x1ad   :  { %v10473_v33 = vld [vmem:[#allocation3 + $0x68] sm:$0xff] }
 0x1ae   :  { %1284 = vst.msk [vmem:[#allocation3 + $0x80] sm:$0xff] %vm102_vm5, %v14210_v54  ;;  %v1480_v49 = vrot.slane %v10473_v33, 1  ;;  %v1401_v23 = vrot.slane %v10473_v33, 7 }
 0x1b0   :  { %8239 = vrot.lane.b32.xlu1 %v8238_v39, %s9470_s30  ;;  %v10500_v53 = vsel %vm352_vm4, %v1480_v49, %v1481_v7  ;;  %v1095_v7 = vadd.f32 %v10408_v50, %v1046_v25  ;;  %v10529_v47 = vsel %vm271_vm3, %v1400_v62, %v1401_v23 }
 0x1b1   :  { %v1236_v18 = vpop.f32.mrf.mxu0  ;;  %v8243_v8 = vpack.i.bf16 %v10500_v53, %v10438_v17 }
 0x1b2   :  { %v10496_v42 = vadd.f32 %v1236_v18, %v1188_v10  ;;  %v1195_v10 = vpop.f32.mrf.mxu3  ;;  %v1144_v35 = vadd.f32 %v10448_v24, %v1095_v7  ;;  %v1487_v24 = vrot.slane %v1316_v32, 1  ;;  %v7990_v7 = vld [vmem:[%s14184_s3 + $0x20] sm:$0xff] }
 0x1b3   :  { %8234 = vrot.lane.b32.xlu0 %v8233_v0, %s9468_s24  ;;  %v1049_v0 = vadd.f32 %v10245_v31, %v10221_v1  ;;  %v1148_v26 = vpop.f32.mrf.mxu2  ;;  %2148 = vmatpush.bf16.msrb.mxu1 %v7990_v7 }
 0x1b4   :  { %v14209_v52 = vmax.f32 %v10496_v42, 0.0  ;;  %8244 = vrot.lane.b32.xlu2 %v8243_v8, %s9469_s28  ;;  %v1193_v25 = vadd.f32 %v1192_v38, %v1144_v35  ;;  %v1319_v8 = vld [vmem:[#allocation3 + $0xb8] sm:$0xff] }
 0x1b5   :  { %v10510_v39 = vld [vmem:[#allocation3 + $0x80] sm:$0xff]  ;;  %v1490_v4 = vrot.slane %v1319_v8, 1 }
 0x1b6   :  { %1285 = vst.msk [vmem:[#allocation3 + $0x98] sm:$0xff] %vm102_vm5, %v14209_v52  ;;  %v10517_v48 = vpack.i.bf16 %v10510_v39, %v10473_v33  ;;  %v1483_v2 = vrot.slane %v10510_v39, 1  ;;  %v1404_v49 = vrot.slane %v10510_v39, 7 }
 0x1b8   :  { %8254 = vrot.lane.b32.xlu1 %v10517_v48, %s9470_s30  ;;  %v10526_v36 = vsel %vm352_vm4, %v1483_v2, %v1484_v11  ;;  %v10532_v51 = vsel %vm271_vm3, %v1403_v58, %v1404_v49  ;;  %v8268_v11 = vpack.i.bf16 %v10529_v47, %v10444_v45  ;;  %v1098_v58 = vadd.f32 %v10475_v57, %v1049_v0  ;;  %v1314_v2 = vld [vmem:[#allocation3 + $0x90] sm:$0xff]  ;;  %v1317_v49 = vld [vmem:[#allocation3 + $0xa8] sm:$0xff] }
 0x1b9   :  { %v1239_v13 = vpop.f32.mrf.mxu0  ;;  %v1958_v50 = vpack.c.bf16 %v10526_v36, %v10500_v53  ;;  %v8258_v18 = vpack.i.bf16 %v10532_v51, %v10529_v47  ;;  %v8263_v57 = vpack.i.bf16 %v10438_v17, %v10389_v19  ;;  %v1406_v32 = vrot.slane %v1314_v2, 7 }
 0x1ba   :  { %v10542_v6 = vadd.f32 %v1239_v13, %v1191_v22  ;;  %v1102_v22 = vpop.f32.mrf.mxu1  ;;  %v1197_v38 = vpop.f32.mrf.mxu3  ;;  %v1409_v0 = vrot.slane %v1317_v49, 7 }
 0x1bb   :  { %7623 = vmatmul.msk.bf16.gmra.mxu3 %vm102_vm5, %v1958_v50  ;;  %8259 = vrot.lane.b32.xlu0 %v8258_v18, %s9468_s24  ;;  %v1147_v18 = vadd.f32 %v1146_v63, %v1098_v58 }
 0x1bc   :  { %v14208_v41 = vmax.f32 %v10542_v6, 0.0  ;;  %8249 = vrot.lane.b32.xlu2 %v10427_v56, %s9469_s28 }
 0x1bd   :  { %v10550_v62 = vld [vmem:[#allocation3 + $0x98] sm:$0xff] }
 0x1be   :  { %1286 = vst.msk [vmem:[#allocation3 + $0xb0] sm:$0xff] %vm102_vm5, %v14208_v41  ;;  %v1486_v23 = vrot.slane %v10550_v62, 1  ;;  %v1407_v35 = vrot.slane %v10550_v62, 7 }
 0x1c0   :  { %8269 = vrot.lane.b32.xlu1 %v8268_v11, %s9470_s30  ;;  %v10570_v50 = vsel %vm352_vm4, %v1486_v23, %v1487_v24  ;;  %v1051_v11 = vadd.f32 %v10245_v31, %v10224_v3  ;;  %v1196_v3 = vadd.f32 %v1195_v10, %v1147_v18  ;;  %v7997_v10 = vld [vmem:[%s14184_s3 + $0x58] sm:$0xff]  ;;  %v1322_v18 = vld [vmem:[#allocation3 + $0xd0] sm:$0xff] }
 0x1c1   :  { %v1241_v1 = vpop.f32.mrf.mxu0  ;;  %v8273_v19 = vpack.i.bf16 %v10570_v50, %v10526_v36  ;;  %2198 = vmatpush.bf16.msrb.mxu2 %v7997_v10  ;;  %v1323_v10 = vld [vmem:[#allocation3 + $0xd8] sm:$0xff] }
 0x1c2   :  { %v10565_v13 = vadd.f32 %v1241_v1, %v1193_v25  ;;  %v1100_v58 = vadd.f32 %v1099_v9, %v1051_v11  ;;  %v1151_v25 = vpop.f32.mrf.mxu2  ;;  %v10596_v1 = vsel %vm271_vm3, %v1406_v32, %v1407_v35  ;;  %v1104_v32 = vpop.f32.mrf.mxu1  ;;  %v1538_v52 = vrot.slane %v1323_v10, 7 }
 0x1c3   :  { %8264 = vrot.lane.b32.xlu0 %v8263_v57, %s9468_s24 }
 0x1c4   :  { %v14207_v56 = vmax.f32 %v10565_v13, 0.0  ;;  %8274 = vrot.lane.b32.xlu2 %v8273_v19, %s9469_s28  ;;  %v1054_v19 = vadd.f32 %v10245_v31, %v10228_v34 }
 0x1c5   :  { %v10579_v17 = vld [vmem:[#allocation3 + $0xb0] sm:$0xff] }
 0x1c6   :  { %1287 = vst.msk [vmem:[#allocation3 + $0xc8] sm:$0xff] %vm102_vm5, %v14207_v56  ;;  %v10586_v63 = vpack.i.bf16 %v10579_v17, %v10550_v62  ;;  %v1489_v23 = vrot.slane %v10579_v17, 1  ;;  %v1410_v24 = vrot.slane %v10579_v17, 7 }
 0x1c8   :  { %8284 = vrot.lane.b32.xlu1 %v10586_v63, %s9470_s30  ;;  %v10593_v8 = vsel %vm352_vm4, %v1489_v23, %v1490_v4  ;;  %v10599_v2 = vsel %vm271_vm3, %v1409_v0, %v1410_v24  ;;  %v1149_v4 = vadd.f32 %v1148_v26, %v1100_v58  ;;  %v1200_v0 = vpop.f32.mrf.mxu3  ;;  %v8298_v23 = vpack.i.bf16 %v10596_v1, %v10532_v51  ;;  %v1324_v58 = vld [vmem:[#allocation3 + $0xe0] sm:$0xff] }
 0x1c9   :  { %v1244_v49 = vpop.f32.mrf.mxu0  ;;  %v1961_v9 = vpack.c.bf16 %v10593_v8, %v10570_v50  ;;  %v8288_v7 = vpack.i.bf16 %v10599_v2, %v10596_v1  ;;  %v1529_v24 = vrot.slane %v1322_v18, 1  ;;  %v7989_v18 = vld [vmem:[%s14184_s3 + $0x18] sm:$0xff] }
 0x1ca   :  { %v10609_v57 = vadd.f32 %v1244_v49, %v1196_v3  ;;  %v1325_v3 = vld [vmem:[#allocation3 + $0xe8] sm:$0xff]  ;;  %v1103_v49 = vadd.f32 %v1102_v22, %v1054_v19  ;;  %v1153_v5 = vpop.f32.mrf.mxu2  ;;  %v1546_v19 = vrot.slane %v1324_v58, 1  ;;  %2149 = vmatpush.bf16.msrb.mxu1 %v7989_v18 }
 0x1cb   :  { %7624 = vmatmul.msk.bf16.gmra.mxu3 %vm102_vm5, %v1961_v9  ;;  %8289 = vrot.lane.b32.xlu0 %v8288_v7, %s9468_s24  ;;  %v1198_v9 = vadd.f32 %v1197_v38, %v1149_v4  ;;  %v1320_v7 = vld [vmem:[#allocation3 + $0xc0] sm:$0xff]  ;;  %v1547_v38 = vrot.slane %v1325_v3, 1  ;;  %v1539_v4 = vrot.slane %v1324_v58, 7 }
 0x1cc   :  { %14249 = vst [vmem:[#allocation5_spill] sm:$0xff] %v10609_v57  ;;  %v14206_v35 = vmax.f32 %v10609_v57, 0.0  ;;  %8279 = vrot.lane.b32.xlu2 %v10517_v48, %s9469_s28  ;;  %v1152_v48 = vadd.f32 %v1151_v25, %v1103_v49 }
 0x1cd   :  { %v10614_v11 = vld [vmem:[#allocation3 + $0xc8] sm:$0xff]  ;;  %v1540_v49 = vsel %vm271_vm3, %v1538_v52, %v1539_v4 }
 0x1ce   :  { %1288 = vst.msk [vmem:[#allocation3 + $0x110] sm:$0xff] %vm102_vm5, %v14206_v35  ;;  %v1528_v26 = vrot.slane %v10614_v11, 1  ;;  %v8293_v35 = vpack.i.bf16 %v10526_v36, %v10500_v53  ;;  %v1521_v41 = vrot.slane %v10614_v11, 7  ;;  %v1056_v36 = vadd.f32 %v10245_v31, %v10231_v60 }
 0x1d0   :  { %8299 = vrot.lane.b32.xlu1 %v8298_v23, %s9470_s30  ;;  %v1530_v22 = vsel %vm352_vm4, %v1528_v26, %v1529_v24  ;;  %v1520_v23 = vrot.slane %v1320_v7, 7  ;;  %v8303_v26 = vpack.i.bf16 %v1324_v58, %v10614_v11  ;;  %v1548_v24 = vsel %vm352_vm4, %v1546_v19, %v1547_v38  ;;  %v1202_v3 = vpop.f32.mrf.mxu3  ;;  %v1331_v38 = vld [vmem:[#allocation3 + $0x118] sm:$0xff] }
 0x1d1   :  { %v1246_v34 = vpop.f32.mrf.mxu0  ;;  %v8308_v53 = vpack.i.bf16 %v1530_v22, %v10593_v8  ;;  %v1201_v7 = vadd.f32 %v1200_v0, %v1152_v48  ;;  %v1964_v10 = vpack.c.bf16 %v1548_v24, %v1530_v22  ;;  %v1059_v0 = vadd.f32 %v10245_v31, %v10235_v43 }
 0x1d2   :  { %v10632_v56 = vadd.f32 %v1246_v34, %v1198_v9  ;;  %v1107_v9 = vpop.f32.mrf.mxu1  ;;  %v1522_v25 = vsel %vm271_vm3, %v1520_v23, %v1521_v41  ;;  %v7996_v34 = vld [vmem:[%s14184_s3 + $0x50] sm:$0xff]  ;;  %v1156_v19 = vpop.f32.mrf.mxu2  ;;  %v1496_v24 = vrot.slane %v1331_v38, 1 }
 0x1d3   :  { %8294 = vrot.lane.b32.xlu0 %v8293_v35, %s9468_s24  ;;  %v1105_v35 = vadd.f32 %v1104_v32, %v1056_v36  ;;  %v8318_v18 = vpack.i.bf16 %v1540_v49, %v1522_v25  ;;  %v1334_v41 = vld [vmem:[#allocation3 + $0x130] sm:$0xff]  ;;  %2199 = vmatpush.bf16.msrb.mxu2 %v7996_v34  ;;  %v8328_v23 = vpack.i.bf16 %v1522_v25, %v10599_v2  ;;  %v1337_v49 = vld [vmem:[#allocation3 + $0x148] sm:$0xff] }
 0x1d4   :  { %14250 = vst [vmem:[#allocation6_spill] sm:$0xff] %v10632_v56  ;;  %v14214_v54 = vmax.f32 %v10632_v56, 0.0  ;;  %8309 = vrot.lane.b32.xlu2 %v8308_v53, %s9469_s28  ;;  %v1499_v48 = vrot.slane %v1334_v41, 1  ;;  %v1108_v53 = vadd.f32 %v1107_v9, %v1059_v0  ;;  %v7988_v25 = vld [vmem:[%s14184_s3 + $0x10] sm:$0xff]  ;;  %v1502_v41 = vrot.slane %v1337_v49, 1 }
 0x1d5   :  { %v1154_v52 = vadd.f32 %v1153_v5, %v1105_v35  ;;  %v10660_v22 = vld [vmem:[#allocation3 + $0x110] sm:$0xff]  ;;  %v1332_v35 = vld [vmem:[#allocation3 + $0x120] sm:$0xff]  ;;  %2150 = vmatpush.bf16.msrb.mxu1 %v7988_v25 }
 0x1d6   :  { %1289 = vst.msk [vmem:[#allocation3 + $0x128] sm:$0xff] %vm102_vm5, %v14214_v54  ;;  %v1495_v43 = vrot.slane %v10660_v22, 1  ;;  %v1328_v25 = vld [vmem:[#allocation3 + $0x100] sm:$0xff] }
 0x1d8   :  { %8304 = vrot.lane.b32.xlu1 %v8303_v26, %s9470_s30  ;;  %v1203_v26 = vadd.f32 %v1202_v3, %v1154_v52  ;;  %v8323_v3 = vpack.i.bf16 %v10593_v8, %v10570_v50  ;;  %v1418_v52 = vrot.slane %v1332_v35, 7  ;;  %v10686_v0 = vsel %vm352_vm4, %v1495_v43, %v1496_v24  ;;  %v1329_v43 = vld [vmem:[#allocation3 + $0x108] sm:$0xff] }
 0x1d9   :  { %v1249_v60 = vpop.f32.mrf.mxu0  ;;  %v1061_v50 = vadd.f32 %v10245_v31, %v10238_v14 }
 0x1da   :  { %v10653_v58 = vadd.f32 %v1249_v60, %v1201_v7  ;;  %v1109_v36 = vpop.f32.mrf.mxu1  ;;  %v1205_v7 = vpop.f32.mrf.mxu3 }
 0x1db   :  { %7625 = vmatmul.msk.bf16.gmra.mxu3 %vm102_vm5, %v1964_v10  ;;  %8319 = vrot.lane.b32.xlu0 %v8318_v18, %s9468_s24  ;;  %v1335_v10 = vld [vmem:[#allocation3 + $0x138] sm:$0xff]  ;;  %v1157_v18 = vadd.f32 %v1156_v19, %v1108_v53  ;;  %v1158_v8 = vpop.f32.mrf.mxu2  ;;  %v1110_v14 = vadd.f32 %v1109_v36, %v1061_v50 }
 0x1dc   :  { %14251 = vst [vmem:[#allocation7_spill] sm:$0xff] %v10653_v58  ;;  %v14212_v32 = vmax.f32 %v10653_v58, 0.0  ;;  %8314 = vrot.lane.b32.xlu2 %v10586_v63, %s9469_s28 }
 0x1dd   :  { %v10662_v4 = vld [vmem:[#allocation3 + $0x128] sm:$0xff]  ;;  %v1206_v24 = vadd.f32 %v1205_v7, %v1157_v18  ;;  %v1415_v18 = vrot.slane %v1329_v43, 7  ;;  %v1064_v43 = vadd.f32 %v10245_v31, %v10240_v16 }
 0x1de   :  { %1290 = vst.msk [vmem:[#allocation3 + $0x140] sm:$0xff] %vm102_vm5, %v14212_v32  ;;  %v1498_v5 = vrot.slane %v10662_v4, 1  ;;  %v1419_v38 = vrot.slane %v10662_v4, 7 }
 0x1e0   :  { %8329 = vrot.lane.b32.xlu1 %v8328_v23, %s9470_s30  ;;  %v10681_v34 = vsel %vm352_vm4, %v1498_v5, %v1499_v48  ;;  %v1421_v23 = vrot.slane %v1335_v10, 7  ;;  %v10710_v35 = vsel %vm271_vm3, %v1418_v52, %v1419_v38  ;;  %v10715_v10 = vld [vmem:[#allocation3 + $0xf8] sm:$0xff] }
 0x1e1   :  { %v1251_v60 = vpop.f32.mrf.mxu0  ;;  %v8333_v19 = vpack.i.bf16 %v10681_v34, %v10686_v0  ;;  %v1492_v50 = vrot.slane %v10715_v10, 1 }
 0x1e2   :  { %v10676_v9 = vadd.f32 %v1251_v60, %v1203_v26  ;;  %v1112_v52 = vpop.f32.mrf.mxu1 }
 0x1e3   :  { %8324 = vrot.lane.b32.xlu0 %v8323_v3, %s9468_s24  ;;  %v1113_v16 = vadd.f32 %v1112_v52, %v1064_v43  ;;  %v7987_v52 = vld [vmem:[%s14184_s3 + $0x8] sm:$0xff] }
 0x1e4   :  { %14252 = vst [vmem:[#allocation8_spill] sm:$0xff] %v10676_v9  ;;  %v14211_v63 = vmax.f32 %v10676_v9, 0.0  ;;  %8334 = vrot.lane.b32.xlu2 %v8333_v19, %s9469_s28  ;;  %v1340_v19 = vld [vmem:[#allocation3 + $0x160] sm:$0xff]  ;;  %2151 = vmatpush.bf16.msrb.mxu1 %v7987_v52 }
 0x1e5   :  { %v10693_v5 = vld [vmem:[#allocation3 + $0x140] sm:$0xff] }
 0x1e6   :  { %1291 = vst.msk [vmem:[#allocation3 + $0x158] sm:$0xff] %vm102_vm5, %v14211_v63  ;;  %v10700_v48 = vpack.i.bf16 %v10693_v5, %v10662_v4  ;;  %v1501_v53 = vrot.slane %v10693_v5, 1  ;;  %v1422_v26 = vrot.slane %v10693_v5, 7 }
 0x1e8   :  { %8344 = vrot.lane.b32.xlu1 %v10700_v48, %s9470_s30  ;;  %v10707_v49 = vsel %vm352_vm4, %v1501_v53, %v1502_v41  ;;  %v10713_v60 = vsel %vm271_vm3, %v1421_v23, %v1422_v26  ;;  %v1416_v41 = vrot.slane %v10660_v22, 7  ;;  %v1207_v23 = vpop.f32.mrf.mxu3  ;;  %v1493_v53 = vrot.slane %v1328_v25, 1 }
 0x1e9   :  { %v1254_v3 = vpop.f32.mrf.mxu0  ;;  %v1967_v36 = vpack.c.bf16 %v10707_v49, %v10681_v34  ;;  %v8348_v7 = vpack.i.bf16 %v10713_v60, %v10710_v35  ;;  %v1159_v26 = vadd.f32 %v1158_v8, %v1110_v14  ;;  %v1505_v14 = vrot.slane %v1340_v19, 1  ;;  %v1338_v19 = vld [vmem:[#allocation3 + $0x150] sm:$0xff] }
 0x1ea   :  { %v10723_v38 = vadd.f32 %v1254_v3, %v1206_v24  ;;  %v10732_v32 = vsel %vm271_vm3, %v1415_v18, %v1416_v41  ;;  %v7995_v3 = vld [vmem:[%s14184_s3 + $0x48] sm:$0xff]  ;;  %v1494_v18 = vsel %vm352_vm4, %v1492_v50, %v1493_v53 }
 0x1eb   :  { %7626 = vmatmul.msk.bf16.gmra.mxu3 %vm102_vm5, %v1967_v36  ;;  %8349 = vrot.lane.b32.xlu0 %v8348_v7, %s9468_s24  ;;  %v8358_v25 = vpack.i.bf16 %v10710_v35, %v10732_v32  ;;  %v1161_v36 = vpop.f32.mrf.mxu2  ;;  %v8338_v7 = vpack.i.bf16 %v10660_v22, %v10715_v10  ;;  %v1208_v41 = vadd.f32 %v1207_v23, %v1159_v26 }
 0x1ec   :  { %14253 = vst [vmem:[#allocation9_spill] sm:$0xff] %v10723_v38  ;;  %v14213_v63 = vmax.f32 %v10723_v38, 0.0  ;;  %2200 = vmatpush.bf16.msrb.mxu2 %v7995_v3  ;;  %v8353_v37 = vpack.i.bf16 %v10686_v0, %v1494_v18  ;;  %v1162_v53 = vadd.f32 %v1161_v36, %v1113_v16 }
 0x1ed   :  { %v10734_v24 = vld [vmem:[#allocation3 + $0x158] sm:$0xff]  ;;  %8339 = vrot.lane.b32.xlu2 %v8338_v7, %s9469_s28  ;;  %v1424_v7 = vrot.slane %v1338_v19, 7 }
 0x1ee   :  { %1292 = vst.msk [vmem:[#allocation3 + $0x170] sm:$0xff] %vm102_vm5, %v14213_v63  ;;  %v1504_v8 = vrot.slane %v10734_v24, 1  ;;  %v1343_v63 = vld [vmem:[#allocation3 + $0x178] sm:$0xff]  ;;  %v1425_v40 = vrot.slane %v10734_v24, 7 }
 0x1ef   :  { %v1508_v26 = vrot.slane %v1343_v63, 1 }
 0x1f0   :  { %8359 = vrot.lane.b32.xlu1 %v8358_v25, %s9470_s30  ;;  %v10757_v50 = vsel %vm352_vm4, %v1504_v8, %v1505_v14  ;;  %v1210_v23 = vpop.f32.mrf.mxu3  ;;  %v1114_v25 = vpop.f32.mrf.mxu1 }
 0x1f1   :  { %v1256_v54 = vpop.f32.mrf.mxu0  ;;  %v8363_v0 = vpack.i.bf16 %v10757_v50, %v10707_v49  ;;  %v1211_v16 = vadd.f32 %v1210_v23, %v1162_v53  ;;  %v1346_v23 = vld [vmem:[#allocation3 + $0x190] sm:$0xff] }
 0x1f2   :  { %v10753_v43 = vadd.f32 %v1256_v54, %v1208_v41  ;;  %v1066_v54 = vadd.f32 %v10245_v31, %v10263_v61  ;;  %v10783_v61 = vsel %vm271_vm3, %v1424_v7, %v1425_v40 }
 0x1f3   :  { %8354 = vrot.lane.b32.xlu0 %v8353_v37, %s9468_s24  ;;  %v1163_v18 = vpop.f32.mrf.mxu2 }
 0x1f4   :  { %14254 = vst [vmem:[#allocation10_spill] sm:$0xff] %v10753_v43  ;;  %v14220_v3 = vmax.f32 %v10753_v43, 0.0  ;;  %v1115_v14 = vadd.f32 %v1114_v25, %v1066_v54  ;;  %v8388_v54 = vpack.i.bf16 %v10783_v61, %v10713_v60 }
 0x1f5   :  { %v10766_v8 = vld [vmem:[#allocation3 + $0x170] sm:$0xff]  ;;  %8364 = vrot.lane.b32.xlu2 %v8363_v0, %s9469_s28 }
 0x1f6   :  { %1293 = vst.msk [vmem:[#allocation3 + $0x188] sm:$0xff] %vm102_vm5, %v14220_v3  ;;  %v10773_v63 = vpack.i.bf16 %v10766_v8, %v10734_v24  ;;  %v1507_v37 = vrot.slane %v10766_v8, 1  ;;  %v1428_v55 = vrot.slane %v10766_v8, 7  ;;  %v1164_v40 = vadd.f32 %v1163_v18, %v1115_v14  ;;  %v1349_v14 = vld [vmem:[#allocation3 + $0x1a8] sm:$0xff] }
 0x1f8   :  { %8374 = vrot.lane.b32.xlu1 %v10773_v63, %s9470_s30  ;;  %v10780_v31 = vsel %vm352_vm4, %v1507_v37, %v1508_v26  ;;  %v10786_v36 = vsel %vm271_vm3, %v1427_v46, %v1428_v55  ;;  %v7994_v46 = vld [vmem:[%s14184_s3 + $0x40] sm:$0xff]  ;;  %v1212_v25 = vpop.f32.mrf.mxu3  ;;  %v1511_v37 = vrot.slane %v1346_v23, 1  ;;  %v8383_v23 = vpack.i.bf16 %v10707_v49, %v10681_v34 }
 0x1f9   :  { %v1259_v41 = vpop.f32.mrf.mxu0  ;;  %v1970_v19 = vpack.c.bf16 %v10780_v31, %v10757_v50  ;;  %v8378_v52 = vpack.i.bf16 %v10786_v36, %v10783_v61  ;;  %2201 = vmatpush.bf16.msrb.mxu2 %v7994_v46  ;;  %v1213_v55 = vadd.f32 %v1212_v25, %v1164_v40  ;;  %v1514_v46 = vrot.slane %v1349_v14, 1 }
 0x1fa   :  { %v10793_v53 = vadd.f32 %v1259_v41, %v1211_v16  ;;  %v1344_v41 = vld [vmem:[#allocation3 + $0x180] sm:$0xff] }
 0x1fb   :  { %7627 = vmatmul.msk.bf16.gmra.mxu3 %vm102_vm5, %v1970_v19  ;;  %8379 = vrot.lane.b32.xlu0 %v8378_v52, %s9468_s24  ;;  %v1347_v19 = vld [vmem:[#allocation3 + $0x198] sm:$0xff]  ;;  %v7986_v52 = vld [vmem:[%s14184_s3] sm:$0xff]  ;;  %v1430_v25 = vrot.slane %v1344_v41, 7  ;;  %s9471_s3 = smov 104  }
 0x1fc   :  { %14255 = vst [vmem:[#allocation11_spill] sm:$0xff] %v10793_v53  ;;  %v14219_v26 = vmax.f32 %v10793_v53, 0.0  ;;  %2152 = vmatpush.bf16.msrb.mxu1 %v7986_v52  ;;  %v1433_v3 = vrot.slane %v1347_v19, 7 }
 0x1fd   :  { %v10801_v7 = vld [vmem:[#allocation3 + $0x188] sm:$0xff]  ;;  %8369 = vrot.lane.b32.xlu2 %v10700_v48, %s9469_s28  ;;  %v10812_v16 = vpop.permute.xlu2 %8214 }
 0x1fe   :  { %1294 = vst.msk [vmem:[#allocation3 + $0x1a0] sm:$0xff] %vm102_vm5, %v14219_v26  ;;  %v1510_v0 = vrot.slane %v10801_v7, 1 }
 0x200   :  { %8389 = vrot.lane.b32.xlu1 %v8388_v54, %s9470_s30  ;;  %v10822_v40 = vsel %vm352_vm4, %v1510_v0, %v1511_v37  ;;  %v1431_v54 = vrot.slane %v10801_v7, 7 }
 0x201   :  { %v1261_v18 = vpop.f32.mrf.mxu0 }
 0x202   :  { %v10817_v26 = vadd.f32 %v1261_v18, %v1213_v55  ;;  %v8393_v55 = vpack.i.bf16 %v10822_v40, %v10780_v31  ;;  %v10846_v14 = vsel %vm271_vm3, %v1430_v25, %v1431_v54 }
 0x203   :  { %8384 = vrot.lane.b32.xlu0 %v8383_v23, %s9468_s24 }
 0x204   :  { %14256 = vst [vmem:[#allocation12_spill] sm:$0xff] %v10817_v26  ;;  %v14221_v48 = vmax.f32 %v10817_v26, 0.0  ;;  %v1353_v26 = vld [vmem:[#allocation3 + $0x1c8] sm:$0xff] }
 0x205   :  { %v10829_v18 = vld [vmem:[#allocation3 + $0x1a0] sm:$0xff]  ;;  %8394 = vrot.lane.b32.xlu2 %v8393_v55, %s9469_s28  ;;  %v1541_v58 = vrot.slane %v1353_v26, 7 }
 0x206   :  { %1295 = vst.msk [vmem:[#allocation3 + $0x1b8] sm:$0xff] %vm102_vm5, %v14221_v48  ;;  %v10836_v34 = vpack.i.bf16 %v10829_v18, %v10801_v7  ;;  %v1513_v49 = vrot.slane %v10829_v18, 1  ;;  %v1434_v0 = vrot.slane %v10829_v18, 7  ;;  %v10856_v23 = vpop.permute.xlu2 %8219  ;;  %v1350_v48 = vld [vmem:[#allocation3 + $0x1b0] sm:$0xff] }
 0x207   :  { %v1523_v9 = vrot.slane %v1350_v48, 7  ;;  %v8217_v48 = vunpack.i.h.bf16 %v10812_v16 }
 0x208   :  { %8404 = vrot.lane.b32.xlu1 %v10836_v34, %s9470_s30  ;;  %v10843_v37 = vsel %vm352_vm4, %v1513_v49, %v1514_v46  ;;  %v10849_v41 = vsel %vm271_vm3, %v1433_v3, %v1434_v0  ;;  %v1352_v46 = vld [vmem:[#allocation3 + $0x1c0] sm:$0xff]  ;;  %v8418_v3 = vpack.i.bf16 %v10846_v14, %v10786_v36  ;;  %v1354_v49 = vld [vmem:[#allocation3 + $0x1d0] sm:$0xff]  ;;  %v1355_v0 = vld [vmem:[#allocation3 + $0x1d8] sm:$0xff] }
 0x209   :  { %v1973_v19 = vpack.c.bf16 %v10843_v37, %v10822_v40  ;;  %v8408_v52 = vpack.i.bf16 %v10849_v41, %v10846_v14  ;;  %v1532_v55 = vrot.slane %v1352_v46, 1  ;;  %v1549_v53 = vrot.slane %v1354_v49, 1 }
 0x20a   :  { %v1550_v43 = vrot.slane %v1355_v0, 1  ;;  %v1542_v56 = vrot.slane %v1354_v49, 7  ;;  %v8216_v0 = vunpack.i.l.bf16 %v10812_v16 }
 0x20b   :  { %7628 = vmatmul.msk.bf16.gmra.mxu3 %vm102_vm5, %v1973_v19  ;;  %8409 = vrot.lane.b32.xlu0 %v8408_v52, %s9468_s24  ;;  %v8413_v19 = vpack.i.bf16 %v10780_v31, %v10757_v50 }
 0x20c   :  { %v1543_v31 = vsel %vm271_vm3, %v1541_v58, %v1542_v56  ;;  %v1906_v56 = vsel %vm102_vm5, %v10371_v12, %v8217_v48  ;;  %v1389_v12 = vrot.slane %v10480_v59, 7 }
 0x20d   :  { %v10860_v25 = vld [vmem:[#allocation3 + $0x1b8] sm:$0xff]  ;;  %8399 = vrot.lane.b32.xlu2 %v10773_v63, %s9469_s28  ;;  %v1551_v63 = vsel %vm352_vm4, %v1549_v53, %v1550_v43 }
 0x20e   :  { %v1531_v54 = vrot.slane %v10860_v25, 1  ;;  %v10871_v38 = vpop.permute.xlu2 %8244  ;;  %v1524_v46 = vrot.slane %v10860_v25, 7  ;;  %v8423_v57 = vpack.i.bf16 %v1354_v49, %v10860_v25  ;;  %v1905_v49 = vsel %vm102_vm5, %v10347_v21, %v8216_v0 }
 0x20f   :  { %v8443_v21 = vpack.i.bf16 %v10843_v37, %v10822_v40  ;;  %v8221_v0 = vunpack.i.l.bf16 %v10856_v23 }
 0x210   :  { %8419 = vrot.lane.b32.xlu1 %v8418_v3, %s9470_s30  ;;  %v1533_v52 = vsel %vm352_vm4, %v1531_v54, %v1532_v55  ;;  %v1525_v50 = vsel %vm271_vm3, %v1523_v9, %v1524_v46 }
 0x211   :  { %v8428_v3 = vpack.i.bf16 %v1533_v52, %v10843_v37  ;;  %v1976_v54 = vpack.c.bf16 %v1551_v63, %v1533_v52  ;;  %v8438_v55 = vpack.i.bf16 %v1543_v31, %v1525_v50  ;;  %v8448_v53 = vpack.i.bf16 %v1525_v50, %v10849_v41 }
 0x213   :  { %8414 = vrot.lane.b32.xlu0 %v8413_v19, %s9468_s24 }
 0x215   :  { %8429 = vrot.lane.b32.xlu2 %v8428_v3, %s9469_s28 }
 0x216   :  { %v10884_v19 = vpop.permute.xlu2 %8249 }
 0x218   :  { %8424 = vrot.lane.b32.xlu1 %v8423_v57, %s9470_s30  ;;  %v1296_v57 = vld [vmem:[#allocation3] sm:$0xff] }
 0x219   :  { %v1388_v63 = vrot.slane %v1296_v57, 7 }
 0x21a   :  { %v8225_v26 = vpop.permute.xlu1 %8224 }
 0x21b   :  { %7629 = vmatmul.msk.bf16.gmra.mxu3 %vm102_vm5, %v1976_v54  ;;  %8439 = vrot.lane.b32.xlu0 %v8438_v55, %s9468_s24  ;;  %v8227_v16 = vunpack.i.h.bf16 %v8225_v26  ;;  %v8226_v52 = vunpack.i.l.bf16 %v8225_v26  ;;  %v8222_v55 = vunpack.i.h.bf16 %v10856_v23  ;;  %v1390_v59 = vsel %vm271_vm3, %v1388_v63, %v1389_v12 }
 0x21c   :  { %v1856_v57 = vsel %vm102_vm5, %v1390_v59, %v8221_v0 }
 0x21d   :  { %v8230_v58 = vpop.permute.xlu0 %8229  ;;  %8434 = vrot.lane.b32.xlu2 %v10836_v34, %s9469_s28  ;;  %v1857_v40 = vsel %vm102_vm5, %v10471_v15, %v8222_v55 }
 0x21e   :  { %v8232_v9 = vunpack.i.h.bf16 %v8230_v58  ;;  %v8231_v43 = vunpack.i.l.bf16 %v8230_v58  ;;  %v10903_v26 = vpop.permute.xlu2 %8274 }
 0x220   :  { %8449 = vrot.lane.b32.xlu1 %v8448_v53, %s9470_s30  ;;  %v1921_v46 = vsel %vm57_vm0, %v1905_v49, %v8231_v43  ;;  %v1922_v3 = vsel %vm57_vm0, %v1906_v56, %v8232_v9 }
 0x221   :  { %v1937_v50 = vsel %vm1888_vm8, %v1921_v46, %v8226_v52  ;;  %v1938_v31 = vsel %vm1888_vm8, %v1922_v3, %v8227_v16  ;;  %v8247_v46 = vunpack.i.h.bf16 %v10871_v38  ;;  %v8246_v3 = vunpack.i.l.bf16 %v10871_v38 }
 0x222   :  { %v8240_v48 = vpop.permute.xlu1 %8239  ;;  %v1954_v54 = vpack.c.bf16 %v1938_v31, %v1937_v50 }
 0x223   :  { %8444 = vrot.lane.b32.xlu0 %v8443_v21, %s9468_s24  ;;  %v8242_v37 = vunpack.i.h.bf16 %v8240_v48  ;;  %v8241_v9 = vunpack.i.l.bf16 %v8240_v48  ;;  %v1907_v21 = vsel %vm102_vm5, %v10420_v29, %v8246_v3 }
 0x224   :  { %2202 = vmatmul.bf16.vlgmr.msrb.gmra.mxu2 %v1954_v54  ;;  %v1908_v54 = vsel %vm102_vm5, %v10473_v33, %v8247_v46 }
 0x225   :  { %v8235_v34 = vpop.permute.xlu0 %8234 }
 0x226   :  { %v8237_v56 = vunpack.i.h.bf16 %v8235_v34  ;;  %v8236_v58 = vunpack.i.l.bf16 %v8235_v34  ;;  %v8280_v12 = vpop.permute.xlu2 %8279 }
 0x228   :  { %v1872_v43 = vsel %vm57_vm0, %v1856_v57, %v8236_v58  ;;  %v1873_v53 = vsel %vm57_vm0, %v1857_v40, %v8237_v56  ;;  %v8252_v58 = vunpack.i.h.bf16 %v10884_v19  ;;  %v8251_v57 = vunpack.i.l.bf16 %v10884_v19 }
 0x229   :  { %v1889_v49 = vsel %vm1888_vm8, %v1872_v43, %v8241_v9  ;;  %v1890_v16 = vsel %vm1888_vm8, %v1873_v53, %v8242_v37 }
 0x22a   :  { %v8255_v23 = vpop.permute.xlu1 %8254  ;;  %v1953_v52 = vpack.c.bf16 %v1890_v16, %v1889_v49  ;;  %v1858_v53 = vsel %vm102_vm5, %v10441_v28, %v8251_v57  ;;  %v8281_v57 = vunpack.i.l.bf16 %v8280_v12 }
 0x22b   :  { %v8257_v31 = vunpack.i.h.bf16 %v8255_v23  ;;  %v8256_v48 = vunpack.i.l.bf16 %v8255_v23  ;;  %v1859_v23 = vsel %vm102_vm5, %v10444_v45, %v8252_v58  ;;  %v8282_v58 = vunpack.i.h.bf16 %v8280_v12 }
 0x22c   :  { %2153 = vmatmul.bf16.vlgmr.msrb.gmra.mxu1 %v1953_v52 }
 0x22d   :  { %v8260_v63 = vpop.permute.xlu0 %8259 }
 0x22e   :  { %v8262_v15 = vunpack.i.h.bf16 %v8260_v63  ;;  %v8261_v50 = vunpack.i.l.bf16 %v8260_v63  ;;  %v8310_v29 = vpop.permute.xlu2 %8309  ;;  %v8277_v63 = vunpack.i.h.bf16 %v10903_v26 }
 0x230   :  { %v1923_v55 = vsel %vm57_vm0, %v1907_v21, %v8261_v50  ;;  %v1924_v0 = vsel %vm57_vm0, %v1908_v54, %v8262_v15  ;;  %v8276_v15 = vunpack.i.l.bf16 %v10903_v26  ;;  %v1910_v54 = vsel %vm102_vm5, %v10550_v62, %v8277_v63 }
 0x231   :  { %v1939_v38 = vsel %vm1888_vm8, %v1923_v55, %v8256_v48  ;;  %v1940_v34 = vsel %vm1888_vm8, %v1924_v0, %v8257_v31  ;;  %v1860_v62 = vsel %vm102_vm5, %v10529_v47, %v8281_v57 }
 0x232   :  { %v8270_v59 = vpop.permute.xlu1 %8269  ;;  %v1957_v56 = vpack.c.bf16 %v1940_v34, %v1939_v38  ;;  %v1909_v21 = vsel %vm102_vm5, %v10510_v39, %v8276_v15 }
 0x233   :  { %v8272_v33 = vunpack.i.h.bf16 %v8270_v59  ;;  %v8271_v43 = vunpack.i.l.bf16 %v8270_v59 }
 0x234   :  { %2207 = vmatmul.bf16.gmra.mxu2 %v1957_v56 }
 0x235   :  { %v8265_v40 = vpop.permute.xlu0 %8264 }
 0x236   :  { %v8267_v37 = vunpack.i.h.bf16 %v8265_v40  ;;  %v8266_v9 = vunpack.i.l.bf16 %v8265_v40  ;;  %v8315_v55 = vpop.permute.xlu2 %8314 }
 0x238   :  { %v1874_v49 = vsel %vm57_vm0, %v1858_v53, %v8266_v9  ;;  %v1875_v16 = vsel %vm57_vm0, %v1859_v23, %v8267_v37 }
 0x239   :  { %v1891_v19 = vsel %vm1888_vm8, %v1874_v49, %v8271_v43  ;;  %v1892_v46 = vsel %vm1888_vm8, %v1875_v16, %v8272_v33  ;;  %v1861_v43 = vsel %vm102_vm5, %v10532_v51, %v8282_v58 }
 0x23a   :  { %v8285_v52 = vpop.permute.xlu1 %8284  ;;  %v1956_v3 = vpack.c.bf16 %v1892_v46, %v1891_v19  ;;  %v8312_v46 = vunpack.i.h.bf16 %v8310_v29 }
 0x23b   :  { %v8287_v48 = vunpack.i.h.bf16 %v8285_v52  ;;  %v8286_v45 = vunpack.i.l.bf16 %v8285_v52 }
 0x23c   :  { %2158 = vmatmul.bf16.gmra.mxu1 %v1956_v3  ;;  %v8311_v3 = vunpack.i.l.bf16 %v8310_v29 }
 0x23d   :  { %v8290_v50 = vpop.permute.xlu0 %8289 }
 0x23e   :  { %v8292_v28 = vunpack.i.h.bf16 %v8290_v50  ;;  %v8291_v31 = vunpack.i.l.bf16 %v8290_v50  ;;  %v8335_v52 = vpop.permute.xlu2 %8334  ;;  %v1911_v51 = vsel %vm102_vm5, %v10579_v17, %v8311_v3 }
 0x240   :  { %v1925_v0 = vsel %vm57_vm0, %v1909_v21, %v8291_v31  ;;  %v1926_v59 = vsel %vm57_vm0, %v1910_v54, %v8292_v28  ;;  %v1912_v31 = vsel %vm102_vm5, %v10614_v11, %v8312_v46 }
 0x241   :  { %v1941_v26 = vsel %vm1888_vm8, %v1925_v0, %v8286_v45  ;;  %v1942_v34 = vsel %vm1888_vm8, %v1926_v59, %v8287_v48  ;;  %v8317_v59 = vunpack.i.h.bf16 %v8315_v55 }
 0x242   :  { %v8300_v38 = vpop.permute.xlu1 %8299  ;;  %v1960_v56 = vpack.c.bf16 %v1942_v34, %v1941_v26 }
 0x243   :  { %v8302_v9 = vunpack.i.h.bf16 %v8300_v38  ;;  %v8301_v33 = vunpack.i.l.bf16 %v8300_v38  ;;  %v8316_v38 = vunpack.i.l.bf16 %v8315_v55 }
 0x244   :  { %2212 = vmatmul.bf16.gmra.mxu2 %v1960_v56 }
 0x245   :  { %v8295_v40 = vpop.permute.xlu0 %8294  ;;  %v1862_v11 = vsel %vm102_vm5, %v10596_v1, %v8316_v38 }
 0x246   :  { %v8297_v37 = vunpack.i.h.bf16 %v8295_v40  ;;  %v8296_v39 = vunpack.i.l.bf16 %v8295_v40  ;;  %v1863_v40 = vsel %vm102_vm5, %v10599_v2, %v8317_v59 }
 0x247   :  { %v8340_v26 = vpop.permute.xlu2 %8339 }
 0x248   :  { %v1876_v53 = vsel %vm57_vm0, %v1860_v62, %v8296_v39  ;;  %v1877_v23 = vsel %vm57_vm0, %v1861_v43, %v8297_v37  ;;  %v8337_v43 = vunpack.i.h.bf16 %v8335_v52 }
 0x249   :  { %v1893_v16 = vsel %vm1888_vm8, %v1876_v53, %v8301_v33  ;;  %v1894_v12 = vsel %vm1888_vm8, %v1877_v23, %v8302_v9  ;;  %v8336_v53 = vunpack.i.l.bf16 %v8335_v52  ;;  %v1326_v23 = vld [vmem:[#allocation3 + $0xf0] sm:$0xff] }
 0x24a   :  { %v8305_v49 = vpop.permute.xlu1 %8304  ;;  %v1959_v19 = vpack.c.bf16 %v1894_v12, %v1893_v16  ;;  %v1914_v2 = vsel %vm102_vm5, %v10662_v4, %v8337_v43  ;;  %v8341_v4 = vunpack.i.l.bf16 %v8340_v26 }
 0x24b   :  { %v8307_v50 = vunpack.i.h.bf16 %v8305_v49  ;;  %v8306_v28 = vunpack.i.l.bf16 %v8305_v49 }
 0x24c   :  { %2163 = vmatmul.bf16.gmra.mxu1 %v1959_v19  ;;  %v1913_v19 = vsel %vm102_vm5, %v10660_v22, %v8336_v53 }
 0x24d   :  { %v8320_v63 = vpop.permute.xlu0 %8319 }
 0x24e   :  { %v8322_v15 = vunpack.i.h.bf16 %v8320_v63  ;;  %v8321_v47 = vunpack.i.l.bf16 %v8320_v63  ;;  %v1413_v63 = vrot.slane %v10715_v10, 7 }
 0x24f   :  { %v8365_v16 = vpop.permute.xlu2 %8364 }
 0x250   :  { %v1927_v48 = vsel %vm57_vm0, %v1911_v51, %v8321_v47  ;;  %v1928_v45 = vsel %vm57_vm0, %v1912_v31, %v8322_v15  ;;  %v1412_v15 = vrot.slane %v1326_v23, 7 }
 0x251   :  { %v1943_v54 = vsel %vm1888_vm8, %v1927_v48, %v8306_v28  ;;  %v1944_v29 = vsel %vm1888_vm8, %v1928_v45, %v8307_v50  ;;  %v8342_v48 = vunpack.i.h.bf16 %v8340_v26 }
 0x252   :  { %v8330_v21 = vpop.permute.xlu1 %8329  ;;  %v1963_v0 = vpack.c.bf16 %v1944_v29, %v1943_v54  ;;  %v1414_v45 = vsel %vm271_vm3, %v1412_v15, %v1413_v63 }
 0x253   :  { %v8332_v58 = vunpack.i.h.bf16 %v8330_v21  ;;  %v8331_v57 = vunpack.i.l.bf16 %v8330_v21  ;;  %v1865_v10 = vsel %vm102_vm5, %v10732_v32, %v8342_v48  ;;  %v1864_v29 = vsel %vm102_vm5, %v1414_v45, %v8341_v4 }
 0x254   :  { %2217 = vmatmul.bf16.gmra.mxu2 %v1963_v0 }
 0x255   :  { %v8325_v34 = vpop.permute.xlu0 %8324 }
 0x256   :  { %v8327_v56 = vunpack.i.h.bf16 %v8325_v34  ;;  %v8326_v17 = vunpack.i.l.bf16 %v8325_v34 }
 0x257   :  { %v8370_v38 = vpop.permute.xlu2 %8369 }
 0x258   :  { %v1878_v37 = vsel %vm57_vm0, %v1862_v11, %v8326_v17  ;;  %v1879_v39 = vsel %vm57_vm0, %v1863_v40, %v8327_v56  ;;  %v8367_v11 = vunpack.i.h.bf16 %v8365_v16  ;;  %v8366_v40 = vunpack.i.l.bf16 %v8365_v16 }
 0x259   :  { %v1895_v55 = vsel %vm1888_vm8, %v1878_v37, %v8331_v57  ;;  %v1896_v33 = vsel %vm1888_vm8, %v1879_v39, %v8332_v58 }
 0x25a   :  { %v8345_v9 = vpop.permute.xlu1 %8344  ;;  %v1962_v62 = vpack.c.bf16 %v1896_v33, %v1895_v55  ;;  %v1915_v55 = vsel %vm102_vm5, %v10693_v5, %v8366_v40 }
 0x25b   :  { %v8347_v46 = vunpack.i.h.bf16 %v8345_v9  ;;  %v8346_v3 = vunpack.i.l.bf16 %v8345_v9  ;;  %v1916_v9 = vsel %vm102_vm5, %v10734_v24, %v8367_v11 }
 0x25c   :  { %2168 = vmatmul.bf16.gmra.mxu1 %v1962_v62 }
 0x25d   :  { %v8350_v49 = vpop.permute.xlu0 %8349 }
 0x25e   :  { %v8352_v1 = vunpack.i.h.bf16 %v8350_v49  ;;  %v8351_v12 = vunpack.i.l.bf16 %v8350_v49 }
 0x260   :  { %v1929_v47 = vsel %vm57_vm0, %v1913_v19, %v8351_v12  ;;  %v1930_v52 = vsel %vm57_vm0, %v1914_v2, %v8352_v1  ;;  %v8395_v1 = vpop.permute.xlu2 %8394  ;;  %v8372_v2 = vunpack.i.h.bf16 %v8370_v38  ;;  %v8371_v19 = vunpack.i.l.bf16 %v8370_v38 }
 0x261   :  { %v1945_v28 = vsel %vm1888_vm8, %v1929_v47, %v8346_v3  ;;  %v1946_v51 = vsel %vm1888_vm8, %v1930_v52, %v8347_v46  ;;  %v8397_v4 = vunpack.i.h.bf16 %v8395_v1  ;;  %v8396_v45 = vunpack.i.l.bf16 %v8395_v1  ;;  %v11019_v1 = vpop.f32.mrf.mxu3 }
 0x262   :  { %v8360_v50 = vpop.permute.xlu1 %8359  ;;  %v1966_v31 = vpack.c.bf16 %v1946_v51, %v1945_v28  ;;  %v1867_v5 = vsel %vm102_vm5, %v10713_v60, %v8372_v2  ;;  %v1866_v63 = vsel %vm102_vm5, %v10710_v35, %v8371_v19 }
 0x263   :  { %v8362_v0 = vunpack.i.h.bf16 %v8360_v50  ;;  %v8361_v59 = vunpack.i.l.bf16 %v8360_v50  ;;  %v1918_v35 = vsel %vm102_vm5, %v10801_v7, %v8397_v4 }
 0x264   :  { %2222 = vmatmul.bf16.gmra.mxu2 %v1966_v31 }
 0x265   :  { %v8355_v22 = vpop.permute.xlu0 %8354 }
 0x266   :  { %v8357_v21 = vunpack.i.h.bf16 %v8355_v22  ;;  %v8356_v54 = vunpack.i.l.bf16 %v8355_v22 }
 0x268   :  { %v1880_v34 = vsel %vm57_vm0, %v1864_v29, %v8356_v54  ;;  %v1881_v56 = vsel %vm57_vm0, %v1865_v10, %v8357_v21  ;;  %v8400_v22 = vpop.permute.xlu2 %8399  ;;  %v1917_v10 = vsel %vm102_vm5, %v10766_v8, %v8396_v45 }
 0x269   :  { %v1897_v26 = vsel %vm1888_vm8, %v1880_v34, %v8361_v59  ;;  %v1898_v58 = vsel %vm1888_vm8, %v1881_v56, %v8362_v0 }
 0x26a   :  { %v8375_v17 = vpop.permute.xlu1 %8374  ;;  %v1965_v57 = vpack.c.bf16 %v1898_v58, %v1897_v26  ;;  %v8402_v58 = vunpack.i.h.bf16 %v8400_v22 }
 0x26b   :  { %v8377_v33 = vunpack.i.h.bf16 %v8375_v17  ;;  %v8376_v62 = vunpack.i.l.bf16 %v8375_v17 }
 0x26c   :  { %2173 = vmatmul.bf16.gmra.mxu1 %v1965_v57  ;;  %v8401_v57 = vunpack.i.l.bf16 %v8400_v22  ;;  %v1869_v8 = vsel %vm102_vm5, %v10786_v36, %v8402_v58 }
 0x26d   :  { %v8380_v37 = vpop.permute.xlu0 %8379 }
 0x26e   :  { %v8382_v32 = vunpack.i.h.bf16 %v8380_v37  ;;  %v8381_v39 = vunpack.i.l.bf16 %v8380_v37 }
 0x270   :  { %v1931_v43 = vsel %vm57_vm0, %v1915_v55, %v8381_v39  ;;  %v1932_v53 = vsel %vm57_vm0, %v1916_v9, %v8382_v32  ;;  %v8430_v7 = vpop.permute.xlu2 %8429  ;;  %v1868_v32 = vsel %vm102_vm5, %v10783_v61, %v8401_v57 }
 0x271   :  { %v1947_v49 = vsel %vm1888_vm8, %v1931_v43, %v8376_v62  ;;  %v1948_v16 = vsel %vm1888_vm8, %v1932_v53, %v8377_v33 }
 0x272   :  { %v8390_v23 = vpop.permute.xlu1 %8389  ;;  %v1969_v12 = vpack.c.bf16 %v1948_v16, %v1947_v49  ;;  %v8432_v49 = vunpack.i.h.bf16 %v8430_v7  ;;  %v8431_v16 = vunpack.i.l.bf16 %v8430_v7 }
 0x273   :  { %v8392_v15 = vunpack.i.h.bf16 %v8390_v23  ;;  %v8391_v47 = vunpack.i.l.bf16 %v8390_v23 }
 0x274   :  { %2227 = vmatmul.bf16.gmra.mxu2 %v1969_v12  ;;  %v1920_v2 = vsel %vm102_vm5, %v10860_v25, %v8432_v49  ;;  %v1919_v19 = vsel %vm102_vm5, %v10829_v18, %v8431_v16  ;;  %v2254_v18 = vpop.f32.mrf.mxu3 }
 0x275   :  { %v8385_v24 = vpop.permute.xlu0 %8384 }
 0x276   :  { %v8387_v46 = vunpack.i.h.bf16 %v8385_v24  ;;  %v8386_v3 = vunpack.i.l.bf16 %v8385_v24 }
 0x278   :  { %v1882_v52 = vsel %vm57_vm0, %v1866_v63, %v8386_v3  ;;  %v1883_v50 = vsel %vm57_vm0, %v1867_v5, %v8387_v46  ;;  %v8435_v3 = vpop.permute.xlu2 %8434 }
 0x279   :  { %v1899_v51 = vsel %vm1888_vm8, %v1882_v52, %v8391_v47  ;;  %v1900_v31 = vsel %vm1888_vm8, %v1883_v50, %v8392_v15  ;;  %v8437_v50 = vunpack.i.h.bf16 %v8435_v3 }
 0x27a   :  { %v8405_v28 = vpop.permute.xlu1 %8404  ;;  %v1968_v48 = vpack.c.bf16 %v1900_v31, %v1899_v51 }
 0x27b   :  { %v8407_v29 = vunpack.i.h.bf16 %v8405_v28  ;;  %v8406_v0 = vunpack.i.l.bf16 %v8405_v28  ;;  %v8436_v28 = vunpack.i.l.bf16 %v8435_v3  ;;  %v1871_v4 = vsel %vm102_vm5, %v10849_v41, %v8437_v50 }
 0x27c   :  { %2178 = vmatmul.bf16.gmra.mxu1 %v1968_v48 }
 0x27d   :  { %v8410_v60 = vpop.permute.xlu0 %8409  ;;  %v1870_v45 = vsel %vm102_vm5, %v10846_v14, %v8436_v28 }
 0x27e   :  { %v8412_v21 = vunpack.i.h.bf16 %v8410_v60  ;;  %v8411_v54 = vunpack.i.l.bf16 %v8410_v60 }
 0x280   :  { %v1933_v59 = vsel %vm57_vm0, %v1917_v10, %v8411_v54  ;;  %v1934_v38 = vsel %vm57_vm0, %v1918_v35, %v8412_v21 }
 0x281   :  { %v1949_v56 = vsel %vm1888_vm8, %v1933_v59, %v8406_v0  ;;  %v1950_v17 = vsel %vm1888_vm8, %v1934_v38, %v8407_v29  ;;  %v2257_v0 = vpop.f32.mrf.mxu3 }
 0x282   :  { %v8420_v34 = vpop.permute.xlu1 %8419  ;;  %v1972_v26 = vpack.c.bf16 %v1950_v17, %v1949_v56 }
 0x283   :  { %v8422_v39 = vunpack.i.h.bf16 %v8420_v34  ;;  %v8421_v9 = vunpack.i.l.bf16 %v8420_v34 }
 0x284   :  { %2232 = vmatmul.bf16.gmra.mxu2 %v1972_v26 }
 0x285   :  { %v8415_v11 = vpop.permute.xlu0 %8414 }
 0x286   :  { %v8417_v40 = vunpack.i.h.bf16 %v8415_v11  ;;  %v8416_v37 = vunpack.i.l.bf16 %v8415_v11 }
 0x288   :  { %v1884_v55 = vsel %vm57_vm0, %v1868_v32, %v8416_v37  ;;  %v1885_v33 = vsel %vm57_vm0, %v1869_v8, %v8417_v40 }
 0x289   :  { %v1901_v62 = vsel %vm1888_vm8, %v1884_v55, %v8421_v9  ;;  %v1902_v43 = vsel %vm1888_vm8, %v1885_v33, %v8422_v39  ;;  %v2259_v41 = vpop.f32.mrf.mxu3 }
 0x28a   :  { %v8425_v53 = vpop.permute.xlu1 %8424  ;;  %v1971_v23 = vpack.c.bf16 %v1902_v43, %v1901_v62 }
 0x28b   :  { %v8427_v24 = vunpack.i.h.bf16 %v8425_v53  ;;  %v8426_v46 = vunpack.i.l.bf16 %v8425_v53 }
 0x28c   :  { %2183 = vmatmul.bf16.gmra.mxu1 %v1971_v23 }
 0x28d   :  { %v8440_v36 = vpop.permute.xlu0 %8439 }
 0x28e   :  { %v8442_v12 = vunpack.i.h.bf16 %v8440_v36  ;;  %v8441_v61 = vunpack.i.l.bf16 %v8440_v36 }
 0x290   :  { %v1935_v5 = vsel %vm57_vm0, %v1919_v19, %v8441_v61  ;;  %v1936_v63 = vsel %vm57_vm0, %v1920_v2, %v8442_v12 }
 0x291   :  { %v1951_v15 = vsel %vm1888_vm8, %v1935_v5, %v8426_v46  ;;  %v1952_v47 = vsel %vm1888_vm8, %v1936_v63, %v8427_v24  ;;  %v2262_v14 = vpop.f32.mrf.mxu3 }
 0x292   :  { %v1975_v52 = vpack.c.bf16 %v1952_v47, %v1951_v15  ;;  %v8450_v51 = vpop.permute.xlu1 %8449 }
 0x293   :  { %v8452_v22 = vunpack.i.h.bf16 %v8450_v51  ;;  %v8451_v60 = vunpack.i.l.bf16 %v8450_v51 }
 0x294   :  { %2237 = vmatmul.bf16.gmra.mxu2 %v1975_v52 }
 0x295   :  { %v8445_v25 = vpop.permute.xlu0 %8444 }
 0x296   :  { %v8447_v31 = vunpack.i.h.bf16 %v8445_v25  ;;  %v8446_v48 = vunpack.i.l.bf16 %v8445_v25 }
 0x298   :  { %v1886_v21 = vsel %vm57_vm0, %v1870_v45, %v8446_v48  ;;  %v1887_v54 = vsel %vm57_vm0, %v1871_v4, %v8447_v31 }
 0x299   :  { %v1903_v35 = vsel %vm1888_vm8, %v1886_v21, %v8451_v60  ;;  %v1904_v10 = vsel %vm1888_vm8, %v1887_v54, %v8452_v22  ;;  %v2264_v11 = vpop.f32.mrf.mxu3 }
 0x29a   :  { %v1974_v29 = vpack.c.bf16 %v1904_v10, %v1903_v35 }
 0x29c   :  { %2188 = vmatmul.bf16.gmra.mxu1 %v1974_v29 }
 0x2a1   :  { %v2267_v8 = vpop.f32.mrf.mxu3 }
 0x2a7   :  { %v2203_v59 = vpop.f32.mrf.mxu2 }
 0x2a9   :  { %v2154_v38 = vpop.f32.mrf.mxu1  ;;  %v2269_v33 = vpop.f32.mrf.mxu3 }
 0x2aa   :  { %v2204_v34 = vadd.f32 %v2203_v59, %v2154_v38 }
 0x2ac   :  { %v11042_v48 = vadd.f32 %v11019_v1, %v2204_v34 }
 0x2ae   :  { %v2294_v21 = vsel %vm102_vm5, %v11042_v48, 0.0 }
 0x2af   :  { %v2205_v56 = vpop.f32.mrf.mxu2 }
 0x2b1   :  { %v2156_v17 = vpop.f32.mrf.mxu1  ;;  %v2272_v49 = vpop.f32.mrf.mxu3 }
 0x2b2   :  { %v2206_v52 = vadd.f32 %v2205_v56, %v2156_v17 }
 0x2b4   :  { %v11039_v51 = vadd.f32 %v2254_v18, %v2206_v52 }
 0x2b6   :  { %v2295_v45 = vsel %vm102_vm5, %v11039_v51, 0.0 }
 0x2b7   :  { %v2208_v26 = vpop.f32.mrf.mxu2  ;;  %v2296_v10 = vadd.f32 %v2295_v45, %v2294_v21 }
 0x2b9   :  { %v2159_v58 = vpop.f32.mrf.mxu1  ;;  %v2274_v12 = vpop.f32.mrf.mxu3 }
 0x2ba   :  { %v2209_v57 = vadd.f32 %v2208_v26, %v2159_v58 }
 0x2bc   :  { %v11044_v4 = vadd.f32 %v2257_v0, %v2209_v57 }
 0x2be   :  { %v2297_v18 = vsel %vm102_vm5, %v11044_v4, 0.0 }
 0x2bf   :  { %v2210_v7 = vpop.f32.mrf.mxu2  ;;  %v2298_v34 = vadd.f32 %v2297_v18, %v2296_v10 }
 0x2c1   :  { %v2161_v40 = vpop.f32.mrf.mxu1  ;;  %v2277_v24 = vpop.f32.mrf.mxu3 }
 0x2c2   :  { %v2211_v25 = vadd.f32 %v2210_v7, %v2161_v40 }
 0x2c4   :  { %v11048_v22 = vadd.f32 %v2259_v41, %v2211_v25 }
 0x2c6   :  { %v2299_v29 = vsel %vm102_vm5, %v11048_v22, 0.0 }
 0x2c7   :  { %v2213_v37 = vpop.f32.mrf.mxu2  ;;  %v2300_v58 = vadd.f32 %v2299_v29, %v2298_v34 }
 0x2c9   :  { %v2164_v32 = vpop.f32.mrf.mxu1  ;;  %v2279_v63 = vpop.f32.mrf.mxu3 }
 0x2ca   :  { %v2214_v39 = vadd.f32 %v2213_v37, %v2164_v32 }
 0x2cc   :  { %v11054_v54 = vadd.f32 %v2262_v14, %v2214_v39 }
 0x2ce   :  { %v2301_v56 = vsel %vm102_vm5, %v11054_v54, 0.0 }
 0x2cf   :  { %v2215_v9 = vpop.f32.mrf.mxu2 }
 0x2d1   :  { %v2166_v55 = vpop.f32.mrf.mxu1  ;;  %v2282_v50 = vpop.f32.mrf.mxu3 }
 0x2d2   :  { %v2216_v60 = vadd.f32 %v2215_v9, %v2166_v55 }
 0x2d4   :  { %v11058_v0 = vadd.f32 %v2264_v11, %v2216_v60  ;;  %v2302_v11 = vadd.f32 %v2301_v56, %v2300_v58 }
 0x2d6   :  { %v2303_v14 = vsel %vm102_vm5, %v11058_v0, 0.0 }
 0x2d7   :  { %v2218_v62 = vpop.f32.mrf.mxu2  ;;  %v2304_v9 = vadd.f32 %v2303_v14, %v2302_v11 }
 0x2d9   :  { %v2169_v43 = vpop.f32.mrf.mxu1  ;;  %v2284_v35 = vpop.f32.mrf.mxu3 }
 0x2da   :  { %v2219_v53 = vadd.f32 %v2218_v62, %v2169_v43 }
 0x2dc   :  { %v11037_v23 = vadd.f32 %v2267_v8, %v2219_v53 }
 0x2de   :  { %v2305_v37 = vsel %vm102_vm5, %v11037_v23, 0.0 }
 0x2df   :  { %v2220_v16 = vpop.f32.mrf.mxu2 }
 0x2e1   :  { %v2171_v36 = vpop.f32.mrf.mxu1 }
 0x2e2   :  { %v2221_v59 = vadd.f32 %v2220_v16, %v2171_v36  ;;  %v2287_v16 = vpop.f32.mrf.mxu3  ;;  %v2306_v36 = vadd.f32 %v2305_v37, %v2304_v9 }
 0x2e4   :  { %v11064_v57 = vadd.f32 %v2269_v33, %v2221_v59 }
 0x2e6   :  { %v2307_v62 = vsel %vm102_vm5, %v11064_v57, 0.0 }
 0x2e7   :  { %v2223_v61 = vpop.f32.mrf.mxu2 }
 0x2e9   :  { %v2174_v2 = vpop.f32.mrf.mxu1 }
 0x2ea   :  { %v2224_v17 = vadd.f32 %v2223_v61, %v2174_v2  ;;  %v2289_v18 = vpop.f32.mrf.mxu3 }
 0x2ec   :  { %v11070_v8 = vadd.f32 %v2272_v49, %v2224_v17 }
 0x2ee   :  { %v2315_v49 = vsel %vm102_vm5, %v11070_v8, 0.0 }
 0x2ef   :  { %v2225_v19 = vpop.f32.mrf.mxu2 }
 0x2f1   :  { %v2176_v46 = vpop.f32.mrf.mxu1 }
 0x2f2   :  { %v2226_v38 = vadd.f32 %v2225_v19, %v2176_v46 }
 0x2f4   :  { %v11066_v7 = vadd.f32 %v2274_v12, %v2226_v38 }
 0x2f6   :  { %v2316_v33 = vsel %vm102_vm5, %v11066_v7, 0.0 }
 0x2f7   :  { %v2228_v3 = vpop.f32.mrf.mxu2  ;;  %v2317_v46 = vadd.f32 %v2316_v33, %v2315_v49 }
 0x2f9   :  { %v2179_v5 = vpop.f32.mrf.mxu1 }
 0x2fa   :  { %v2229_v26 = vadd.f32 %v2228_v3, %v2179_v5 }
 0x2fc   :  { %v11072_v32 = vadd.f32 %v2277_v24, %v2229_v26  ;;  %v2308_v24 = vadd.f32 %v2307_v62, %v2306_v36 }
 0x2fe   :  { %v2318_v61 = vsel %vm102_vm5, %v11072_v32, 0.0  ;;  %v2309_v52 = vrot.slane %v2308_v24, 4 }
 0x2ff   :  { %v2230_v15 = vpop.f32.mrf.mxu2 }
 0x301   :  { %v2181_v47 = vpop.f32.mrf.mxu1 }
 0x302   :  { %v2231_v40 = vadd.f32 %v2230_v15, %v2181_v47 }
 0x304   :  { %v11078_v43 = vadd.f32 %v2279_v63, %v2231_v40  ;;  %v2319_v63 = vadd.f32 %v2318_v61, %v2317_v46 }
 0x306   :  { %v2320_v3 = vsel %vm102_vm5, %v11078_v43, 0.0 }
 0x307   :  { %v2233_v28 = vpop.f32.mrf.mxu2 }
 0x309   :  { %v2184_v31 = vpop.f32.mrf.mxu1 }
 0x30a   :  { %v2234_v39 = vadd.f32 %v2233_v28, %v2184_v31  ;;  %v2321_v28 = vadd.f32 %v2320_v3, %v2319_v63 }
 0x30c   :  { %v11084_v2 = vadd.f32 %v2282_v50, %v2234_v39 }
 0x30e   :  { %v2322_v15 = vsel %vm102_vm5, %v11084_v2, 0.0 }
 0x30f   :  { %v2235_v1 = vpop.f32.mrf.mxu2  ;;  %v2323_v25 = vadd.f32 %v2322_v15, %v2321_v28 }
 0x311   :  { %v2186_v41 = vpop.f32.mrf.mxu1 }
 0x312   :  { %v2236_v53 = vadd.f32 %v2235_v1, %v2186_v41 }
 0x314   :  { %v11088_v5 = vadd.f32 %v2284_v35, %v2236_v53  ;;  %v2310_v35 = vadd.f32 %v2309_v52, %v2308_v24 }
 0x316   :  { %v2324_v50 = vsel %vm102_vm5, %v11088_v5, 0.0  ;;  %v2311_v38 = vrot.slane %v2310_v35, 2 }
 0x317   :  { %v2238_v55 = vpop.f32.mrf.mxu2  ;;  %v2325_v10 = vadd.f32 %v2324_v50, %v2323_v25 }
 0x318   :  { %v2312_v17 = vadd.f32 %v2311_v38, %v2310_v35 }
 0x319   :  { %v2189_v12 = vpop.f32.mrf.mxu1 }
 0x31a   :  { %v2239_v19 = vadd.f32 %v2238_v55, %v2189_v12  ;;  %v2313_v58 = vrot.slane %v2312_v17, 1 }
 0x31c   :  { %v11092_v47 = vadd.f32 %v2287_v16, %v2239_v19  ;;  %v2314_v11 = vadd.f32 %v2313_v58, %v2312_v17 }
 0x31e   :  { %v2326_v60 = vsel %vm102_vm5, %v11092_v47, 0.0 }
 0x31f   :  { %v2240_v31 = vpop.f32.mrf.mxu2  ;;  %v2327_v29 = vadd.f32 %v2326_v60, %v2325_v10 }
 0x321   :  { %v2191_v45 = vpop.f32.mrf.mxu1 }
 0x322   :  { %v2241_v21 = vadd.f32 %v2240_v31, %v2191_v45 }
 0x324   :  { %v11098_v1 = vadd.f32 %v2289_v18, %v2241_v21 }
 0x326   :  { %v2328_v59 = vsel %vm102_vm5, %v11098_v1, 0.0 }
 0x327   :  { %v2329_v34 = vadd.f32 %v2328_v59, %v2327_v29 }
 0x329   :  { %v2330_v41 = vrot.slane %v2329_v34, 4 }
 0x32b   :  { %v2331_v56 = vadd.f32 %v2330_v41, %v2329_v34 }
 0x32d   :  { %v2332_v26 = vrot.slane %v2331_v56, 2 }
 0x32f   :  { %v2333_v14 = vadd.f32 %v2332_v26, %v2331_v56 }
 0x331   :  { %v2334_v40 = vrot.slane %v2333_v14, 1 }
 0x333   :  { %v2335_v37 = vadd.f32 %v2334_v40, %v2333_v14 }
 0x335   :  { %v2339_v39 = vsel %vm2338_vm9, %v2335_v37, %v2314_v11 }
 0x336   :  { %2357 = vrot.lane.b32.xlu1 %v2339_v39, %s9471_s3  ;;  %2351 = vrot.lane.b32.xlu0 %v2339_v39, %s9472_s25  ;;  %v2342_v9 = vsel %vm2341_vm10, %v2339_v39, 0.0 }
 0x337   :  { %2345 = vrot.lane.b32.xlu2 %v2339_v39, %s9473_s27 }
 0x360   :  { %2343 = vadd.xlane.f32.xlu2 %v2342_v9 }
 0x391   :  { %v2346_v55 = vpop.permute.xlu2 %2345 }
 0x392   :  { %v2348_v62 = vsel %vm2341_vm10, %v2346_v55, 0.0 }
 0x393   :  { %2349 = vadd.xlane.f32.xlu0 %v2348_v62 }
 0x3a8   :  { %v2358_v33 = vpop.permute.xlu1 %2357  ;;  %v2352_v53 = vpop.permute.xlu0 %2351 }
 0x3a9   :  { %v2354_v16 = vsel %vm2341_vm10, %v2352_v53, 0.0  ;;  %v2360_v36 = vsel %vm2341_vm10, %v2358_v33, 0.0 }
 0x3aa   :  { %2355 = vadd.xlane.f32.xlu1 %v2354_v16  ;;  %2361 = vadd.xlane.f32.xlu2 %v2360_v36 }
 0x3d3   :  { %v2344_v12 = vpop.xlane.xlu2 %2343 }
 0x406   :  { %v2350_v49 = vpop.xlane.xlu0 %2349 }
 0x407   :  { %v2364_v61 = vsel %vm2363_vm11, %v2344_v12, %v2350_v49 }
 0x41d   :  { %v2356_v19 = vpop.xlane.xlu1 %2355  ;;  %v2362_v24 = vpop.xlane.xlu2 %2361 }
 0x41e   :  { %v2366_v46 = vsel %vm2365_vm12, %v2364_v61, %v2356_v19 }
 0x41f   :  { %v2368_v3 = vsel %vm2367_vm13, %v2366_v46, %v2362_v24 }
 0x420   :  { %v2369_v63 = vmul.f32 0.001953125, %v2368_v3 }
 0x422   :  { %v2371_v15 = vrot.slane %v2369_v63, 1  ;;  %v2372_v52 = vperm.slane %v2369_v63, 0 }
 0x424   :  { %v2373_v28 = vperm.slane %v2371_v15, 0  ;;  %v11114_v50 = vsub.f32 %v11042_v48, %v2372_v52  ;;  %v11117_v25 = vsub.f32 %v11039_v51, %v2372_v52  ;;  %v11120_v31 = vsub.f32 %v11044_v4, %v2372_v52 }
 0x425   :  { %v11129_v21 = vsub.f32 %v11048_v22, %v2372_v52  ;;  %v11139_v4 = vsub.f32 %v11054_v54, %v2372_v52  ;;  %v11151_v35 = vsub.f32 %v11058_v0, %v2372_v52  ;;  %v11163_v38 = vsub.f32 %v11037_v23, %v2372_v52 }
 0x426   :  { %v11123_v45 = vsub.f32 %v11070_v8, %v2373_v28  ;;  %v11126_v60 = vsub.f32 %v11066_v7, %v2373_v28  ;;  %v11132_v18 = vsub.f32 %v11072_v32, %v2373_v28  ;;  %v2392_v48 = vmul.f32 %v11114_v50, %v11114_v50 }
 0x427   :  { %v2393_v51 = vmul.f32 %v11117_v25, %v11117_v25  ;;  %v11142_v8 = vsub.f32 %v11078_v43, %v2373_v28  ;;  %v2394_v7 = vmul.f32 %v11120_v31, %v11120_v31  ;;  %v11154_v10 = vsub.f32 %v11084_v2, %v2373_v28 }
 0x428   :  { %v2400_v22 = vmul.f32 %v11123_v45, %v11123_v45  ;;  %v2401_v32 = vmul.f32 %v11126_v60, %v11126_v60  ;;  %v2395_v54 = vmul.f32 %v11129_v21, %v11129_v21  ;;  %v2402_v43 = vmul.f32 %v11132_v18, %v11132_v18 }
 0x429   :  { %v2408_v29 = vsel %vm102_vm5, %v2392_v48, 0.0  ;;  %v2409_v59 = vsel %vm102_vm5, %v2393_v51, 0.0  ;;  %v11166_v34 = vsub.f32 %v11088_v5, %v2373_v28  ;;  %v2396_v0 = vmul.f32 %v11139_v4, %v11139_v4 }
 0x42a   :  { %v2410_v2 = vadd.f32 %v2409_v59, %v2408_v29  ;;  %v2403_v41 = vmul.f32 %v11142_v8, %v11142_v8  ;;  %v2411_v56 = vsel %vm102_vm5, %v2394_v7, 0.0  ;;  %v2429_v17 = vsel %vm102_vm5, %v2400_v22, 0.0 }
 0x42b   :  { %v2430_v26 = vsel %vm102_vm5, %v2401_v32, 0.0  ;;  %v11176_v58 = vsub.f32 %v11064_v57, %v2372_v52  ;;  %v11179_v23 = vsub.f32 %v11092_v47, %v2373_v28  ;;  %v2397_v40 = vmul.f32 %v11151_v35, %v11151_v35 }
 0x42c   :  { %v2412_v5 = vadd.f32 %v2411_v56, %v2410_v2  ;;  %v2431_v14 = vadd.f32 %v2430_v26, %v2429_v17  ;;  %v2404_v11 = vmul.f32 %v11154_v10, %v11154_v10  ;;  %v2413_v37 = vsel %vm102_vm5, %v2395_v54, 0.0 }
 0x42d   :  { %v2432_v39 = vsel %vm102_vm5, %v2402_v43, 0.0  ;;  %v11188_v9 = vsub.f32 %v11098_v1, %v2373_v28  ;;  %v2398_v47 = vmul.f32 %v11163_v38, %v11163_v38  ;;  %v2405_v62 = vmul.f32 %v11166_v34, %v11166_v34 }
 0x42e   :  { %v2414_v57 = vadd.f32 %v2413_v37, %v2412_v5  ;;  %v2433_v55 = vadd.f32 %v2432_v39, %v2431_v14  ;;  %v2415_v33 = vsel %vm102_vm5, %v2396_v0, 0.0  ;;  %v2434_v53 = vsel %vm102_vm5, %v2403_v41, 0.0 }
 0x42f   :  { %v2399_v12 = vmul.f32 %v11176_v58, %v11176_v58  ;;  %v2406_v1 = vmul.f32 %v11179_v23, %v11179_v23  ;;  %v2417_v49 = vsel %vm102_vm5, %v2397_v40, 0.0  ;;  %v2436_v61 = vsel %vm102_vm5, %v2404_v11, 0.0 }
 0x430   :  { %v2416_v16 = vadd.f32 %v2415_v33, %v2414_v57  ;;  %v2435_v36 = vadd.f32 %v2434_v53, %v2433_v55  ;;  %v2407_v46 = vmul.f32 %v11188_v9, %v11188_v9  ;;  %v2419_v3 = vsel %vm102_vm5, %v2398_v47, 0.0 }
 0x431   :  { %v2438_v63 = vsel %vm102_vm5, %v2405_v62, 0.0  ;;  %v2421_v28 = vsel %vm102_vm5, %v2399_v12, 0.0  ;;  %v2440_v48 = vsel %vm102_vm5, %v2406_v1, 0.0 }
 0x432   :  { %v2418_v19 = vadd.f32 %v2417_v49, %v2416_v16  ;;  %v2437_v24 = vadd.f32 %v2436_v61, %v2435_v36  ;;  %v2442_v22 = vsel %vm102_vm5, %v2407_v46, 0.0 }
 0x434   :  { %v2420_v15 = vadd.f32 %v2419_v3, %v2418_v19  ;;  %v2439_v52 = vadd.f32 %v2438_v63, %v2437_v24 }
 0x436   :  { %v2422_v51 = vadd.f32 %v2421_v28, %v2420_v15  ;;  %v2441_v7 = vadd.f32 %v2440_v48, %v2439_v52  ;;  %v9414_v52 = vld [vmem:[%s14185_s4] ss:$0 sm:$0xff]  ;;  %v8021_v48 = vld [vmem:[%s14187_s6 + $0x88] sm:$0xff] }
 0x437   :  { %3519 = vmatpush.bf16.msra.mxu2 %v8021_v48 }
 0x438   :  { %v2423_v32 = vrot.slane %v2422_v51, 4  ;;  %v2443_v54 = vadd.f32 %v2442_v22, %v2441_v7  ;;  %v8019_v7 = vld [vmem:[%s14187_s6 + $0x78] sm:$0xff] }
 0x439   :  { %3464 = vmatpush.bf16.msra.mxu1 %v8019_v7  ;;  %v2573_v7 = vld [vmem:[#allocation3 + $0x30] sm:$0xff] }
 0x43a   :  { %v2424_v43 = vadd.f32 %v2423_v32, %v2422_v51  ;;  %v2444_v29 = vrot.slane %v2443_v54, 4  ;;  %v8011_v51 = vld [vmem:[%s14187_s6 + $0x38] sm:$0xff]  ;;  %v8020_v32 = vld [vmem:[%s14187_s6 + $0x80] sm:$0xff] }
 0x43b   :  { %3415 = vmatpush.bf16.msra.mxu0 %v8011_v51  ;;  %3520 = vmatpush.bf16.msra.mxu2 %v8020_v32 }
 0x43c   :  { %v2425_v59 = vrot.slane %v2424_v43, 2  ;;  %v2445_v0 = vadd.f32 %v2444_v29, %v2443_v54 }
 0x43e   :  { %v2426_v2 = vadd.f32 %v2425_v59, %v2424_v43  ;;  %v2446_v41 = vrot.slane %v2445_v0, 2  ;;  %v11238_v59 = vld [vmem:[%s14186_s5] ss:$0 sm:$0xff] }
 0x440   :  { %v2427_v56 = vrot.slane %v2426_v2, 1  ;;  %v2447_v17 = vadd.f32 %v2446_v41, %v2445_v0 }
 0x442   :  { %v2448_v26 = vrot.slane %v2447_v17, 1  ;;  %v2428_v5 = vadd.f32 %v2427_v56, %v2426_v2 }
 0x444   :  { %v2449_v14 = vadd.f32 %v2448_v26, %v2447_v17 }
 0x446   :  { %v2452_v40 = vsel %vm2338_vm9, %v2449_v14, %v2428_v5 }
 0x447   :  { %2469 = vrot.lane.b32.xlu1 %v2452_v40, %s9471_s3  ;;  %2463 = vrot.lane.b32.xlu0 %v2452_v40, %s9472_s25  ;;  %v2454_v11 = vsel %vm2341_vm10, %v2452_v40, 0.0 }
 0x448   :  { %2457 = vrot.lane.b32.xlu2 %v2452_v40, %s9473_s27 }
 0x471   :  { %2455 = vadd.xlane.f32.xlu0 %v2454_v11 }
 0x4a2   :  { %v2458_v37 = vpop.permute.xlu2 %2457 }
 0x4a3   :  { %v2460_v39 = vsel %vm2341_vm10, %v2458_v37, 0.0 }
 0x4a4   :  { %2461 = vadd.xlane.f32.xlu2 %v2460_v39 }
 0x4b9   :  { %v2470_v57 = vpop.permute.xlu1 %2469  ;;  %v2464_v55 = vpop.permute.xlu0 %2463 }
 0x4ba   :  { %v2466_v47 = vsel %vm2341_vm10, %v2464_v55, 0.0  ;;  %v2472_v62 = vsel %vm2341_vm10, %v2470_v57, 0.0 }
 0x4bb   :  { %2467 = vadd.xlane.f32.xlu1 %v2466_v47  ;;  %2473 = vadd.xlane.f32.xlu0 %v2472_v62 }
 0x4e4   :  { %v2456_v33 = vpop.xlane.xlu0 %2455 }
 0x517   :  { %v2462_v53 = vpop.xlane.xlu2 %2461 }
 0x518   :  { %v2475_v16 = vsel %vm2363_vm11, %v2456_v33, %v2462_v53 }
 0x52e   :  { %v2468_v36 = vpop.xlane.xlu1 %2467  ;;  %v2474_v12 = vpop.xlane.xlu0 %2473 }
 0x52f   :  { %v2476_v1 = vsel %vm2365_vm12, %v2475_v16, %v2468_v36 }
 0x530   :  { %v2477_v49 = vsel %vm2367_vm13, %v2476_v1, %v2474_v12 }
 0x531   :  { %v2478_v61 = vmul.f32 0.001953125, %v2477_v49 }
 0x533   :  { %v2479_v19 = vadd.f32 1e-05, %v2478_v61 }
 0x535   :  { %9423 = vrsqrt.f32 %v2479_v19  ;;  %vm2486_vm15 = vweird.f32 %v2479_v19 }
 0x53b   :  { %v9424_v24 = vpop.eup %9423 }
 0x53c   :  { %v2481_v46 = vmul.f32 %v9424_v24, %v2479_v19  ;;  %vm2487_vm14 = vweird.f32 %v9424_v24  ;;  %v2569_v19 = vld [vmem:[#allocation3 + $0x10] sm:$0xff] }
 0x53d   :  { %vm2488_vm1 = vmor %vm2486_vm15, %vm2487_vm14  ;;  %v2740_v51 = vrot.slane %v2569_v19, 1 }
 0x53e   :  { %v2482_v3 = vmul.f32 %v9424_v24, %v2481_v46 }
 0x540   :  { %v2483_v63 = vmul.f32 0.5, %v2482_v3  ;;  %v2575_v3 = vld [vmem:[#allocation3 + $0x40] sm:$0xff] }
 0x542   :  { %v2484_v15 = vsub.f32 1.5, %v2483_v63 }
 0x544   :  { %v2485_v28 = vmul.f32 %v9424_v24, %v2484_v15 }
 0x546   :  { %v2489_v22 = vsel %vm2488_vm1, %v9424_v24, %v2485_v28 }
 0x547   :  { %v2493_v54 = vmul.f32 %v9414_v52, %v2489_v22 }
 0x549   :  { %v2495_v43 = vrot.slane %v2493_v54, 1  ;;  %v2496_v29 = vperm.slane %v2493_v54, 0  ;;  %v2746_v54 = vrot.slane %v2575_v3, 1 }
 0x54b   :  { %v2500_v0 = vmul.f32 %v2496_v29, %v11114_v50  ;;  %v2501_v2 = vmul.f32 %v2496_v29, %v11117_v25  ;;  %v2502_v41 = vmul.f32 %v2496_v29, %v11120_v31  ;;  %v2503_v56 = vmul.f32 %v2496_v29, %v11129_v21 }
 0x54c   :  { %v2497_v17 = vperm.slane %v2495_v43, 0  ;;  %v2504_v26 = vmul.f32 %v2496_v29, %v11139_v4  ;;  %v2505_v5 = vmul.f32 %v2496_v29, %v11151_v35  ;;  %v2506_v14 = vmul.f32 %v2496_v29, %v11163_v38  ;;  %v8010_v4 = vld [vmem:[%s14187_s6 + $0x30] sm:$0xff]  ;;  %v2576_v43 = vld [vmem:[#allocation3 + $0x48] sm:$0xff] }
 0x54d   :  { %v2519_v40 = vadd.f32 %v11238_v59, %v2500_v0  ;;  %v2520_v11 = vadd.f32 %v11238_v59, %v2501_v2  ;;  %v2521_v37 = vadd.f32 %v11238_v59, %v2502_v41  ;;  %v2507_v50 = vmul.f32 %v2496_v29, %v11176_v58  ;;  %v8018_v35 = vld [vmem:[%s14187_s6 + $0x70] sm:$0xff]  ;;  %3416 = vmatpush.bf16.msra.mxu0 %v8010_v4 }
 0x54e   :  { %v2522_v25 = vadd.f32 %v11238_v59, %v2503_v56  ;;  %v2508_v31 = vmul.f32 %v2497_v17, %v11123_v45  ;;  %v2523_v21 = vadd.f32 %v11238_v59, %v2504_v26  ;;  %v2509_v38 = vmul.f32 %v2497_v17, %v11126_v60  ;;  %3465 = vmatpush.bf16.msra.mxu1 %v8018_v35 }
 0x54f   :  { %v2510_v39 = vmul.f32 %v2497_v17, %v11132_v18  ;;  %v2524_v58 = vadd.f32 %v11238_v59, %v2505_v5  ;;  %v2525_v57 = vadd.f32 %v11238_v59, %v2506_v14  ;;  %v2535_v55 = vmax.f32 %v2519_v40, 0.0 }
 0x550   :  { %v2536_v45 = vmax.f32 %v2520_v11, 0.0  ;;  %v2537_v47 = vmax.f32 %v2521_v37, 0.0  ;;  %v2511_v62 = vmul.f32 %v2497_v17, %v11142_v8  ;;  %v2526_v33 = vadd.f32 %v11238_v59, %v2507_v50 }
 0x551   :  { %v2538_v53 = vmax.f32 %v2522_v25, 0.0  ;;  %v2512_v16 = vmul.f32 %v2497_v17, %v11154_v10  ;;  %v2527_v60 = vadd.f32 %v11238_v59, %v2508_v31  ;;  %v2539_v36 = vmax.f32 %v2523_v21, 0.0  ;;  %2551 = vst.msk [vmem:[#allocation3 + $0x20] sm:$0xff] %vm102_vm5, %v2535_v55  ;;  %v11275_v10 = vld [vmem:[#allocation3 + $0x8] sm:$0xff] }
 0x552   :  { %2552 = vst.msk [vmem:[#allocation3 + $0x38] sm:$0xff] %vm102_vm5, %v2536_v45  ;;  %v2513_v18 = vmul.f32 %v2497_v17, %v11166_v34  ;;  %v2528_v12 = vadd.f32 %v11238_v59, %v2509_v38  ;;  %v2540_v1 = vmax.f32 %v2524_v58, 0.0  ;;  %v2514_v49 = vmul.f32 %v2497_v17, %v11179_v23  ;;  %v2578_v23 = vld [vmem:[#allocation3 + $0x58] sm:$0xff] }
 0x553   :  { %2553 = vst.msk [vmem:[#allocation3 + $0x50] sm:$0xff] %vm102_vm5, %v2537_v47  ;;  %v2529_v8 = vadd.f32 %v11238_v59, %v2510_v39  ;;  %v2541_v61 = vmax.f32 %v2525_v57, 0.0  ;;  %v2515_v24 = vmul.f32 %v2497_v17, %v11188_v9  ;;  %v2530_v46 = vadd.f32 %v11238_v59, %v2511_v62  ;;  %v2572_v9 = vld [vmem:[#allocation3 + $0x28] sm:$0xff]  ;;  %v2570_v57 = vld [vmem:[#allocation3 + $0x18] sm:$0xff] }
 0x554   :  { %v2542_v34 = vmax.f32 %v2526_v33, 0.0  ;;  %2554 = vst.msk [vmem:[#allocation3 + $0x68] sm:$0xff] %vm102_vm5, %v2538_v53  ;;  %v2531_v63 = vadd.f32 %v11238_v59, %v2512_v16  ;;  %v2543_v15 = vmax.f32 %v2527_v60, 0.0  ;;  %v2532_v52 = vadd.f32 %v11238_v59, %v2513_v18  ;;  %v8009_v47 = vld [vmem:[%s14187_s6 + $0x28] sm:$0xff] }
 0x555   :  { %2555 = vst.msk [vmem:[#allocation3 + $0x80] sm:$0xff] %vm102_vm5, %v2539_v36  ;;  %v2544_v28 = vmax.f32 %v2528_v12, 0.0  ;;  %v2739_v48 = vrot.slane %v11275_v10, 1  ;;  %v2533_v22 = vadd.f32 %v11238_v59, %v2514_v49  ;;  %v2545_v32 = vmax.f32 %v2529_v8, 0.0  ;;  %v8017_v62 = vld [vmem:[%s14187_s6 + $0x68] sm:$0xff]  ;;  %3417 = vmatpush.bf16.msra.mxu0 %v8009_v47  ;;  %v2581_v12 = vld [vmem:[#allocation3 + $0x70] sm:$0xff] }
 0x556   :  { %2556 = vst.msk [vmem:[#allocation3 + $0x98] sm:$0xff] %vm102_vm5, %v2540_v1  ;;  %v2534_v29 = vadd.f32 %v11238_v59, %v2515_v24  ;;  %v2546_v0 = vmax.f32 %v2530_v46, 0.0  ;;  %v2749_v41 = vrot.slane %v2578_v23, 1  ;;  %v2547_v56 = vmax.f32 %v2531_v63, 0.0  ;;  %3466 = vmatpush.bf16.msra.mxu1 %v8017_v62  ;;  %v2584_v1 = vld [vmem:[#allocation3 + $0x88] sm:$0xff]  ;;  %v2579_v23 = vld [vmem:[#allocation3 + $0x60] sm:$0xff] }
 0x557   :  { %2557 = vst.msk [vmem:[#allocation3 + $0xb0] sm:$0xff] %vm102_vm5, %v2541_v61  ;;  %v2743_v5 = vrot.slane %v2572_v9, 1  ;;  %v2665_v14 = vrot.slane %v2573_v7, 7  ;;  %v2548_v40 = vmax.f32 %v2532_v52, 0.0  ;;  %v2741_v37 = vsel %vm352_vm4, %v2739_v48, %v2740_v51  ;;  %v2582_v52 = vld [vmem:[#allocation3 + $0x78] sm:$0xff] }
 0x558   :  { %2558 = vst.msk [vmem:[#allocation3 + $0xc8] sm:$0xff] %vm102_vm5, %v2542_v34  ;;  %v11296_v11 = vld [vmem:[#allocation3 + $0x20] sm:$0xff]  ;;  %v2668_v50 = vrot.slane %v2576_v43, 7  ;;  %v2549_v25 = vmax.f32 %v2533_v22, 0.0  ;;  %v2550_v35 = vmax.f32 %v2534_v29, 0.0  ;;  %v2662_v16 = vrot.slane %v2570_v57, 7 }
 0x559   :  { %v11289_v2 = vld [vmem:[#allocation3 + $0x38] sm:$0xff]  ;;  %2559 = vst.msk [vmem:[#allocation3 + $0x110] sm:$0xff] %vm102_vm5, %v2543_v15  ;;  %v8453_v31 = vpack.i.bf16 %v11296_v11, %v11275_v10  ;;  %v2742_v4 = vrot.slane %v11296_v11, 1  ;;  %v2663_v60 = vrot.slane %v11296_v11, 7  ;;  %v2752_v24 = vrot.slane %v2581_v12, 1  ;;  %v8016_v43 = vld [vmem:[%s14187_s6 + $0x60] sm:$0xff] }
 0x55a   :  { %v11292_v17 = vld [vmem:[#allocation3 + $0x50] sm:$0xff]  ;;  %v2745_v26 = vrot.slane %v11289_v2, 1  ;;  %2560 = vst.msk [vmem:[#allocation3 + $0x128] sm:$0xff] %vm102_vm5, %v2544_v28  ;;  %v2666_v39 = vrot.slane %v11289_v2, 7  ;;  %v2755_v46 = vrot.slane %v2584_v1, 1  ;;  %v2671_v9 = vrot.slane %v2579_v23, 7  ;;  %3467 = vmatpush.bf16.msra.mxu1 %v8016_v43 }
 0x55b   :  { %v2748_v59 = vrot.slane %v11292_v17, 1  ;;  %2561 = vst.msk [vmem:[#allocation3 + $0x140] sm:$0xff] %vm102_vm5, %v2545_v32  ;;  %v2669_v58 = vrot.slane %v11292_v17, 7  ;;  %8454 = vrot.lane.b32.xlu2 %v8453_v31, %s9469_s28  ;;  %v2744_v45 = vsel %vm352_vm4, %v2742_v4, %v2743_v5  ;;  %v11334_v8 = vsel %vm271_vm3, %v2662_v16, %v2663_v60  ;;  %v11336_v61 = vld [vmem:[#allocation3 + $0x68] sm:$0xff]  ;;  %v2590_v5 = vld [vmem:[#allocation3 + $0xb8] sm:$0xff] }
 0x55c   :  { %v2747_v21 = vsel %vm352_vm4, %v2745_v26, %v2746_v54  ;;  %2562 = vst.msk [vmem:[#allocation3 + $0x158] sm:$0xff] %vm102_vm5, %v2546_v0  ;;  %v8468_v33 = vpack.i.bf16 %v2744_v45, %v2741_v37  ;;  %v11326_v36 = vsel %vm271_vm3, %v2665_v14, %v2666_v39  ;;  %v11338_v19 = vld [vmem:[#allocation3 + $0x80] sm:$0xff]  ;;  %v8463_v34 = vpack.i.bf16 %v11292_v17, %v11289_v2 }
 0x55d   :  { %v2750_v38 = vsel %vm352_vm4, %v2748_v59, %v2749_v41  ;;  %2563 = vst.msk [vmem:[#allocation3 + $0x170] sm:$0xff] %vm102_vm5, %v2547_v56  ;;  %v8458_v53 = vpack.i.bf16 %v2747_v21, %v2744_v45  ;;  %v11329_v18 = vsel %vm271_vm3, %v2668_v50, %v2669_v58  ;;  %v8483_v3 = vpack.i.bf16 %v11326_v36, %v11334_v8  ;;  %v8008_v54 = vld [vmem:[%s14187_s6 + $0x20] sm:$0xff] }
 0x55e   :  { %v3225_v55 = vpack.c.bf16 %v2750_v38, %v2747_v21  ;;  %2564 = vst.msk [vmem:[#allocation3 + $0x188] sm:$0xff] %vm102_vm5, %v2548_v40  ;;  %8469 = vrot.lane.b32.xlu0 %v8468_v33, %s9468_s24  ;;  %v8473_v49 = vpack.i.bf16 %v11329_v18, %v11326_v36  ;;  %v2751_v63 = vrot.slane %v11336_v61, 1  ;;  %v2754_v15 = vrot.slane %v11338_v19, 1  ;;  %3418 = vmatpush.bf16.msra.mxu0 %v8008_v54  ;;  %v2587_v26 = vld [vmem:[#allocation3 + $0xa0] sm:$0xff]  ;;  %v11371_v40 = vld [vmem:[#allocation3 + $0x98] sm:$0xff]  ;;  %v11373_v59 = vld [vmem:[#allocation3 + $0xb0] sm:$0xff] }
 0x55f   :  { %2565 = vst.msk [vmem:[#allocation3 + $0x1a0] sm:$0xff] %vm102_vm5, %v2549_v25  ;;  %8459 = vrot.lane.b32.xlu1 %v8458_v53, %s9469_s28  ;;  %v2672_v51 = vrot.slane %v11336_v61, 7  ;;  %v2674_v7 = vrot.slane %v2582_v52, 7  ;;  %v2675_v22 = vrot.slane %v11338_v19, 7  ;;  %v8493_v29 = vpack.i.bf16 %v2750_v38, %v2747_v21  ;;  %v8007_v33 = vld [vmem:[%s14187_s6 + $0x18] sm:$0xff] }
 0x560   :  { %7702 = vmatmul.msk.bf16.vlgmr.msra.gmra.mxu2 %vm102_vm5, %v3225_v55  ;;  %2566 = vst.msk [vmem:[#allocation3 + $0x1b8] sm:$0xff] %vm102_vm5, %v2550_v35  ;;  %v2753_v28 = vsel %vm352_vm4, %v2751_v63, %v2752_v24  ;;  %v2756_v48 = vsel %vm352_vm4, %v2754_v15, %v2755_v46  ;;  %v2758_v37 = vrot.slane %v2587_v26, 1  ;;  %v2761_v50 = vrot.slane %v2590_v5, 1  ;;  %v2585_v35 = vld [vmem:[#allocation3 + $0x90] sm:$0xff]  ;;  %v8015_v53 = vld [vmem:[%s14187_s6 + $0x58] sm:$0xff]  ;;  %v2595_v24 = vld [vmem:[#allocation3 + $0xe0] sm:$0xff] }
 0x561   :  { %v3228_v32 = vpack.c.bf16 %v2756_v48, %v2753_v28  ;;  %v8488_v0 = vpack.i.bf16 %v2753_v28, %v2750_v38  ;;  %v11364_v41 = vsel %vm271_vm3, %v2671_v9, %v2672_v51  ;;  %v11367_v56 = vsel %vm271_vm3, %v2674_v7, %v2675_v22  ;;  %v2588_v38 = vld [vmem:[#allocation3 + $0xa8] sm:$0xff]  ;;  %3468 = vmatpush.bf16.msra.mxu1 %v8015_v53  ;;  %v2591_v9 = vld [vmem:[#allocation3 + $0xc0] sm:$0xff]  ;;  %v2594_v51 = vld [vmem:[#allocation3 + $0xd8] sm:$0xff] }
 0x562   :  { %v8503_v14 = vpack.i.bf16 %v11367_v56, %v11364_v41  ;;  %v8498_v25 = vpack.i.bf16 %v11338_v19, %v11336_v61  ;;  %v8513_v31 = vpack.i.bf16 %v11364_v41, %v11329_v18  ;;  %v2757_v21 = vrot.slane %v11371_v40, 1  ;;  %3419 = vmatpush.bf16.msra.mxu0 %v8007_v33  ;;  %v8006_v26 = vld [vmem:[%s14187_s6 + $0x10] sm:$0xff] }
 0x563   :  { %8474 = vrot.lane.b32.xlu2 %v8473_v49, %s9468_s24  ;;  %v2760_v4 = vrot.slane %v11373_v59, 1  ;;  %v2677_v57 = vrot.slane %v2585_v35, 7  ;;  %v2678_v55 = vrot.slane %v11371_v40, 7  ;;  %v2680_v45 = vrot.slane %v2588_v38, 7  ;;  %v2593_v49 = vld [vmem:[#allocation3 + $0xd0] sm:$0xff]  ;;  %v11431_v35 = vld [vmem:[#allocation3 + $0xf8] sm:$0xff] }
 0x564   :  { %v2759_v39 = vsel %vm352_vm4, %v2757_v21, %v2758_v37  ;;  %v2681_v47 = vrot.slane %v11373_v59, 7  ;;  %v8523_v16 = vpack.i.bf16 %v2756_v48, %v2753_v28  ;;  %v2800_v63 = vrot.slane %v2593_v49, 1  ;;  %v8014_v5 = vld [vmem:[%s14187_s6 + $0x50] sm:$0xff]  ;;  %v2608_v21 = vld [vmem:[#allocation3 + $0x148] sm:$0xff] }
 0x565   :  { %v2762_v58 = vsel %vm352_vm4, %v2760_v4, %v2761_v50  ;;  %v8518_v60 = vpack.i.bf16 %v2759_v39, %v2756_v48  ;;  %v11399_v12 = vsel %vm271_vm3, %v2677_v57, %v2678_v55  ;;  %v2817_v15 = vrot.slane %v2595_v24, 1  ;;  %3469 = vmatpush.bf16.msra.mxu1 %v8014_v5  ;;  %v11433_v38 = vld [vmem:[#allocation3 + $0x128] sm:$0xff]  ;;  %v2599_v57 = vld [vmem:[#allocation3 + $0x100] sm:$0xff]  ;;  %v2602_v55 = vld [vmem:[#allocation3 + $0x118] sm:$0xff] }
 0x566   :  { %8484 = vrot.lane.b32.xlu0 %v8483_v3, %s9470_s30  ;;  %v3231_v62 = vpack.c.bf16 %v2762_v58, %v2759_v39  ;;  %v11402_v1 = vsel %vm271_vm3, %v2680_v45, %v2681_v47  ;;  %v2596_v3 = vld [vmem:[#allocation3 + $0xe8] sm:$0xff]  ;;  %v8528_v23 = vpack.i.bf16 %v11373_v59, %v11371_v40  ;;  %v8543_v52 = vpack.i.bf16 %v11399_v12, %v11367_v56 }
 0x567   :  { %8464 = vrot.lane.b32.xlu1 %v8463_v34, %s9470_s30  ;;  %v8533_v46 = vpack.i.bf16 %v11402_v1, %v11399_v12  ;;  %v2818_v48 = vrot.slane %v2596_v3, 1  ;;  %v2809_v43 = vrot.slane %v2594_v51, 7  ;;  %3420 = vmatpush.bf16.msra.mxu0 %v8006_v26  ;;  %v2773_v47 = vrot.slane %v2608_v21, 1 }
 0x568   :  { %v2769_v53 = vrot.slane %v11433_v38, 1  ;;  %v2764_v49 = vrot.slane %v2599_v57, 1  ;;  %v2767_v3 = vrot.slane %v2602_v55, 1  ;;  %v2690_v51 = vrot.slane %v11433_v38, 7  ;;  %v11480_v57 = vld [vmem:[#allocation3 + $0x170] sm:$0xff]  ;;  %v2614_v55 = vld [vmem:[#allocation3 + $0x178] sm:$0xff] }
 0x569   :  { %v2819_v22 = vsel %vm352_vm4, %v2817_v15, %v2818_v48  ;;  %v2606_v15 = vld [vmem:[#allocation3 + $0x138] sm:$0xff] }
 0x56b   :  { %8479 = vrot.lane.b32.xlu2 %v8463_v34, %s9469_s28  ;;  %v11406_v34 = vld [vmem:[#allocation3 + $0xc8] sm:$0xff] }
 0x56c   :  { %v2799_v28 = vrot.slane %v11406_v34, 1  ;;  %v2792_v54 = vrot.slane %v11406_v34, 7 }
 0x56e   :  { %8489 = vrot.lane.b32.xlu0 %v8488_v0, %s9469_s28  ;;  %v2801_v7 = vsel %vm352_vm4, %v2799_v28, %v2800_v63  ;;  %v2603_v63 = vld [vmem:[#allocation3 + $0x120] sm:$0xff] }
 0x56f   :  { %8494 = vrot.lane.b32.xlu1 %v8493_v29, %s9468_s24  ;;  %v2810_v29 = vrot.slane %v2595_v24, 7  ;;  %v3234_v0 = vpack.c.bf16 %v2819_v22, %v2801_v7  ;;  %v8548_v37 = vpack.i.bf16 %v2801_v7, %v2762_v58  ;;  %v2692_v7 = vrot.slane %v2606_v15, 7 }
 0x570   :  { %7703 = vmatmul.msk.bf16.gmra.mxu2 %vm102_vm5, %v3228_v32  ;;  %v2791_v32 = vrot.slane %v2591_v9, 7  ;;  %v2689_v9 = vrot.slane %v2603_v63, 7 }
 0x572   :  { %v2793_v50 = vsel %vm271_vm3, %v2791_v32, %v2792_v54  ;;  %v2600_v32 = vld [vmem:[#allocation3 + $0x108] sm:$0xff]  ;;  %v11462_v5 = vsel %vm271_vm3, %v2689_v9, %v2690_v51 }
 0x573   :  { %8504 = vrot.lane.b32.xlu2 %v8503_v14, %s9468_s24  ;;  %v8553_v14 = vpack.i.bf16 %v2762_v58, %v2759_v39  ;;  %v11435_v39 = vld [vmem:[#allocation3 + $0x140] sm:$0xff]  ;;  %v11437_v58 = vld [vmem:[#allocation3 + $0x110] sm:$0xff]  ;;  %v8573_v33 = vpack.i.bf16 %v2793_v50, %v11402_v1 }
 0x574   :  { %v2693_v22 = vrot.slane %v11435_v39, 7  ;;  %v2687_v26 = vrot.slane %v11437_v58, 7 }
 0x576   :  { %8514 = vrot.lane.b32.xlu0 %v8513_v31, %s9470_s30  ;;  %v2605_v31 = vld [vmem:[#allocation3 + $0x130] sm:$0xff] }
 0x577   :  { %8499 = vrot.lane.b32.xlu1 %v8498_v25, %s9470_s30  ;;  %v2770_v45 = vrot.slane %v2605_v31, 1 }
 0x57b   :  { %8509 = vrot.lane.b32.xlu2 %v8498_v25, %s9469_s28  ;;  %v2811_v25 = vsel %vm271_vm3, %v2809_v43, %v2810_v29 }
 0x57c   :  { %v8563_v4 = vpack.i.bf16 %v2811_v25, %v2793_v50  ;;  %v8013_v50 = vld [vmem:[%s14187_s6 + $0x48] sm:$0xff]  ;;  %v11473_v25 = vld [vmem:[#allocation3 + $0x158] sm:$0xff] }
 0x57d   :  { %3470 = vmatpush.bf16.msra.mxu1 %v8013_v50  ;;  %v2696_v15 = vrot.slane %v11473_v25, 7 }
 0x57e   :  { %8519 = vrot.lane.b32.xlu0 %v8518_v60, %s9469_s28  ;;  %v2763_v60 = vrot.slane %v11431_v35, 1 }
 0x57f   :  { %8524 = vrot.lane.b32.xlu1 %v8523_v16, %s9468_s24  ;;  %v2772_v16 = vrot.slane %v11435_v39, 1 }
 0x580   :  { %7704 = vmatmul.msk.bf16.gmra.mxu2 %vm102_vm5, %v3231_v62  ;;  %v8558_v62 = vpack.i.bf16 %v2595_v24, %v11406_v34  ;;  %v2771_v24 = vsel %vm352_vm4, %v2769_v53, %v2770_v45  ;;  %v2765_v28 = vsel %vm352_vm4, %v2763_v60, %v2764_v49  ;;  %v8588_v45 = vpack.i.bf16 %v11435_v39, %v11433_v38  ;;  %v2609_v60 = vld [vmem:[#allocation3 + $0x150] sm:$0xff]  ;;  %v2612_v49 = vld [vmem:[#allocation3 + $0x168] sm:$0xff] }
 0x581   :  { %v2778_v53 = vrot.slane %v11480_v57, 1  ;;  %v2695_v63 = vrot.slane %v2609_v60, 7 }
 0x583   :  { %8534 = vrot.lane.b32.xlu2 %v8533_v46, %s9468_s24  ;;  %v2766_v46 = vrot.slane %v11437_v58, 1 }
 0x585   :  { %v2768_v48 = vsel %vm352_vm4, %v2766_v46, %v2767_v3 }
 0x586   :  { %8544 = vrot.lane.b32.xlu0 %v8543_v52, %s9470_s30  ;;  %v8568_v52 = vpack.i.bf16 %v11437_v58, %v11431_v35  ;;  %v8583_v43 = vpack.i.bf16 %v2768_v48, %v2765_v28  ;;  %v8578_v29 = vpack.i.bf16 %v2771_v24, %v2768_v48  ;;  %v2699_v28 = vrot.slane %v11480_v57, 7 }
 0x587   :  { %8529 = vrot.lane.b32.xlu1 %v8528_v23, %s9470_s30 }
 0x58b   :  { %8539 = vrot.lane.b32.xlu2 %v8528_v23, %s9469_s28  ;;  %v2774_v23 = vsel %vm352_vm4, %v2772_v16, %v2773_v47  ;;  %v2775_v47 = vrot.slane %v11473_v25, 1  ;;  %v2779_v16 = vrot.slane %v2614_v55, 1 }
 0x58c   :  { %v3237_v54 = vpack.c.bf16 %v2774_v23, %v2771_v24  ;;  %v8613_v9 = vpack.i.bf16 %v2774_v23, %v2771_v24  ;;  %v8012_v24 = vld [vmem:[%s14187_s6 + $0x40] sm:$0xff] }
 0x58d   :  { %v2780_v3 = vsel %vm352_vm4, %v2778_v53, %v2779_v16  ;;  %3471 = vmatpush.bf16.msra.mxu1 %v8012_v24  ;;  %v2625_v24 = vld [vmem:[#allocation3 + $0x1d0] sm:$0xff] }
 0x58e   :  { %8549 = vrot.lane.b32.xlu0 %v8548_v37, %s9469_s28  ;;  %v8005_v37 = vld [vmem:[%s14187_s6 + $0x8] sm:$0xff] }
 0x58f   :  { %8554 = vrot.lane.b32.xlu1 %v8553_v14, %s9468_s24  ;;  %v11465_v14 = vsel %vm271_vm3, %v2692_v7, %v2693_v22  ;;  %3421 = vmatpush.bf16.msra.mxu0 %v8005_v37  ;;  %v11500_v7 = vsel %vm271_vm3, %v2695_v63, %v2696_v15 }
 0x590   :  { %7705 = vmatmul.msk.bf16.gmra.mxu2 %vm102_vm5, %v3234_v0  ;;  %v2686_v0 = vrot.slane %v2600_v32, 7  ;;  %v8593_v31 = vpack.i.bf16 %v11465_v14, %v11462_v5  ;;  %v8004_v32 = vld [vmem:[%s14187_s6] sm:$0xff]  ;;  %v8633_v50 = vpack.i.bf16 %v11500_v7, %v11465_v14 }
 0x592   :  { %v11478_v21 = vsel %vm271_vm3, %v2686_v0, %v2687_v26  ;;  %v2620_v0 = vld [vmem:[#allocation3 + $0x1a8] sm:$0xff]  ;;  %v8618_v26 = vpack.i.bf16 %v11480_v57, %v11473_v25 }
 0x593   :  { %8564 = vrot.lane.b32.xlu2 %v8563_v4, %s9468_s24  ;;  %v2611_v4 = vld [vmem:[#allocation3 + $0x160] sm:$0xff]  ;;  %3422 = vmatpush.bf16.msra.mxu0 %v8004_v32  ;;  %v2785_v55 = vrot.slane %v2620_v0, 1  ;;  %v11544_v32 = vld [vmem:[#allocation3 + $0x1b8] sm:$0xff] }
 0x594   :  { %v2802_v0 = vrot.slane %v11544_v32, 1 }
 0x596   :  { %8574 = vrot.lane.b32.xlu0 %v8573_v33, %s9470_s30  ;;  %v2776_v33 = vrot.slane %v2611_v4, 1 }
 0x597   :  { %8559 = vrot.lane.b32.xlu1 %v8558_v62, %s9470_s30  ;;  %v8603_v62 = vpack.i.bf16 %v11462_v5, %v11478_v21 }
 0x598   :  { %v2777_v46 = vsel %vm352_vm4, %v2775_v47, %v2776_v33  ;;  %v2615_v47 = vld [vmem:[#allocation3 + $0x180] sm:$0xff] }
 0x599   :  { %v3240_v48 = vpack.c.bf16 %v2780_v3, %v2777_v46  ;;  %v8608_v51 = vpack.i.bf16 %v2777_v46, %v2774_v23  ;;  %v11511_v23 = vld [vmem:[#allocation3 + $0x188] sm:$0xff]  ;;  %v2701_v16 = vrot.slane %v2615_v47, 7 }
 0x59a   :  { %v2781_v37 = vrot.slane %v11511_v23, 1  ;;  %v2702_v60 = vrot.slane %v11511_v23, 7  ;;  %v2624_v47 = vld [vmem:[#allocation3 + $0x1c8] sm:$0xff] }
 0x59b   :  { %8569 = vrot.lane.b32.xlu2 %v8568_v52, %s9469_s28  ;;  %v2698_v52 = vrot.slane %v2612_v49, 7 }
 0x59d   :  { %v11503_v22 = vsel %vm271_vm3, %v2698_v52, %v2699_v28  ;;  %v8643_v52 = vpack.i.bf16 %v2780_v3, %v2777_v46 }
 0x59e   :  { %8579 = vrot.lane.b32.xlu0 %v8578_v29, %s9469_s28  ;;  %v11515_v29 = vld [vmem:[#allocation3 + $0x1a0] sm:$0xff] }
 0x59f   :  { %8584 = vrot.lane.b32.xlu1 %v8583_v43, %s9468_s24  ;;  %v2617_v43 = vld [vmem:[#allocation3 + $0x190] sm:$0xff]  ;;  %v2784_v4 = vrot.slane %v11515_v29, 1  ;;  %v2705_v63 = vrot.slane %v11515_v29, 7 }
 0x5a0   :  { %7706 = vmatmul.msk.bf16.gmra.mxu2 %vm102_vm5, %v3237_v54  ;;  %v8623_v54 = vpack.i.bf16 %v11503_v22, %v11500_v7 }
 0x5a1   :  { %v2786_v53 = vsel %vm352_vm4, %v2784_v4, %v2785_v55  ;;  %v2621_v55 = vld [vmem:[#allocation3 + $0x1b0] sm:$0xff] }
 0x5a3   :  { %8594 = vrot.lane.b32.xlu2 %v8593_v31, %s9468_s24  ;;  %v2782_v31 = vrot.slane %v2617_v43, 1  ;;  %v8648_v43 = vpack.i.bf16 %v11515_v29, %v11511_v23 }
 0x5a5   :  { %v2783_v33 = vsel %vm352_vm4, %v2781_v37, %v2782_v31 }
 0x5a6   :  { %8604 = vrot.lane.b32.xlu0 %v8603_v62, %s9470_s30  ;;  %v2618_v62 = vld [vmem:[#allocation3 + $0x198] sm:$0xff]  ;;  %v3243_v15 = vpack.c.bf16 %v2786_v53, %v2783_v33  ;;  %v8638_v28 = vpack.i.bf16 %v2783_v33, %v2780_v3  ;;  %v2623_v3 = vld [vmem:[#allocation3 + $0x1c0] sm:$0xff] }
 0x5a7   :  { %8589 = vrot.lane.b32.xlu1 %v8588_v45, %s9470_s30  ;;  %v2704_v49 = vrot.slane %v2618_v62, 7  ;;  %v2803_v37 = vrot.slane %v2623_v3, 1 }
 0x5a9   :  { %v2804_v62 = vsel %vm352_vm4, %v2802_v0, %v2803_v37 }
 0x5ab   :  { %8599 = vrot.lane.b32.xlu2 %v8588_v45, %s9469_s28 }
 0x5ae   :  { %8609 = vrot.lane.b32.xlu0 %v8608_v51, %s9469_s28  ;;  %v11542_v51 = vsel %vm271_vm3, %v2704_v49, %v2705_v63  ;;  %v2795_v49 = vrot.slane %v11544_v32, 7  ;;  %v2812_v63 = vrot.slane %v2624_v47, 7 }
 0x5af   :  { %8614 = vrot.lane.b32.xlu1 %v8613_v9, %s9468_s24  ;;  %v11539_v9 = vsel %vm271_vm3, %v2701_v16, %v2702_v60  ;;  %v2794_v60 = vrot.slane %v2621_v55, 7 }
 0x5b0   :  { %7707 = vmatmul.msk.bf16.gmra.mxu2 %vm102_vm5, %v3240_v48  ;;  %v8653_v46 = vpack.i.bf16 %v11542_v51, %v11539_v9 }
 0x5b1   :  { %v2796_v0 = vsel %vm271_vm3, %v2794_v60, %v2795_v49 }
 0x5b2   :  { %v8683_v60 = vpack.i.bf16 %v2796_v0, %v11542_v51 }
 0x5b3   :  { %8624 = vrot.lane.b32.xlu2 %v8623_v54, %s9468_s24  ;;  %v2626_v54 = vld [vmem:[#allocation3 + $0x1d8] sm:$0xff] }
 0x5b4   :  { %v2821_v31 = vrot.slane %v2626_v54, 1  ;;  %v2567_v54 = vld [vmem:[#allocation3] sm:$0xff] }
 0x5b5   :  { %v11524_v45 = vpop.permute.xlu2 %8454 }
 0x5b6   :  { %8634 = vrot.lane.b32.xlu0 %v8633_v50, %s9470_s30  ;;  %v2820_v50 = vrot.slane %v2625_v24, 1  ;;  %v8457_v47 = vunpack.i.h.bf16 %v11524_v45 }
 0x5b7   :  { %8619 = vrot.lane.b32.xlu1 %v8618_v26, %s9470_s30 }
 0x5b8   :  { %v2822_v16 = vsel %vm352_vm4, %v2820_v50, %v2821_v31  ;;  %v2659_v31 = vrot.slane %v2567_v54, 7 }
 0x5bb   :  { %8629 = vrot.lane.b32.xlu2 %v8618_v26, %s9469_s28  ;;  %v8663_v26 = vpack.i.bf16 %v11539_v9, %v11503_v22 }
 0x5bd   :  { %v11533_v48 = vpop.permute.xlu2 %8474 }
 0x5be   :  { %8639 = vrot.lane.b32.xlu0 %v8638_v28, %s9469_s28  ;;  %v8673_v28 = vpack.i.bf16 %v2786_v53, %v2783_v33  ;;  %v8476_v54 = vunpack.i.l.bf16 %v11533_v48 }
 0x5bf   :  { %8644 = vrot.lane.b32.xlu1 %v8643_v52, %s9468_s24  ;;  %v3246_v52 = vpack.c.bf16 %v2822_v16, %v2804_v62  ;;  %v8688_v16 = vpack.i.bf16 %v2625_v24, %v11544_v32 }
 0x5c0   :  { %7708 = vmatmul.msk.bf16.gmra.mxu2 %vm102_vm5, %v3243_v15  ;;  %v2813_v15 = vrot.slane %v2625_v24, 7  ;;  %v3128_v24 = vsel %vm102_vm5, %v11334_v8, %v8457_v47 }
 0x5c3   :  { %8654 = vrot.lane.b32.xlu2 %v8653_v46, %s9468_s24  ;;  %v8668_v46 = vpack.i.bf16 %v2804_v62, %v2786_v53  ;;  %v8456_v62 = vunpack.i.l.bf16 %v11524_v45 }
 0x5c5   :  { %v11554_v4 = vpop.permute.xlu2 %8479 }
 0x5c6   :  { %8664 = vrot.lane.b32.xlu0 %v8663_v26, %s9470_s30  ;;  %v2814_v26 = vsel %vm271_vm3, %v2812_v63, %v2813_v15 }
 0x5c7   :  { %8649 = vrot.lane.b32.xlu1 %v8648_v43, %s9470_s30  ;;  %v8678_v33 = vpack.i.bf16 %v2814_v26, %v2796_v0 }
 0x5cb   :  { %8659 = vrot.lane.b32.xlu2 %v8648_v43, %s9469_s28  ;;  %v2660_v43 = vrot.slane %v11275_v10, 7 }
 0x5cd   :  { %v11562_v3 = vpop.permute.xlu2 %8504  ;;  %v2661_v49 = vsel %vm271_vm3, %v2659_v31, %v2660_v43 }
 0x5ce   :  { %8669 = vrot.lane.b32.xlu0 %v8668_v46, %s9469_s28  ;;  %v3127_v45 = vsel %vm102_vm5, %v2661_v49, %v8456_v62  ;;  %v8477_v46 = vunpack.i.h.bf16 %v11533_v48 }
 0x5cf   :  { %8674 = vrot.lane.b32.xlu1 %v8673_v28, %s9468_s24 }
 0x5d0   :  { %7709 = vmatmul.msk.bf16.gmra.mxu2 %vm102_vm5, %v3246_v52  ;;  %v8470_v37 = vpop.permute.xlu0 %8469 }
 0x5d1   :  { %v8460_v50 = vpop.permute.xlu1 %8459  ;;  %v8472_v63 = vunpack.i.h.bf16 %v8470_v37  ;;  %v8471_v15 = vunpack.i.l.bf16 %v8470_v37 }
 0x5d2   :  { %v8462_v53 = vunpack.i.h.bf16 %v8460_v50  ;;  %v8461_v55 = vunpack.i.l.bf16 %v8460_v50 }
 0x5d3   :  { %8679 = vrot.lane.b32.xlu2 %v8678_v33, %s9468_s24  ;;  %v3143_v31 = vsel %vm57_vm0, %v3127_v45, %v8471_v15 }
 0x5d4   :  { %v3176_v10 = vsel %vm102_vm5, %v11289_v2, %v8462_v53  ;;  %v3175_v52 = vsel %vm102_vm5, %v11296_v11, %v8461_v55  ;;  %v3144_v11 = vsel %vm57_vm0, %v3128_v24, %v8472_v63 }
 0x5d5   :  { %v11582_v28 = vpop.permute.xlu2 %8509  ;;  %v3191_v33 = vsel %vm57_vm0, %v3175_v52, %v8476_v54  ;;  %v3192_v53 = vsel %vm57_vm0, %v3176_v10, %v8477_v46  ;;  %v8482_v52 = vunpack.i.h.bf16 %v11554_v4  ;;  %v8481_v10 = vunpack.i.l.bf16 %v11554_v4 }
 0x5d6   :  { %8684 = vrot.lane.b32.xlu0 %v8683_v60, %s9470_s30 }
 0x5d7   :  { %8689 = vrot.lane.b32.xlu1 %v8688_v16, %s9470_s30 }
 0x5d8   :  { %v8485_v26 = vpop.permute.xlu0 %8484 }
 0x5d9   :  { %v8465_v0 = vpop.permute.xlu1 %8464  ;;  %v8487_v43 = vunpack.i.h.bf16 %v8485_v26  ;;  %v8486_v2 = vunpack.i.l.bf16 %v8485_v26  ;;  %v3130_v26 = vsel %vm102_vm5, %v11329_v18, %v8482_v52  ;;  %v8512_v52 = vunpack.i.h.bf16 %v11582_v28 }
 0x5da   :  { %v8467_v37 = vunpack.i.h.bf16 %v8465_v0  ;;  %v8466_v50 = vunpack.i.l.bf16 %v8465_v0 }
 0x5db   :  { %v3159_v48 = vsel %vm1888_vm8, %v3143_v31, %v8486_v2  ;;  %v3160_v47 = vsel %vm1888_vm8, %v3144_v11, %v8487_v43  ;;  %v8506_v43 = vunpack.i.l.bf16 %v11562_v3 }
 0x5dc   :  { %v3207_v8 = vsel %vm1888_vm8, %v3191_v33, %v8466_v50  ;;  %v3208_v55 = vsel %vm1888_vm8, %v3192_v53, %v8467_v37  ;;  %v3223_v16 = vpack.c.bf16 %v3160_v47, %v3159_v48  ;;  %v3129_v37 = vsel %vm102_vm5, %v11326_v36, %v8481_v10 }
 0x5dd   :  { %v3224_v62 = vpack.c.bf16 %v3208_v55, %v3207_v8  ;;  %v8535_v15 = vpop.permute.xlu2 %8534  ;;  %v8507_v50 = vunpack.i.h.bf16 %v11562_v3  ;;  %v8511_v10 = vunpack.i.l.bf16 %v11582_v28 }
 0x5de   :  { %3423 = vmatmul.bf16.vlgmr.msra.gmra.mxu0 %v3223_v16 }
 0x5df   :  { %3472 = vmatmul.bf16.vlgmr.msra.gmra.mxu1 %v3224_v62 }
 0x5e0   :  { %v8490_v49 = vpop.permute.xlu0 %8489 }
 0x5e1   :  { %v8495_v60 = vpop.permute.xlu1 %8494  ;;  %v8492_v63 = vunpack.i.h.bf16 %v8490_v49  ;;  %v8491_v45 = vunpack.i.l.bf16 %v8490_v49 }
 0x5e2   :  { %v8497_v24 = vunpack.i.h.bf16 %v8495_v60  ;;  %v8496_v46 = vunpack.i.l.bf16 %v8495_v60 }
 0x5e3   :  { %v3178_v54 = vsel %vm102_vm5, %v11336_v61, %v8492_v63  ;;  %v3177_v0 = vsel %vm102_vm5, %v11292_v17, %v8491_v45 }
 0x5e4   :  { %v3145_v61 = vsel %vm57_vm0, %v3129_v37, %v8496_v46  ;;  %v3146_v17 = vsel %vm57_vm0, %v3130_v26, %v8497_v24  ;;  %v3193_v8 = vsel %vm57_vm0, %v3177_v0, %v8506_v43  ;;  %v3194_v18 = vsel %vm57_vm0, %v3178_v54, %v8507_v50 }
 0x5e5   :  { %v8540_v55 = vpop.permute.xlu2 %8539  ;;  %v3132_v37 = vsel %vm102_vm5, %v11367_v56, %v8512_v52  ;;  %v3131_v50 = vsel %vm102_vm5, %v11364_v41, %v8511_v10  ;;  %v8537_v43 = vunpack.i.h.bf16 %v8535_v15 }
 0x5e8   :  { %v8515_v4 = vpop.permute.xlu0 %8514 }
 0x5e9   :  { %v8500_v2 = vpop.permute.xlu1 %8499  ;;  %v8517_v33 = vunpack.i.h.bf16 %v8515_v4  ;;  %v8516_v53 = vunpack.i.l.bf16 %v8515_v4 }
 0x5ea   :  { %v8502_v31 = vunpack.i.h.bf16 %v8500_v2  ;;  %v8501_v11 = vunpack.i.l.bf16 %v8500_v2  ;;  %v8536_v2 = vunpack.i.l.bf16 %v8535_v15 }
 0x5eb   :  { %v3161_v36 = vsel %vm1888_vm8, %v3145_v61, %v8516_v53  ;;  %v3162_v48 = vsel %vm1888_vm8, %v3146_v17, %v8517_v33 }
 0x5ec   :  { %v3209_v3 = vsel %vm1888_vm8, %v3193_v8, %v8501_v11  ;;  %v3210_v47 = vsel %vm1888_vm8, %v3194_v18, %v8502_v31  ;;  %v3226_v62 = vpack.c.bf16 %v3162_v48, %v3161_v36 }
 0x5ed   :  { %v3227_v16 = vpack.c.bf16 %v3210_v47, %v3209_v3  ;;  %v8565_v24 = vpop.permute.xlu2 %8564 }
 0x5ee   :  { %3428 = vmatmul.bf16.gmra.mxu0 %v3226_v62 }
 0x5ef   :  { %3477 = vmatmul.bf16.gmra.mxu1 %v3227_v16 }
 0x5f0   :  { %v8520_v49 = vpop.permute.xlu0 %8519 }
 0x5f1   :  { %v8525_v60 = vpop.permute.xlu1 %8524  ;;  %v8522_v63 = vunpack.i.h.bf16 %v8520_v49  ;;  %v8521_v45 = vunpack.i.l.bf16 %v8520_v49  ;;  %v8541_v49 = vunpack.i.l.bf16 %v8540_v55 }
 0x5f2   :  { %v8527_v46 = vunpack.i.h.bf16 %v8525_v60  ;;  %v8526_v54 = vunpack.i.l.bf16 %v8525_v60  ;;  %v8542_v60 = vunpack.i.h.bf16 %v8540_v55 }
 0x5f3   :  { %v3180_v0 = vsel %vm102_vm5, %v11371_v40, %v8522_v63  ;;  %v3179_v26 = vsel %vm102_vm5, %v11338_v19, %v8521_v45 }
 0x5f4   :  { %v3147_v61 = vsel %vm57_vm0, %v3131_v50, %v8526_v54  ;;  %v3148_v40 = vsel %vm57_vm0, %v3132_v37, %v8527_v46  ;;  %v3195_v19 = vsel %vm57_vm0, %v3179_v26, %v8536_v2  ;;  %v3196_v17 = vsel %vm57_vm0, %v3180_v0, %v8537_v43 }
 0x5f5   :  { %v8570_v48 = vpop.permute.xlu2 %8569  ;;  %v3134_v46 = vsel %vm102_vm5, %v11402_v1, %v8542_v60  ;;  %v3133_v54 = vsel %vm102_vm5, %v11399_v12, %v8541_v49  ;;  %v8567_v0 = vunpack.i.h.bf16 %v8565_v24  ;;  %v8566_v26 = vunpack.i.l.bf16 %v8565_v24 }
 0x5f8   :  { %v8545_v31 = vpop.permute.xlu0 %8544 }
 0x5f9   :  { %v8530_v4 = vpop.permute.xlu1 %8529  ;;  %v8547_v33 = vunpack.i.h.bf16 %v8545_v31  ;;  %v8546_v53 = vunpack.i.l.bf16 %v8545_v31 }
 0x5fa   :  { %v8532_v28 = vunpack.i.h.bf16 %v8530_v4  ;;  %v8531_v11 = vunpack.i.l.bf16 %v8530_v4 }
 0x5fb   :  { %v3163_v56 = vsel %vm1888_vm8, %v3147_v61, %v8546_v53  ;;  %v3164_v41 = vsel %vm1888_vm8, %v3148_v40, %v8547_v33  ;;  %v2597_v40 = vld [vmem:[#allocation3 + $0xf0] sm:$0xff] }
 0x5fc   :  { %v3211_v15 = vsel %vm1888_vm8, %v3195_v19, %v8531_v11  ;;  %v3212_v8 = vsel %vm1888_vm8, %v3196_v17, %v8532_v28  ;;  %v3229_v18 = vpack.c.bf16 %v3164_v41, %v3163_v56  ;;  %v2684_v56 = vrot.slane %v11431_v35, 7 }
 0x5fd   :  { %v3230_v36 = vpack.c.bf16 %v3212_v8, %v3211_v15  ;;  %v8595_v43 = vpop.permute.xlu2 %8594  ;;  %v2683_v41 = vrot.slane %v2597_v40, 7 }
 0x5fe   :  { %3433 = vmatmul.bf16.gmra.mxu0 %v3229_v18 }
 0x5ff   :  { %3482 = vmatmul.bf16.gmra.mxu1 %v3230_v36  ;;  %v8572_v36 = vunpack.i.h.bf16 %v8570_v48 }
 0x600   :  { %v8550_v47 = vpop.permute.xlu0 %8549 }
 0x601   :  { %v8555_v3 = vpop.permute.xlu1 %8554  ;;  %v8552_v62 = vunpack.i.h.bf16 %v8550_v47  ;;  %v8551_v16 = vunpack.i.l.bf16 %v8550_v47  ;;  %v2685_v47 = vsel %vm271_vm3, %v2683_v41, %v2684_v56  ;;  %v3136_v35 = vsel %vm102_vm5, %v11478_v21, %v8572_v36 }
 0x602   :  { %v8557_v63 = vunpack.i.h.bf16 %v8555_v3  ;;  %v8556_v45 = vunpack.i.l.bf16 %v8555_v3  ;;  %v8571_v3 = vunpack.i.l.bf16 %v8570_v48 }
 0x603   :  { %v3182_v52 = vsel %vm102_vm5, %v11406_v34, %v8552_v62  ;;  %v3181_v10 = vsel %vm102_vm5, %v11373_v59, %v8551_v16 }
 0x604   :  { %v3149_v34 = vsel %vm57_vm0, %v3133_v54, %v8556_v45  ;;  %v3150_v28 = vsel %vm57_vm0, %v3134_v46, %v8557_v63  ;;  %v3197_v59 = vsel %vm57_vm0, %v3181_v10, %v8566_v26  ;;  %v3198_v1 = vsel %vm57_vm0, %v3182_v52, %v8567_v0 }
 0x605   :  { %v8600_v15 = vpop.permute.xlu2 %8599  ;;  %v3135_v63 = vsel %vm102_vm5, %v2685_v47, %v8571_v3  ;;  %v8597_v45 = vunpack.i.h.bf16 %v8595_v43  ;;  %v8596_v52 = vunpack.i.l.bf16 %v8595_v43 }
 0x608   :  { %v8575_v50 = vpop.permute.xlu0 %8574 }
 0x609   :  { %v8560_v37 = vpop.permute.xlu1 %8559  ;;  %v8577_v4 = vunpack.i.h.bf16 %v8575_v50  ;;  %v8576_v31 = vunpack.i.l.bf16 %v8575_v50 }
 0x60a   :  { %v8562_v55 = vunpack.i.h.bf16 %v8560_v37  ;;  %v8561_v2 = vunpack.i.l.bf16 %v8560_v37 }
 0x60b   :  { %v3165_v11 = vsel %vm1888_vm8, %v3149_v34, %v8576_v31  ;;  %v3166_v12 = vsel %vm1888_vm8, %v3150_v28, %v8577_v4 }
 0x60c   :  { %v3213_v24 = vsel %vm1888_vm8, %v3197_v59, %v8561_v2  ;;  %v3214_v33 = vsel %vm1888_vm8, %v3198_v1, %v8562_v55  ;;  %v3232_v53 = vpack.c.bf16 %v3166_v12, %v3165_v11  ;;  %v8602_v12 = vunpack.i.h.bf16 %v8600_v15 }
 0x60d   :  { %v3233_v61 = vpack.c.bf16 %v3214_v33, %v3213_v24  ;;  %v8625_v34 = vpop.permute.xlu2 %8624  ;;  %v8601_v24 = vunpack.i.l.bf16 %v8600_v15 }
 0x60e   :  { %3438 = vmatmul.bf16.gmra.mxu0 %v3232_v53  ;;  %v8627_v41 = vunpack.i.h.bf16 %v8625_v34 }
 0x60f   :  { %3487 = vmatmul.bf16.gmra.mxu1 %v3233_v61  ;;  %v3137_v56 = vsel %vm102_vm5, %v11462_v5, %v8601_v24 }
 0x610   :  { %v8580_v17 = vpop.permute.xlu0 %8579 }
 0x611   :  { %v8585_v19 = vpop.permute.xlu1 %8584  ;;  %v8582_v8 = vunpack.i.h.bf16 %v8580_v17  ;;  %v8581_v18 = vunpack.i.l.bf16 %v8580_v17  ;;  %v3138_v17 = vsel %vm102_vm5, %v11465_v14, %v8602_v12 }
 0x612   :  { %v8587_v62 = vunpack.i.h.bf16 %v8585_v19  ;;  %v8586_v16 = vunpack.i.l.bf16 %v8585_v19 }
 0x613   :  { %v3184_v60 = vsel %vm102_vm5, %v11433_v38, %v8582_v8  ;;  %v3183_v49 = vsel %vm102_vm5, %v11437_v58, %v8581_v18  ;;  %v8626_v8 = vunpack.i.l.bf16 %v8625_v34 }
 0x614   :  { %v3151_v37 = vsel %vm57_vm0, %v3135_v63, %v8586_v16  ;;  %v3152_v38 = vsel %vm57_vm0, %v3136_v35, %v8587_v62  ;;  %v3199_v50 = vsel %vm57_vm0, %v3183_v49, %v8596_v52  ;;  %v3200_v58 = vsel %vm57_vm0, %v3184_v60, %v8597_v45 }
 0x615   :  { %v8630_v61 = vpop.permute.xlu2 %8629 }
 0x618   :  { %v8605_v46 = vpop.permute.xlu0 %8604 }
 0x619   :  { %v8590_v10 = vpop.permute.xlu1 %8589  ;;  %v8607_v0 = vunpack.i.h.bf16 %v8605_v46  ;;  %v8606_v26 = vunpack.i.l.bf16 %v8605_v46 }
 0x61a   :  { %v8592_v48 = vunpack.i.h.bf16 %v8590_v10  ;;  %v8591_v54 = vunpack.i.l.bf16 %v8590_v10 }
 0x61b   :  { %v3167_v55 = vsel %vm1888_vm8, %v3151_v37, %v8606_v26  ;;  %v3168_v21 = vsel %vm1888_vm8, %v3152_v38, %v8607_v0  ;;  %v8632_v0 = vunpack.i.h.bf16 %v8630_v61  ;;  %v8631_v26 = vunpack.i.l.bf16 %v8630_v61 }
 0x61c   :  { %v3215_v43 = vsel %vm1888_vm8, %v3199_v50, %v8591_v54  ;;  %v3216_v2 = vsel %vm1888_vm8, %v3200_v58, %v8592_v48  ;;  %v3235_v4 = vpack.c.bf16 %v3168_v21, %v3167_v55 }
 0x61d   :  { %v3236_v31 = vpack.c.bf16 %v3216_v2, %v3215_v43  ;;  %v8655_v46 = vpop.permute.xlu2 %8654  ;;  %v3140_v55 = vsel %vm102_vm5, %v11503_v22, %v8632_v0  ;;  %v3139_v21 = vsel %vm102_vm5, %v11500_v7, %v8631_v26 }
 0x61e   :  { %3443 = vmatmul.bf16.gmra.mxu0 %v3235_v4  ;;  %v8657_v43 = vunpack.i.h.bf16 %v8655_v46  ;;  %v8656_v2 = vunpack.i.l.bf16 %v8655_v46 }
 0x61f   :  { %3492 = vmatmul.bf16.gmra.mxu1 %v3236_v31 }
 0x620   :  { %v8610_v59 = vpop.permute.xlu0 %8609 }
 0x621   :  { %v8615_v28 = vpop.permute.xlu1 %8614  ;;  %v8612_v1 = vunpack.i.h.bf16 %v8610_v59  ;;  %v8611_v11 = vunpack.i.l.bf16 %v8610_v59 }
 0x622   :  { %v8617_v33 = vunpack.i.h.bf16 %v8615_v28  ;;  %v8616_v53 = vunpack.i.l.bf16 %v8615_v28 }
 0x623   :  { %v3186_v40 = vsel %vm102_vm5, %v11473_v25, %v8612_v1  ;;  %v3185_v19 = vsel %vm102_vm5, %v11435_v39, %v8611_v11 }
 0x624   :  { %v3153_v16 = vsel %vm57_vm0, %v3137_v56, %v8616_v53  ;;  %v3154_v25 = vsel %vm57_vm0, %v3138_v17, %v8617_v33  ;;  %v3201_v39 = vsel %vm57_vm0, %v3185_v19, %v8626_v8  ;;  %v3202_v60 = vsel %vm57_vm0, %v3186_v40, %v8627_v41  ;;  %v11700_v19 = vpop.f32.mrf.mxu2 }
 0x625   :  { %v8660_v22 = vpop.permute.xlu2 %8659 }
 0x628   :  { %v8635_v36 = vpop.permute.xlu0 %8634 }
 0x629   :  { %v8620_v18 = vpop.permute.xlu1 %8619  ;;  %v8637_v47 = vunpack.i.h.bf16 %v8635_v36  ;;  %v8636_v62 = vunpack.i.l.bf16 %v8635_v36  ;;  %v8661_v36 = vunpack.i.l.bf16 %v8660_v22 }
 0x62a   :  { %v8622_v15 = vunpack.i.h.bf16 %v8620_v18  ;;  %v8621_v3 = vunpack.i.l.bf16 %v8620_v18  ;;  %v8662_v18 = vunpack.i.h.bf16 %v8660_v22 }
 0x62b   :  { %v3169_v14 = vsel %vm1888_vm8, %v3153_v16, %v8636_v62  ;;  %v3170_v5 = vsel %vm1888_vm8, %v3154_v25, %v8637_v47 }
 0x62c   :  { %v3217_v49 = vsel %vm1888_vm8, %v3201_v39, %v8621_v3  ;;  %v3218_v63 = vsel %vm1888_vm8, %v3202_v60, %v8622_v15  ;;  %v3238_v35 = vpack.c.bf16 %v3170_v5, %v3169_v14  ;;  %v11702_v62 = vpop.f32.mrf.mxu2  ;;  %v3142_v39 = vsel %vm102_vm5, %v11542_v51, %v8662_v18 }
 0x62d   :  { %v3239_v45 = vpack.c.bf16 %v3218_v63, %v3217_v49  ;;  %v8680_v15 = vpop.permute.xlu2 %8679  ;;  %v3141_v60 = vsel %vm102_vm5, %v11539_v9, %v8661_v36 }
 0x62e   :  { %3448 = vmatmul.bf16.gmra.mxu0 %v3238_v35  ;;  %v8682_v14 = vunpack.i.h.bf16 %v8680_v15  ;;  %v8681_v5 = vunpack.i.l.bf16 %v8680_v15 }
 0x62f   :  { %3497 = vmatmul.bf16.gmra.mxu1 %v3239_v45 }
 0x630   :  { %v8640_v10 = vpop.permute.xlu0 %8639 }
 0x631   :  { %v8645_v52 = vpop.permute.xlu1 %8644  ;;  %v8642_v48 = vunpack.i.h.bf16 %v8640_v10  ;;  %v8641_v54 = vunpack.i.l.bf16 %v8640_v10 }
 0x632   :  { %v8647_v37 = vunpack.i.h.bf16 %v8645_v52  ;;  %v8646_v38 = vunpack.i.l.bf16 %v8645_v52 }
 0x633   :  { %v3188_v50 = vsel %vm102_vm5, %v11511_v23, %v8642_v48  ;;  %v3187_v58 = vsel %vm102_vm5, %v11480_v57, %v8641_v54 }
 0x634   :  { %v3155_v11 = vsel %vm57_vm0, %v3139_v21, %v8646_v38  ;;  %v3156_v23 = vsel %vm57_vm0, %v3140_v55, %v8647_v37  ;;  %v3203_v57 = vsel %vm57_vm0, %v3187_v58, %v8656_v2  ;;  %v3204_v12 = vsel %vm57_vm0, %v3188_v50, %v8657_v43  ;;  %v3527_v38 = vpop.f32.mrf.mxu2 }
 0x638   :  { %v8665_v31 = vpop.permute.xlu0 %8664 }
 0x639   :  { %v8650_v4 = vpop.permute.xlu1 %8649  ;;  %v8667_v59 = vunpack.i.h.bf16 %v8665_v31  ;;  %v8666_v1 = vunpack.i.l.bf16 %v8665_v31 }
 0x63a   :  { %v8652_v34 = vunpack.i.h.bf16 %v8650_v4  ;;  %v8651_v28 = vunpack.i.l.bf16 %v8650_v4 }
 0x63b   :  { %v3171_v24 = vsel %vm1888_vm8, %v3155_v11, %v8666_v1  ;;  %v3172_v7 = vsel %vm1888_vm8, %v3156_v23, %v8667_v59 }
 0x63c   :  { %v3219_v33 = vsel %vm1888_vm8, %v3203_v57, %v8651_v28  ;;  %v3220_v53 = vsel %vm1888_vm8, %v3204_v12, %v8652_v34  ;;  %v3241_v61 = vpack.c.bf16 %v3172_v7, %v3171_v24  ;;  %v3529_v55 = vpop.f32.mrf.mxu2 }
 0x63d   :  { %v3242_v40 = vpack.c.bf16 %v3220_v53, %v3219_v33 }
 0x63e   :  { %3453 = vmatmul.bf16.gmra.mxu0 %v3241_v61 }
 0x63f   :  { %3502 = vmatmul.bf16.gmra.mxu1 %v3242_v40 }
 0x640   :  { %v8670_v56 = vpop.permute.xlu0 %8669 }
 0x641   :  { %v8675_v17 = vpop.permute.xlu1 %8674  ;;  %v8672_v41 = vunpack.i.h.bf16 %v8670_v56  ;;  %v8671_v8 = vunpack.i.l.bf16 %v8670_v56 }
 0x642   :  { %v8677_v3 = vunpack.i.h.bf16 %v8675_v17  ;;  %v8676_v47 = vunpack.i.l.bf16 %v8675_v17 }
 0x643   :  { %v3190_v16 = vsel %vm102_vm5, %v11544_v32, %v8672_v41  ;;  %v3189_v25 = vsel %vm102_vm5, %v11515_v29, %v8671_v8 }
 0x644   :  { %v3157_v46 = vsel %vm57_vm0, %v3141_v60, %v8676_v47  ;;  %v3158_v32 = vsel %vm57_vm0, %v3142_v39, %v8677_v3  ;;  %v3205_v29 = vsel %vm57_vm0, %v3189_v25, %v8681_v5  ;;  %v3206_v48 = vsel %vm57_vm0, %v3190_v16, %v8682_v14  ;;  %v3532_v4 = vpop.f32.mrf.mxu2 }
 0x648   :  { %v8685_v63 = vpop.permute.xlu0 %8684 }
 0x649   :  { %v8690_v49 = vpop.permute.xlu1 %8689  ;;  %v8687_v52 = vunpack.i.h.bf16 %v8685_v63  ;;  %v8686_v10 = vunpack.i.l.bf16 %v8685_v63 }
 0x64a   :  { %v8692_v35 = vunpack.i.h.bf16 %v8690_v49  ;;  %v8691_v45 = vunpack.i.l.bf16 %v8690_v49 }
 0x64b   :  { %v3173_v51 = vsel %vm1888_vm8, %v3157_v46, %v8686_v10  ;;  %v3174_v9 = vsel %vm1888_vm8, %v3158_v32, %v8687_v52 }
 0x64c   :  { %v3221_v54 = vsel %vm1888_vm8, %v3205_v29, %v8691_v45  ;;  %v3222_v0 = vsel %vm1888_vm8, %v3206_v48, %v8692_v35  ;;  %v3244_v26 = vpack.c.bf16 %v3174_v9, %v3173_v51  ;;  %v3534_v59 = vpop.f32.mrf.mxu2 }
 0x64d   :  { %v3245_v37 = vpack.c.bf16 %v3222_v0, %v3221_v54 }
 0x64e   :  { %3458 = vmatmul.bf16.gmra.mxu0 %v3244_v26 }
 0x64f   :  { %3507 = vmatmul.bf16.gmra.mxu1 %v3245_v37 }
 0x654   :  { %v3537_v23 = vpop.f32.mrf.mxu2 }
 0x65b   :  { %v3424_v50 = vpop.f32.mrf.mxu0 }
 0x65c   :  { %v3473_v58 = vpop.f32.mrf.mxu1  ;;  %v3539_v33 = vpop.f32.mrf.mxu2 }
 0x65d   :  { %v3474_v21 = vadd.f32 %v3473_v58, %v3424_v50 }
 0x65f   :  { %v11726_v46 = vadd.f32 %v11700_v19, %v3474_v21 }
 0x661   :  { %v3564_v54 = vsel %vm102_vm5, %v11726_v46, 0.0 }
 0x663   :  { %v3426_v43 = vpop.f32.mrf.mxu0 }
 0x664   :  { %v3475_v2 = vpop.f32.mrf.mxu1  ;;  %v3542_v17 = vpop.f32.mrf.mxu2 }
 0x665   :  { %v3476_v63 = vadd.f32 %v3475_v2, %v3426_v43 }
 0x667   :  { %v11723_v35 = vadd.f32 %v11702_v62, %v3476_v63 }
 0x669   :  { %v3565_v29 = vsel %vm102_vm5, %v11723_v35, 0.0 }
 0x66a   :  { %v3566_v26 = vadd.f32 %v3565_v29, %v3564_v54 }
 0x66b   :  { %v3429_v31 = vpop.f32.mrf.mxu0 }
 0x66c   :  { %v3478_v34 = vpop.f32.mrf.mxu1  ;;  %v3544_v18 = vpop.f32.mrf.mxu2 }
 0x66d   :  { %v3479_v28 = vadd.f32 %v3478_v34, %v3429_v31 }
 0x66f   :  { %v11728_v32 = vadd.f32 %v3527_v38, %v3479_v28 }
 0x671   :  { %v3567_v62 = vsel %vm102_vm5, %v11728_v32, 0.0 }
 0x672   :  { %v3568_v58 = vadd.f32 %v3567_v62, %v3566_v26 }
 0x673   :  { %v3431_v1 = vpop.f32.mrf.mxu0 }
 0x674   :  { %v3480_v11 = vpop.f32.mrf.mxu1  ;;  %v3547_v3 = vpop.f32.mrf.mxu2 }
 0x675   :  { %v3481_v45 = vadd.f32 %v3480_v11, %v3431_v1 }
 0x677   :  { %v11732_v48 = vadd.f32 %v3529_v55, %v3481_v45 }
 0x679   :  { %v3569_v19 = vsel %vm102_vm5, %v11732_v48, 0.0 }
 0x67a   :  { %v3570_v34 = vadd.f32 %v3569_v19, %v3568_v58 }
 0x67b   :  { %v3434_v57 = vpop.f32.mrf.mxu0 }
 0x67c   :  { %v3483_v12 = vpop.f32.mrf.mxu1  ;;  %v3549_v60 = vpop.f32.mrf.mxu2 }
 0x67d   :  { %v3484_v22 = vadd.f32 %v3483_v12, %v3434_v57 }
 0x67f   :  { %v11738_v0 = vadd.f32 %v3532_v4, %v3484_v22 }
 0x681   :  { %v3571_v43 = vsel %vm102_vm5, %v11738_v0, 0.0 }
 0x682   :  { %v3572_v11 = vadd.f32 %v3571_v43, %v3570_v34 }
 0x683   :  { %v3436_v24 = vpop.f32.mrf.mxu0 }
 0x684   :  { %v3485_v7 = vpop.f32.mrf.mxu1  ;;  %v3552_v49 = vpop.f32.mrf.mxu2 }
 0x685   :  { %v3486_v51 = vadd.f32 %v3485_v7, %v3436_v24 }
 0x687   :  { %v11742_v37 = vadd.f32 %v3534_v59, %v3486_v51 }
 0x689   :  { %v3573_v4 = vsel %vm102_vm5, %v11742_v37, 0.0 }
 0x68a   :  { %v3574_v24 = vadd.f32 %v3573_v4, %v3572_v11 }
 0x68b   :  { %v3439_v53 = vpop.f32.mrf.mxu0 }
 0x68c   :  { %v3488_v61 = vpop.f32.mrf.mxu1  ;;  %v3554_v9 = vpop.f32.mrf.mxu2 }
 0x68d   :  { %v3489_v40 = vadd.f32 %v3488_v61, %v3439_v53 }
 0x68f   :  { %v11720_v56 = vadd.f32 %v3537_v23, %v3489_v40 }
 0x691   :  { %v3575_v23 = vsel %vm102_vm5, %v11720_v56, 0.0 }
 0x693   :  { %v3441_v41 = vpop.f32.mrf.mxu0 }
 0x694   :  { %v3490_v8 = vpop.f32.mrf.mxu1  ;;  %v3557_v7 = vpop.f32.mrf.mxu2 }
 0x695   :  { %v3491_v38 = vadd.f32 %v3490_v8, %v3441_v41  ;;  %v3576_v41 = vadd.f32 %v3575_v23, %v3574_v24 }
 0x697   :  { %v11748_v28 = vadd.f32 %v3539_v33, %v3491_v38 }
 0x699   :  { %v3577_v53 = vsel %vm102_vm5, %v11748_v28, 0.0 }
 0x69b   :  { %v3444_v36 = vpop.f32.mrf.mxu0 }
 0x69c   :  { %v3493_v15 = vpop.f32.mrf.mxu1 }
 0x69d   :  { %v3494_v2 = vadd.f32 %v3493_v15, %v3444_v36 }
 0x69f   :  { %v11754_v57 = vadd.f32 %v3542_v17, %v3494_v2 }
 0x6a1   :  { %v3585_v17 = vsel %vm102_vm5, %v11754_v57, 0.0 }
 0x6a3   :  { %v3446_v47 = vpop.f32.mrf.mxu0 }
 0x6a4   :  { %v3495_v16 = vpop.f32.mrf.mxu1 }
 0x6a5   :  { %v3496_v50 = vadd.f32 %v3495_v16, %v3446_v47  ;;  %v3578_v47 = vadd.f32 %v3577_v53, %v3576_v41 }
 0x6a7   :  { %v11750_v1 = vadd.f32 %v3544_v18, %v3496_v50  ;;  %v3579_v63 = vrot.slane %v3578_v47, 4 }
 0x6a9   :  { %v3586_v33 = vsel %vm102_vm5, %v11750_v1, 0.0  ;;  %v3580_v62 = vadd.f32 %v3579_v63, %v3578_v47 }
 0x6aa   :  { %v3587_v16 = vadd.f32 %v3586_v33, %v3585_v17 }
 0x6ab   :  { %v3449_v25 = vpop.f32.mrf.mxu0  ;;  %v3581_v58 = vrot.slane %v3580_v62, 2 }
 0x6ac   :  { %v3498_v39 = vpop.f32.mrf.mxu1 }
 0x6ad   :  { %v3499_v31 = vadd.f32 %v3498_v39, %v3449_v25  ;;  %v3582_v2 = vadd.f32 %v3581_v58, %v3580_v62 }
 0x6af   :  { %v11756_v12 = vadd.f32 %v3547_v3, %v3499_v31  ;;  %v3583_v34 = vrot.slane %v3582_v2, 1 }
 0x6b1   :  { %v3588_v36 = vsel %vm102_vm5, %v11756_v12, 0.0  ;;  %v3584_v11 = vadd.f32 %v3583_v34, %v3582_v2 }
 0x6b3   :  { %v3451_v14 = vpop.f32.mrf.mxu0 }
 0x6b4   :  { %v3500_v5 = vpop.f32.mrf.mxu1 }
 0x6b5   :  { %v3501_v59 = vadd.f32 %v3500_v5, %v3451_v14 }
 0x6b7   :  { %v11762_v61 = vadd.f32 %v3549_v60, %v3501_v59  ;;  %v3589_v60 = vadd.f32 %v3588_v36, %v3587_v16 }
 0x6b9   :  { %v3590_v25 = vsel %vm102_vm5, %v11762_v61, 0.0 }
 0x6ba   :  { %v3591_v45 = vadd.f32 %v3590_v25, %v3589_v60 }
 0x6bb   :  { %v3454_v52 = vpop.f32.mrf.mxu0 }
 0x6bc   :  { %v3503_v10 = vpop.f32.mrf.mxu1 }
 0x6bd   :  { %v3504_v22 = vadd.f32 %v3503_v10, %v3454_v52 }
 0x6bf   :  { %v11768_v15 = vadd.f32 %v3552_v49, %v3504_v22 }
 0x6c1   :  { %v3592_v14 = vsel %vm102_vm5, %v11768_v15, 0.0 }
 0x6c2   :  { %v3593_v52 = vadd.f32 %v3592_v14, %v3591_v45 }
 0x6c3   :  { %v3456_v55 = vpop.f32.mrf.mxu0 }
 0x6c4   :  { %v3505_v21 = vpop.f32.mrf.mxu1 }
 0x6c5   :  { %v3506_v40 = vadd.f32 %v3505_v21, %v3456_v55 }
 0x6c7   :  { %v11772_v39 = vadd.f32 %v3554_v9, %v3506_v40  ;;  %v3559_v9 = vpop.f32.mrf.mxu2 }
 0x6c9   :  { %v3594_v49 = vsel %vm102_vm5, %v11772_v39, 0.0 }
 0x6ca   :  { %v3595_v26 = vadd.f32 %v3594_v49, %v3593_v52 }
 0x6cb   :  { %v3459_v8 = vpop.f32.mrf.mxu0 }
 0x6cc   :  { %v3508_v18 = vpop.f32.mrf.mxu1 }
 0x6cd   :  { %v3509_v3 = vadd.f32 %v3508_v18, %v3459_v8 }
 0x6cf   :  { %v11776_v5 = vadd.f32 %v3557_v7, %v3509_v3 }
 0x6d1   :  { %v3596_v51 = vsel %vm102_vm5, %v11776_v5, 0.0 }
 0x6d2   :  { %v3597_v38 = vadd.f32 %v3596_v51, %v3595_v26 }
 0x6d3   :  { %v3461_v10 = vpop.f32.mrf.mxu0 }
 0x6d4   :  { %v3510_v29 = vpop.f32.mrf.mxu1 }
 0x6d5   :  { %v3511_v54 = vadd.f32 %v3510_v29, %v3461_v10 }
 0x6d7   :  { %v11782_v19 = vadd.f32 %v3559_v9, %v3511_v54 }
 0x6d9   :  { %v3598_v50 = vsel %vm102_vm5, %v11782_v19, 0.0 }
 0x6da   :  { %v3599_v55 = vadd.f32 %v3598_v50, %v3597_v38 }
 0x6dc   :  { %v3600_v21 = vrot.slane %v3599_v55, 4 }
 0x6de   :  { %v3601_v43 = vadd.f32 %v3600_v21, %v3599_v55 }
 0x6e0   :  { %v3602_v31 = vrot.slane %v3601_v43, 2 }
 0x6e2   :  { %v3603_v4 = vadd.f32 %v3602_v31, %v3601_v43 }
 0x6e4   :  { %v3604_v59 = vrot.slane %v3603_v4, 1 }
 0x6e6   :  { %v3605_v23 = vadd.f32 %v3604_v59, %v3603_v4 }
 0x6e8   :  { %v3608_v22 = vsel %vm2338_vm9, %v3605_v23, %v3584_v11 }
 0x6e9   :  { %3625 = vrot.lane.b32.xlu1 %v3608_v22, %s9471_s3  ;;  %3619 = vrot.lane.b32.xlu0 %v3608_v22, %s9472_s25  ;;  %v3610_v24 = vsel %vm2341_vm10, %v3608_v22, 0.0 }
 0x6ea   :  { %3613 = vrot.lane.b32.xlu2 %v3608_v22, %s9473_s27 }
 0x713   :  { %3611 = vadd.xlane.f32.xlu2 %v3610_v24 }
 0x744   :  { %v3614_v7 = vpop.permute.xlu2 %3613 }
 0x745   :  { %v3616_v53 = vsel %vm2341_vm10, %v3614_v7, 0.0 }
 0x746   :  { %3617 = vadd.xlane.f32.xlu0 %v3616_v53 }
 0x75b   :  { %v3626_v33 = vpop.permute.xlu1 %3625  ;;  %v3620_v40 = vpop.permute.xlu0 %3619 }
 0x75c   :  { %v3622_v41 = vsel %vm2341_vm10, %v3620_v40, 0.0  ;;  %v3628_v8 = vsel %vm2341_vm10, %v3626_v33, 0.0 }
 0x75d   :  { %3623 = vadd.xlane.f32.xlu1 %v3622_v41  ;;  %3629 = vadd.xlane.f32.xlu2 %v3628_v8 }
 0x786   :  { %v3612_v18 = vpop.xlane.xlu2 %3611 }
 0x7b9   :  { %v3618_v17 = vpop.xlane.xlu0 %3617 }
 0x7ba   :  { %v3631_v36 = vsel %vm2363_vm11, %v3612_v18, %v3618_v17 }
 0x7d0   :  { %v3624_v3 = vpop.xlane.xlu1 %3623  ;;  %v3630_v47 = vpop.xlane.xlu2 %3629 }
 0x7d1   :  { %v3632_v16 = vsel %vm2365_vm12, %v3631_v36, %v3624_v3 }
 0x7d2   :  { %v3633_v25 = vsel %vm2367_vm13, %v3632_v16, %v3630_v47 }
 0x7d3   :  { %v3634_v60 = vmul.f32 0.001953125, %v3633_v25 }
 0x7d5   :  { %v3636_v14 = vrot.slane %v3634_v60, 1  ;;  %v3637_v63 = vperm.slane %v3634_v60, 0 }
 0x7d7   :  { %v3638_v45 = vperm.slane %v3636_v14, 0  ;;  %v11798_v49 = vsub.f32 %v11726_v46, %v3637_v63  ;;  %v11801_v52 = vsub.f32 %v11723_v35, %v3637_v63  ;;  %v11804_v10 = vsub.f32 %v11728_v32, %v3637_v63 }
 0x7d8   :  { %v11813_v54 = vsub.f32 %v11732_v48, %v3637_v63  ;;  %v11823_v32 = vsub.f32 %v11738_v0, %v3637_v63  ;;  %v11835_v62 = vsub.f32 %v11742_v37, %v3637_v63  ;;  %v11847_v58 = vsub.f32 %v11720_v56, %v3637_v63 }
 0x7d9   :  { %v11807_v29 = vsub.f32 %v11754_v57, %v3638_v45  ;;  %v11810_v51 = vsub.f32 %v11750_v1, %v3638_v45  ;;  %v11816_v9 = vsub.f32 %v11756_v12, %v3638_v45  ;;  %v3657_v46 = vmul.f32 %v11798_v49, %v11798_v49 }
 0x7da   :  { %v3658_v35 = vmul.f32 %v11801_v52, %v11801_v52  ;;  %v11826_v57 = vsub.f32 %v11762_v61, %v3638_v45  ;;  %v3659_v1 = vmul.f32 %v11804_v10, %v11804_v10  ;;  %v11838_v26 = vsub.f32 %v11768_v15, %v3638_v45 }
 0x7db   :  { %v3665_v48 = vmul.f32 %v11807_v29, %v11807_v29  ;;  %v3666_v12 = vmul.f32 %v11810_v51, %v11810_v51  ;;  %v3660_v0 = vmul.f32 %v11813_v54, %v11813_v54  ;;  %v3667_v61 = vmul.f32 %v11816_v9, %v11816_v9 }
 0x7dc   :  { %v3673_v38 = vsel %vm102_vm5, %v3657_v46, 0.0  ;;  %v3674_v50 = vsel %vm102_vm5, %v3658_v35, 0.0  ;;  %v11850_v55 = vsub.f32 %v11772_v39, %v3638_v45  ;;  %v3661_v37 = vmul.f32 %v11823_v32, %v11823_v32 }
 0x7dd   :  { %v3675_v15 = vadd.f32 %v3674_v50, %v3673_v38  ;;  %v3668_v21 = vmul.f32 %v11826_v57, %v11826_v57  ;;  %v3676_v43 = vsel %vm102_vm5, %v3659_v1, 0.0  ;;  %v3694_v2 = vsel %vm102_vm5, %v3665_v48, 0.0 }
 0x7de   :  { %v3695_v31 = vsel %vm102_vm5, %v3666_v12, 0.0  ;;  %v11860_v34 = vsub.f32 %v11748_v28, %v3637_v63  ;;  %v11863_v56 = vsub.f32 %v11776_v5, %v3638_v45  ;;  %v3662_v59 = vmul.f32 %v11835_v62, %v11835_v62 }
 0x7df   :  { %v3677_v39 = vadd.f32 %v3676_v43, %v3675_v15  ;;  %v3696_v4 = vadd.f32 %v3695_v31, %v3694_v2  ;;  %v3669_v11 = vmul.f32 %v11838_v26, %v11838_v26  ;;  %v3678_v23 = vsel %vm102_vm5, %v3660_v0, 0.0 }
 0x7e0   :  { %v3697_v22 = vsel %vm102_vm5, %v3667_v61, 0.0  ;;  %v11872_v24 = vsub.f32 %v11782_v19, %v3638_v45  ;;  %v3663_v5 = vmul.f32 %v11847_v58, %v11847_v58  ;;  %v3670_v53 = vmul.f32 %v11850_v55, %v11850_v55 }
 0x7e1   :  { %v3679_v28 = vadd.f32 %v3678_v23, %v3677_v39  ;;  %v3698_v7 = vadd.f32 %v3697_v22, %v3696_v4  ;;  %v3680_v33 = vsel %vm102_vm5, %v3661_v37, 0.0  ;;  %v3699_v40 = vsel %vm102_vm5, %v3668_v21, 0.0 }
 0x7e2   :  { %v3664_v18 = vmul.f32 %v11860_v34, %v11860_v34  ;;  %v3671_v19 = vmul.f32 %v11863_v56, %v11863_v56  ;;  %v3682_v17 = vsel %vm102_vm5, %v3662_v59, 0.0  ;;  %v3701_v36 = vsel %vm102_vm5, %v3669_v11, 0.0 }
 0x7e3   :  { %v3681_v41 = vadd.f32 %v3680_v33, %v3679_v28  ;;  %v3700_v8 = vadd.f32 %v3699_v40, %v3698_v7  ;;  %v3672_v16 = vmul.f32 %v11872_v24, %v11872_v24  ;;  %v3684_v25 = vsel %vm102_vm5, %v3663_v5, 0.0 }
 0x7e4   :  { %v3703_v60 = vsel %vm102_vm5, %v3670_v53, 0.0  ;;  %v3686_v45 = vsel %vm102_vm5, %v3664_v18, 0.0  ;;  %v3705_v46 = vsel %vm102_vm5, %v3671_v19, 0.0 }
 0x7e5   :  { %v3683_v3 = vadd.f32 %v3682_v17, %v3681_v41  ;;  %v3702_v47 = vadd.f32 %v3701_v36, %v3700_v8  ;;  %v3707_v48 = vsel %vm102_vm5, %v3672_v16, 0.0 }
 0x7e7   :  { %v3685_v14 = vadd.f32 %v3684_v25, %v3683_v3  ;;  %v3704_v63 = vadd.f32 %v3703_v60, %v3702_v47 }
 0x7e9   :  { %v3687_v35 = vadd.f32 %v3686_v45, %v3685_v14  ;;  %v3706_v1 = vadd.f32 %v3705_v46, %v3704_v63  ;;  %v9416_v63 = vld [vmem:[%s14188_s7] ss:$0 sm:$0xff]  ;;  %v8039_v45 = vld [vmem:[%s14190_s9 + $0x88] sm:$0xff]  ;;  %v8029_v46 = vld [vmem:[%s14190_s9 + $0x38] sm:$0xff] }
 0x7ea   :  { %4784 = vmatpush.bf16.msrb.mxu1 %v8039_v45  ;;  %4680 = vmatpush.bf16.msra.mxu3 %v8029_v46  ;;  %v14271_v45 = vld [vmem:[#allocation7_spill] sm:$0xff] }
 0x7eb   :  { %v3688_v12 = vrot.slane %v3687_v35, 4  ;;  %v3708_v0 = vadd.f32 %v3707_v48, %v3706_v1  ;;  %v8038_v1 = vld [vmem:[%s14190_s9 + $0x80] sm:$0xff]  ;;  %v14272_v46 = vmax.f32 %v14271_v45, 0.0 }
 0x7ed   :  { %v3689_v61 = vadd.f32 %v3688_v12, %v3687_v35  ;;  %v3709_v38 = vrot.slane %v3708_v0, 4 }
 0x7ee   :  { %4785 = vmatpush.bf16.msrb.mxu1 %v8038_v1 }
 0x7ef   :  { %v3690_v50 = vrot.slane %v3689_v61, 2  ;;  %v3710_v37 = vadd.f32 %v3709_v38, %v3708_v0  ;;  %v9417_v38 = vld [vmem:[%s14189_s8] ss:$0 sm:$0xff] }
 0x7f1   :  { %v3691_v15 = vadd.f32 %v3690_v50, %v3689_v61  ;;  %v3711_v21 = vrot.slane %v3710_v37, 2 }
 0x7f3   :  { %v3692_v43 = vrot.slane %v3691_v15, 1  ;;  %v3712_v2 = vadd.f32 %v3711_v21, %v3710_v37 }
 0x7f5   :  { %v3713_v31 = vrot.slane %v3712_v2, 1  ;;  %v3693_v39 = vadd.f32 %v3692_v43, %v3691_v15 }
 0x7f7   :  { %v3714_v4 = vadd.f32 %v3713_v31, %v3712_v2 }
 0x7f9   :  { %v3717_v59 = vsel %vm2338_vm9, %v3714_v4, %v3693_v39 }
 0x7fa   :  { %3734 = vrot.lane.b32.xlu2 %v3717_v59, %s9471_s3  ;;  %3728 = vrot.lane.b32.xlu1 %v3717_v59, %s9472_s25  ;;  %v3719_v11 = vsel %vm2341_vm10, %v3717_v59, 0.0 }
 0x7fb   :  { %3722 = vrot.lane.b32.xlu0 %v3717_v59, %s9473_s27 }
 0x825   :  { %3720 = vadd.xlane.f32.xlu0 %v3719_v11 }
 0x854   :  { %v3735_v23 = vpop.permute.xlu2 %3734 }
 0x855   :  { %v3737_v22 = vsel %vm2341_vm10, %v3735_v23, 0.0 }
 0x856   :  { %3738 = vadd.xlane.f32.xlu0 %v3737_v22 }
 0x86c   :  { %v3729_v28 = vpop.permute.xlu1 %3728 }
 0x86d   :  { %v3723_v7 = vpop.permute.xlu0 %3722  ;;  %v3731_v5 = vsel %vm2341_vm10, %v3729_v28, 0.0 }
 0x86e   :  { %3732 = vadd.xlane.f32.xlu2 %v3731_v5  ;;  %v3725_v53 = vsel %vm2341_vm10, %v3723_v7, 0.0 }
 0x86f   :  { %3726 = vadd.xlane.f32.xlu1 %v3725_v53 }
 0x898   :  { %v3721_v33 = vpop.xlane.xlu0 %3720 }
 0x8c9   :  { %v3739_v18 = vpop.xlane.xlu0 %3738 }
 0x8e1   :  { %v3733_v40 = vpop.xlane.xlu2 %3732 }
 0x8e2   :  { %v3727_v41 = vpop.xlane.xlu1 %3726 }
 0x8e3   :  { %v3740_v8 = vsel %vm2363_vm11, %v3721_v33, %v3727_v41 }
 0x8e4   :  { %v3741_v19 = vsel %vm2365_vm12, %v3740_v8, %v3733_v40  ;;  %v14261_v8 = vmax.f32 %v10496_v42, 0.0  ;;  %v14263_v42 = vmax.f32 %v10565_v13, 0.0 }
 0x8e5   :  { %v3742_v17 = vsel %vm2367_vm13, %v3741_v19, %v3739_v18 }
 0x8e6   :  { %v3743_v36 = vmul.f32 0.001953125, %v3742_v17 }
 0x8e8   :  { %v3744_v3 = vadd.f32 1e-05, %v3743_v36 }
 0x8ea   :  { %9425 = vrsqrt.f32 %v3744_v3  ;;  %vm3751_vm6 = vweird.f32 %v3744_v3 }
 0x8f0   :  { %v9426_v47 = vpop.eup %9425 }
 0x8f1   :  { %v3746_v16 = vmul.f32 %v9426_v47, %v3744_v3  ;;  %vm3752_vm2 = vweird.f32 %v9426_v47  ;;  %v14265_v3 = vld [vmem:[#allocation5_spill] sm:$0xff] }
 0x8f2   :  { %vm3753_vm7 = vmor %vm3751_vm6, %vm3752_vm2 }
 0x8f3   :  { %v3747_v25 = vmul.f32 %v9426_v47, %v3746_v16  ;;  %v3840_v16 = vld [vmem:[#allocation3 + $0x40] sm:$0xff] }
 0x8f5   :  { %v3748_v60 = vmul.f32 0.5, %v3747_v25  ;;  %v14268_v25 = vld [vmem:[#allocation6_spill] sm:$0xff] }
 0x8f7   :  { %v3749_v14 = vsub.f32 1.5, %v3748_v60  ;;  %v14269_v60 = vmax.f32 %v14268_v25, 0.0 }
 0x8f9   :  { %v3750_v35 = vmul.f32 %v9426_v47, %v3749_v14  ;;  %v3843_v14 = vld [vmem:[#allocation3 + $0x58] sm:$0xff] }
 0x8fb   :  { %v3754_v48 = vsel %vm3753_vm7, %v9426_v47, %v3750_v35 }
 0x8fc   :  { %v3758_v12 = vmul.f32 %v9416_v63, %v3754_v48  ;;  %v14274_v48 = vld [vmem:[#allocation8_spill] sm:$0xff] }
 0x8fe   :  { %v3760_v0 = vrot.slane %v3758_v12, 1  ;;  %v3761_v61 = vperm.slane %v3758_v12, 0  ;;  %v14275_v12 = vmax.f32 %v14274_v48, 0.0 }
 0x900   :  { %v3766_v50 = vmul.f32 %v3761_v61, %v11801_v52  ;;  %v3767_v37 = vmul.f32 %v3761_v61, %v11804_v10  ;;  %v3762_v15 = vperm.slane %v3760_v0, 0  ;;  %v3768_v21 = vmul.f32 %v3761_v61, %v11813_v54  ;;  %v8037_v54 = vld [vmem:[%s14190_s9 + $0x78] sm:$0xff] }
 0x901   :  { %v3769_v43 = vmul.f32 %v3761_v61, %v11823_v32  ;;  %v3770_v2 = vmul.f32 %v3761_v61, %v11835_v62  ;;  %v3771_v31 = vmul.f32 %v3761_v61, %v11847_v58  ;;  %v3772_v39 = vmul.f32 %v3761_v61, %v11860_v34  ;;  %4729 = vmatpush.bf16.msrb.mxu0 %v8037_v54 }
 0x902   :  { %v3785_v4 = vadd.f32 %v9417_v38, %v3766_v50  ;;  %v3786_v59 = vadd.f32 %v9417_v38, %v3767_v37  ;;  %v3773_v11 = vmul.f32 %v3762_v15, %v11807_v29  ;;  %v3787_v23 = vadd.f32 %v9417_v38, %v3768_v21  ;;  %v14277_v37 = vld [vmem:[#allocation9_spill] sm:$0xff] }
 0x903   :  { %v3788_v22 = vadd.f32 %v9417_v38, %v3769_v43  ;;  %v3774_v52 = vmul.f32 %v3762_v15, %v11810_v51  ;;  %v3789_v10 = vadd.f32 %v9417_v38, %v3770_v2  ;;  %v3775_v32 = vmul.f32 %v3762_v15, %v11816_v9 }
 0x904   :  { %v3776_v62 = vmul.f32 %v3762_v15, %v11826_v57  ;;  %v3790_v58 = vadd.f32 %v9417_v38, %v3771_v31  ;;  %v3791_v28 = vadd.f32 %v9417_v38, %v3772_v39  ;;  %v14257_v34 = vmax.f32 %v10313_v20, 0.0  ;;  %v14280_v31 = vld [vmem:[#allocation10_spill] sm:$0xff] }
 0x905   :  { %v14258_v29 = vmax.f32 %v10356_v44, 0.0  ;;  %v14259_v51 = vmax.f32 %v10400_v27, 0.0  ;;  %v3777_v33 = vmul.f32 %v3762_v15, %v11838_v26  ;;  %v3792_v9 = vadd.f32 %v9417_v38, %v3773_v11  ;;  %v14283_v11 = vld [vmem:[#allocation11_spill] sm:$0xff] }
 0x906   :  { %v11935_v7 = vadd.f32 %v3785_v4, %v14257_v34  ;;  %v14260_v57 = vmax.f32 %v10460_v30, 0.0  ;;  %v3778_v20 = vmul.f32 %v3762_v15, %v11850_v55  ;;  %v3793_v41 = vadd.f32 %v9417_v38, %v3774_v52 }
 0x907   :  { %v11939_v5 = vadd.f32 %v3786_v59, %v14258_v29  ;;  %v11943_v53 = vadd.f32 %v3787_v23, %v14259_v51  ;;  %v11953_v44 = vadd.f32 %v3789_v10, %v14261_v8  ;;  %v3779_v27 = vmul.f32 %v3762_v15, %v11863_v56  ;;  %v14286_v10 = vld [vmem:[#allocation12_spill] sm:$0xff]  ;;  %v3835_v8 = vld [vmem:[#allocation3 + $0x18] sm:$0xff] }
 0x908   :  { %v11948_v40 = vadd.f32 %v3788_v22, %v14260_v57  ;;  %3817 = vst.msk [vmem:[#allocation3 + $0x38] sm:$0xff] %vm102_vm5, %v11935_v7  ;;  %v3794_v18 = vadd.f32 %v9417_v38, %v3775_v32  ;;  %v14262_v26 = vmax.f32 %v10542_v6, 0.0  ;;  %v3780_v30 = vmul.f32 %v3762_v15, %v11872_v24  ;;  %v3834_v57 = vld [vmem:[#allocation3 + $0x10] sm:$0xff] }
 0x909   :  { %3818 = vst.msk [vmem:[#allocation3 + $0x50] sm:$0xff] %vm102_vm5, %v11939_v5  ;;  %v3795_v55 = vadd.f32 %v9417_v38, %v3776_v62  ;;  %v11967_v17 = vadd.f32 %v3791_v28, %v14263_v42  ;;  %v3765_v56 = vmul.f32 %v3761_v61, %v11798_v49  ;;  %v3796_v36 = vadd.f32 %v9417_v38, %v3777_v33  ;;  %v8028_v49 = vld [vmem:[%s14190_s9 + $0x30] sm:$0xff]  ;;  %v3849_v42 = vld [vmem:[#allocation3 + $0x88] sm:$0xff] }
 0x90a   :  { %v11960_v19 = vadd.f32 %v3790_v58, %v14262_v26  ;;  %3819 = vst.msk [vmem:[#allocation3 + $0x68] sm:$0xff] %vm102_vm5, %v11943_v53  ;;  %v14266_v6 = vmax.f32 %v14265_v3, 0.0  ;;  %v3797_v24 = vadd.f32 %v9417_v38, %v3778_v20  ;;  %v11980_v13 = vadd.f32 %v3793_v41, %v14269_v60  ;;  %4681 = vmatpush.bf16.msra.mxu3 %v8028_v49  ;;  %v14289_v58 = vld [vmem:[#allocation4_spill] sm:$0xff]  ;;  %v8036_v33 = vld [vmem:[%s14190_s9 + $0x70] sm:$0xff]  ;;  %v3837_v41 = vld [vmem:[#allocation3 + $0x28] sm:$0xff] }
 0x90b   :  { %14264 = vst [vmem:[#allocation13_spill] sm:$0xff] %v11967_v17  ;;  %v3798_v63 = vadd.f32 %v9417_v38, %v3779_v27  ;;  %v11989_v35 = vadd.f32 %v3794_v18, %v14272_v46  ;;  %v3799_v1 = vadd.f32 %v9417_v38, %v3780_v30  ;;  %v11995_v0 = vadd.f32 %v3795_v55, %v14275_v12  ;;  %v3838_v20 = vld [vmem:[#allocation3 + $0x30] sm:$0xff] }
 0x90c   :  { %v11974_v47 = vadd.f32 %v3792_v9, %v14266_v6  ;;  %3820 = vst.msk [vmem:[#allocation3 + $0x80] sm:$0xff] %vm102_vm5, %v11948_v40  ;;  %v4011_v61 = vrot.slane %v3840_v16, 1  ;;  %v3784_v50 = vadd.f32 %v9417_v38, %v3765_v56  ;;  %v14278_v15 = vmax.f32 %v14277_v37, 0.0  ;;  %4730 = vmatpush.bf16.msrb.mxu0 %v8036_v33  ;;  %v12055_v9 = vld [vmem:[#allocation3 + $0x8] sm:$0xff]  ;;  %v3846_v27 = vld [vmem:[#allocation3 + $0x70] sm:$0xff] }
 0x90d   :  { %14270 = vst [vmem:[#allocation6_spill] sm:$0xff] %v11980_v13  ;;  %v4014_v2 = vrot.slane %v3843_v14, 1  ;;  %v14281_v39 = vmax.f32 %v14280_v31, 0.0  ;;  %v14284_v23 = vmax.f32 %v14283_v11, 0.0  ;;  %v14287_v54 = vmax.f32 %v14286_v10, 0.0  ;;  %v8027_v16 = vld [vmem:[%s14190_s9 + $0x28] sm:$0xff] }
 0x90e   :  { %14267 = vst [vmem:[#allocation5_spill] sm:$0xff] %v11974_v47  ;;  %v12001_v21 = vadd.f32 %v3796_v36, %v14278_v15  ;;  %v14290_v28 = vmax.f32 %v14289_v58, 0.0  ;;  %v4004_v18 = vrot.slane %v12055_v9, 1  ;;  %v4005_v26 = vrot.slane %v3834_v57, 1  ;;  %4682 = vmatpush.bf16.msra.mxu3 %v8027_v16  ;;  %v3852_v58 = vld [vmem:[#allocation3 + $0xa0] sm:$0xff] }
 0x90f   :  { %3821 = vst.msk [vmem:[#allocation3 + $0x98] sm:$0xff] %vm102_vm5, %v11953_v44  ;;  %v12005_v43 = vld [vmem:[#allocation3 + $0x38] sm:$0xff]  ;;  %v12009_v4 = vadd.f32 %v3797_v24, %v14281_v39  ;;  %v12018_v22 = vadd.f32 %v3798_v63, %v14284_v23  ;;  %v12025_v32 = vadd.f32 %v3799_v1, %v14287_v54  ;;  %v3930_v56 = vrot.slane %v3838_v20, 7  ;;  %v3841_v24 = vld [vmem:[#allocation3 + $0x48] sm:$0xff]  ;;  %v3844_v54 = vld [vmem:[#allocation3 + $0x60] sm:$0xff] }
 0x910   :  { %14273 = vst [vmem:[#allocation7_spill] sm:$0xff] %v11989_v35  ;;  %v12013_v59 = vld [vmem:[#allocation3 + $0x50] sm:$0xff]  ;;  %v4010_v38 = vrot.slane %v12005_v43, 1  ;;  %v12036_v34 = vadd.f32 %v3784_v50, %v14290_v28  ;;  %v3931_v36 = vrot.slane %v12005_v43, 7  ;;  %v4008_v3 = vrot.slane %v3837_v41, 1  ;;  %v3855_v20 = vld [vmem:[#allocation3 + $0xb8] sm:$0xff] }
 0x911   :  { %3822 = vst.msk [vmem:[#allocation3 + $0xb0] sm:$0xff] %vm102_vm5, %v11960_v19  ;;  %v4013_v52 = vrot.slane %v12013_v59, 1  ;;  %v12058_v30 = vld [vmem:[#allocation3 + $0x68] sm:$0xff]  ;;  %v3927_v6 = vrot.slane %v3835_v8, 7  ;;  %v4017_v60 = vrot.slane %v3846_v27, 1  ;;  %v4020_v49 = vrot.slane %v3849_v42, 1 }
 0x912   :  { %14276 = vst [vmem:[#allocation8_spill] sm:$0xff] %v11995_v0  ;;  %v12030_v62 = vsel %vm352_vm4, %v4010_v38, %v4011_v61  ;;  %v4016_v25 = vrot.slane %v12058_v30, 1  ;;  %v4006_v45 = vsel %vm352_vm4, %v4004_v18, %v4005_v26  ;;  %v12076_v12 = vsel %vm271_vm3, %v3930_v56, %v3931_v36  ;;  %v8026_v27 = vld [vmem:[%s14190_s9 + $0x20] sm:$0xff]  ;;  %v3847_v18 = vld [vmem:[#allocation3 + $0x78] sm:$0xff] }
 0x913   :  { %3823 = vst.msk [vmem:[#allocation3 + $0xc8] sm:$0xff] %vm102_vm5, %v11967_v17  ;;  %v12039_v29 = vsel %vm352_vm4, %v4013_v52, %v4014_v2  ;;  %v12060_v55 = vld [vmem:[#allocation3 + $0x80] sm:$0xff]  ;;  %v3933_v61 = vrot.slane %v3841_v24, 7  ;;  %v3934_v50 = vrot.slane %v12013_v59, 7  ;;  %v8035_v52 = vld [vmem:[%s14190_s9 + $0x68] sm:$0xff]  ;;  %v3936_v41 = vrot.slane %v3844_v54, 7  ;;  %4683 = vmatpush.bf16.msra.mxu3 %v8026_v27 }
 0x914   :  { %14279 = vst [vmem:[#allocation9_spill] sm:$0xff] %v12001_v21  ;;  %v4490_v51 = vpack.c.bf16 %v12039_v29, %v12030_v62  ;;  %v4019_v14 = vrot.slane %v12060_v55, 1  ;;  %v12085_v2 = vsel %vm352_vm4, %v4016_v25, %v4017_v60  ;;  %4731 = vmatpush.bf16.msrb.mxu0 %v8035_v52  ;;  %v3937_v8 = vrot.slane %v12058_v30, 7 }
 0x915   :  { %3824 = vst.msk [vmem:[#allocation3 + $0x110] sm:$0xff] %vm102_vm5, %v11974_v47  ;;  %v12095_v11 = vsel %vm271_vm3, %v3933_v61, %v3934_v50  ;;  %v4023_v42 = vrot.slane %v3852_v58, 1  ;;  %v4026_v36 = vrot.slane %v3855_v20, 1  ;;  %v3939_v16 = vrot.slane %v3847_v18, 7 }
 0x916   :  { %14282 = vst [vmem:[#allocation10_spill] sm:$0xff] %v12009_v4  ;;  %7782 = vmatmul.msk.bf16.vlgmr.msrb.gmra.mxu1 %vm102_vm5, %v4490_v51  ;;  %v12088_v31 = vsel %vm352_vm4, %v4019_v14, %v4020_v49  ;;  %v8723_v10 = vpack.i.bf16 %v12095_v11, %v12076_v12  ;;  %v8708_v51 = vpack.i.bf16 %v12013_v59, %v12005_v43  ;;  %v12109_v33 = vld [vmem:[#allocation3 + $0x98] sm:$0xff]  ;;  %v3940_v24 = vrot.slane %v12060_v55, 7 }
 0x917   :  { %3825 = vst.msk [vmem:[#allocation3 + $0x128] sm:$0xff] %vm102_vm5, %v11980_v13  ;;  %v4493_v23 = vpack.c.bf16 %v12088_v31, %v12085_v2  ;;  %v4022_v26 = vrot.slane %v12109_v33, 1  ;;  %v8743_v61 = vpack.i.bf16 %v12085_v2, %v12039_v29  ;;  %v8738_v50 = vpack.i.bf16 %v12060_v55, %v12058_v30 }
 0x918   :  { %14285 = vst [vmem:[#allocation11_spill] sm:$0xff] %v12018_v22  ;;  %v12111_v57 = vld [vmem:[#allocation3 + $0xb0] sm:$0xff]  ;;  %v3943_v52 = vrot.slane %v12109_v33, 7  ;;  %v8758_v20 = vpack.i.bf16 %v12088_v31, %v12085_v2 }
 0x919   :  { %3826 = vst.msk [vmem:[#allocation3 + $0x140] sm:$0xff] %vm102_vm5, %v11989_v35  ;;  %v4025_v56 = vrot.slane %v12111_v57, 1  ;;  %v12129_v25 = vsel %vm352_vm4, %v4022_v26, %v4023_v42  ;;  %v3946_v27 = vrot.slane %v12111_v57, 7 }
 0x91a   :  { %14288 = vst [vmem:[#allocation12_spill] sm:$0xff] %v12025_v32 }
 0x91b   :  { %3827 = vst.msk [vmem:[#allocation3 + $0x158] sm:$0xff] %vm102_vm5, %v11995_v0  ;;  %v12132_v60 = vsel %vm352_vm4, %v4025_v56, %v4026_v36  ;;  %v8033_v36 = vld [vmem:[%s14190_s9 + $0x58] sm:$0xff] }
 0x91c   :  { %3828 = vst.msk [vmem:[#allocation3 + $0x170] sm:$0xff] %vm102_vm5, %v12001_v21  ;;  %v4496_v49 = vpack.c.bf16 %v12132_v60, %v12129_v25 }
 0x91d   :  { %3829 = vst.msk [vmem:[#allocation3 + $0x188] sm:$0xff] %vm102_vm5, %v12009_v4 }
 0x91e   :  { %3830 = vst.msk [vmem:[#allocation3 + $0x1a0] sm:$0xff] %vm102_vm5, %v12018_v22 }
 0x91f   :  { %3831 = vst.msk [vmem:[#allocation3 + $0x1b8] sm:$0xff] %vm102_vm5, %v12025_v32 }
 0x920   :  { %3816 = vst.msk [vmem:[#allocation3 + $0x20] sm:$0xff] %vm102_vm5, %v12036_v34 }
 0x926   :  { %7783 = vmatmul.msk.bf16.gmra.mxu1 %vm102_vm5, %v4493_v23 }
 0x927   :  { %v12068_v63 = vld [vmem:[#allocation3 + $0x20] sm:$0xff] }
 0x928   :  { %v8693_v46 = vpack.i.bf16 %v12068_v63, %v12055_v9  ;;  %v4007_v1 = vrot.slane %v12068_v63, 1  ;;  %v3928_v48 = vrot.slane %v12068_v63, 7 }
 0x92a   :  { %8694 = vrot.lane.b32.xlu1 %v8693_v46, %s9469_s28  ;;  %v4009_v37 = vsel %vm352_vm4, %v4007_v1, %v4008_v3  ;;  %v12082_v15 = vsel %vm271_vm3, %v3927_v6, %v3928_v48  ;;  %v8728_v3 = vpack.i.bf16 %v12039_v29, %v12030_v62  ;;  %v12124_v6 = vsel %vm271_vm3, %v3936_v41, %v3937_v8  ;;  %v3850_v1 = vld [vmem:[#allocation3 + $0x90] sm:$0xff]  ;;  %v3853_v29 = vld [vmem:[#allocation3 + $0xa8] sm:$0xff] }
 0x92b   :  { %v8698_v39 = vpack.i.bf16 %v4009_v37, %v4006_v45  ;;  %v8703_v38 = vpack.i.bf16 %v12076_v12, %v12082_v15  ;;  %v8713_v28 = vpack.i.bf16 %v12030_v62, %v4009_v37  ;;  %v8733_v14 = vpack.i.bf16 %v12124_v6, %v12095_v11  ;;  %v8034_v45 = vld [vmem:[%s14190_s9 + $0x60] sm:$0xff]  ;;  %v3858_v48 = vld [vmem:[#allocation3 + $0xd0] sm:$0xff]  ;;  %v12154_v37 = vld [vmem:[#allocation3 + $0xc8] sm:$0xff] }
 0x92c   :  { %v12139_v62 = vsel %vm271_vm3, %v3939_v16, %v3940_v24  ;;  %4732 = vmatpush.bf16.msrb.mxu0 %v8034_v45  ;;  %v3942_v23 = vrot.slane %v3850_v1, 7  ;;  %v4064_v54 = vrot.slane %v12154_v37, 1  ;;  %v4065_v58 = vrot.slane %v3858_v48, 1  ;;  %v3856_v16 = vld [vmem:[#allocation3 + $0xc0] sm:$0xff]  ;;  %v3870_v24 = vld [vmem:[#allocation3 + $0x130] sm:$0xff]  ;;  %v12196_v45 = vld [vmem:[#allocation3 + $0x128] sm:$0xff] }
 0x92d   :  { %8699 = vrot.lane.b32.xlu0 %v8698_v39, %s9468_s24  ;;  %8704 = vrot.lane.b32.xlu2 %v8703_v38, %s9470_s30  ;;  %v8753_v46 = vpack.i.bf16 %v12139_v62, %v12124_v6  ;;  %v12156_v39 = vld [vmem:[#allocation3 + $0xe0] sm:$0xff]  ;;  %v3861_v38 = vld [vmem:[#allocation3 + $0xe8] sm:$0xff]  ;;  %v3945_v8 = vrot.slane %v3853_v29, 7  ;;  %v4056_v48 = vrot.slane %v3856_v16, 7  ;;  %v8788_v29 = vpack.i.bf16 %v12132_v60, %v12129_v25 }
 0x92e   :  { %v12169_v41 = vsel %vm271_vm3, %v3942_v23, %v3943_v52  ;;  %v12174_v18 = vsel %vm352_vm4, %v4064_v54, %v4065_v58  ;;  %v3873_v1 = vld [vmem:[#allocation3 + $0x148] sm:$0xff]  ;;  %v4035_v23 = vrot.slane %v3870_v24, 1 }
 0x92f   :  { %v8763_v42 = vpack.i.bf16 %v12169_v41, %v12139_v62  ;;  %v12182_v2 = vsel %vm271_vm3, %v3945_v8, %v3946_v27  ;;  %v12223_v27 = vld [vmem:[#allocation3 + $0xf8] sm:$0xff] }
 0x930   :  { %4733 = vmatpush.bf16.msrb.mxu0 %v8033_v36  ;;  %v12230_v36 = vld [vmem:[#allocation3 + $0x110] sm:$0xff]  ;;  %v4028_v24 = vrot.slane %v12223_v27, 1 }
 0x932   :  { %8724 = vrot.lane.b32.xlu1 %v8723_v10, %s9468_s24  ;;  %v8025_v10 = vld [vmem:[%s14190_s9 + $0x18] sm:$0xff] }
 0x933   :  { %4684 = vmatpush.bf16.msra.mxu3 %v8025_v10  ;;  %v4038_v10 = vrot.slane %v3873_v1, 1 }
 0x935   :  { %8714 = vrot.lane.b32.xlu0 %v8713_v28, %s9469_s28  ;;  %8709 = vrot.lane.b32.xlu2 %v8708_v51, %s9470_s30  ;;  %v4082_v28 = vrot.slane %v12156_v39, 1 }
 0x936   :  { %7784 = vmatmul.msk.bf16.gmra.mxu1 %vm102_vm5, %v4496_v49  ;;  %v8768_v49 = vpack.i.bf16 %v12111_v57, %v12109_v33 }
 0x93a   :  { %8729 = vrot.lane.b32.xlu1 %v8728_v3, %s9468_s24  ;;  %v8783_v3 = vpack.i.bf16 %v12182_v2, %v12169_v41 }
 0x93d   :  { %8719 = vrot.lane.b32.xlu0 %v8708_v51, %s9469_s28  ;;  %8734 = vrot.lane.b32.xlu2 %v8733_v14, %s9470_s30  ;;  %v4083_v51 = vrot.slane %v3861_v38, 1  ;;  %v8773_v14 = vpack.i.bf16 %v12129_v25, %v12088_v31  ;;  %v3859_v31 = vld [vmem:[#allocation3 + $0xd8] sm:$0xff]  ;;  %v4034_v38 = vrot.slane %v12196_v45, 1 }
 0x93e   :  { %v4074_v58 = vrot.slane %v3859_v31, 7  ;;  %v8803_v31 = vpack.i.bf16 %v12174_v18, %v12132_v60 }
 0x93f   :  { %v4084_v26 = vsel %vm352_vm4, %v4082_v28, %v4083_v51  ;;  %v4075_v28 = vrot.slane %v12156_v39, 7  ;;  %v12214_v51 = vsel %vm352_vm4, %v4034_v38, %v4035_v23  ;;  %v8798_v38 = vpack.i.bf16 %v12156_v39, %v12154_v37  ;;  %v12240_v23 = vld [vmem:[#allocation3 + $0x158] sm:$0xff] }
 0x940   :  { %v4499_v56 = vpack.c.bf16 %v4084_v26, %v12174_v18  ;;  %v3871_v39 = vld [vmem:[#allocation3 + $0x138] sm:$0xff] }
 0x941   :  { %v4076_v25 = vsel %vm271_vm3, %v4074_v58, %v4075_v28  ;;  %v3955_v28 = vrot.slane %v12196_v45, 7 }
 0x942   :  { %8754 = vrot.lane.b32.xlu1 %v8753_v46, %s9468_s24  ;;  %v12198_v46 = vld [vmem:[#allocation3 + $0x140] sm:$0xff] }
 0x943   :  { %v4037_v52 = vrot.slane %v12198_v46, 1 }
 0x945   :  { %8744 = vrot.lane.b32.xlu0 %v8743_v61, %s9469_s28  ;;  %8739 = vrot.lane.b32.xlu2 %v8738_v50, %s9470_s30  ;;  %v4057_v61 = vrot.slane %v12154_v37, 7 }
 0x946   :  { %7785 = vmatmul.msk.bf16.gmra.mxu1 %vm102_vm5, %v4499_v56  ;;  %v3864_v56 = vld [vmem:[#allocation3 + $0x100] sm:$0xff] }
 0x947   :  { %v4058_v54 = vsel %vm271_vm3, %v4056_v48, %v4057_v61  ;;  %v3865_v48 = vld [vmem:[#allocation3 + $0x108] sm:$0xff]  ;;  %v3868_v61 = vld [vmem:[#allocation3 + $0x120] sm:$0xff] }
 0x948   :  { %v8793_v8 = vpack.i.bf16 %v4058_v54, %v12182_v2  ;;  %v8813_v16 = vpack.i.bf16 %v4076_v25, %v4058_v54  ;;  %v3952_v54 = vrot.slane %v12230_v36, 7  ;;  %v3954_v58 = vrot.slane %v3868_v61, 7 }
 0x949   :  { %v8808_v61 = vpack.i.bf16 %v12230_v36, %v12223_v27 }
 0x94a   :  { %8759 = vrot.lane.b32.xlu1 %v8758_v20, %s9468_s24  ;;  %v12217_v20 = vsel %vm352_vm4, %v4037_v52, %v4038_v10  ;;  %v12242_v52 = vld [vmem:[#allocation3 + $0x170] sm:$0xff]  ;;  %v3879_v10 = vld [vmem:[#allocation3 + $0x178] sm:$0xff] }
 0x94b   :  { %v4502_v26 = vpack.c.bf16 %v12217_v20, %v12214_v51 }
 0x94d   :  { %8749 = vrot.lane.b32.xlu0 %v8738_v50, %s9469_s28  ;;  %8764 = vrot.lane.b32.xlu2 %v8763_v42, %s9470_s30  ;;  %v8024_v50 = vld [vmem:[%s14190_s9 + $0x10] sm:$0xff] }
 0x94e   :  { %4685 = vmatpush.bf16.msra.mxu3 %v8024_v50  ;;  %v8032_v42 = vld [vmem:[%s14190_s9 + $0x50] sm:$0xff]  ;;  %v3876_v50 = vld [vmem:[#allocation3 + $0x160] sm:$0xff] }
 0x94f   :  { %4734 = vmatpush.bf16.msrb.mxu0 %v8032_v42  ;;  %v4041_v25 = vrot.slane %v3876_v50, 1  ;;  %v4044_v42 = vrot.slane %v3879_v10, 1  ;;  %v8031_v10 = vld [vmem:[%s14190_s9 + $0x48] sm:$0xff] }
 0x952   :  { %8784 = vrot.lane.b32.xlu1 %v8783_v3, %s9468_s24  ;;  %v3867_v3 = vld [vmem:[#allocation3 + $0x118] sm:$0xff] }
 0x953   :  { %v4032_v1 = vrot.slane %v3867_v3, 1  ;;  %4735 = vmatpush.bf16.msrb.mxu0 %v8031_v10 }
 0x955   :  { %8774 = vrot.lane.b32.xlu0 %v8773_v14, %s9469_s28  ;;  %8769 = vrot.lane.b32.xlu2 %v8768_v49, %s9470_s30  ;;  %v4029_v14 = vrot.slane %v3864_v56, 1 }
 0x956   :  { %7786 = vmatmul.msk.bf16.gmra.mxu1 %vm102_vm5, %v4502_v26  ;;  %v4043_v26 = vrot.slane %v12242_v52, 1 }
 0x957   :  { %v4030_v60 = vsel %vm352_vm4, %v4028_v24, %v4029_v14  ;;  %v8023_v24 = vld [vmem:[%s14190_s9 + $0x8] sm:$0xff]  ;;  %v3957_v14 = vrot.slane %v3871_v39, 7 }
 0x958   :  { %4686 = vmatpush.bf16.msra.mxu3 %v8023_v24  ;;  %v12290_v39 = vld [vmem:[#allocation3 + $0x188] sm:$0xff] }
 0x959   :  { %v4046_v24 = vrot.slane %v12290_v39, 1 }
 0x95a   :  { %8789 = vrot.lane.b32.xlu1 %v8788_v29, %s9468_s24  ;;  %v3951_v29 = vrot.slane %v3865_v48, 7  ;;  %v12267_v48 = vsel %vm352_vm4, %v4043_v26, %v4044_v42  ;;  %v3961_v42 = vrot.slane %v12240_v23, 7 }
 0x95c   :  { %v12253_v3 = vsel %vm271_vm3, %v3951_v29, %v3952_v54  ;;  %v3874_v54 = vld [vmem:[#allocation3 + $0x150] sm:$0xff] }
 0x95d   :  { %8779 = vrot.lane.b32.xlu0 %v8768_v49, %s9469_s28  ;;  %8794 = vrot.lane.b32.xlu2 %v8793_v8, %s9470_s30  ;;  %v4031_v49 = vrot.slane %v12230_v36, 1  ;;  %v4040_v8 = vrot.slane %v12240_v23, 1  ;;  %v3960_v26 = vrot.slane %v3874_v54, 7 }
 0x95f   :  { %v4033_v18 = vsel %vm352_vm4, %v4031_v49, %v4032_v1  ;;  %v3958_v49 = vrot.slane %v12198_v46, 7  ;;  %v12264_v1 = vsel %vm352_vm4, %v4040_v8, %v4041_v25  ;;  %v12292_v8 = vld [vmem:[#allocation3 + $0x1a0] sm:$0xff]  ;;  %v3885_v25 = vld [vmem:[#allocation3 + $0x1a8] sm:$0xff] }
 0x960   :  { %v8818_v56 = vpack.i.bf16 %v4033_v18, %v4030_v60  ;;  %v8828_v60 = vpack.i.bf16 %v12198_v46, %v12196_v45  ;;  %v8878_v32 = vpack.i.bf16 %v12267_v48, %v12264_v1  ;;  %v3970_v4 = vrot.slane %v12292_v8, 7 }
 0x962   :  { %8814 = vrot.lane.b32.xlu1 %v8813_v16, %s9468_s24  ;;  %v12256_v16 = vsel %vm271_vm3, %v3954_v58, %v3955_v28  ;;  %v3882_v58 = vld [vmem:[#allocation3 + $0x190] sm:$0xff]  ;;  %v8833_v28 = vpack.i.bf16 %v12214_v51, %v4033_v18  ;;  %v4049_v18 = vrot.slane %v12292_v8, 1 }
 0x963   :  { %v8823_v50 = vpack.i.bf16 %v12256_v16, %v12253_v3 }
 0x965   :  { %8804 = vrot.lane.b32.xlu0 %v8803_v31, %s9469_s28  ;;  %8799 = vrot.lane.b32.xlu2 %v8798_v38, %s9470_s30  ;;  %v12276_v31 = vsel %vm271_vm3, %v3957_v14, %v3958_v49  ;;  %v4505_v38 = vpack.c.bf16 %v12267_v48, %v12264_v1  ;;  %v4047_v14 = vrot.slane %v3882_v58, 1  ;;  %v4050_v49 = vrot.slane %v3885_v25, 1 }
 0x966   :  { %v8843_v29 = vpack.i.bf16 %v12276_v31, %v12256_v16 }
 0x967   :  { %7787 = vmatmul.msk.bf16.gmra.mxu1 %vm102_vm5, %v4505_v38  ;;  %v8022_v38 = vld [vmem:[%s14190_s9] sm:$0xff]  ;;  %v4048_v54 = vsel %vm352_vm4, %v4046_v24, %v4047_v14  ;;  %v12311_v58 = vsel %vm352_vm4, %v4049_v18, %v4050_v49  ;;  %v8863_v24 = vpack.i.bf16 %v12264_v1, %v12217_v20  ;;  %v8858_v14 = vpack.i.bf16 %v12242_v52, %v12240_v23  ;;  %v12332_v18 = vld [vmem:[#allocation3 + $0x1b8] sm:$0xff]  ;;  %v12334_v49 = vld [vmem:[#allocation3 + $0x1d0] sm:$0xff] }
 0x968   :  { %4687 = vmatpush.bf16.msra.mxu3 %v8022_v38  ;;  %v4508_v25 = vpack.c.bf16 %v12311_v58, %v4048_v54 }
 0x96a   :  { %8819 = vrot.lane.b32.xlu1 %v8818_v56, %s9468_s24  ;;  %v3877_v56 = vld [vmem:[#allocation3 + $0x168] sm:$0xff] }
 0x96b   :  { %v3963_v10 = vrot.slane %v3877_v56, 7  ;;  %v3880_v56 = vld [vmem:[#allocation3 + $0x180] sm:$0xff] }
 0x96c   :  { %v3966_v38 = vrot.slane %v3880_v56, 7 }
 0x96d   :  { %8809 = vrot.lane.b32.xlu0 %v8808_v61, %s9469_s28  ;;  %8824 = vrot.lane.b32.xlu2 %v8823_v50, %s9470_s30  ;;  %v8848_v61 = vpack.i.bf16 %v12217_v20, %v12214_v51  ;;  %v12302_v50 = vsel %vm271_vm3, %v3960_v26, %v3961_v42  ;;  %v8030_v26 = vld [vmem:[%s14190_s9 + $0x40] sm:$0xff]  ;;  %v4085_v20 = vrot.slane %v12334_v49, 1 }
 0x96e   :  { %v8853_v51 = vpack.i.bf16 %v12302_v50, %v12276_v31  ;;  %4736 = vmatpush.bf16.msrb.mxu0 %v8030_v26 }
 0x972   :  { %8844 = vrot.lane.b32.xlu1 %v8843_v29, %s9468_s24  ;;  %v3964_v29 = vrot.slane %v12242_v52, 7 }
 0x975   :  { %8834 = vrot.lane.b32.xlu0 %v8833_v28, %s9469_s28  ;;  %8829 = vrot.lane.b32.xlu2 %v8828_v60, %s9470_s30  ;;  %v12318_v28 = vsel %vm271_vm3, %v3963_v10, %v3964_v29  ;;  %v3967_v10 = vrot.slane %v12290_v39, 7  ;;  %v3883_v29 = vld [vmem:[#allocation3 + $0x198] sm:$0xff] }
 0x976   :  { %v8873_v42 = vpack.i.bf16 %v12318_v28, %v12302_v50  ;;  %v3969_v56 = vrot.slane %v3883_v29, 7  ;;  %v8893_v29 = vpack.i.bf16 %v4048_v54, %v12267_v48  ;;  %v4078_v48 = vrot.slane %v12334_v49, 7 }
 0x977   :  { %7788 = vmatmul.msk.bf16.gmra.mxu1 %vm102_vm5, %v4508_v25  ;;  %v12344_v22 = vsel %vm271_vm3, %v3966_v38, %v3967_v10  ;;  %v3886_v10 = vld [vmem:[#allocation3 + $0x1b0] sm:$0xff] }
 0x978   :  { %v12355_v1 = vsel %vm271_vm3, %v3969_v56, %v3970_v4  ;;  %v4060_v4 = vrot.slane %v12332_v18, 7 }
 0x97a   :  { %8849 = vrot.lane.b32.xlu1 %v8848_v61, %s9468_s24  ;;  %v3891_v61 = vld [vmem:[#allocation3 + $0x1d8] sm:$0xff] }
 0x97b   :  { %v4086_v26 = vrot.slane %v3891_v61, 1 }
 0x97d   :  { %8839 = vrot.lane.b32.xlu0 %v8828_v60, %s9469_s28  ;;  %8854 = vrot.lane.b32.xlu2 %v8853_v51, %s9470_s30  ;;  %v3888_v60 = vld [vmem:[#allocation3 + $0x1c0] sm:$0xff]  ;;  %v4067_v51 = vrot.slane %v12332_v18, 1  ;;  %v4087_v21 = vsel %vm352_vm4, %v4085_v20, %v4086_v26  ;;  %v8908_v26 = vpack.i.bf16 %v12311_v58, %v4048_v54 }
 0x97e   :  { %v4068_v25 = vrot.slane %v3888_v60, 1  ;;  %v8883_v60 = vpack.i.bf16 %v12344_v22, %v12318_v28  ;;  %v3832_v20 = vld [vmem:[#allocation3] sm:$0xff] }
 0x982   :  { %8874 = vrot.lane.b32.xlu1 %v8873_v42, %s9468_s24 }
 0x985   :  { %8864 = vrot.lane.b32.xlu0 %v8863_v24, %s9469_s28  ;;  %8859 = vrot.lane.b32.xlu2 %v8858_v14, %s9470_s30  ;;  %v4069_v24 = vsel %vm352_vm4, %v4067_v51, %v4068_v25  ;;  %v4059_v51 = vrot.slane %v3886_v10, 7 }
 0x986   :  { %v4511_v61 = vpack.c.bf16 %v4087_v21, %v4069_v24  ;;  %v3889_v21 = vld [vmem:[#allocation3 + $0x1c8] sm:$0xff] }
 0x987   :  { %v8705_v42 = vpop.permute.xlu2 %8704  ;;  %v4061_v56 = vsel %vm271_vm3, %v4059_v51, %v4060_v4 }
 0x988   :  { %7789 = vmatmul.msk.bf16.gmra.mxu1 %vm102_vm5, %v4511_v61  ;;  %v3925_v61 = vrot.slane %v12055_v9, 7  ;;  %v8913_v10 = vpack.i.bf16 %v4061_v56, %v12355_v1  ;;  %v8706_v47 = vunpack.i.l.bf16 %v8705_v42 }
 0x98a   :  { %8879 = vrot.lane.b32.xlu1 %v8878_v32, %s9468_s24  ;;  %v8903_v32 = vpack.i.bf16 %v12355_v1, %v12344_v22 }
 0x98d   :  { %8869 = vrot.lane.b32.xlu0 %v8858_v14, %s9469_s28  ;;  %8884 = vrot.lane.b32.xlu2 %v8883_v60, %s9470_s30  ;;  %v8888_v14 = vpack.i.bf16 %v12292_v8, %v12290_v39  ;;  %v4077_v60 = vrot.slane %v3889_v21, 7 }
 0x98f   :  { %v12357_v38 = vpop.permute.xlu2 %8709  ;;  %v4079_v54 = vsel %vm271_vm3, %v4077_v60, %v4078_v48 }
 0x992   :  { %8904 = vrot.lane.b32.xlu1 %v8903_v32, %s9468_s24  ;;  %v3924_v32 = vrot.slane %v3832_v20, 7  ;;  %v8707_v20 = vunpack.i.h.bf16 %v8705_v42  ;;  %v8928_v42 = vpack.i.bf16 %v12334_v49, %v12332_v18 }
 0x994   :  { %v3926_v51 = vsel %vm271_vm3, %v3924_v32, %v3925_v61  ;;  %v8918_v61 = vpack.i.bf16 %v4069_v24, %v12311_v58  ;;  %v8711_v58 = vunpack.i.l.bf16 %v12357_v38 }
 0x995   :  { %8894 = vrot.lane.b32.xlu0 %v8893_v29, %s9469_s28  ;;  %8889 = vrot.lane.b32.xlu2 %v8888_v14, %s9470_s30 }
 0x997   :  { %v12369_v25 = vpop.permute.xlu2 %8734 }
 0x99a   :  { %8909 = vrot.lane.b32.xlu1 %v8908_v26, %s9468_s24  ;;  %v8923_v26 = vpack.i.bf16 %v4079_v54, %v4061_v56  ;;  %v8712_v54 = vunpack.i.h.bf16 %v12357_v38 }
 0x99c   :  { %v8695_v29 = vpop.permute.xlu1 %8694 }
 0x99d   :  { %v8697_v0 = vunpack.i.h.bf16 %v8695_v29  ;;  %v8696_v35 = vunpack.i.l.bf16 %v8695_v29  ;;  %8899 = vrot.lane.b32.xlu0 %v8888_v14, %s9469_s28  ;;  %8914 = vrot.lane.b32.xlu2 %v8913_v10, %s9470_s30 }
 0x99f   :  { %v8700_v4 = vpop.permute.xlu0 %8699  ;;  %v12381_v21 = vpop.permute.xlu2 %8739  ;;  %v4392_v17 = vsel %vm102_vm5, %v3926_v51, %v8696_v35  ;;  %v4393_v29 = vsel %vm102_vm5, %v12082_v15, %v8697_v0 }
 0x9a0   :  { %v8702_v9 = vunpack.i.h.bf16 %v8700_v4  ;;  %v8701_v13 = vunpack.i.l.bf16 %v8700_v4 }
 0x9a2   :  { %v4408_v14 = vsel %vm57_vm0, %v4392_v17, %v8701_v13  ;;  %v4409_v10 = vsel %vm57_vm0, %v4393_v29, %v8702_v9  ;;  %8924 = vrot.lane.b32.xlu1 %v8923_v26, %s9468_s24 }
 0x9a3   :  { %v4424_v60 = vsel %vm1888_vm8, %v4408_v14, %v8706_v47  ;;  %v4425_v48 = vsel %vm1888_vm8, %v4409_v10, %v8707_v20 }
 0x9a4   :  { %v4488_v56 = vpack.c.bf16 %v4425_v48, %v4424_v60  ;;  %v8725_v35 = vpop.permute.xlu1 %8724 }
 0x9a5   :  { %8919 = vrot.lane.b32.xlu0 %v8918_v61, %s9469_s28  ;;  %8929 = vrot.lane.b32.xlu2 %v8928_v42, %s9470_s30  ;;  %v8727_v15 = vunpack.i.h.bf16 %v8725_v35  ;;  %v8726_v32 = vunpack.i.l.bf16 %v8725_v35 }
 0x9a6   :  { %4688 = vmatmul.bf16.vlgmr.msra.gmra.mxu3 %v4488_v56 }
 0x9a7   :  { %v8715_v17 = vpop.permute.xlu0 %8714  ;;  %v8765_v47 = vpop.permute.xlu2 %8764 }
 0x9a8   :  { %v8717_v13 = vunpack.i.h.bf16 %v8715_v17  ;;  %v8716_v0 = vunpack.i.l.bf16 %v8715_v17 }
 0x9aa   :  { %v4441_v49 = vsel %vm102_vm5, %v12005_v43, %v8717_v13  ;;  %v4440_v24 = vsel %vm102_vm5, %v12068_v63, %v8716_v0  ;;  %v8737_v43 = vunpack.i.h.bf16 %v12369_v25  ;;  %v8736_v63 = vunpack.i.l.bf16 %v12369_v25 }
 0x9ab   :  { %v4457_v51 = vsel %vm57_vm0, %v4441_v49, %v8727_v15  ;;  %v4456_v4 = vsel %vm57_vm0, %v4440_v24, %v8726_v32  ;;  %v8742_v24 = vunpack.i.h.bf16 %v12381_v21 }
 0x9ac   :  { %v4472_v9 = vsel %vm1888_vm8, %v4456_v4, %v8711_v58  ;;  %v4473_v26 = vsel %vm1888_vm8, %v4457_v51, %v8712_v54  ;;  %v8730_v20 = vpop.permute.xlu1 %8729 }
 0x9ad   :  { %v4489_v29 = vpack.c.bf16 %v4473_v26, %v4472_v9  ;;  %v8732_v60 = vunpack.i.h.bf16 %v8730_v20  ;;  %v8731_v48 = vunpack.i.l.bf16 %v8730_v20 }
 0x9af   :  { %v8720_v14 = vpop.permute.xlu0 %8719  ;;  %4737 = vmatmul.bf16.vlgmr.msrb.gmra.mxu0 %v4489_v29  ;;  %v8770_v56 = vpop.permute.xlu2 %8769 }
 0x9b0   :  { %v8722_v10 = vunpack.i.h.bf16 %v8720_v14  ;;  %v8721_v38 = vunpack.i.l.bf16 %v8720_v14 }
 0x9b2   :  { %v4395_v61 = vsel %vm102_vm5, %v12095_v11, %v8722_v10  ;;  %v4394_v42 = vsel %vm102_vm5, %v12076_v12, %v8721_v38  ;;  %v8741_v12 = vunpack.i.l.bf16 %v12381_v21 }
 0x9b3   :  { %v4410_v35 = vsel %vm57_vm0, %v4394_v42, %v8731_v48  ;;  %v4411_v17 = vsel %vm57_vm0, %v4395_v61, %v8732_v60  ;;  %v8766_v61 = vunpack.i.l.bf16 %v8765_v47 }
 0x9b4   :  { %v8755_v13 = vpop.permute.xlu1 %8754  ;;  %v4426_v0 = vsel %vm1888_vm8, %v4410_v35, %v8736_v63  ;;  %v4427_v15 = vsel %vm1888_vm8, %v4411_v17, %v8737_v43  ;;  %v8767_v63 = vunpack.i.h.bf16 %v8765_v47 }
 0x9b5   :  { %v4491_v32 = vpack.c.bf16 %v4427_v15, %v4426_v0  ;;  %v8757_v49 = vunpack.i.h.bf16 %v8755_v13  ;;  %v8756_v11 = vunpack.i.l.bf16 %v8755_v13 }
 0x9b7   :  { %v8745_v54 = vpop.permute.xlu0 %8744  ;;  %4693 = vmatmul.bf16.gmra.mxu3 %v4491_v32  ;;  %v8795_v10 = vpop.permute.xlu2 %8794 }
 0x9b8   :  { %v8747_v25 = vunpack.i.h.bf16 %v8745_v54  ;;  %v8746_v58 = vunpack.i.l.bf16 %v8745_v54 }
 0x9ba   :  { %v4443_v51 = vsel %vm102_vm5, %v12058_v30, %v8747_v25  ;;  %v4442_v4 = vsel %vm102_vm5, %v12013_v59, %v8746_v58 }
 0x9bb   :  { %v4458_v9 = vsel %vm57_vm0, %v4442_v4, %v8756_v11  ;;  %v4459_v26 = vsel %vm57_vm0, %v4443_v51, %v8757_v49  ;;  %v8772_v11 = vunpack.i.h.bf16 %v8770_v56 }
 0x9bc   :  { %v8760_v20 = vpop.permute.xlu1 %8759  ;;  %v4474_v29 = vsel %vm1888_vm8, %v4458_v9, %v8741_v12  ;;  %v4475_v14 = vsel %vm1888_vm8, %v4459_v26, %v8742_v24  ;;  %v8771_v24 = vunpack.i.l.bf16 %v8770_v56 }
 0x9bd   :  { %v4492_v38 = vpack.c.bf16 %v4475_v14, %v4474_v29  ;;  %v8762_v43 = vunpack.i.h.bf16 %v8760_v20  ;;  %v8761_v30 = vunpack.i.l.bf16 %v8760_v20 }
 0x9bf   :  { %v8750_v60 = vpop.permute.xlu0 %8749  ;;  %4742 = vmatmul.bf16.gmra.mxu0 %v4492_v38  ;;  %v8800_v54 = vpop.permute.xlu2 %8799 }
 0x9c0   :  { %v8752_v21 = vunpack.i.h.bf16 %v8750_v60  ;;  %v8751_v48 = vunpack.i.l.bf16 %v8750_v60 }
 0x9c2   :  { %v4397_v59 = vsel %vm102_vm5, %v12139_v62, %v8752_v21  ;;  %v4396_v42 = vsel %vm102_vm5, %v12124_v6, %v8751_v48  ;;  %v8797_v48 = vunpack.i.h.bf16 %v8795_v10 }
 0x9c3   :  { %v4412_v35 = vsel %vm57_vm0, %v4396_v42, %v8761_v30  ;;  %v4413_v17 = vsel %vm57_vm0, %v4397_v59, %v8762_v43  ;;  %v8796_v43 = vunpack.i.l.bf16 %v8795_v10 }
 0x9c4   :  { %v8785_v13 = vpop.permute.xlu1 %8784  ;;  %v4428_v0 = vsel %vm1888_vm8, %v4412_v35, %v8766_v61  ;;  %v4429_v15 = vsel %vm1888_vm8, %v4413_v17, %v8767_v63 }
 0x9c5   :  { %v4494_v32 = vpack.c.bf16 %v4429_v15, %v4428_v0  ;;  %v8787_v49 = vunpack.i.h.bf16 %v8785_v13  ;;  %v8786_v62 = vunpack.i.l.bf16 %v8785_v13  ;;  %v3862_v15 = vld [vmem:[#allocation3 + $0xf0] sm:$0xff] }
 0x9c7   :  { %v8775_v25 = vpop.permute.xlu0 %8774  ;;  %4698 = vmatmul.bf16.gmra.mxu3 %v4494_v32  ;;  %v8825_v60 = vpop.permute.xlu2 %8824 }
 0x9c8   :  { %v8777_v47 = vunpack.i.h.bf16 %v8775_v25  ;;  %v8776_v58 = vunpack.i.l.bf16 %v8775_v25  ;;  %v8802_v25 = vunpack.i.h.bf16 %v8800_v54 }
 0x9ca   :  { %v4445_v6 = vsel %vm102_vm5, %v12109_v33, %v8777_v47  ;;  %v4444_v12 = vsel %vm102_vm5, %v12060_v55, %v8776_v58  ;;  %v8801_v47 = vunpack.i.l.bf16 %v8800_v54 }
 0x9cb   :  { %v4460_v51 = vsel %vm57_vm0, %v4444_v12, %v8786_v62  ;;  %v4461_v4 = vsel %vm57_vm0, %v4445_v6, %v8787_v49  ;;  %v3949_v6 = vrot.slane %v12223_v27, 7 }
 0x9cc   :  { %v8790_v9 = vpop.permute.xlu1 %8789  ;;  %v4476_v26 = vsel %vm1888_vm8, %v4460_v51, %v8771_v24  ;;  %v4477_v20 = vsel %vm1888_vm8, %v4461_v4, %v8772_v11  ;;  %v3948_v24 = vrot.slane %v3862_v15, 7 }
 0x9cd   :  { %v4495_v29 = vpack.c.bf16 %v4477_v20, %v4476_v26  ;;  %v8792_v21 = vunpack.i.h.bf16 %v8790_v9  ;;  %v8791_v33 = vunpack.i.l.bf16 %v8790_v9 }
 0x9cf   :  { %v8780_v14 = vpop.permute.xlu0 %8779  ;;  %4747 = vmatmul.bf16.gmra.mxu0 %v4495_v29  ;;  %v8830_v49 = vpop.permute.xlu2 %8829 }
 0x9d0   :  { %v8782_v38 = vunpack.i.h.bf16 %v8780_v14  ;;  %v8781_v56 = vunpack.i.l.bf16 %v8780_v14  ;;  %v8827_v14 = vunpack.i.h.bf16 %v8825_v60 }
 0x9d2   :  { %v4399_v55 = vsel %vm102_vm5, %v12182_v2, %v8782_v38  ;;  %v4398_v30 = vsel %vm102_vm5, %v12169_v41, %v8781_v56  ;;  %v8826_v38 = vunpack.i.l.bf16 %v8825_v60 }
 0x9d3   :  { %v4414_v63 = vsel %vm57_vm0, %v4398_v30, %v8791_v33  ;;  %v4415_v61 = vsel %vm57_vm0, %v4399_v55, %v8792_v21 }
 0x9d4   :  { %v8815_v59 = vpop.permute.xlu1 %8814  ;;  %v4430_v42 = vsel %vm1888_vm8, %v4414_v63, %v8796_v43  ;;  %v4431_v35 = vsel %vm1888_vm8, %v4415_v61, %v8797_v48 }
 0x9d5   :  { %v4497_v17 = vpack.c.bf16 %v4431_v35, %v4430_v42  ;;  %v8817_v32 = vunpack.i.h.bf16 %v8815_v59  ;;  %v8816_v2 = vunpack.i.l.bf16 %v8815_v59 }
 0x9d7   :  { %v8805_v13 = vpop.permute.xlu0 %8804  ;;  %4703 = vmatmul.bf16.gmra.mxu3 %v4497_v17  ;;  %v8855_v30 = vpop.permute.xlu2 %8854  ;;  %v8832_v17 = vunpack.i.h.bf16 %v8830_v49 }
 0x9d8   :  { %v8807_v0 = vunpack.i.h.bf16 %v8805_v13  ;;  %v8806_v10 = vunpack.i.l.bf16 %v8805_v13  ;;  %v8831_v13 = vunpack.i.l.bf16 %v8830_v49 }
 0x9da   :  { %v4447_v41 = vsel %vm102_vm5, %v12154_v37, %v8807_v0  ;;  %v4446_v58 = vsel %vm102_vm5, %v12111_v57, %v8806_v10  ;;  %v3950_v37 = vsel %vm271_vm3, %v3948_v24, %v3949_v6  ;;  %v8857_v24 = vunpack.i.h.bf16 %v8855_v30 }
 0x9db   :  { %v4462_v62 = vsel %vm57_vm0, %v4446_v58, %v8816_v2  ;;  %v4463_v11 = vsel %vm57_vm0, %v4447_v41, %v8817_v32  ;;  %v8856_v6 = vunpack.i.l.bf16 %v8855_v30 }
 0x9dc   :  { %v8820_v12 = vpop.permute.xlu1 %8819  ;;  %v4478_v51 = vsel %vm1888_vm8, %v4462_v62, %v8801_v47  ;;  %v4479_v4 = vsel %vm1888_vm8, %v4463_v11, %v8802_v25 }
 0x9dd   :  { %v4498_v54 = vpack.c.bf16 %v4479_v4, %v4478_v51  ;;  %v8822_v20 = vunpack.i.h.bf16 %v8820_v12  ;;  %v8821_v29 = vunpack.i.l.bf16 %v8820_v12 }
 0x9df   :  { %4752 = vmatmul.bf16.gmra.mxu0 %v4498_v54  ;;  %v8810_v9 = vpop.permute.xlu0 %8809  ;;  %v8860_v41 = vpop.permute.xlu2 %8859 }
 0x9e0   :  { %v8812_v26 = vunpack.i.h.bf16 %v8810_v9  ;;  %v8811_v57 = vunpack.i.l.bf16 %v8810_v9 }
 0x9e2   :  { %v4400_v56 = vsel %vm102_vm5, %v3950_v37, %v8811_v57  ;;  %v4401_v27 = vsel %vm102_vm5, %v12253_v3, %v8812_v26 }
 0x9e3   :  { %v4416_v21 = vsel %vm57_vm0, %v4400_v56, %v8821_v29  ;;  %v4417_v33 = vsel %vm57_vm0, %v4401_v27, %v8822_v20  ;;  %v8862_v56 = vunpack.i.h.bf16 %v8860_v41  ;;  %v8861_v27 = vunpack.i.l.bf16 %v8860_v41 }
 0x9e4   :  { %v8845_v48 = vpop.permute.xlu1 %8844  ;;  %v4432_v43 = vsel %vm1888_vm8, %v4416_v21, %v8826_v38  ;;  %v4433_v55 = vsel %vm1888_vm8, %v4417_v33, %v8827_v14 }
 0x9e5   :  { %v4500_v63 = vpack.c.bf16 %v4433_v55, %v4432_v43  ;;  %v8847_v42 = vunpack.i.h.bf16 %v8845_v48  ;;  %v8846_v35 = vunpack.i.l.bf16 %v8845_v48 }
 0x9e7   :  { %v8835_v61 = vpop.permute.xlu0 %8834  ;;  %4708 = vmatmul.bf16.gmra.mxu3 %v4500_v63  ;;  %v8885_v14 = vpop.permute.xlu2 %8884 }
 0x9e8   :  { %v8837_v59 = vunpack.i.h.bf16 %v8835_v61  ;;  %v8836_v60 = vunpack.i.l.bf16 %v8835_v61 }
 0x9ea   :  { %v4449_v3 = vsel %vm102_vm5, %v12196_v45, %v8837_v59  ;;  %v4448_v0 = vsel %vm102_vm5, %v12230_v36, %v8836_v60 }
 0x9eb   :  { %v4464_v10 = vsel %vm57_vm0, %v4448_v0, %v8846_v35  ;;  %v4465_v15 = vsel %vm57_vm0, %v4449_v3, %v8847_v42 }
 0x9ec   :  { %v8850_v32 = vpop.permute.xlu1 %8849  ;;  %v4480_v2 = vsel %vm1888_vm8, %v4464_v10, %v8831_v13  ;;  %v4481_v25 = vsel %vm1888_vm8, %v4465_v15, %v8832_v17  ;;  %v8886_v17 = vunpack.i.l.bf16 %v8885_v14 }
 0x9ed   :  { %v4501_v47 = vpack.c.bf16 %v4481_v25, %v4480_v2  ;;  %v8852_v11 = vunpack.i.h.bf16 %v8850_v32  ;;  %v8851_v45 = vunpack.i.l.bf16 %v8850_v32 }
 0x9ef   :  { %v8840_v58 = vpop.permute.xlu0 %8839  ;;  %4757 = vmatmul.bf16.gmra.mxu0 %v4501_v47  ;;  %v8890_v3 = vpop.permute.xlu2 %8889 }
 0x9f0   :  { %v8842_v49 = vunpack.i.h.bf16 %v8840_v58  ;;  %v8841_v62 = vunpack.i.l.bf16 %v8840_v58 }
 0x9f2   :  { %v4403_v36 = vsel %vm102_vm5, %v12276_v31, %v8842_v49  ;;  %v4402_v12 = vsel %vm102_vm5, %v12256_v16, %v8841_v62  ;;  %v8892_v62 = vunpack.i.h.bf16 %v8890_v3 }
 0x9f3   :  { %v4418_v51 = vsel %vm57_vm0, %v4402_v12, %v8851_v45  ;;  %v4419_v4 = vsel %vm57_vm0, %v4403_v36, %v8852_v11  ;;  %v8891_v11 = vunpack.i.l.bf16 %v8890_v3 }
 0x9f4   :  { %v8875_v54 = vpop.permute.xlu1 %8874  ;;  %v4434_v37 = vsel %vm1888_vm8, %v4418_v51, %v8856_v6  ;;  %v4435_v9 = vsel %vm1888_vm8, %v4419_v4, %v8857_v24 }
 0x9f5   :  { %v4503_v26 = vpack.c.bf16 %v4435_v9, %v4434_v37  ;;  %v8877_v38 = vunpack.i.h.bf16 %v8875_v54  ;;  %v8876_v31 = vunpack.i.l.bf16 %v8875_v54  ;;  %v12507_v9 = vpop.f32.mrf.mxu1 }
 0x9f7   :  { %v8865_v57 = vpop.permute.xlu0 %8864  ;;  %4713 = vmatmul.bf16.gmra.mxu3 %v4503_v26  ;;  %v8915_v4 = vpop.permute.xlu2 %8914 }
 0x9f8   :  { %v8867_v20 = vunpack.i.h.bf16 %v8865_v57  ;;  %v8866_v29 = vunpack.i.l.bf16 %v8865_v57 }
 0x9fa   :  { %v4451_v16 = vsel %vm102_vm5, %v12240_v23, %v8867_v20  ;;  %v4450_v21 = vsel %vm102_vm5, %v12198_v46, %v8866_v29  ;;  %v8887_v23 = vunpack.i.h.bf16 %v8885_v14  ;;  %v8916_v29 = vunpack.i.l.bf16 %v8915_v4 }
 0x9fb   :  { %v4466_v33 = vsel %vm57_vm0, %v4450_v21, %v8876_v31  ;;  %v4467_v48 = vsel %vm57_vm0, %v4451_v16, %v8877_v38 }
 0x9fc   :  { %v8880_v43 = vpop.permute.xlu1 %8879  ;;  %v4482_v55 = vsel %vm1888_vm8, %v4466_v33, %v8861_v27  ;;  %v4483_v30 = vsel %vm1888_vm8, %v4467_v48, %v8862_v56 }
 0x9fd   :  { %v4504_v63 = vpack.c.bf16 %v4483_v30, %v4482_v55  ;;  %v8882_v42 = vunpack.i.h.bf16 %v8880_v43  ;;  %v8881_v35 = vunpack.i.l.bf16 %v8880_v43 }
 0x9ff   :  { %v8870_v61 = vpop.permute.xlu0 %8869  ;;  %4762 = vmatmul.bf16.gmra.mxu0 %v4504_v63  ;;  %v8930_v48 = vpop.permute.xlu2 %8929 }
 0xa00   :  { %v8872_v59 = vunpack.i.h.bf16 %v8870_v61  ;;  %v8871_v60 = vunpack.i.l.bf16 %v8870_v61  ;;  %v4789_v61 = vpop.f32.mrf.mxu1 }
 0xa02   :  { %v4405_v46 = vsel %vm102_vm5, %v12318_v28, %v8872_v59  ;;  %v4404_v13 = vsel %vm102_vm5, %v12302_v50, %v8871_v60  ;;  %v8932_v59 = vunpack.i.h.bf16 %v8930_v48 }
 0xa03   :  { %v4420_v0 = vsel %vm57_vm0, %v4404_v13, %v8881_v35  ;;  %v4421_v10 = vsel %vm57_vm0, %v4405_v46, %v8882_v42 }
 0xa04   :  { %v8905_v15 = vpop.permute.xlu1 %8904  ;;  %v4436_v32 = vsel %vm1888_vm8, %v4420_v0, %v8886_v17  ;;  %v4437_v2 = vsel %vm1888_vm8, %v4421_v10, %v8887_v23 }
 0xa05   :  { %v4506_v25 = vpack.c.bf16 %v4437_v2, %v4436_v32  ;;  %v8907_v49 = vunpack.i.h.bf16 %v8905_v15  ;;  %v8906_v28 = vunpack.i.l.bf16 %v8905_v15 }
 0xa07   :  { %v8895_v47 = vpop.permute.xlu0 %8894  ;;  %4718 = vmatmul.bf16.gmra.mxu3 %v4506_v25 }
 0xa08   :  { %v8897_v41 = vunpack.i.h.bf16 %v8895_v47  ;;  %v8896_v58 = vunpack.i.l.bf16 %v8895_v47  ;;  %v4792_v3 = vpop.f32.mrf.mxu1 }
 0xa0a   :  { %v4453_v50 = vsel %vm102_vm5, %v12290_v39, %v8897_v41  ;;  %v4452_v45 = vsel %vm102_vm5, %v12242_v52, %v8896_v58  ;;  %v8917_v52 = vunpack.i.h.bf16 %v8915_v4 }
 0xa0b   :  { %v4468_v24 = vsel %vm57_vm0, %v4452_v45, %v8906_v28  ;;  %v4469_v6 = vsel %vm57_vm0, %v4453_v50, %v8907_v49 }
 0xa0c   :  { %v8910_v36 = vpop.permute.xlu1 %8909  ;;  %v4484_v12 = vsel %vm1888_vm8, %v4468_v24, %v8891_v11  ;;  %v4485_v51 = vsel %vm1888_vm8, %v4469_v6, %v8892_v62 }
 0xa0d   :  { %v4507_v54 = vpack.c.bf16 %v4485_v51, %v4484_v12  ;;  %v8912_v57 = vunpack.i.h.bf16 %v8910_v36  ;;  %v8911_v20 = vunpack.i.l.bf16 %v8910_v36 }
 0xa0f   :  { %v8900_v37 = vpop.permute.xlu0 %8899  ;;  %4767 = vmatmul.bf16.gmra.mxu0 %v4507_v54 }
 0xa10   :  { %v8902_v26 = vunpack.i.h.bf16 %v8900_v37  ;;  %v8901_v39 = vunpack.i.l.bf16 %v8900_v37  ;;  %v4794_v32 = vpop.f32.mrf.mxu1 }
 0xa12   :  { %v4407_v14 = vsel %vm102_vm5, %v12355_v1, %v8902_v26  ;;  %v4406_v38 = vsel %vm102_vm5, %v12344_v22, %v8901_v39  ;;  %v8931_v22 = vunpack.i.l.bf16 %v8930_v48 }
 0xa13   :  { %v4422_v31 = vsel %vm57_vm0, %v4406_v38, %v8911_v20  ;;  %v4423_v56 = vsel %vm57_vm0, %v4407_v14, %v8912_v57 }
 0xa14   :  { %v4438_v27 = vsel %vm1888_vm8, %v4422_v31, %v8916_v29  ;;  %v4439_v16 = vsel %vm1888_vm8, %v4423_v56, %v8917_v52  ;;  %v8925_v33 = vpop.permute.xlu1 %8924 }
 0xa15   :  { %v4509_v21 = vpack.c.bf16 %v4439_v16, %v4438_v27  ;;  %v8927_v63 = vunpack.i.h.bf16 %v8925_v33  ;;  %v8926_v1 = vunpack.i.l.bf16 %v8925_v33 }
 0xa17   :  { %v8920_v43 = vpop.permute.xlu0 %8919  ;;  %4723 = vmatmul.bf16.gmra.mxu3 %v4509_v21 }
 0xa18   :  { %v8922_v55 = vunpack.i.h.bf16 %v8920_v43  ;;  %v8921_v30 = vunpack.i.l.bf16 %v8920_v43  ;;  %v4797_v25 = vpop.f32.mrf.mxu1 }
 0xa1a   :  { %v4455_v60 = vsel %vm102_vm5, %v12332_v18, %v8922_v55  ;;  %v4454_v42 = vsel %vm102_vm5, %v12292_v8, %v8921_v30 }
 0xa1b   :  { %v4470_v35 = vsel %vm57_vm0, %v4454_v42, %v8926_v1  ;;  %v4471_v23 = vsel %vm57_vm0, %v4455_v60, %v8927_v63 }
 0xa1c   :  { %v4486_v17 = vsel %vm1888_vm8, %v4470_v35, %v8931_v22  ;;  %v4487_v46 = vsel %vm1888_vm8, %v4471_v23, %v8932_v59 }
 0xa1d   :  { %v4510_v13 = vpack.c.bf16 %v4487_v46, %v4486_v17 }
 0xa1f   :  { %4772 = vmatmul.bf16.gmra.mxu0 %v4510_v13 }
 0xa20   :  { %v4799_v58 = vpop.f32.mrf.mxu1 }
 0xa28   :  { %v4802_v11 = vpop.f32.mrf.mxu1 }
 0xa29   :  { %v4689_v0 = vpop.f32.mrf.mxu3 }
 0xa2c   :  { %v4738_v10 = vpop.f32.mrf.mxu0 }
 0xa2d   :  { %v4739_v15 = vadd.f32 %v4738_v10, %v4689_v0 }
 0xa2f   :  { %v12530_v1 = vadd.f32 %v12507_v9, %v4739_v15 }
 0xa30   :  { %v4804_v36 = vpop.f32.mrf.mxu1 }
 0xa31   :  { %v4691_v2 = vpop.f32.mrf.mxu3  ;;  %v4829_v35 = vsel %vm102_vm5, %v12530_v1, 0.0 }
 0xa34   :  { %v4740_v18 = vpop.f32.mrf.mxu0 }
 0xa35   :  { %v4741_v33 = vadd.f32 %v4740_v18, %v4691_v2 }
 0xa37   :  { %v12527_v55 = vadd.f32 %v4789_v61, %v4741_v33 }
 0xa38   :  { %v4807_v37 = vpop.f32.mrf.mxu1 }
 0xa39   :  { %v4830_v22 = vsel %vm102_vm5, %v12527_v55, 0.0 }
 0xa3a   :  { %v4694_v47 = vpop.f32.mrf.mxu3  ;;  %v4831_v46 = vadd.f32 %v4830_v22, %v4829_v35 }
 0xa3c   :  { %v4743_v8 = vpop.f32.mrf.mxu0 }
 0xa3d   :  { %v4744_v41 = vadd.f32 %v4743_v8, %v4694_v47 }
 0xa3f   :  { %v12532_v59 = vadd.f32 %v4792_v3, %v4744_v41 }
 0xa40   :  { %v4809_v57 = vpop.f32.mrf.mxu1 }
 0xa41   :  { %v4832_v61 = vsel %vm102_vm5, %v12532_v59, 0.0 }
 0xa42   :  { %v4696_v49 = vpop.f32.mrf.mxu3  ;;  %v4833_v15 = vadd.f32 %v4832_v61, %v4831_v46 }
 0xa44   :  { %v4745_v28 = vpop.f32.mrf.mxu0 }
 0xa45   :  { %v4746_v30 = vadd.f32 %v4745_v28, %v4696_v49 }
 0xa47   :  { %v12536_v60 = vadd.f32 %v4794_v32, %v4746_v30 }
 0xa48   :  { %v4812_v14 = vpop.f32.mrf.mxu1 }
 0xa49   :  { %v4834_v13 = vsel %vm102_vm5, %v12536_v60, 0.0 }
 0xa4a   :  { %v4699_v62 = vpop.f32.mrf.mxu3  ;;  %v4835_v8 = vadd.f32 %v4834_v13, %v4833_v15 }
 0xa4c   :  { %v4748_v50 = vpop.f32.mrf.mxu0 }
 0xa4d   :  { %v4749_v45 = vadd.f32 %v4748_v50, %v4699_v62 }
 0xa4f   :  { %v12542_v23 = vadd.f32 %v4797_v25, %v4749_v45 }
 0xa50   :  { %v4814_v27 = vpop.f32.mrf.mxu1 }
 0xa51   :  { %v4836_v2 = vsel %vm102_vm5, %v12542_v23, 0.0 }
 0xa52   :  { %v4701_v24 = vpop.f32.mrf.mxu3 }
 0xa54   :  { %v4750_v6 = vpop.f32.mrf.mxu0 }
 0xa55   :  { %v4751_v42 = vadd.f32 %v4750_v6, %v4701_v24 }
 0xa57   :  { %v12546_v3 = vadd.f32 %v4799_v58, %v4751_v42  ;;  %v4837_v58 = vadd.f32 %v4836_v2, %v4835_v8 }
 0xa58   :  { %v4817_v48 = vpop.f32.mrf.mxu1 }
 0xa59   :  { %v4838_v25 = vsel %vm102_vm5, %v12546_v3, 0.0 }
 0xa5a   :  { %v4704_v12 = vpop.f32.mrf.mxu3  ;;  %v4839_v24 = vadd.f32 %v4838_v25, %v4837_v58 }
 0xa5c   :  { %v4753_v51 = vpop.f32.mrf.mxu0 }
 0xa5d   :  { %v4754_v4 = vadd.f32 %v4753_v51, %v4704_v12 }
 0xa5f   :  { %v12525_v54 = vadd.f32 %v4802_v11, %v4754_v4 }
 0xa60   :  { %v4819_v17 = vpop.f32.mrf.mxu1 }
 0xa61   :  { %v4840_v62 = vsel %vm102_vm5, %v12525_v54, 0.0 }
 0xa62   :  { %v4706_v26 = vpop.f32.mrf.mxu3 }
 0xa64   :  { %v4755_v39 = vpop.f32.mrf.mxu0 }
 0xa65   :  { %v4756_v0 = vadd.f32 %v4755_v39, %v4706_v26  ;;  %v4841_v39 = vadd.f32 %v4840_v62, %v4839_v24 }
 0xa67   :  { %v12552_v41 = vadd.f32 %v4804_v36, %v4756_v0 }
 0xa68   :  { %v4822_v26 = vpop.f32.mrf.mxu1 }
 0xa69   :  { %v4842_v12 = vsel %vm102_vm5, %v12552_v41, 0.0 }
 0xa6a   :  { %v4709_v20 = vpop.f32.mrf.mxu3 }
 0xa6c   :  { %v4758_v52 = vpop.f32.mrf.mxu0 }
 0xa6d   :  { %v4759_v18 = vadd.f32 %v4758_v52, %v4709_v20 }
 0xa6f   :  { %v12558_v11 = vadd.f32 %v4807_v37, %v4759_v18 }
 0xa70   :  { %v4824_v61 = vpop.f32.mrf.mxu1 }
 0xa71   :  { %v4850_v37 = vsel %vm102_vm5, %v12558_v11, 0.0 }
 0xa72   :  { %v4711_v29 = vpop.f32.mrf.mxu3 }
 0xa74   :  { %v4760_v38 = vpop.f32.mrf.mxu0 }
 0xa75   :  { %v4761_v10 = vadd.f32 %v4760_v38, %v4711_v29 }
 0xa77   :  { %v12554_v49 = vadd.f32 %v4809_v57, %v4761_v10 }
 0xa79   :  { %v4851_v36 = vsel %vm102_vm5, %v12554_v49, 0.0 }
 0xa7a   :  { %v4714_v31 = vpop.f32.mrf.mxu3  ;;  %v4852_v38 = vadd.f32 %v4851_v36, %v4850_v37 }
 0xa7c   :  { %v4763_v56 = vpop.f32.mrf.mxu0 }
 0xa7d   :  { %v4764_v47 = vadd.f32 %v4763_v56, %v4714_v31 }
 0xa7f   :  { %v12560_v50 = vadd.f32 %v4812_v14, %v4764_v47  ;;  %v4843_v14 = vadd.f32 %v4842_v12, %v4841_v39 }
 0xa81   :  { %v4853_v20 = vsel %vm102_vm5, %v12560_v50, 0.0  ;;  %v4844_v33 = vrot.slane %v4843_v14, 4 }
 0xa82   :  { %v4716_v16 = vpop.f32.mrf.mxu3 }
 0xa84   :  { %v4765_v21 = vpop.f32.mrf.mxu0 }
 0xa85   :  { %v4766_v28 = vadd.f32 %v4765_v21, %v4716_v16 }
 0xa87   :  { %v12566_v51 = vadd.f32 %v4814_v27, %v4766_v28  ;;  %v4854_v27 = vadd.f32 %v4853_v20, %v4852_v38 }
 0xa89   :  { %v4855_v31 = vsel %vm102_vm5, %v12566_v51, 0.0 }
 0xa8a   :  { %v4719_v43 = vpop.f32.mrf.mxu3 }
 0xa8c   :  { %v4768_v63 = vpop.f32.mrf.mxu0 }
 0xa8d   :  { %v4769_v45 = vadd.f32 %v4768_v63, %v4719_v43  ;;  %v4856_v43 = vadd.f32 %v4855_v31, %v4854_v27 }
 0xa8f   :  { %v12572_v52 = vadd.f32 %v4817_v48, %v4769_v45 }
 0xa91   :  { %v4857_v16 = vsel %vm102_vm5, %v12572_v52, 0.0 }
 0xa92   :  { %v4721_v9 = vpop.f32.mrf.mxu3  ;;  %v4858_v30 = vadd.f32 %v4857_v16, %v4856_v43 }
 0xa94   :  { %v4770_v32 = vpop.f32.mrf.mxu0 }
 0xa95   :  { %v4771_v4 = vadd.f32 %v4770_v32, %v4721_v9 }
 0xa97   :  { %v12576_v56 = vadd.f32 %v4819_v17, %v4771_v4  ;;  %v4845_v17 = vadd.f32 %v4844_v33, %v4843_v14 }
 0xa99   :  { %v4859_v48 = vsel %vm102_vm5, %v12576_v56, 0.0  ;;  %v4846_v10 = vrot.slane %v4845_v17, 2 }
 0xa9a   :  { %v4724_v6 = vpop.f32.mrf.mxu3  ;;  %v4860_v46 = vadd.f32 %v4859_v48, %v4858_v30 }
 0xa9b   :  { %v4847_v18 = vadd.f32 %v4846_v10, %v4845_v17 }
 0xa9c   :  { %v4773_v57 = vpop.f32.mrf.mxu0 }
 0xa9d   :  { %v4774_v29 = vadd.f32 %v4773_v57, %v4724_v6  ;;  %v4848_v25 = vrot.slane %v4847_v18, 1 }
 0xa9f   :  { %v12580_v21 = vadd.f32 %v4822_v26, %v4774_v29  ;;  %v4849_v58 = vadd.f32 %v4848_v25, %v4847_v18 }
 0xaa1   :  { %v4861_v42 = vsel %vm102_vm5, %v12580_v21, 0.0 }
 0xaa2   :  { %v4726_v63 = vpop.f32.mrf.mxu3  ;;  %v4862_v13 = vadd.f32 %v4861_v42, %v4860_v46 }
 0xaa4   :  { %v4775_v22 = vpop.f32.mrf.mxu0 }
 0xaa5   :  { %v4776_v35 = vadd.f32 %v4775_v22, %v4726_v63 }
 0xaa7   :  { %v12586_v9 = vadd.f32 %v4824_v61, %v4776_v35 }
 0xaa9   :  { %v4863_v0 = vsel %vm102_vm5, %v12586_v9, 0.0 }
 0xaaa   :  { %v4864_v15 = vadd.f32 %v4863_v0, %v4862_v13 }
 0xaac   :  { %v4865_v32 = vrot.slane %v4864_v15, 4 }
 0xaae   :  { %v4866_v2 = vadd.f32 %v4865_v32, %v4864_v15 }
 0xab0   :  { %v4867_v47 = vrot.slane %v4866_v2, 2 }
 0xab2   :  { %v4868_v8 = vadd.f32 %v4867_v47, %v4866_v2 }
 0xab4   :  { %v4869_v28 = vrot.slane %v4868_v8, 1 }
 0xab6   :  { %v4870_v62 = vadd.f32 %v4869_v28, %v4868_v8 }
 0xab8   :  { %v4873_v45 = vsel %vm2338_vm9, %v4870_v62, %v4849_v58 }
 0xab9   :  { %4890 = vrot.lane.b32.xlu2 %v4873_v45, %s9471_s3  ;;  %4884 = vrot.lane.b32.xlu1 %v4873_v45, %s9472_s25  ;;  %v4875_v24 = vsel %vm2341_vm10, %v4873_v45, 0.0 }
 0xaba   :  { %4878 = vrot.lane.b32.xlu0 %v4873_v45, %s9473_s27 }
 0xae4   :  { %4876 = vadd.xlane.f32.xlu0 %v4875_v24 }
 0xb13   :  { %v4891_v6 = vpop.permute.xlu2 %4890 }
 0xb14   :  { %v4893_v12 = vsel %vm2341_vm10, %v4891_v6, 0.0 }
 0xb15   :  { %4894 = vadd.xlane.f32.xlu0 %v4893_v12 }
 0xb2b   :  { %v4885_v36 = vpop.permute.xlu1 %4884 }
 0xb2c   :  { %v4887_v4 = vsel %vm2341_vm10, %v4885_v36, 0.0  ;;  %v4879_v26 = vpop.permute.xlu0 %4878 }
 0xb2d   :  { %v4881_v39 = vsel %vm2341_vm10, %v4879_v26, 0.0  ;;  %4888 = vadd.xlane.f32.xlu2 %v4887_v4 }
 0xb2e   :  { %4882 = vadd.xlane.f32.xlu1 %v4881_v39 }
 0xb57   :  { %v4877_v57 = vpop.xlane.xlu0 %4876 }
 0xb88   :  { %v4895_v14 = vpop.xlane.xlu0 %4894 }
 0xba0   :  { %v4889_v37 = vpop.xlane.xlu2 %4888 }
 0xba1   :  { %v4883_v20 = vpop.xlane.xlu1 %4882 }
 0xba2   :  { %v4896_v29 = vsel %vm2363_vm11, %v4877_v57, %v4883_v20 }
 0xba3   :  { %v4897_v38 = vsel %vm2365_vm12, %v4896_v29, %v4889_v37 }
 0xba4   :  { %v4898_v31 = vsel %vm2367_vm13, %v4897_v38, %v4895_v14 }
 0xba5   :  { %v4899_v27 = vmul.f32 0.001953125, %v4898_v31 }
 0xba7   :  { %v4901_v16 = vrot.slane %v4899_v27, 1  ;;  %v4902_v33 = vperm.slane %v4899_v27, 0 }
 0xba9   :  { %v4903_v43 = vperm.slane %v4901_v16, 0  ;;  %v12602_v48 = vsub.f32 %v12530_v1, %v4902_v33  ;;  %v12605_v30 = vsub.f32 %v12527_v55, %v4902_v33  ;;  %v12608_v63 = vsub.f32 %v12532_v59, %v4902_v33 }
 0xbaa   :  { %v12617_v35 = vsub.f32 %v12536_v60, %v4902_v33  ;;  %v12627_v59 = vsub.f32 %v12542_v23, %v4902_v33  ;;  %v12639_v17 = vsub.f32 %v12546_v3, %v4902_v33  ;;  %v12651_v10 = vsub.f32 %v12525_v54, %v4902_v33 }
 0xbab   :  { %v12611_v22 = vsub.f32 %v12558_v11, %v4903_v43  ;;  %v12614_v42 = vsub.f32 %v12554_v49, %v4903_v43  ;;  %v12620_v61 = vsub.f32 %v12560_v50, %v4903_v43  ;;  %v4922_v1 = vmul.f32 %v12602_v48, %v12602_v48 }
 0xbac   :  { %v4923_v55 = vmul.f32 %v12605_v30, %v12605_v30  ;;  %v12630_v11 = vsub.f32 %v12566_v51, %v4903_v43  ;;  %v4924_v49 = vmul.f32 %v12608_v63, %v12608_v63  ;;  %v12642_v46 = vsub.f32 %v12572_v52, %v4903_v43 }
 0xbad   :  { %v4930_v60 = vmul.f32 %v12611_v22, %v12611_v22  ;;  %v4931_v50 = vmul.f32 %v12614_v42, %v12614_v42  ;;  %v4925_v23 = vmul.f32 %v12617_v35, %v12617_v35  ;;  %v4932_v51 = vmul.f32 %v12620_v61, %v12620_v61 }
 0xbae   :  { %v4938_v13 = vsel %vm102_vm5, %v4922_v1, 0.0  ;;  %v4939_v0 = vsel %vm102_vm5, %v4923_v55, 0.0  ;;  %v12654_v15 = vsub.f32 %v12576_v56, %v4903_v43  ;;  %v4926_v3 = vmul.f32 %v12627_v59, %v12627_v59 }
 0xbaf   :  { %v4940_v52 = vadd.f32 %v4939_v0, %v4938_v13  ;;  %v4933_v32 = vmul.f32 %v12630_v11, %v12630_v11  ;;  %v4941_v2 = vsel %vm102_vm5, %v4924_v49, 0.0  ;;  %v4959_v18 = vsel %vm102_vm5, %v4930_v60, 0.0 }
 0xbb0   :  { %v4960_v47 = vsel %vm102_vm5, %v4931_v50, 0.0  ;;  %v12664_v8 = vsub.f32 %v12552_v41, %v4902_v33  ;;  %v12667_v54 = vsub.f32 %v12580_v21, %v4903_v43  ;;  %v4927_v28 = vmul.f32 %v12639_v17, %v12639_v17 }
 0xbb1   :  { %v4942_v56 = vadd.f32 %v4941_v2, %v4940_v52  ;;  %v4961_v25 = vadd.f32 %v4960_v47, %v4959_v18  ;;  %v4934_v58 = vmul.f32 %v12642_v46, %v12642_v46  ;;  %v4943_v62 = vsel %vm102_vm5, %v4925_v23, 0.0 }
 0xbb2   :  { %v4962_v45 = vsel %vm102_vm5, %v4932_v51, 0.0  ;;  %v12676_v24 = vsub.f32 %v12586_v9, %v4903_v43  ;;  %v4928_v21 = vmul.f32 %v12651_v10, %v12651_v10  ;;  %v4935_v12 = vmul.f32 %v12654_v15, %v12654_v15 }
 0xbb3   :  { %v4944_v41 = vadd.f32 %v4943_v62, %v4942_v56  ;;  %v4963_v6 = vadd.f32 %v4962_v45, %v4961_v25  ;;  %v4945_v36 = vsel %vm102_vm5, %v4926_v3, 0.0  ;;  %v4964_v4 = vsel %vm102_vm5, %v4933_v32, 0.0 }
 0xbb4   :  { %v4929_v57 = vmul.f32 %v12664_v8, %v12664_v8  ;;  %v4936_v9 = vmul.f32 %v12667_v54, %v12667_v54  ;;  %v4947_v37 = vsel %vm102_vm5, %v4927_v28, 0.0  ;;  %v4966_v20 = vsel %vm102_vm5, %v4934_v58, 0.0 }
 0xbb5   :  { %v4946_v26 = vadd.f32 %v4945_v36, %v4944_v41  ;;  %v4965_v39 = vadd.f32 %v4964_v4, %v4963_v6  ;;  %v4937_v38 = vmul.f32 %v12676_v24, %v12676_v24  ;;  %v4949_v31 = vsel %vm102_vm5, %v4928_v21, 0.0 }
 0xbb6   :  { %v4968_v27 = vsel %vm102_vm5, %v4935_v12, 0.0  ;;  %v4951_v43 = vsel %vm102_vm5, %v4929_v57, 0.0  ;;  %v4970_v1 = vsel %vm102_vm5, %v4936_v9, 0.0 }
 0xbb7   :  { %v4948_v29 = vadd.f32 %v4947_v37, %v4946_v26  ;;  %v4967_v14 = vadd.f32 %v4966_v20, %v4965_v39  ;;  %v4972_v60 = vsel %vm102_vm5, %v4937_v38, 0.0 }
 0xbb9   :  { %v4950_v16 = vadd.f32 %v4949_v31, %v4948_v29  ;;  %v4969_v33 = vadd.f32 %v4968_v27, %v4967_v14 }
 0xbbb   :  { %v4952_v55 = vadd.f32 %v4951_v43, %v4950_v16  ;;  %v4971_v49 = vadd.f32 %v4970_v1, %v4969_v33  ;;  %v9418_v33 = vld [vmem:[%s14191_s10] ss:$0 sm:$0xff]  ;;  %v8057_v1 = vld [vmem:[%s14193_s12 + $0x88] sm:$0xff] }
 0xbbc   :  { %6049 = vmatpush.bf16.msra.mxu0 %v8057_v1 }
 0xbbd   :  { %v4953_v50 = vrot.slane %v4952_v55, 4  ;;  %v4973_v23 = vadd.f32 %v4972_v60, %v4971_v49  ;;  %v8056_v49 = vld [vmem:[%s14193_s12 + $0x80] sm:$0xff] }
 0xbbf   :  { %v4954_v51 = vadd.f32 %v4953_v50, %v4952_v55  ;;  %v4974_v13 = vrot.slane %v4973_v23, 4 }
 0xbc0   :  { %6050 = vmatpush.bf16.msra.mxu0 %v8056_v49 }
 0xbc1   :  { %v4955_v0 = vrot.slane %v4954_v51, 2  ;;  %v4975_v3 = vadd.f32 %v4974_v13, %v4973_v23 }
 0xbc3   :  { %v4956_v52 = vadd.f32 %v4955_v0, %v4954_v51  ;;  %v4976_v32 = vrot.slane %v4975_v3, 2  ;;  %v9419_v51 = vld [vmem:[%s14192_s11] ss:$0 sm:$0xff] }
 0xbc5   :  { %v4957_v2 = vrot.slane %v4956_v52, 1  ;;  %v4977_v18 = vadd.f32 %v4976_v32, %v4975_v3 }
 0xbc7   :  { %v4978_v47 = vrot.slane %v4977_v18, 1  ;;  %v4958_v56 = vadd.f32 %v4957_v2, %v4956_v52 }
 0xbc9   :  { %v4979_v25 = vadd.f32 %v4978_v47, %v4977_v18 }
 0xbcb   :  { %v4982_v28 = vsel %vm2338_vm9, %v4979_v25, %v4958_v56 }
 0xbcc   :  { %4999 = vrot.lane.b32.xlu0 %v4982_v28, %s9471_s3  ;;  %4993 = vrot.lane.b32.xlu1 %v4982_v28, %s9472_s25  ;;  %v4984_v58 = vsel %vm2341_vm10, %v4982_v28, 0.0 }
 0xbcd   :  { %4987 = vrot.lane.b32.xlu2 %v4982_v28, %s9473_s27 }
 0xbf6   :  { %4985 = vadd.xlane.f32.xlu2 %v4984_v58 }
 0xc27   :  { %v4988_v62 = vpop.permute.xlu2 %4987 }
 0xc28   :  { %v4990_v45 = vsel %vm2341_vm10, %v4988_v62, 0.0 }
 0xc29   :  { %4991 = vadd.xlane.f32.xlu0 %v4990_v45 }
 0xc3e   :  { %v5000_v41 = vpop.permute.xlu0 %4999  ;;  %v4994_v6 = vpop.permute.xlu1 %4993 }
 0xc3f   :  { %v5002_v21 = vsel %vm2341_vm10, %v5000_v41, 0.0  ;;  %v4996_v12 = vsel %vm2341_vm10, %v4994_v6, 0.0 }
 0xc40   :  { %4997 = vadd.xlane.f32.xlu1 %v4996_v12  ;;  %5003 = vadd.xlane.f32.xlu2 %v5002_v21 }
 0xc69   :  { %v4986_v36 = vpop.xlane.xlu2 %4985 }
 0xc9c   :  { %v4992_v4 = vpop.xlane.xlu0 %4991 }
 0xc9d   :  { %v5005_v26 = vsel %vm2363_vm11, %v4986_v36, %v4992_v4 }
 0xcb3   :  { %v4998_v39 = vpop.xlane.xlu1 %4997  ;;  %v5004_v57 = vpop.xlane.xlu2 %5003 }
 0xcb4   :  { %v5006_v9 = vsel %vm2365_vm12, %v5005_v26, %v4998_v39 }
 0xcb5   :  { %v5007_v37 = vsel %vm2367_vm13, %v5006_v9, %v5004_v57 }
 0xcb6   :  { %v5008_v20 = vmul.f32 0.001953125, %v5007_v37 }
 0xcb8   :  { %v5009_v29 = vadd.f32 1e-05, %v5008_v20 }
 0xcba   :  { %9427 = vrsqrt.f32 %v5009_v29  ;;  %vm5016_vm15 = vweird.f32 %v5009_v29 }
 0xcc0   :  { %v9428_v14 = vpop.eup %9427 }
 0xcc1   :  { %v5011_v38 = vmul.f32 %v9428_v14, %v5009_v29  ;;  %vm5017_vm14 = vweird.f32 %v9428_v14 }
 0xcc2   :  { %vm5018_vm1 = vmor %vm5016_vm15, %vm5017_vm14 }
 0xcc3   :  { %v5012_v31 = vmul.f32 %v9428_v14, %v5011_v38  ;;  %v5108_v38 = vld [vmem:[#allocation3 + $0x58] sm:$0xff] }
 0xcc5   :  { %v5013_v27 = vmul.f32 0.5, %v5012_v31 }
 0xcc7   :  { %v5014_v16 = vsub.f32 1.5, %v5013_v27 }
 0xcc9   :  { %v5015_v43 = vmul.f32 %v9428_v14, %v5014_v16 }
 0xccb   :  { %v5019_v55 = vsel %vm5018_vm1, %v9428_v14, %v5015_v43 }
 0xccc   :  { %v5023_v60 = vmul.f32 %v9418_v33, %v5019_v55 }
 0xcce   :  { %v5025_v50 = vrot.slane %v5023_v60, 1  ;;  %v5026_v23 = vperm.slane %v5023_v60, 0  ;;  %v5279_v60 = vrot.slane %v5108_v38, 1 }
 0xcd0   :  { %v5030_v13 = vmul.f32 %v5026_v23, %v12602_v48  ;;  %v5031_v0 = vmul.f32 %v5026_v23, %v12605_v30  ;;  %v5032_v3 = vmul.f32 %v5026_v23, %v12608_v63  ;;  %v5033_v52 = vmul.f32 %v5026_v23, %v12617_v35 }
 0xcd1   :  { %v5027_v32 = vperm.slane %v5025_v50, 0  ;;  %v5034_v2 = vmul.f32 %v5026_v23, %v12627_v59  ;;  %v5035_v18 = vmul.f32 %v5026_v23, %v12639_v17  ;;  %v5036_v47 = vmul.f32 %v5026_v23, %v12651_v10 }
 0xcd2   :  { %v5049_v56 = vadd.f32 %v9419_v51, %v5030_v13  ;;  %v5050_v25 = vadd.f32 %v9419_v51, %v5031_v0  ;;  %v5051_v28 = vadd.f32 %v9419_v51, %v5032_v3  ;;  %v5037_v58 = vmul.f32 %v5026_v23, %v12664_v8 }
 0xcd3   :  { %v5052_v62 = vadd.f32 %v9419_v51, %v5033_v52  ;;  %v5038_v48 = vmul.f32 %v5027_v32, %v12611_v22  ;;  %v5053_v30 = vadd.f32 %v9419_v51, %v5034_v2  ;;  %v5039_v63 = vmul.f32 %v5027_v32, %v12614_v42 }
 0xcd4   :  { %v5040_v35 = vmul.f32 %v5027_v32, %v12620_v61  ;;  %v5054_v45 = vadd.f32 %v9419_v51, %v5035_v18  ;;  %v5055_v41 = vadd.f32 %v9419_v51, %v5036_v47  ;;  %v5065_v59 = vmax.f32 %v5049_v56, 0.0 }
 0xcd5   :  { %v5066_v6 = vmax.f32 %v5050_v25, 0.0  ;;  %v5067_v17 = vmax.f32 %v5051_v28, 0.0  ;;  %v5041_v10 = vmul.f32 %v5027_v32, %v12630_v11  ;;  %v5056_v21 = vadd.f32 %v9419_v51, %v5037_v58 }
 0xcd6   :  { %v5068_v12 = vmax.f32 %v5052_v62, 0.0  ;;  %v5042_v36 = vmul.f32 %v5027_v32, %v12642_v46  ;;  %v5057_v8 = vadd.f32 %v9419_v51, %v5038_v48  ;;  %v5069_v4 = vmax.f32 %v5053_v30, 0.0  ;;  %5081 = vst.msk [vmem:[#allocation3 + $0x20] sm:$0xff] %vm102_vm5, %v5065_v59  ;;  %v8047_v62 = vld [vmem:[%s14193_s12 + $0x38] sm:$0xff] }
 0xcd7   :  { %v5043_v22 = vmul.f32 %v5027_v32, %v12654_v15  ;;  %v5058_v42 = vadd.f32 %v9419_v51, %v5039_v63  ;;  %v5070_v26 = vmax.f32 %v5054_v45, 0.0  ;;  %5082 = vst.msk [vmem:[#allocation3 + $0x38] sm:$0xff] %vm102_vm5, %v5066_v6  ;;  %v5044_v61 = vmul.f32 %v5027_v32, %v12667_v54  ;;  %v5105_v15 = vld [vmem:[#allocation3 + $0x40] sm:$0xff]  ;;  %v12742_v54 = vld [vmem:[#allocation3 + $0x8] sm:$0xff]  ;;  %v8055_v48 = vld [vmem:[%s14193_s12 + $0x78] sm:$0xff]  ;;  %5945 = vmatpush.bf16.msrb.mxu2 %v8047_v62 }
 0xcd8   :  { %v5059_v39 = vadd.f32 %v9419_v51, %v5040_v35  ;;  %v5071_v57 = vmax.f32 %v5055_v41, 0.0  ;;  %5083 = vst.msk [vmem:[#allocation3 + $0x50] sm:$0xff] %vm102_vm5, %v5067_v17  ;;  %v5045_v11 = vmul.f32 %v5027_v32, %v12676_v24  ;;  %v5060_v9 = vadd.f32 %v9419_v51, %v5041_v10  ;;  %v12800_v30 = vld [vmem:[#allocation3 + $0xf8] sm:$0xff]  ;;  %5994 = vmatpush.bf16.msrb.mxu3 %v8055_v48  ;;  %v5111_v6 = vld [vmem:[#allocation3 + $0x70] sm:$0xff]  ;;  %v5114_v17 = vld [vmem:[#allocation3 + $0x88] sm:$0xff] }
 0xcd9   :  { %v5072_v46 = vmax.f32 %v5056_v21, 0.0  ;;  %5084 = vst.msk [vmem:[#allocation3 + $0x68] sm:$0xff] %vm102_vm5, %v5068_v12  ;;  %v5061_v37 = vadd.f32 %v9419_v51, %v5042_v36  ;;  %v5073_v20 = vmax.f32 %v5057_v8, 0.0  ;;  %v5062_v29 = vadd.f32 %v9419_v51, %v5043_v22  ;;  %v5099_v36 = vld [vmem:[#allocation3 + $0x10] sm:$0xff] }
 0xcda   :  { %5085 = vst.msk [vmem:[#allocation3 + $0x80] sm:$0xff] %vm102_vm5, %v5069_v4  ;;  %v5074_v14 = vmax.f32 %v5058_v42, 0.0  ;;  %v5063_v31 = vadd.f32 %v9419_v51, %v5044_v61  ;;  %v5075_v27 = vmax.f32 %v5059_v39, 0.0  ;;  %v5064_v24 = vadd.f32 %v9419_v51, %v5045_v11 }
 0xcdb   :  { %5086 = vst.msk [vmem:[#allocation3 + $0x98] sm:$0xff] %vm102_vm5, %v5070_v26  ;;  %v5076_v16 = vmax.f32 %v5060_v9, 0.0  ;;  %v5276_v43 = vrot.slane %v5105_v15, 1  ;;  %v5077_v1 = vmax.f32 %v5061_v37, 0.0  ;;  %v5078_v50 = vmax.f32 %v5062_v29, 0.0  ;;  %v5102_v26 = vld [vmem:[#allocation3 + $0x28] sm:$0xff] }
 0xcdc   :  { %5087 = vst.msk [vmem:[#allocation3 + $0xb0] sm:$0xff] %vm102_vm5, %v5071_v57  ;;  %v5079_v13 = vmax.f32 %v5063_v31, 0.0  ;;  %v5080_v32 = vmax.f32 %v5064_v24, 0.0  ;;  %v5282_v4 = vrot.slane %v5111_v6, 1  ;;  %v5285_v42 = vrot.slane %v5114_v17, 1  ;;  %v5103_v37 = vld [vmem:[#allocation3 + $0x30] sm:$0xff] }
 0xcdd   :  { %5088 = vst.msk [vmem:[#allocation3 + $0xc8] sm:$0xff] %vm102_vm5, %v5072_v46  ;;  %v12746_v33 = vld [vmem:[#allocation3 + $0x20] sm:$0xff]  ;;  %v5269_v57 = vrot.slane %v12742_v54, 1  ;;  %v5270_v9 = vrot.slane %v5099_v36, 1  ;;  %v5100_v46 = vld [vmem:[#allocation3 + $0x18] sm:$0xff]  ;;  %v5273_v15 = vrot.slane %v5102_v26, 1 }
 0xcde   :  { %5089 = vst.msk [vmem:[#allocation3 + $0x110] sm:$0xff] %vm102_vm5, %v5073_v20  ;;  %v12749_v55 = vld [vmem:[#allocation3 + $0x38] sm:$0xff]  ;;  %v8933_v49 = vpack.i.bf16 %v12746_v33, %v12742_v54  ;;  %v5272_v20 = vrot.slane %v12746_v33, 1  ;;  %v5195_v24 = vrot.slane %v5103_v37, 7  ;;  %v5109_v6 = vld [vmem:[#allocation3 + $0x60] sm:$0xff] }
 0xcdf   :  { %5090 = vst.msk [vmem:[#allocation3 + $0x128] sm:$0xff] %vm102_vm5, %v5074_v14  ;;  %v12754_v23 = vld [vmem:[#allocation3 + $0x50] sm:$0xff]  ;;  %v5275_v51 = vrot.slane %v12749_v55, 1  ;;  %v5112_v17 = vld [vmem:[#allocation3 + $0x78] sm:$0xff] }
 0xce0   :  { %5091 = vst.msk [vmem:[#allocation3 + $0x140] sm:$0xff] %vm102_vm5, %v5075_v27  ;;  %v12758_v0 = vld [vmem:[#allocation3 + $0x68] sm:$0xff]  ;;  %v12762_v3 = vpack.i.bf16 %v12754_v23, %v12749_v55  ;;  %8934 = vrot.lane.b32.xlu0 %v8933_v49, %s9469_s28  ;;  %v5278_v52 = vrot.slane %v12754_v23, 1  ;;  %v5192_v27 = vrot.slane %v5100_v46, 7  ;;  %v5196_v49 = vrot.slane %v12749_v55, 7 }
 0xce1   :  { %5092 = vst.msk [vmem:[#allocation3 + $0x158] sm:$0xff] %vm102_vm5, %v5076_v16  ;;  %v12767_v2 = vld [vmem:[#allocation3 + $0x80] sm:$0xff]  ;;  %v12770_v18 = vsel %vm352_vm4, %v5275_v51, %v5276_v43  ;;  %v5281_v8 = vrot.slane %v12758_v0, 1  ;;  %v5271_v16 = vsel %vm352_vm4, %v5269_v57, %v5270_v9  ;;  %v5120_v51 = vld [vmem:[#allocation3 + $0xb8] sm:$0xff]  ;;  %v5204_v26 = vrot.slane %v5112_v17, 7 }
 0xce2   :  { %5093 = vst.msk [vmem:[#allocation3 + $0x170] sm:$0xff] %vm102_vm5, %v5077_v1  ;;  %v12775_v47 = vpack.i.bf16 %v12767_v2, %v12758_v0  ;;  %8939 = vrot.lane.b32.xlu1 %v12762_v3, %s9469_s28  ;;  %v12780_v56 = vsel %vm352_vm4, %v5278_v52, %v5279_v60  ;;  %v12785_v28 = vld [vmem:[#allocation3 + $0x98] sm:$0xff]  ;;  %v5284_v22 = vrot.slane %v12767_v2, 1  ;;  %v5193_v1 = vrot.slane %v12746_v33, 7  ;;  %v8054_v52 = vld [vmem:[%s14193_s12 + $0x70] sm:$0xff] }
 0xce3   :  { %5094 = vst.msk [vmem:[#allocation3 + $0x188] sm:$0xff] %vm102_vm5, %v5078_v50  ;;  %v5755_v25 = vpack.c.bf16 %v12780_v56, %v12770_v18  ;;  %v12787_v58 = vld [vmem:[#allocation3 + $0xb0] sm:$0xff]  ;;  %v12846_v14 = vsel %vm352_vm4, %v5281_v8, %v5282_v4  ;;  %v8978_v31 = vpack.i.bf16 %v12780_v56, %v12770_v18  ;;  %v5274_v60 = vsel %vm352_vm4, %v5272_v20, %v5273_v15  ;;  %v5117_v50 = vld [vmem:[#allocation3 + $0xa0] sm:$0xff]  ;;  %v5106_v20 = vld [vmem:[#allocation3 + $0x48] sm:$0xff] }
 0xce4   :  { %5095 = vst.msk [vmem:[#allocation3 + $0x1a0] sm:$0xff] %vm102_vm5, %v5079_v13  ;;  %8944 = vrot.lane.b32.xlu2 %v12775_v47, %s9469_s28  ;;  %v12806_v35 = vpack.i.bf16 %v12787_v58, %v12785_v28  ;;  %v12849_v38 = vsel %vm352_vm4, %v5284_v22, %v5285_v42  ;;  %v8046_v13 = vld [vmem:[%s14193_s12 + $0x30] sm:$0xff]  ;;  %v5291_v62 = vrot.slane %v5120_v51, 1  ;;  %5995 = vmatpush.bf16.msrb.mxu3 %v8054_v52  ;;  %v5287_v36 = vrot.slane %v12785_v28, 1  ;;  %v8045_v51 = vld [vmem:[%s14193_s12 + $0x28] sm:$0xff] }
 0xce5   :  { %5096 = vst.msk [vmem:[#allocation3 + $0x1b8] sm:$0xff] %vm102_vm5, %v5080_v32  ;;  %7862 = vmatmul.msk.bf16.vlgmr.msra.gmra.mxu0 %vm102_vm5, %v5755_v25  ;;  %v12802_v63 = vld [vmem:[#allocation3 + $0x110] sm:$0xff]  ;;  %v5758_v43 = vpack.c.bf16 %v12849_v38, %v12846_v14  ;;  %v8973_v32 = vpack.i.bf16 %v5274_v60, %v5271_v16  ;;  %v5288_v25 = vrot.slane %v5117_v50, 1  ;;  %5946 = vmatpush.bf16.msrb.mxu2 %v8046_v13  ;;  %v5290_v8 = vrot.slane %v12787_v58, 1  ;;  %v12918_v52 = vld [vmem:[#allocation3 + $0xc8] sm:$0xff] }
 0xce6   :  { %v8953_v41 = vpack.i.bf16 %v12802_v63, %v12800_v30  ;;  %v12821_v21 = vld [vmem:[#allocation3 + $0x128] sm:$0xff]  ;;  %v12870_v48 = vsel %vm271_vm3, %v5192_v27, %v5193_v1  ;;  %v8983_v4 = vpack.i.bf16 %v12849_v38, %v12846_v14  ;;  %v5201_v42 = vrot.slane %v5109_v6, 7  ;;  %v5123_v13 = vld [vmem:[#allocation3 + $0xd0] sm:$0xff] }
 0xce7   :  { %v12823_v12 = vld [vmem:[#allocation3 + $0x140] sm:$0xff]  ;;  %v5202_v57 = vrot.slane %v12758_v0, 7  ;;  %v5205_v9 = vrot.slane %v12767_v2, 7  ;;  %v5289_v46 = vsel %vm352_vm4, %v5287_v36, %v5288_v25  ;;  %v12887_v37 = vsel %vm352_vm4, %v5290_v8, %v5291_v62  ;;  %v5126_v25 = vld [vmem:[#allocation3 + $0xe8] sm:$0xff] }
 0xce8   :  { %8949 = vrot.lane.b32.xlu0 %v12806_v35, %s9469_s28  ;;  %v12810_v45 = vld [vmem:[#allocation3 + $0x158] sm:$0xff]  ;;  %v12836_v11 = vpack.i.bf16 %v12823_v12, %v12821_v21  ;;  %v8988_v15 = vpack.i.bf16 %v12887_v37, %v5289_v46  ;;  %v5199_v16 = vrot.slane %v12754_v23, 7  ;;  %v9033_v62 = vpack.i.bf16 %v5289_v46, %v12849_v38 }
 0xce9   :  { %v12814_v59 = vld [vmem:[#allocation3 + $0x170] sm:$0xff]  ;;  %v12895_v27 = vsel %vm271_vm3, %v5204_v26, %v5205_v9  ;;  %5947 = vmatpush.bf16.msrb.mxu2 %v8045_v51  ;;  %v5329_v6 = vrot.slane %v12918_v52, 1  ;;  %v5330_v17 = vrot.slane %v5123_v13, 1  ;;  %v5348_v8 = vrot.slane %v5126_v25, 1  ;;  %v5138_v25 = vld [vmem:[#allocation3 + $0x148] sm:$0xff] }
 0xcea   :  { %v12818_v10 = vpack.i.bf16 %v12814_v59, %v12810_v45  ;;  %8954 = vrot.lane.b32.xlu1 %v8953_v41, %s9469_s28  ;;  %v12829_v61 = vld [vmem:[#allocation3 + $0x188] sm:$0xff]  ;;  %v12873_v41 = vsel %vm271_vm3, %v5195_v24, %v5196_v49  ;;  %v5198_v24 = vrot.slane %v5106_v20, 7  ;;  %v5761_v49 = vpack.c.bf16 %v12887_v37, %v5289_v46  ;;  %v5135_v13 = vld [vmem:[#allocation3 + $0x130] sm:$0xff] }
 0xceb   :  { %v12831_v39 = vld [vmem:[#allocation3 + $0x1a0] sm:$0xff]  ;;  %v9003_v22 = vpack.i.bf16 %v12873_v41, %v12870_v48  ;;  %v5211_v46 = vrot.slane %v12787_v58, 7 }
 0xcec   :  { %8964 = vrot.lane.b32.xlu2 %v12818_v10, %s9469_s28  ;;  %v12843_v29 = vpack.i.bf16 %v12831_v39, %v12829_v61  ;;  %v12905_v50 = vsel %vm271_vm3, %v5198_v24, %v5199_v16  ;;  %v5322_v24 = vrot.slane %v12918_v52, 7  ;;  %v8044_v16 = vld [vmem:[%s14193_s12 + $0x20] sm:$0xff] }
 0xced   :  { %5948 = vmatpush.bf16.msrb.mxu2 %v8044_v16  ;;  %v5136_v16 = vld [vmem:[#allocation3 + $0x138] sm:$0xff] }
 0xcf0   :  { %8959 = vrot.lane.b32.xlu0 %v12836_v11, %s9469_s28 }
 0xcf2   :  { %8969 = vrot.lane.b32.xlu1 %v12843_v29, %s9469_s28 }
 0xcf4   :  { %8979 = vrot.lane.b32.xlu2 %v8978_v31, %s9468_s24  ;;  %v12892_v31 = vsel %vm271_vm3, %v5201_v42, %v5202_v57  ;;  %v5115_v42 = vld [vmem:[#allocation3 + $0x90] sm:$0xff]  ;;  %v5121_v57 = vld [vmem:[#allocation3 + $0xc0] sm:$0xff] }
 0xcf5   :  { %7863 = vmatmul.msk.bf16.gmra.mxu0 %vm102_vm5, %v5758_v43  ;;  %v8993_v43 = vpack.i.bf16 %v12770_v18, %v5274_v60  ;;  %v9018_v1 = vpack.i.bf16 %v12895_v27, %v12892_v31  ;;  %v8053_v18 = vld [vmem:[%s14193_s12 + $0x68] sm:$0xff]  ;;  %v8998_v60 = vpack.i.bf16 %v12905_v50, %v12873_v41  ;;  %v9023_v38 = vpack.i.bf16 %v12892_v31, %v12905_v50 }
 0xcf6   :  { %5996 = vmatpush.bf16.msrb.mxu3 %v8053_v18  ;;  %v5207_v20 = vrot.slane %v5115_v42, 7  ;;  %v5129_v18 = vld [vmem:[#allocation3 + $0x100] sm:$0xff]  ;;  %v5302_v42 = vrot.slane %v12823_v12, 1 }
 0xcf8   :  { %8974 = vrot.lane.b32.xlu0 %v8973_v32, %s9468_s24  ;;  %v12920_v32 = vld [vmem:[#allocation3 + $0xe0] sm:$0xff] }
 0xcf9   :  { %v5347_v36 = vrot.slane %v12920_v32, 1 }
 0xcfa   :  { %8984 = vrot.lane.b32.xlu1 %v8983_v4, %s9468_s24  ;;  %v9013_v4 = vpack.i.bf16 %v12846_v14, %v12780_v56  ;;  %v5321_v14 = vrot.slane %v5121_v57, 7 }
 0xcfb   :  { %v5349_v26 = vsel %vm352_vm4, %v5347_v36, %v5348_v8  ;;  %v5296_v36 = vrot.slane %v12802_v63, 1 }
 0xcfc   :  { %9004 = vrot.lane.b32.xlu2 %v9003_v22, %s9470_s30  ;;  %v5118_v22 = vld [vmem:[#allocation3 + $0xa8] sm:$0xff] }
 0xcfd   :  { %v5210_v9 = vrot.slane %v5118_v22, 7  ;;  %v5300_v22 = vrot.slane %v5135_v13, 1  ;;  %v5220_v13 = vrot.slane %v12821_v21, 7 }
 0xd00   :  { %8989 = vrot.lane.b32.xlu0 %v8988_v15, %s9468_s24  ;;  %v5208_v15 = vrot.slane %v12785_v28, 7 }
 0xd02   :  { %8994 = vrot.lane.b32.xlu1 %v8993_v43, %s9469_s28  ;;  %v8052_v43 = vld [vmem:[%s14193_s12 + $0x60] sm:$0xff] }
 0xd03   :  { %5997 = vmatpush.bf16.msrb.mxu3 %v8052_v43 }
 0xd04   :  { %9019 = vrot.lane.b32.xlu2 %v9018_v1, %s9468_s24  ;;  %v12949_v1 = vsel %vm271_vm3, %v5210_v9, %v5211_v46  ;;  %v5340_v9 = vrot.slane %v12920_v32, 7 }
 0xd05   :  { %7864 = vmatmul.msk.bf16.gmra.mxu0 %vm102_vm5, %v5761_v49  ;;  %v12952_v49 = vsel %vm271_vm3, %v5207_v20, %v5208_v15  ;;  %v5133_v15 = vld [vmem:[#allocation3 + $0x120] sm:$0xff] }
 0xd06   :  { %v9038_v51 = vpack.i.bf16 %v12949_v1, %v12952_v49 }
 0xd08   :  { %8999 = vrot.lane.b32.xlu0 %v8998_v60, %s9468_s24  ;;  %v5132_v60 = vld [vmem:[#allocation3 + $0x118] sm:$0xff] }
 0xd09   :  { %v5297_v8 = vrot.slane %v5132_v60, 1 }
 0xd0a   :  { %9009 = vrot.lane.b32.xlu1 %v12762_v3, %s9470_s30  ;;  %v5331_v3 = vsel %vm352_vm4, %v5329_v6, %v5330_v17  ;;  %v5293_v6 = vrot.slane %v12800_v30, 1  ;;  %v5294_v17 = vrot.slane %v5129_v18, 1  ;;  %v5219_v18 = vrot.slane %v5133_v15, 7 }
 0xd0b   :  { %v5764_v56 = vpack.c.bf16 %v5349_v26, %v5331_v3  ;;  %v9043_v26 = vpack.i.bf16 %v12952_v49, %v12895_v27  ;;  %v5298_v20 = vsel %vm352_vm4, %v5296_v36, %v5297_v8 }
 0xd0c   :  { %9034 = vrot.lane.b32.xlu2 %v9033_v62, %s9469_s28  ;;  %v5295_v46 = vsel %vm352_vm4, %v5293_v6, %v5294_v17  ;;  %v5130_v17 = vld [vmem:[#allocation3 + $0x108] sm:$0xff]  ;;  %v12988_v36 = vsel %vm271_vm3, %v5219_v18, %v5220_v13 }
 0xd0d   :  { %v9073_v43 = vpack.i.bf16 %v5298_v20, %v5295_v46 }
 0xd10   :  { %9014 = vrot.lane.b32.xlu0 %v9013_v4, %s9469_s28  ;;  %v5124_v4 = vld [vmem:[#allocation3 + $0xd8] sm:$0xff] }
 0xd11   :  { %v5339_v57 = vrot.slane %v5124_v4, 7  ;;  %v9063_v4 = vpack.i.bf16 %v12920_v32, %v12918_v52 }
 0xd12   :  { %9024 = vrot.lane.b32.xlu1 %v9023_v38, %s9470_s30  ;;  %v5303_v38 = vrot.slane %v5138_v25, 1  ;;  %v5222_v25 = vrot.slane %v5136_v16, 7 }
 0xd14   :  { %9049 = vrot.lane.b32.xlu2 %v12806_v35, %s9470_s30  ;;  %v5323_v35 = vsel %vm271_vm3, %v5321_v14, %v5322_v24  ;;  %v5304_v24 = vsel %vm352_vm4, %v5302_v42, %v5303_v38  ;;  %v5217_v42 = vrot.slane %v12802_v63, 7  ;;  %v5144_v38 = vld [vmem:[#allocation3 + $0x178] sm:$0xff] }
 0xd15   :  { %7865 = vmatmul.msk.bf16.gmra.mxu0 %vm102_vm5, %v5764_v56  ;;  %v9068_v62 = vpack.i.bf16 %v5323_v35, %v12949_v1  ;;  %v9053_v56 = vpack.i.bf16 %v5331_v3, %v12887_v37  ;;  %v8043_v37 = vld [vmem:[%s14193_s12 + $0x18] sm:$0xff]  ;;  %v5309_v46 = vrot.slane %v5144_v38, 1 }
 0xd16   :  { %v8051_v3 = vld [vmem:[%s14193_s12 + $0x58] sm:$0xff]  ;;  %5949 = vmatpush.bf16.msrb.mxu2 %v8043_v37  ;;  %v8050_v37 = vld [vmem:[%s14193_s12 + $0x50] sm:$0xff] }
 0xd17   :  { %5998 = vmatpush.bf16.msrb.mxu3 %v8051_v3 }
 0xd18   :  { %9029 = vrot.lane.b32.xlu0 %v12775_v47, %s9470_s30  ;;  %v5299_v47 = vrot.slane %v12821_v21, 1 }
 0xd1a   :  { %9039 = vrot.lane.b32.xlu1 %v9038_v51, %s9468_s24  ;;  %v5301_v14 = vsel %vm352_vm4, %v5299_v47, %v5300_v22  ;;  %v5341_v51 = vsel %vm271_vm3, %v5339_v57, %v5340_v9  ;;  %v5141_v47 = vld [vmem:[#allocation3 + $0x160] sm:$0xff]  ;;  %v5216_v22 = vrot.slane %v5130_v17, 7  ;;  %v5308_v9 = vrot.slane %v12814_v59, 1 }
 0xd1b   :  { %v5767_v60 = vpack.c.bf16 %v5304_v24, %v5301_v14  ;;  %v9058_v6 = vpack.i.bf16 %v5341_v51, %v5323_v35  ;;  %v5306_v57 = vrot.slane %v5141_v47, 1  ;;  %v9078_v15 = vpack.i.bf16 %v5301_v14, %v5298_v20  ;;  %v5139_v51 = vld [vmem:[#allocation3 + $0x150] sm:$0xff]  ;;  %v5142_v20 = vld [vmem:[#allocation3 + $0x168] sm:$0xff]  ;;  %5999 = vmatpush.bf16.msrb.mxu3 %v8050_v37  ;;  %v5153_v37 = vld [vmem:[#allocation3 + $0x1c0] sm:$0xff] }
 0xd1c   :  { %9069 = vrot.lane.b32.xlu2 %v9068_v62, %s9470_s30  ;;  %v5223_v62 = vrot.slane %v12823_v12, 7  ;;  %v13004_v32 = vsel %vm271_vm3, %v5216_v22, %v5217_v42  ;;  %v5225_v13 = vrot.slane %v5139_v51, 7  ;;  %v5229_v17 = vrot.slane %v12814_v59, 7  ;;  %v5147_v47 = vld [vmem:[#allocation3 + $0x190] sm:$0xff]  ;;  %v5150_v22 = vld [vmem:[#allocation3 + $0x1a8] sm:$0xff] }
 0xd1d   :  { %v9093_v16 = vpack.i.bf16 %v12988_v36, %v13004_v32  ;;  %v5314_v59 = vrot.slane %v12831_v39, 1 }
 0xd1e   :  { %v12991_v8 = vsel %vm271_vm3, %v5222_v25, %v5223_v62  ;;  %v5226_v25 = vrot.slane %v12810_v45, 7  ;;  %v8042_v62 = vld [vmem:[%s14193_s12 + $0x10] sm:$0xff] }
 0xd1f   :  { %v9083_v35 = vpack.i.bf16 %v12991_v8, %v12988_v36  ;;  %5950 = vmatpush.bf16.msrb.mxu2 %v8042_v62  ;;  %v13059_v62 = vld [vmem:[#allocation3 + $0x1b8] sm:$0xff] }
 0xd20   :  { %9044 = vrot.lane.b32.xlu0 %v9043_v26, %s9470_s30  ;;  %v5305_v26 = vrot.slane %v12810_v45, 1  ;;  %v13022_v3 = vsel %vm271_vm3, %v5225_v13, %v5226_v25  ;;  %v8041_v13 = vld [vmem:[%s14193_s12 + $0x8] sm:$0xff] }
 0xd21   :  { %v9118_v42 = vpack.i.bf16 %v13022_v3, %v12991_v8  ;;  %v8049_v25 = vld [vmem:[%s14193_s12 + $0x48] sm:$0xff] }
 0xd22   :  { %9054 = vrot.lane.b32.xlu1 %v9053_v56, %s9469_s28  ;;  %v5307_v56 = vsel %vm352_vm4, %v5305_v26, %v5306_v57  ;;  %v5312_v26 = vrot.slane %v5147_v47, 1  ;;  %v5315_v57 = vrot.slane %v5150_v22, 1  ;;  %6000 = vmatpush.bf16.msrb.mxu3 %v8049_v25  ;;  %v5155_v47 = vld [vmem:[#allocation3 + $0x1d0] sm:$0xff]  ;;  %v5332_v22 = vrot.slane %v13059_v62, 1 }
 0xd23   :  { %v9098_v18 = vpack.i.bf16 %v5307_v56, %v5304_v24  ;;  %5951 = vmatpush.bf16.msrb.mxu2 %v8041_v13 }
 0xd24   :  { %9074 = vrot.lane.b32.xlu2 %v9073_v43, %s9468_s24  ;;  %v5310_v43 = vsel %vm352_vm4, %v5308_v9, %v5309_v46  ;;  %v5316_v46 = vsel %vm352_vm4, %v5314_v59, %v5315_v57  ;;  %v5325_v59 = vrot.slane %v13059_v62, 7 }
 0xd25   :  { %7866 = vmatmul.msk.bf16.gmra.mxu0 %vm102_vm5, %v5767_v60  ;;  %v5770_v60 = vpack.c.bf16 %v5310_v43, %v5307_v56 }
 0xd28   :  { %9059 = vrot.lane.b32.xlu0 %v9058_v6, %s9468_s24  ;;  %v5228_v6 = vrot.slane %v5142_v20, 7 }
 0xd2a   :  { %9064 = vrot.lane.b32.xlu1 %v9063_v4, %s9470_s30  ;;  %v9103_v4 = vpack.i.bf16 %v5304_v24, %v5301_v14  ;;  %v13031_v38 = vsel %vm271_vm3, %v5228_v6, %v5229_v17  ;;  %v5145_v14 = vld [vmem:[#allocation3 + $0x180] sm:$0xff]  ;;  %v5148_v24 = vld [vmem:[#allocation3 + $0x198] sm:$0xff]  ;;  %v5151_v17 = vld [vmem:[#allocation3 + $0x1b0] sm:$0xff] }
 0xd2b   :  { %v5234_v51 = vrot.slane %v5148_v24, 7 }
 0xd2c   :  { %9084 = vrot.lane.b32.xlu2 %v9083_v35, %s9468_s24  ;;  %v5311_v35 = vrot.slane %v12829_v61, 1 }
 0xd2e   :  { %v5313_v9 = vsel %vm352_vm4, %v5311_v35, %v5312_v26  ;;  %v5156_v35 = vld [vmem:[#allocation3 + $0x1d8] sm:$0xff] }
 0xd2f   :  { %v5773_v20 = vpack.c.bf16 %v5316_v46, %v5313_v9  ;;  %v5351_v24 = vrot.slane %v5156_v35, 1 }
 0xd30   :  { %9079 = vrot.lane.b32.xlu0 %v9078_v15, %s9469_s28  ;;  %v5231_v15 = vrot.slane %v5145_v14, 7  ;;  %v5350_v14 = vrot.slane %v5155_v47, 1 }
 0xd32   :  { %9094 = vrot.lane.b32.xlu1 %v9093_v16, %s9470_s30  ;;  %v5232_v16 = vrot.slane %v12829_v61, 7  ;;  %v5352_v13 = vsel %vm352_vm4, %v5350_v14, %v5351_v24  ;;  %v9168_v24 = vpack.i.bf16 %v5155_v47, %v13059_v62 }
 0xd34   :  { %9099 = vrot.lane.b32.xlu2 %v9098_v18, %s9469_s28  ;;  %v5235_v18 = vrot.slane %v12831_v39, 7  ;;  %v13054_v39 = vsel %vm271_vm3, %v5231_v15, %v5232_v16 }
 0xd35   :  { %7867 = vmatmul.msk.bf16.gmra.mxu0 %vm102_vm5, %v5770_v60  ;;  %v9128_v60 = vpack.i.bf16 %v5310_v43, %v5307_v56  ;;  %v9143_v16 = vpack.i.bf16 %v13054_v39, %v13031_v38 }
 0xd36   :  { %v13057_v56 = vsel %vm271_vm3, %v5234_v51, %v5235_v18 }
 0xd37   :  { %v9133_v6 = vpack.i.bf16 %v13057_v56, %v13054_v39 }
 0xd38   :  { %9089 = vrot.lane.b32.xlu0 %v12836_v11, %s9470_s30  ;;  %v9108_v11 = vpack.i.bf16 %v13031_v38, %v13022_v3 }
 0xd3a   :  { %9104 = vrot.lane.b32.xlu1 %v9103_v4, %s9468_s24  ;;  %v5154_v4 = vld [vmem:[#allocation3 + $0x1c8] sm:$0xff] }
 0xd3b   :  { %v5342_v57 = vrot.slane %v5154_v4, 7  ;;  %v5127_v4 = vld [vmem:[#allocation3 + $0xf0] sm:$0xff] }
 0xd3c   :  { %9119 = vrot.lane.b32.xlu2 %v9118_v42, %s9470_s30  ;;  %v5333_v42 = vrot.slane %v5153_v37, 1 }
 0xd3e   :  { %v13066_v26 = vpop.permute.xlu2 %8944  ;;  %v5334_v15 = vsel %vm352_vm4, %v5332_v22, %v5333_v42  ;;  %v9153_v22 = vpack.i.bf16 %v5316_v46, %v5313_v9  ;;  %v5214_v42 = vrot.slane %v12800_v30, 7 }
 0xd3f   :  { %v5776_v37 = vpack.c.bf16 %v5352_v13, %v5334_v15 }
 0xd40   :  { %9109 = vrot.lane.b32.xlu0 %v9108_v11, %s9468_s24  ;;  %v5343_v11 = vrot.slane %v5155_v47, 7 }
 0xd42   :  { %9114 = vrot.lane.b32.xlu1 %v12818_v10, %s9470_s30  ;;  %v9123_v10 = vpack.i.bf16 %v5313_v9, %v5310_v43  ;;  %v5324_v43 = vrot.slane %v5151_v17, 7  ;;  %v5344_v18 = vsel %vm271_vm3, %v5342_v57, %v5343_v11 }
 0xd44   :  { %9129 = vrot.lane.b32.xlu2 %v9128_v60, %s9468_s24  ;;  %v5326_v51 = vsel %vm271_vm3, %v5324_v43, %v5325_v59  ;;  %v9148_v60 = vpack.i.bf16 %v5334_v15, %v5316_v46  ;;  %v5213_v43 = vrot.slane %v5127_v4, 7  ;;  %v5097_v46 = vld [vmem:[#allocation3] sm:$0xff] }
 0xd45   :  { %7868 = vmatmul.msk.bf16.gmra.mxu0 %vm102_vm5, %v5773_v20  ;;  %v9158_v25 = vpack.i.bf16 %v5344_v18, %v5326_v51  ;;  %v9163_v35 = vpack.i.bf16 %v5326_v51, %v13057_v56  ;;  %v5190_v51 = vrot.slane %v12742_v54, 7  ;;  %v5189_v18 = vrot.slane %v5097_v46, 7 }
 0xd46   :  { %v13088_v17 = vpop.permute.xlu2 %8964  ;;  %v5215_v57 = vsel %vm271_vm3, %v5213_v43, %v5214_v42 }
 0xd48   :  { %9124 = vrot.lane.b32.xlu0 %v9123_v10, %s9469_s28  ;;  %v8048_v10 = vld [vmem:[%s14193_s12 + $0x40] sm:$0xff] }
 0xd49   :  { %6001 = vmatpush.bf16.msrb.mxu3 %v8048_v10 }
 0xd4a   :  { %9134 = vrot.lane.b32.xlu1 %v9133_v6, %s9468_s24 }
 0xd4c   :  { %9139 = vrot.lane.b32.xlu2 %v12843_v29, %s9470_s30  ;;  %v8040_v29 = vld [vmem:[%s14193_s12] sm:$0xff] }
 0xd4d   :  { %5952 = vmatpush.bf16.msrb.mxu2 %v8040_v29  ;;  %v5191_v29 = vsel %vm271_vm3, %v5189_v18, %v5190_v51 }
 0xd4e   :  { %v8980_v9 = vpop.permute.xlu2 %8979 }
 0xd50   :  { %9144 = vrot.lane.b32.xlu0 %v9143_v16, %s9470_s30 }
 0xd52   :  { %9149 = vrot.lane.b32.xlu1 %v9148_v60, %s9469_s28  ;;  %v8935_v20 = vpop.permute.xlu0 %8934 }
 0xd53   :  { %v8937_v60 = vunpack.i.h.bf16 %v8935_v20  ;;  %v8936_v13 = vunpack.i.l.bf16 %v8935_v20 }
 0xd54   :  { %9159 = vrot.lane.b32.xlu2 %v9158_v25, %s9468_s24  ;;  %v13086_v6 = vpop.permute.xlu1 %8939 }
 0xd55   :  { %7869 = vmatmul.msk.bf16.gmra.mxu0 %vm102_vm5, %v5776_v37  ;;  %v5657_v4 = vsel %vm102_vm5, %v5191_v29, %v8936_v13 }
 0xd56   :  { %v9005_v25 = vpop.permute.xlu2 %9004 }
 0xd57   :  { %v9007_v42 = vunpack.i.h.bf16 %v9005_v25 }
 0xd58   :  { %9154 = vrot.lane.b32.xlu0 %v9153_v22, %s9468_s24  ;;  %v5658_v22 = vsel %vm102_vm5, %v12870_v48, %v8937_v60 }
 0xd5a   :  { %9164 = vrot.lane.b32.xlu1 %v9163_v35, %s9470_s30  ;;  %v13095_v59 = vpop.permute.xlu0 %8949  ;;  %v9006_v35 = vunpack.i.l.bf16 %v9005_v25 }
 0xd5c   :  { %v13098_v11 = vpop.permute.xlu1 %8954 }
 0xd5d   :  { %v8956_v14 = vunpack.i.l.bf16 %v13098_v11 }
 0xd5e   :  { %v9020_v18 = vpop.permute.xlu2 %9019 }
 0xd5f   :  { %v13103_v30 = vsel %vm102_vm5, %v5215_v57, %v8956_v14 }
 0xd60   :  { %9169 = vrot.lane.b32.xlu0 %v9168_v24, %s9470_s30 }
 0xd62   :  { %v13106_v15 = vpop.permute.xlu0 %8959 }
 0xd64   :  { %v13108_v16 = vpop.permute.xlu1 %8969 }
 0xd6a   :  { %v8975_v47 = vpop.permute.xlu0 %8974 }
 0xd6b   :  { %v8977_v10 = vunpack.i.h.bf16 %v8975_v47  ;;  %v8976_v37 = vunpack.i.l.bf16 %v8975_v47 }
 0xd6c   :  { %v13115_v43 = vpop.permute.xlu1 %8984 }
 0xd6d   :  { %v5674_v54 = vsel %vm57_vm0, %v5658_v22, %v8977_v10  ;;  %v5673_v57 = vsel %vm57_vm0, %v5657_v4, %v8976_v37 }
 0xd6e   :  { %v5690_v20 = vsel %vm1888_vm8, %v5674_v54, %v9007_v42  ;;  %v5689_v14 = vsel %vm1888_vm8, %v5673_v57, %v9006_v35  ;;  %v8942_v54 = vunpack.i.h.bf16 %v13086_v6  ;;  %v8941_v57 = vunpack.i.l.bf16 %v13086_v6 }
 0xd6f   :  { %v5753_v24 = vpack.c.bf16 %v5690_v20, %v5689_v14 }
 0xd71   :  { %5953 = vmatmul.bf16.vlgmr.msrb.gmra.mxu2 %v5753_v24 }
 0xd72   :  { %v13121_v46 = vpop.permute.xlu0 %8989 }
 0xd74   :  { %v8995_v51 = vpop.permute.xlu1 %8994 }
 0xd75   :  { %v8997_v13 = vunpack.i.h.bf16 %v8995_v51  ;;  %v8996_v48 = vunpack.i.l.bf16 %v8995_v51 }
 0xd77   :  { %v5706_v47 = vsel %vm102_vm5, %v12749_v55, %v8997_v13  ;;  %v5705_v10 = vsel %vm102_vm5, %v12746_v33, %v8996_v48  ;;  %v9035_v55 = vpop.permute.xlu2 %9034  ;;  %v5660_v33 = vsel %vm102_vm5, %v12905_v50, %v8942_v54  ;;  %v5659_v13 = vsel %vm102_vm5, %v12873_v41, %v8941_v57 }
 0xd78   :  { %v8982_v48 = vunpack.i.h.bf16 %v8980_v9  ;;  %v9021_v54 = vunpack.i.l.bf16 %v9020_v18 }
 0xd7a   :  { %v9000_v60 = vpop.permute.xlu0 %8999 }
 0xd7b   :  { %v9002_v29 = vunpack.i.h.bf16 %v9000_v60  ;;  %v9001_v25 = vunpack.i.l.bf16 %v9000_v60  ;;  %v8981_v60 = vunpack.i.l.bf16 %v8980_v9  ;;  %v9022_v9 = vunpack.i.h.bf16 %v9020_v18 }
 0xd7c   :  { %v9010_v37 = vpop.permute.xlu1 %9009  ;;  %v8987_v18 = vunpack.i.h.bf16 %v13115_v43 }
 0xd7d   :  { %v5721_v4 = vsel %vm57_vm0, %v5705_v10, %v9001_v25  ;;  %v5722_v22 = vsel %vm57_vm0, %v5706_v47, %v9002_v29  ;;  %v9012_v42 = vunpack.i.h.bf16 %v9010_v37  ;;  %v9011_v35 = vunpack.i.l.bf16 %v9010_v37 }
 0xd7e   :  { %v5675_v37 = vsel %vm57_vm0, %v5659_v13, %v8981_v60 }
 0xd7f   :  { %v5737_v20 = vsel %vm1888_vm8, %v5721_v4, %v9011_v35  ;;  %v5738_v14 = vsel %vm1888_vm8, %v5722_v22, %v9012_v42  ;;  %v5676_v4 = vsel %vm57_vm0, %v5660_v33, %v8982_v48 }
 0xd80   :  { %v5754_v24 = vpack.c.bf16 %v5738_v14, %v5737_v20  ;;  %v9050_v20 = vpop.permute.xlu2 %9049 }
 0xd82   :  { %6002 = vmatmul.bf16.vlgmr.msrb.gmra.mxu3 %v5754_v24  ;;  %v9015_v51 = vpop.permute.xlu0 %9014 }
 0xd83   :  { %v9017_v25 = vunpack.i.h.bf16 %v9015_v51  ;;  %v9016_v47 = vunpack.i.l.bf16 %v9015_v51 }
 0xd84   :  { %v9025_v29 = vpop.permute.xlu1 %9024 }
 0xd85   :  { %v9027_v6 = vunpack.i.h.bf16 %v9025_v29  ;;  %v9026_v10 = vunpack.i.l.bf16 %v9025_v29  ;;  %v5708_v50 = vsel %vm102_vm5, %v12758_v0, %v9017_v25  ;;  %v5707_v41 = vsel %vm102_vm5, %v12754_v23, %v9016_v47 }
 0xd86   :  { %v5723_v33 = vsel %vm57_vm0, %v5707_v41, %v9021_v54  ;;  %v5724_v13 = vsel %vm57_vm0, %v5708_v50, %v9022_v9  ;;  %v8947_v29 = vunpack.i.h.bf16 %v13066_v26  ;;  %v8946_v23 = vunpack.i.l.bf16 %v13066_v26 }
 0xd87   :  { %v5691_v22 = vsel %vm1888_vm8, %v5675_v37, %v9026_v10  ;;  %v5692_v42 = vsel %vm1888_vm8, %v5676_v4, %v9027_v6  ;;  %v8986_v25 = vunpack.i.l.bf16 %v13115_v43  ;;  %v9037_v26 = vunpack.i.h.bf16 %v9035_v55 }
 0xd88   :  { %v5756_v35 = vpack.c.bf16 %v5692_v42, %v5691_v22  ;;  %v5662_v6 = vsel %vm102_vm5, %v12895_v27, %v8947_v29  ;;  %v5661_v10 = vsel %vm102_vm5, %v12892_v31, %v8946_v23  ;;  %v9036_v50 = vunpack.i.l.bf16 %v9035_v55  ;;  %v9070_v41 = vpop.permute.xlu2 %9069 }
 0xd89   :  { %v5678_v22 = vsel %vm57_vm0, %v5662_v6, %v8987_v18  ;;  %v5677_v42 = vsel %vm57_vm0, %v5661_v10, %v8986_v25  ;;  %v5710_v31 = vsel %vm102_vm5, %v12785_v28, %v9037_v26  ;;  %v8952_v55 = vunpack.i.h.bf16 %v13095_v59 }
 0xd8a   :  { %5958 = vmatmul.bf16.gmra.mxu2 %v5756_v35  ;;  %v9030_v57 = vpop.permute.xlu0 %9029  ;;  %v8992_v29 = vunpack.i.h.bf16 %v13121_v46  ;;  %v8991_v28 = vunpack.i.l.bf16 %v13121_v46  ;;  %v9071_v6 = vunpack.i.l.bf16 %v9070_v41 }
 0xd8b   :  { %v9032_v14 = vunpack.i.h.bf16 %v9030_v57  ;;  %v9031_v24 = vunpack.i.l.bf16 %v9030_v57  ;;  %v5664_v18 = vsel %vm102_vm5, %v12949_v1, %v8952_v55 }
 0xd8c   :  { %v9040_v51 = vpop.permute.xlu1 %9039 }
 0xd8d   :  { %v5739_v48 = vsel %vm1888_vm8, %v5723_v33, %v9031_v24  ;;  %v5740_v60 = vsel %vm1888_vm8, %v5724_v13, %v9032_v14  ;;  %v9042_v54 = vunpack.i.h.bf16 %v9040_v51  ;;  %v9041_v57 = vunpack.i.l.bf16 %v9040_v51 }
 0xd8e   :  { %v5757_v0 = vpack.c.bf16 %v5740_v60, %v5739_v48  ;;  %v5709_v14 = vsel %vm102_vm5, %v12767_v2, %v9036_v50  ;;  %v8951_v13 = vunpack.i.l.bf16 %v13095_v59  ;;  %v9052_v48 = vunpack.i.h.bf16 %v9050_v20 }
 0xd8f   :  { %v5726_v24 = vsel %vm57_vm0, %v5710_v31, %v9042_v54  ;;  %v5725_v33 = vsel %vm57_vm0, %v5709_v14, %v9041_v57  ;;  %v9051_v60 = vunpack.i.l.bf16 %v9050_v20  ;;  %v8957_v59 = vunpack.i.h.bf16 %v13098_v11 }
 0xd90   :  { %v5742_v2 = vsel %vm1888_vm8, %v5726_v24, %v9052_v48  ;;  %v5663_v25 = vsel %vm102_vm5, %v12952_v49, %v8951_v13  ;;  %v9072_v20 = vunpack.i.h.bf16 %v9070_v41 }
 0xd91   :  { %v5741_v23 = vsel %vm1888_vm8, %v5725_v33, %v9051_v60  ;;  %v5679_v46 = vsel %vm57_vm0, %v5663_v25, %v8991_v28 }
 0xd92   :  { %6007 = vmatmul.bf16.gmra.mxu3 %v5757_v0  ;;  %v9045_v47 = vpop.permute.xlu0 %9044  ;;  %v5760_v10 = vpack.c.bf16 %v5742_v2, %v5741_v23  ;;  %v5695_v26 = vsel %vm1888_vm8, %v5679_v46, %v9071_v6 }
 0xd93   :  { %v9047_v37 = vunpack.i.h.bf16 %v9045_v47  ;;  %v9046_v4 = vunpack.i.l.bf16 %v9045_v47  ;;  %v9075_v47 = vpop.permute.xlu2 %9074 }
 0xd94   :  { %v9055_v35 = vpop.permute.xlu1 %9054 }
 0xd95   :  { %v5693_v43 = vsel %vm1888_vm8, %v5677_v42, %v9046_v4  ;;  %v5694_v9 = vsel %vm1888_vm8, %v5678_v22, %v9047_v37  ;;  %v5680_v37 = vsel %vm57_vm0, %v5664_v18, %v8992_v29  ;;  %v9077_v4 = vunpack.i.h.bf16 %v9075_v47 }
 0xd96   :  { %v5759_v27 = vpack.c.bf16 %v5694_v9, %v5693_v43  ;;  %v9076_v22 = vunpack.i.l.bf16 %v9075_v47  ;;  %v5666_v42 = vsel %vm102_vm5, %v13004_v32, %v8957_v59  ;;  %v5696_v49 = vsel %vm1888_vm8, %v5680_v37, %v9072_v20 }
 0xd97   :  { %v9057_v50 = vunpack.i.h.bf16 %v9055_v35  ;;  %v9056_v11 = vunpack.i.l.bf16 %v9055_v35  ;;  %v5682_v54 = vsel %vm57_vm0, %v5666_v42, %v9077_v4  ;;  %v5762_v24 = vpack.c.bf16 %v5696_v49, %v5695_v26 }
 0xd98   :  { %v5681_v9 = vsel %vm57_vm0, %v13103_v30, %v9076_v22  ;;  %v8962_v22 = vunpack.i.h.bf16 %v13106_v15  ;;  %v8961_v42 = vunpack.i.l.bf16 %v13106_v15 }
 0xd99   :  { %v5712_v55 = vsel %vm102_vm5, %v12918_v52, %v9057_v50  ;;  %v5711_v35 = vsel %vm102_vm5, %v12787_v58, %v9056_v11 }
 0xd9a   :  { %5963 = vmatmul.bf16.gmra.mxu2 %v5759_v27  ;;  %v9060_v0 = vpop.permute.xlu0 %9059 }
 0xd9b   :  { %v9062_v57 = vunpack.i.h.bf16 %v9060_v0  ;;  %v9061_v27 = vunpack.i.l.bf16 %v9060_v0  ;;  %v9085_v0 = vpop.permute.xlu2 %9084 }
 0xd9c   :  { %v9065_v51 = vpop.permute.xlu1 %9064  ;;  %v9087_v6 = vunpack.i.h.bf16 %v9085_v0 }
 0xd9d   :  { %v9067_v13 = vunpack.i.h.bf16 %v9065_v51  ;;  %v9066_v48 = vunpack.i.l.bf16 %v9065_v51  ;;  %v5727_v30 = vsel %vm57_vm0, %v5711_v35, %v9061_v27  ;;  %v5728_v60 = vsel %vm57_vm0, %v5712_v55, %v9062_v57 }
 0xd9f   :  { %v5743_v29 = vsel %vm1888_vm8, %v5727_v30, %v9066_v48  ;;  %v5744_v28 = vsel %vm1888_vm8, %v5728_v60, %v9067_v13 }
 0xda0   :  { %v5763_v2 = vpack.c.bf16 %v5744_v28, %v5743_v29 }
 0xda2   :  { %6012 = vmatmul.bf16.gmra.mxu3 %v5760_v10  ;;  %v9080_v31 = vpop.permute.xlu0 %9079  ;;  %v9086_v10 = vunpack.i.l.bf16 %v9085_v0 }
 0xda3   :  { %v9082_v18 = vunpack.i.h.bf16 %v9080_v31  ;;  %v9081_v52 = vunpack.i.l.bf16 %v9080_v31  ;;  %v9100_v25 = vpop.permute.xlu2 %9099 }
 0xda4   :  { %v9095_v1 = vpop.permute.xlu1 %9094  ;;  %v9102_v31 = vunpack.i.h.bf16 %v9100_v25 }
 0xda5   :  { %v9097_v43 = vunpack.i.h.bf16 %v9095_v1  ;;  %v9096_v41 = vunpack.i.l.bf16 %v9095_v1  ;;  %v5714_v58 = vsel %vm102_vm5, %v12821_v21, %v9082_v18  ;;  %v5713_v51 = vsel %vm102_vm5, %v12802_v63, %v9081_v52 }
 0xda6   :  { %v5729_v46 = vsel %vm57_vm0, %v5713_v51, %v9086_v10  ;;  %v5730_v4 = vsel %vm57_vm0, %v5714_v58, %v9087_v6  ;;  %v8967_v18 = vunpack.i.h.bf16 %v13088_v17 }
 0xda7   :  { %v5697_v14 = vsel %vm1888_vm8, %v5681_v9, %v9096_v41  ;;  %v5698_v32 = vsel %vm1888_vm8, %v5682_v54, %v9097_v43  ;;  %v5668_v43 = vsel %vm102_vm5, %v12991_v8, %v8962_v22  ;;  %v5667_v41 = vsel %vm102_vm5, %v12988_v36, %v8961_v42 }
 0xda8   :  { %v5765_v33 = vpack.c.bf16 %v5698_v32, %v5697_v14  ;;  %v9101_v14 = vunpack.i.l.bf16 %v9100_v25  ;;  %v5716_v36 = vsel %vm102_vm5, %v12810_v45, %v9102_v31  ;;  %v8966_v45 = vunpack.i.l.bf16 %v13088_v17 }
 0xda9   :  { %v5670_v51 = vsel %vm102_vm5, %v13031_v38, %v8967_v18  ;;  %v9463_v38 = vld [vmem:[#allocation3 + $0x170] sm:$0xff] }
 0xdaa   :  { %5968 = vmatmul.bf16.gmra.mxu2 %v5762_v24  ;;  %v9090_v23 = vpop.permute.xlu0 %9089  ;;  %v5715_v35 = vsel %vm102_vm5, %v12823_v12, %v9101_v14 }
 0xdab   :  { %v9092_v59 = vunpack.i.h.bf16 %v9090_v23  ;;  %v9091_v20 = vunpack.i.l.bf16 %v9090_v23  ;;  %v9120_v49 = vpop.permute.xlu2 %9119 }
 0xdac   :  { %v9105_v47 = vpop.permute.xlu1 %9104  ;;  %v9122_v15 = vunpack.i.h.bf16 %v9120_v49  ;;  %v9121_v57 = vunpack.i.l.bf16 %v9120_v49 }
 0xdad   :  { %v5745_v1 = vsel %vm1888_vm8, %v5729_v46, %v9091_v20  ;;  %v5746_v21 = vsel %vm1888_vm8, %v5730_v4, %v9092_v59  ;;  %v9107_v26 = vunpack.i.h.bf16 %v9105_v47  ;;  %v9106_v63 = vunpack.i.l.bf16 %v9105_v47 }
 0xdae   :  { %v5766_v11 = vpack.c.bf16 %v5746_v21, %v5745_v1  ;;  %v5669_v59 = vsel %vm102_vm5, %v13022_v3, %v8966_v45 }
 0xdaf   :  { %v5684_v9 = vsel %vm57_vm0, %v5668_v43, %v9107_v26  ;;  %v5683_v54 = vsel %vm57_vm0, %v5667_v41, %v9106_v63  ;;  %v8972_v41 = vunpack.i.h.bf16 %v13108_v16 }
 0xdb0   :  { %v5699_v32 = vsel %vm1888_vm8, %v5683_v54, %v9121_v57  ;;  %v5700_v24 = vsel %vm1888_vm8, %v5684_v9, %v9122_v15  ;;  %v8971_v9 = vunpack.i.l.bf16 %v13108_v16 }
 0xdb1   :  { %v5768_v8 = vpack.c.bf16 %v5700_v24, %v5699_v32  ;;  %v5672_v14 = vsel %vm102_vm5, %v13057_v56, %v8972_v41 }
 0xdb2   :  { %6017 = vmatmul.bf16.gmra.mxu3 %v5763_v2  ;;  %v9110_v37 = vpop.permute.xlu0 %9109  ;;  %v5671_v32 = vsel %vm102_vm5, %v13054_v39, %v8971_v9 }
 0xdb3   :  { %v9111_v55 = vunpack.i.l.bf16 %v9110_v37  ;;  %v9130_v29 = vpop.permute.xlu2 %9129 }
 0xdb4   :  { %v9115_v50 = vpop.permute.xlu1 %9114  ;;  %v9132_v52 = vunpack.i.h.bf16 %v9130_v29  ;;  %v9131_v12 = vunpack.i.l.bf16 %v9130_v29 }
 0xdb5   :  { %v9117_v13 = vunpack.i.h.bf16 %v9115_v50  ;;  %v9116_v48 = vunpack.i.l.bf16 %v9115_v50  ;;  %v5731_v30 = vsel %vm57_vm0, %v5715_v35, %v9111_v55 }
 0xdb6   :  { %v5686_v10 = vsel %vm57_vm0, %v5670_v51, %v9132_v52 }
 0xdb7   :  { %v5747_v28 = vsel %vm1888_vm8, %v5731_v30, %v9116_v48 }
 0xdba   :  { %5973 = vmatmul.bf16.gmra.mxu2 %v5765_v33  ;;  %v9125_v27 = vpop.permute.xlu0 %9124  ;;  %v9112_v33 = vunpack.i.h.bf16 %v9110_v37  ;;  %v5685_v37 = vsel %vm57_vm0, %v5669_v59, %v9131_v12 }
 0xdbb   :  { %v9127_v20 = vunpack.i.h.bf16 %v9125_v27  ;;  %v9126_v6 = vunpack.i.l.bf16 %v9125_v27  ;;  %v9140_v3 = vpop.permute.xlu2 %9139 }
 0xdbc   :  { %v5732_v60 = vsel %vm57_vm0, %v5716_v36, %v9112_v33  ;;  %v9135_v0 = vpop.permute.xlu1 %9134  ;;  %v9142_v50 = vunpack.i.h.bf16 %v9140_v3 }
 0xdbd   :  { %v5748_v23 = vsel %vm1888_vm8, %v5732_v60, %v9117_v13  ;;  %v9137_v22 = vunpack.i.h.bf16 %v9135_v0  ;;  %v9136_v42 = vunpack.i.l.bf16 %v9135_v0  ;;  %v5718_v1 = vsel %vm102_vm5, %v12829_v61, %v9127_v20  ;;  %v6052_v60 = vpop.f32.mrf.mxu0  ;;  %v9464_v0 = vld [vmem:[#allocation3 + $0x1a0] sm:$0xff] }
 0xdbe   :  { %v5769_v25 = vpack.c.bf16 %v5748_v23, %v5747_v28  ;;  %v5717_v21 = vsel %vm102_vm5, %v9463_v38, %v9126_v6 }
 0xdbf   :  { %v5734_v63 = vsel %vm57_vm0, %v5718_v1, %v9137_v22  ;;  %v5733_v49 = vsel %vm57_vm0, %v5717_v21, %v9136_v42 }
 0xdc0   :  { %v5750_v61 = vsel %vm1888_vm8, %v5734_v63, %v9142_v50 }
 0xdc2   :  { %6022 = vmatmul.bf16.gmra.mxu3 %v5766_v11  ;;  %v9145_v2 = vpop.permute.xlu0 %9144  ;;  %v9141_v11 = vunpack.i.l.bf16 %v9140_v3 }
 0xdc3   :  { %v9147_v47 = vunpack.i.h.bf16 %v9145_v2  ;;  %v9146_v58 = vunpack.i.l.bf16 %v9145_v2  ;;  %v9160_v30 = vpop.permute.xlu2 %9159 }
 0xdc4   :  { %v9150_v46 = vpop.permute.xlu1 %9149  ;;  %v5749_v54 = vsel %vm1888_vm8, %v5733_v49, %v9141_v11  ;;  %v9162_v2 = vunpack.i.h.bf16 %v9160_v30  ;;  %v9161_v18 = vunpack.i.l.bf16 %v9160_v30 }
 0xdc5   :  { %v5701_v17 = vsel %vm1888_vm8, %v5685_v37, %v9146_v58  ;;  %v5702_v4 = vsel %vm1888_vm8, %v5686_v10, %v9147_v47  ;;  %v5772_v31 = vpack.c.bf16 %v5750_v61, %v5749_v54  ;;  %v9151_v36 = vunpack.i.l.bf16 %v9150_v46  ;;  %v6054_v58 = vpop.f32.mrf.mxu0 }
 0xdc6   :  { %v5771_v26 = vpack.c.bf16 %v5702_v4, %v5701_v17 }
 0xdc7   :  { %v5719_v29 = vsel %vm102_vm5, %v9464_v0, %v9151_v36 }
 0xdc8   :  { %v5735_v45 = vsel %vm57_vm0, %v5719_v29, %v9161_v18 }
 0xdca   :  { %5978 = vmatmul.bf16.gmra.mxu2 %v5768_v8  ;;  %v9155_v43 = vpop.permute.xlu0 %9154  ;;  %v9152_v8 = vunpack.i.h.bf16 %v9150_v46 }
 0xdcb   :  { %v9157_v15 = vunpack.i.h.bf16 %v9155_v43  ;;  %v9156_v57 = vunpack.i.l.bf16 %v9155_v43 }
 0xdcc   :  { %v9165_v27 = vpop.permute.xlu1 %9164  ;;  %v5720_v39 = vsel %vm102_vm5, %v13059_v62, %v9152_v8 }
 0xdcd   :  { %v9167_v24 = vunpack.i.h.bf16 %v9165_v27  ;;  %v9166_v33 = vunpack.i.l.bf16 %v9165_v27  ;;  %v5688_v55 = vsel %vm57_vm0, %v5672_v14, %v9157_v15  ;;  %v5687_v16 = vsel %vm57_vm0, %v5671_v32, %v9156_v57  ;;  %v6057_v51 = vpop.f32.mrf.mxu0 }
 0xdce   :  { %v5736_v52 = vsel %vm57_vm0, %v5720_v39, %v9162_v2 }
 0xdcf   :  { %v5703_v35 = vsel %vm1888_vm8, %v5687_v16, %v9166_v33  ;;  %v5704_v13 = vsel %vm1888_vm8, %v5688_v55, %v9167_v24 }
 0xdd0   :  { %v5774_v56 = vpack.c.bf16 %v5704_v13, %v5703_v35 }
 0xdd2   :  { %6027 = vmatmul.bf16.gmra.mxu3 %v5769_v25  ;;  %v9170_v48 = vpop.permute.xlu0 %9169 }
 0xdd3   :  { %v9172_v28 = vunpack.i.h.bf16 %v9170_v48  ;;  %v9171_v23 = vunpack.i.l.bf16 %v9170_v48 }
 0xdd5   :  { %v5751_v12 = vsel %vm1888_vm8, %v5735_v45, %v9171_v23  ;;  %v5752_v25 = vsel %vm1888_vm8, %v5736_v52, %v9172_v28  ;;  %v6059_v6 = vpop.f32.mrf.mxu0 }
 0xdd6   :  { %v5775_v47 = vpack.c.bf16 %v5752_v25, %v5751_v12 }
 0xdda   :  { %5983 = vmatmul.bf16.gmra.mxu2 %v5771_v26 }
 0xddd   :  { %v6062_v17 = vpop.f32.mrf.mxu0 }
 0xde2   :  { %6032 = vmatmul.bf16.gmra.mxu3 %v5772_v31 }
 0xde5   :  { %v6064_v1 = vpop.f32.mrf.mxu0 }
 0xdea   :  { %5988 = vmatmul.bf16.gmra.mxu2 %v5774_v56 }
 0xded   :  { %v6067_v3 = vpop.f32.mrf.mxu0 }
 0xdf2   :  { %6037 = vmatmul.bf16.gmra.mxu3 %v5775_v47 }
 0xdf4   :  { %v5954_v62 = vpop.f32.mrf.mxu2 }
 0xdf5   :  { %v6069_v43 = vpop.f32.mrf.mxu0 }
 0xdfc   :  { %v5956_v59 = vpop.f32.mrf.mxu2 }
 0xdfd   :  { %v6072_v61 = vpop.f32.mrf.mxu0 }
 0xe05   :  { %v6003_v20 = vpop.f32.mrf.mxu3  ;;  %v6074_v31 = vpop.f32.mrf.mxu0 }
 0xe06   :  { %v6004_v10 = vadd.f32 %v6003_v20, %v5954_v62 }
 0xe08   :  { %v13261_v29 = vadd.f32 %v6052_v60, %v6004_v10 }
 0xe0a   :  { %v6094_v52 = vsel %vm102_vm5, %v13261_v29, 0.0 }
 0xe0d   :  { %v5959_v37 = vpop.f32.mrf.mxu2  ;;  %v6005_v46 = vpop.f32.mrf.mxu3 }
 0xe0e   :  { %v6077_v24 = vpop.f32.mrf.mxu0  ;;  %v6006_v48 = vadd.f32 %v6005_v46, %v5956_v59 }
 0xe10   :  { %v13259_v56 = vadd.f32 %v6054_v58, %v6006_v48 }
 0xe12   :  { %v6095_v23 = vsel %vm102_vm5, %v13259_v56, 0.0 }
 0xe13   :  { %v6096_v60 = vadd.f32 %v6095_v23, %v6094_v52 }
 0xe15   :  { %v5961_v4 = vpop.f32.mrf.mxu2  ;;  %v6008_v22 = vpop.f32.mrf.mxu3 }
 0xe16   :  { %v6009_v42 = vadd.f32 %v6008_v22, %v5959_v37  ;;  %v6079_v36 = vpop.f32.mrf.mxu0 }
 0xe18   :  { %v13263_v28 = vadd.f32 %v6057_v51, %v6009_v42 }
 0xe1a   :  { %v6097_v12 = vsel %vm102_vm5, %v13263_v28, 0.0 }
 0xe1b   :  { %v6098_v20 = vadd.f32 %v6097_v12, %v6096_v60 }
 0xe1d   :  { %v5964_v38 = vpop.f32.mrf.mxu2  ;;  %v6010_v21 = vpop.f32.mrf.mxu3 }
 0xe1e   :  { %v6082_v30 = vpop.f32.mrf.mxu0  ;;  %v6011_v39 = vadd.f32 %v6010_v21, %v5961_v4 }
 0xe20   :  { %v13267_v2 = vadd.f32 %v6059_v6, %v6011_v39 }
 0xe22   :  { %v6099_v58 = vsel %vm102_vm5, %v13267_v2, 0.0 }
 0xe23   :  { %v6100_v4 = vadd.f32 %v6099_v58, %v6098_v20 }
 0xe25   :  { %v5966_v26 = vpop.f32.mrf.mxu2  ;;  %v6013_v63 = vpop.f32.mrf.mxu3 }
 0xe26   :  { %v6014_v49 = vadd.f32 %v6013_v63, %v5964_v38  ;;  %v6084_v47 = vpop.f32.mrf.mxu0 }
 0xe28   :  { %v13273_v25 = vadd.f32 %v6062_v17, %v6014_v49 }
 0xe2a   :  { %v6101_v10 = vsel %vm102_vm5, %v13273_v25, 0.0 }
 0xe2d   :  { %v5969_v50 = vpop.f32.mrf.mxu2  ;;  %v6015_v11 = vpop.f32.mrf.mxu3 }
 0xe2e   :  { %v6016_v18 = vadd.f32 %v6015_v11, %v5966_v26 }
 0xe30   :  { %v13277_v62 = vadd.f32 %v6064_v1, %v6016_v18  ;;  %v6102_v1 = vadd.f32 %v6101_v10, %v6100_v4 }
 0xe32   :  { %v6103_v17 = vsel %vm102_vm5, %v13277_v62, 0.0 }
 0xe33   :  { %v6104_v49 = vadd.f32 %v6103_v17, %v6102_v1 }
 0xe35   :  { %v5971_v41 = vpop.f32.mrf.mxu2  ;;  %v6018_v9 = vpop.f32.mrf.mxu3 }
 0xe36   :  { %v6019_v54 = vadd.f32 %v6018_v9, %v5969_v50 }
 0xe38   :  { %v13257_v15 = vadd.f32 %v6067_v3, %v6019_v54  ;;  %v6087_v54 = vpop.f32.mrf.mxu0 }
 0xe3a   :  { %v6105_v21 = vsel %vm102_vm5, %v13257_v15, 0.0 }
 0xe3d   :  { %v5974_v57 = vpop.f32.mrf.mxu2  ;;  %v6020_v27 = vpop.f32.mrf.mxu3 }
 0xe3e   :  { %v6021_v51 = vadd.f32 %v6020_v27, %v5971_v41 }
 0xe40   :  { %v13283_v22 = vadd.f32 %v6069_v43, %v6021_v51  ;;  %v6089_v52 = vpop.f32.mrf.mxu0 }
 0xe42   :  { %v6107_v11 = vsel %vm102_vm5, %v13283_v22, 0.0 }
 0xe45   :  { %v5976_v14 = vpop.f32.mrf.mxu2  ;;  %v6023_v32 = vpop.f32.mrf.mxu3 }
 0xe46   :  { %v6024_v37 = vadd.f32 %v6023_v32, %v5974_v57  ;;  %v6106_v57 = vadd.f32 %v6105_v21, %v6104_v49 }
 0xe48   :  { %v13289_v3 = vadd.f32 %v6072_v61, %v6024_v37 }
 0xe4a   :  { %v6115_v61 = vsel %vm102_vm5, %v13289_v3, 0.0 }
 0xe4d   :  { %v5979_v33 = vpop.f32.mrf.mxu2  ;;  %v6025_v55 = vpop.f32.mrf.mxu3 }
 0xe4e   :  { %v6026_v59 = vadd.f32 %v6025_v55, %v5976_v14 }
 0xe50   :  { %v13285_v42 = vadd.f32 %v6074_v31, %v6026_v59 }
 0xe52   :  { %v6116_v43 = vsel %vm102_vm5, %v13285_v42, 0.0 }
 0xe55   :  { %v5981_v16 = vpop.f32.mrf.mxu2  ;;  %v6028_v8 = vpop.f32.mrf.mxu3 }
 0xe56   :  { %v6029_v46 = vadd.f32 %v6028_v8, %v5979_v33  ;;  %v6117_v33 = vadd.f32 %v6116_v43, %v6115_v61 }
 0xe58   :  { %v13291_v26 = vadd.f32 %v6077_v24, %v6029_v46  ;;  %v6108_v24 = vadd.f32 %v6107_v11, %v6106_v57 }
 0xe5a   :  { %v6118_v31 = vsel %vm102_vm5, %v13291_v26, 0.0 }
 0xe5b   :  { %v6119_v8 = vadd.f32 %v6118_v31, %v6117_v33 }
 0xe5d   :  { %v6030_v35 = vpop.f32.mrf.mxu3  ;;  %v5984_v13 = vpop.f32.mrf.mxu2 }
 0xe5e   :  { %v6031_v38 = vadd.f32 %v6030_v35, %v5981_v16 }
 0xe60   :  { %v13297_v41 = vadd.f32 %v6079_v36, %v6031_v38 }
 0xe62   :  { %v6120_v55 = vsel %vm102_vm5, %v13297_v41, 0.0 }
 0xe63   :  { %v6121_v48 = vadd.f32 %v6120_v55, %v6119_v8 }
 0xe65   :  { %v6033_v0 = vpop.f32.mrf.mxu3  ;;  %v5986_v45 = vpop.f32.mrf.mxu2 }
 0xe66   :  { %v6034_v63 = vadd.f32 %v6033_v0, %v5984_v13  ;;  %v6109_v13 = vrot.slane %v6108_v24, 4 }
 0xe68   :  { %v13303_v14 = vadd.f32 %v6082_v30, %v6034_v63  ;;  %v6110_v12 = vadd.f32 %v6109_v13, %v6108_v24 }
 0xe6a   :  { %v6122_v36 = vsel %vm102_vm5, %v13303_v14, 0.0  ;;  %v6111_v59 = vrot.slane %v6110_v12, 2 }
 0xe6b   :  { %v6123_v39 = vadd.f32 %v6122_v36, %v6121_v48 }
 0xe6c   :  { %v6112_v37 = vadd.f32 %v6111_v59, %v6110_v12 }
 0xe6d   :  { %v6035_v6 = vpop.f32.mrf.mxu3  ;;  %v5989_v50 = vpop.f32.mrf.mxu2 }
 0xe6e   :  { %v6036_v9 = vadd.f32 %v6035_v6, %v5986_v45  ;;  %v6113_v17 = vrot.slane %v6112_v37, 1 }
 0xe70   :  { %v13307_v16 = vadd.f32 %v6084_v47, %v6036_v9  ;;  %v6114_v1 = vadd.f32 %v6113_v17, %v6112_v37 }
 0xe72   :  { %v6124_v30 = vsel %vm102_vm5, %v13307_v16, 0.0 }
 0xe73   :  { %v6125_v47 = vadd.f32 %v6124_v30, %v6123_v39 }
 0xe75   :  { %v6038_v27 = vpop.f32.mrf.mxu3  ;;  %v5991_v0 = vpop.f32.mrf.mxu2 }
 0xe76   :  { %v6039_v32 = vadd.f32 %v6038_v27, %v5989_v50 }
 0xe78   :  { %v13311_v35 = vadd.f32 %v6087_v54, %v6039_v32 }
 0xe7a   :  { %v6126_v18 = vsel %vm102_vm5, %v13311_v35, 0.0 }
 0xe7b   :  { %v6127_v58 = vadd.f32 %v6126_v18, %v6125_v47 }
 0xe7d   :  { %v6040_v23 = vpop.f32.mrf.mxu3 }
 0xe7e   :  { %v6041_v45 = vadd.f32 %v6040_v23, %v5991_v0 }
 0xe80   :  { %v13317_v60 = vadd.f32 %v6089_v52, %v6041_v45 }
 0xe82   :  { %v6128_v51 = vsel %vm102_vm5, %v13317_v60, 0.0 }
 0xe83   :  { %v6129_v20 = vadd.f32 %v6128_v51, %v6127_v58 }
 0xe85   :  { %v6130_v6 = vrot.slane %v6129_v20, 4 }
 0xe87   :  { %v6131_v10 = vadd.f32 %v6130_v6, %v6129_v20 }
 0xe89   :  { %v6132_v46 = vrot.slane %v6131_v10, 2 }
 0xe8b   :  { %v6133_v4 = vadd.f32 %v6132_v46, %v6131_v10 }
 0xe8d   :  { %v6134_v38 = vrot.slane %v6133_v4, 1 }
 0xe8f   :  { %v6135_v21 = vadd.f32 %v6134_v38, %v6133_v4 }
 0xe91   :  { %v6138_v63 = vsel %vm2338_vm9, %v6135_v21, %v6114_v1 }
 0xe92   :  { %6143 = vrot.lane.b32.xlu1 %v6138_v63, %s9473_s27  ;;  %v6140_v49 = vsel %vm2341_vm10, %v6138_v63, 0.0 }
 0xe93   :  { %6141 = vadd.xlane.f32.xlu2 %v6140_v49 }
 0xe9a   :  { %6149 = vrot.lane.b32.xlu1 %v6138_v63, %s9472_s25 }
 0xeab   :  { %6155 = vrot.lane.b32.xlu2 %v6138_v63, %s9471_s3 }
 0xf04   :  { %v6144_v50 = vpop.permute.xlu1 %6143 }
 0xf05   :  { %v6146_v11 = vsel %vm2341_vm10, %v6144_v50, 0.0 }
 0xf06   :  { %6147 = vadd.xlane.f32.xlu0 %v6146_v11  ;;  %v6142_v43 = vpop.xlane.xlu2 %6141 }
 0xf0c   :  { %v6150_v9 = vpop.permute.xlu1 %6149 }
 0xf0d   :  { %v6152_v54 = vsel %vm2341_vm10, %v6150_v9, 0.0 }
 0xf0e   :  { %6153 = vadd.xlane.f32.xlu1 %v6152_v54  ;;  %v6156_v57 = vpop.permute.xlu2 %6155 }
 0xf0f   :  { %v6158_v27 = vsel %vm2341_vm10, %v6156_v57, 0.0 }
 0xf10   :  { %6159 = vadd.xlane.f32.xlu0 %v6158_v27 }
 0xf79   :  { %v6148_v61 = vpop.xlane.xlu0 %6147 }
 0xf7a   :  { %v6161_v31 = vsel %vm2363_vm11, %v6142_v43, %v6148_v61 }
 0xf81   :  { %v6154_v32 = vpop.xlane.xlu1 %6153 }
 0xf82   :  { %v6162_v24 = vsel %vm2365_vm12, %v6161_v31, %v6154_v32 }
 0xf83   :  { %v6160_v33 = vpop.xlane.xlu0 %6159 }
 0xf84   :  { %v6163_v55 = vsel %vm2367_vm13, %v6162_v24, %v6160_v33 }
 0xf85   :  { %v6164_v8 = vmul.f32 0.001953125, %v6163_v55 }
 0xf87   :  { %v6166_v36 = vrot.slane %v6164_v8, 1  ;;  %v6167_v13 = vperm.slane %v6164_v8, 0 }
 0xf89   :  { %v6168_v48 = vperm.slane %v6166_v36, 0  ;;  %v13333_v30 = vsub.f32 %v13261_v29, %v6167_v13  ;;  %v13336_v39 = vsub.f32 %v13259_v56, %v6167_v13  ;;  %v13339_v0 = vsub.f32 %v13263_v28, %v6167_v13 }
 0xf8a   :  { %v13348_v45 = vsub.f32 %v13267_v2, %v6167_v13  ;;  %v13358_v28 = vsub.f32 %v13273_v25, %v6167_v13  ;;  %v13370_v12 = vsub.f32 %v13277_v62, %v6167_v13  ;;  %v13382_v59 = vsub.f32 %v13257_v15, %v6167_v13 }
 0xf8b   :  { %v13342_v23 = vsub.f32 %v13289_v3, %v6168_v48  ;;  %v13345_v18 = vsub.f32 %v13285_v42, %v6168_v48  ;;  %v13351_v52 = vsub.f32 %v13291_v26, %v6168_v48  ;;  %v6187_v29 = vmul.f32 %v13333_v30, %v13333_v30 }
 0xf8c   :  { %v6188_v56 = vmul.f32 %v13336_v39, %v13336_v39  ;;  %v13361_v3 = vsub.f32 %v13297_v41, %v6168_v48  ;;  %v6189_v42 = vmul.f32 %v13339_v0, %v13339_v0  ;;  %v13373_v47 = vsub.f32 %v13303_v14, %v6168_v48 }
 0xf8d   :  { %v6195_v2 = vmul.f32 %v13342_v23, %v13342_v23  ;;  %v6196_v26 = vmul.f32 %v13345_v18, %v13345_v18  ;;  %v6190_v25 = vmul.f32 %v13348_v45, %v13348_v45  ;;  %v6197_v41 = vmul.f32 %v13351_v52, %v13351_v52 }
 0xf8e   :  { %v6203_v58 = vsel %vm102_vm5, %v6187_v29, 0.0  ;;  %v6204_v51 = vsel %vm102_vm5, %v6188_v56, 0.0  ;;  %v13385_v20 = vsub.f32 %v13307_v16, %v6168_v48  ;;  %v6191_v62 = vmul.f32 %v13358_v28, %v13358_v28 }
 0xf8f   :  { %v6205_v14 = vadd.f32 %v6204_v51, %v6203_v58  ;;  %v6198_v6 = vmul.f32 %v13361_v3, %v13361_v3  ;;  %v6206_v10 = vsel %vm102_vm5, %v6189_v42, 0.0  ;;  %v6224_v37 = vsel %vm102_vm5, %v6195_v2, 0.0 }
 0xf90   :  { %v6225_v46 = vsel %vm102_vm5, %v6196_v26, 0.0  ;;  %v13395_v4 = vsub.f32 %v13283_v22, %v6167_v13  ;;  %v13398_v15 = vsub.f32 %v13311_v35, %v6168_v48  ;;  %v6192_v38 = vmul.f32 %v13370_v12, %v13370_v12 }
 0xf91   :  { %v6207_v16 = vadd.f32 %v6206_v10, %v6205_v14  ;;  %v6226_v17 = vadd.f32 %v6225_v46, %v6224_v37  ;;  %v6199_v1 = vmul.f32 %v13373_v47, %v13373_v47  ;;  %v6208_v21 = vsel %vm102_vm5, %v6190_v25, 0.0 }
 0xf92   :  { %v6227_v63 = vsel %vm102_vm5, %v6197_v41, 0.0  ;;  %v13407_v49 = vsub.f32 %v13317_v60, %v6168_v48  ;;  %v6193_v35 = vmul.f32 %v13382_v59, %v13382_v59  ;;  %v6200_v11 = vmul.f32 %v13385_v20, %v13385_v20 }
 0xf93   :  { %v6209_v22 = vadd.f32 %v6208_v21, %v6207_v16  ;;  %v6228_v50 = vadd.f32 %v6227_v63, %v6226_v17  ;;  %v6210_v43 = vsel %vm102_vm5, %v6191_v62, 0.0  ;;  %v6229_v9 = vsel %vm102_vm5, %v6198_v6, 0.0 }
 0xf94   :  { %v6194_v27 = vmul.f32 %v13395_v4, %v13395_v4  ;;  %v6201_v60 = vmul.f32 %v13398_v15, %v13398_v15  ;;  %v6212_v61 = vsel %vm102_vm5, %v6192_v38, 0.0  ;;  %v6231_v31 = vsel %vm102_vm5, %v6199_v1, 0.0 }
 0xf95   :  { %v6211_v54 = vadd.f32 %v6210_v43, %v6209_v22  ;;  %v6230_v57 = vadd.f32 %v6229_v9, %v6228_v50  ;;  %v6202_v33 = vmul.f32 %v13407_v49, %v13407_v49  ;;  %v6214_v55 = vsel %vm102_vm5, %v6193_v35, 0.0 }
 0xf96   :  { %v6233_v8 = vsel %vm102_vm5, %v6200_v11, 0.0  ;;  %v6216_v48 = vsel %vm102_vm5, %v6194_v27, 0.0  ;;  %v6235_v29 = vsel %vm102_vm5, %v6201_v60, 0.0 }
 0xf97   :  { %v6213_v32 = vadd.f32 %v6212_v61, %v6211_v54  ;;  %v6232_v24 = vadd.f32 %v6231_v31, %v6230_v57  ;;  %v6237_v2 = vsel %vm102_vm5, %v6202_v33, 0.0 }
 0xf99   :  { %v6215_v36 = vadd.f32 %v6214_v55, %v6213_v32  ;;  %v6234_v13 = vadd.f32 %v6233_v8, %v6232_v24 }
 0xf9b   :  { %v6217_v56 = vadd.f32 %v6216_v48, %v6215_v36  ;;  %v6236_v42 = vadd.f32 %v6235_v29, %v6234_v13  ;;  %v9420_v13 = vld [vmem:[%s14194_s13] ss:$0 sm:$0xff]  ;;  %v8075_v29 = vld [vmem:[%s14196_s15 + $0x88] sm:$0xff] }
 0xf9c   :  { %7318 = vmatpush.bf16.msra.mxu3 %v8075_v29 }
 0xf9d   :  { %v6218_v26 = vrot.slane %v6217_v56, 4  ;;  %v6238_v25 = vadd.f32 %v6237_v2, %v6236_v42  ;;  %v8074_v42 = vld [vmem:[%s14196_s15 + $0x80] sm:$0xff] }
 0xf9f   :  { %v6219_v41 = vadd.f32 %v6218_v26, %v6217_v56  ;;  %v6239_v58 = vrot.slane %v6238_v25, 4 }
 0xfa0   :  { %7319 = vmatpush.bf16.msra.mxu3 %v8074_v42 }
 0xfa1   :  { %v6220_v51 = vrot.slane %v6219_v41, 2  ;;  %v6240_v62 = vadd.f32 %v6239_v58, %v6238_v25 }
 0xfa3   :  { %v6221_v14 = vadd.f32 %v6220_v51, %v6219_v41  ;;  %v6241_v6 = vrot.slane %v6240_v62, 2  ;;  %v9421_v41 = vld [vmem:[%s14195_s14] ss:$0 sm:$0xff] }
 0xfa5   :  { %v6222_v10 = vrot.slane %v6221_v14, 1  ;;  %v6242_v37 = vadd.f32 %v6241_v6, %v6240_v62 }
 0xfa7   :  { %v6243_v46 = vrot.slane %v6242_v37, 1  ;;  %v6223_v16 = vadd.f32 %v6222_v10, %v6221_v14 }
 0xfa9   :  { %v6244_v17 = vadd.f32 %v6243_v46, %v6242_v37 }
 0xfab   :  { %v6247_v38 = vsel %vm2338_vm9, %v6244_v17, %v6223_v16 }
 0xfac   :  { %6258 = vrot.lane.b32.xlu2 %v6247_v38, %s9472_s25  ;;  %6252 = vrot.lane.b32.xlu1 %v6247_v38, %s9473_s27  ;;  %v6249_v1 = vsel %vm2341_vm10, %v6247_v38, 0.0 }
 0xfad   :  { %6250 = vadd.xlane.f32.xlu0 %v6249_v1 }
 0xfb4   :  { %6264 = vrot.lane.b32.xlu2 %v6247_v38, %s9471_s3 }
0x1006   :  { %v6259_v22 = vpop.permute.xlu2 %6258 }
0x1007   :  { %v6261_v50 = vsel %vm2341_vm10, %v6259_v22, 0.0 }
0x100e   :  { %v6265_v35 = vpop.permute.xlu2 %6264 }
0x100f   :  { %v6267_v11 = vsel %vm2341_vm10, %v6265_v35, 0.0 }
0x101e   :  { %v6253_v21 = vpop.permute.xlu1 %6252 }
0x101f   :  { %v6255_v63 = vsel %vm2341_vm10, %v6253_v21, 0.0 }
0x1020   :  { %6256 = vadd.xlane.f32.xlu0 %v6255_v63  ;;  %v6251_v43 = vpop.xlane.xlu0 %6250 }
0x1028   :  { %6262 = vadd.xlane.f32.xlu0 %v6261_v50 }
0x1030   :  { %6268 = vadd.xlane.f32.xlu0 %v6267_v11 }
0x1093   :  { %v6257_v9 = vpop.xlane.xlu0 %6256 }
0x1094   :  { %v6270_v57 = vsel %vm2363_vm11, %v6251_v43, %v6257_v9 }
0x109b   :  { %v6263_v54 = vpop.xlane.xlu0 %6262 }
0x109c   :  { %v6271_v27 = vsel %vm2365_vm12, %v6270_v57, %v6263_v54  ;;  %v14292_v54 = vld [vmem:[#allocation5_spill] sm:$0xff] }
0x10a3   :  { %v6269_v60 = vpop.xlane.xlu0 %6268 }
0x10a4   :  { %v6272_v61 = vsel %vm2367_vm13, %v6271_v27, %v6269_v60 }
0x10a5   :  { %v6273_v31 = vmul.f32 0.001953125, %v6272_v61  ;;  %v6373_v61 = vld [vmem:[#allocation3 + $0x58] sm:$0xff] }
0x10a6   :  { %v6544_v42 = vrot.slane %v6373_v61, 1 }
0x10a7   :  { %v6274_v32 = vadd.f32 1e-05, %v6273_v31  ;;  %v14294_v31 = vld [vmem:[#allocation7_spill] sm:$0xff] }
0x10a9   :  { %9429 = vrsqrt.f32 %v6274_v32  ;;  %vm6281_vm10 = vweird.f32 %v6274_v32 }
0x10af   :  { %v9430_v24 = vpop.eup %9429 }
0x10b0   :  { %v6276_v33 = vmul.f32 %v9430_v24, %v6274_v32  ;;  %vm6282_vm9 = vweird.f32 %v9430_v24 }
0x10b1   :  { %vm6283_vm11 = vmor %vm6281_vm10, %vm6282_vm9 }
0x10b2   :  { %v6277_v55 = vmul.f32 %v9430_v24, %v6276_v33  ;;  %v14295_v33 = vld [vmem:[#allocation8_spill] sm:$0xff] }
0x10b4   :  { %v6278_v8 = vmul.f32 0.5, %v6277_v55 }
0x10b6   :  { %v6279_v36 = vsub.f32 1.5, %v6278_v8 }
0x10b8   :  { %v6280_v48 = vmul.f32 %v9430_v24, %v6279_v36 }
0x10ba   :  { %v6284_v56 = vsel %vm6283_vm11, %v9430_v24, %v6280_v48 }
0x10bb   :  { %v6288_v2 = vmul.f32 %v9420_v13, %v6284_v56  ;;  %v14296_v13 = vld [vmem:[#allocation9_spill] sm:$0xff] }
0x10bd   :  { %v6290_v26 = vrot.slane %v6288_v2, 1  ;;  %v6291_v25 = vperm.slane %v6288_v2, 0  ;;  %v14297_v2 = vld [vmem:[#allocation10_spill] sm:$0xff] }
0x10bf   :  { %v6295_v58 = vmul.f32 %v6291_v25, %v13333_v30  ;;  %v6296_v51 = vmul.f32 %v6291_v25, %v13336_v39  ;;  %v6297_v62 = vmul.f32 %v6291_v25, %v13339_v0  ;;  %v6298_v14 = vmul.f32 %v6291_v25, %v13348_v45 }
0x10c0   :  { %v6292_v6 = vperm.slane %v6290_v26, 0  ;;  %v6299_v10 = vmul.f32 %v6291_v25, %v13358_v28  ;;  %v6300_v37 = vmul.f32 %v6291_v25, %v13370_v12  ;;  %v6301_v46 = vmul.f32 %v6291_v25, %v13382_v59 }
0x10c1   :  { %v6314_v16 = vadd.f32 %v9421_v41, %v6295_v58  ;;  %v6315_v17 = vadd.f32 %v9421_v41, %v6296_v51  ;;  %v6316_v38 = vadd.f32 %v9421_v41, %v6297_v62  ;;  %v6302_v1 = vmul.f32 %v6291_v25, %v13395_v4  ;;  %v14298_v58 = vld [vmem:[#allocation11_spill] sm:$0xff] }
0x10c2   :  { %v6317_v21 = vadd.f32 %v9421_v41, %v6298_v14  ;;  %v6303_v30 = vmul.f32 %v6292_v6, %v13342_v23  ;;  %v6318_v39 = vadd.f32 %v9421_v41, %v6299_v10  ;;  %v6304_v0 = vmul.f32 %v6292_v6, %v13345_v18  ;;  %v6364_v10 = vld [vmem:[#allocation3 + $0x10] sm:$0xff] }
0x10c3   :  { %v6305_v45 = vmul.f32 %v6292_v6, %v13351_v52  ;;  %v6319_v63 = vadd.f32 %v9421_v41, %v6300_v37  ;;  %v6320_v22 = vadd.f32 %v9421_v41, %v6301_v46  ;;  %v6330_v28 = vadd.f32 %v6314_v16, %v12036_v34  ;;  %v6367_v37 = vld [vmem:[#allocation3 + $0x28] sm:$0xff]  ;;  %v14299_v46 = vld [vmem:[#allocation12_spill] sm:$0xff] }
0x10c4   :  { %v6331_v12 = vadd.f32 %v6315_v17, %v11935_v7  ;;  %v6332_v59 = vadd.f32 %v6316_v38, %v11939_v5  ;;  %v6306_v50 = vmul.f32 %v6292_v6, %v13361_v3  ;;  %v6321_v35 = vadd.f32 %v9421_v41, %v6302_v1 }
0x10c5   :  { %v6333_v4 = vadd.f32 %v6317_v21, %v11943_v53  ;;  %v6307_v23 = vmul.f32 %v6292_v6, %v13373_v47  ;;  %v6322_v11 = vadd.f32 %v9421_v41, %v6303_v30  ;;  %v6334_v18 = vadd.f32 %v6318_v39, %v11948_v40  ;;  %6346 = vst.msk [vmem:[#allocation3 + $0x20] sm:$0xff] %vm102_vm5, %v6330_v28  ;;  %v14291_v40 = vld [vmem:[#allocation13_spill] sm:$0xff] }
0x10c6   :  { %v6308_v52 = vmul.f32 %v6292_v6, %v13385_v20  ;;  %v6323_v43 = vadd.f32 %v9421_v41, %v6304_v0  ;;  %v6335_v34 = vadd.f32 %v6319_v63, %v11953_v44  ;;  %6347 = vst.msk [vmem:[#allocation3 + $0x38] sm:$0xff] %vm102_vm5, %v6331_v12  ;;  %v6309_v7 = vmul.f32 %v6292_v6, %v13398_v15  ;;  %v6370_v44 = vld [vmem:[#allocation3 + $0x40] sm:$0xff]  ;;  %v14293_v15 = vld [vmem:[#allocation6_spill] sm:$0xff]  ;;  %v13543_v12 = vld [vmem:[#allocation3 + $0xf8] sm:$0xff] }
0x10c7   :  { %v6324_v5 = vadd.f32 %v9421_v41, %v6305_v45  ;;  %v6336_v3 = vadd.f32 %v6320_v22, %v11960_v19  ;;  %6348 = vst.msk [vmem:[#allocation3 + $0x50] sm:$0xff] %vm102_vm5, %v6332_v59  ;;  %v6310_v53 = vmul.f32 %v6292_v6, %v13407_v49  ;;  %v6325_v47 = vadd.f32 %v9421_v41, %v6306_v50  ;;  %v13483_v19 = vld [vmem:[#allocation3 + $0x8] sm:$0xff]  ;;  %v8073_v50 = vld [vmem:[%s14196_s15 + $0x78] sm:$0xff] }
0x10c8   :  { %v6337_v9 = vadd.f32 %v6321_v35, %v14291_v40  ;;  %6349 = vst.msk [vmem:[#allocation3 + $0x68] sm:$0xff] %vm102_vm5, %v6333_v4  ;;  %v6326_v20 = vadd.f32 %v9421_v41, %v6307_v23  ;;  %v6338_v57 = vadd.f32 %v6322_v11, %v14292_v54  ;;  %v6327_v27 = vadd.f32 %v9421_v41, %v6308_v52  ;;  %v6385_v52 = vld [vmem:[#allocation3 + $0xb8] sm:$0xff] }
0x10c9   :  { %6350 = vst.msk [vmem:[#allocation3 + $0x80] sm:$0xff] %vm102_vm5, %v6334_v18  ;;  %v6339_v60 = vadd.f32 %v6323_v43, %v14293_v15  ;;  %v6328_v49 = vadd.f32 %v9421_v41, %v6309_v7  ;;  %v6340_v32 = vadd.f32 %v6324_v5, %v14294_v31  ;;  %v6329_v24 = vadd.f32 %v9421_v41, %v6310_v53  ;;  %v6382_v18 = vld [vmem:[#allocation3 + $0xa0] sm:$0xff]  ;;  %v6376_v43 = vld [vmem:[#allocation3 + $0x70] sm:$0xff] }
0x10ca   :  { %6351 = vst.msk [vmem:[#allocation3 + $0x98] sm:$0xff] %vm102_vm5, %v6335_v34  ;;  %v6341_v55 = vadd.f32 %v6325_v47, %v14295_v33  ;;  %v6541_v36 = vrot.slane %v6370_v44, 1  ;;  %v6342_v48 = vadd.f32 %v6326_v20, %v14296_v13  ;;  %v6343_v26 = vadd.f32 %v6327_v27, %v14297_v2  ;;  %7263 = vmatpush.bf16.msra.mxu2 %v8073_v50  ;;  %v6379_v34 = vld [vmem:[#allocation3 + $0x88] sm:$0xff]  ;;  %v8065_v27 = vld [vmem:[%s14196_s15 + $0x38] sm:$0xff] }
0x10cb   :  { %6352 = vst.msk [vmem:[#allocation3 + $0xb0] sm:$0xff] %vm102_vm5, %v6336_v3  ;;  %v6344_v51 = vadd.f32 %v6328_v49, %v14298_v58  ;;  %v6345_v16 = vadd.f32 %v6329_v24, %v14299_v46  ;;  %v6534_v21 = vrot.slane %v13483_v19, 1  ;;  %v6535_v63 = vrot.slane %v6364_v10, 1  ;;  %7214 = vmatpush.bf16.msra.mxu1 %v8065_v27  ;;  %v6377_v10 = vld [vmem:[#allocation3 + $0x78] sm:$0xff]  ;;  %v6383_v27 = vld [vmem:[#allocation3 + $0xa8] sm:$0xff] }
0x10cc   :  { %6353 = vst.msk [vmem:[#allocation3 + $0xc8] sm:$0xff] %vm102_vm5, %v6337_v9  ;;  %v13489_v8 = vld [vmem:[#allocation3 + $0x20] sm:$0xff]  ;;  %v6538_v28 = vrot.slane %v6367_v37, 1  ;;  %v6553_v3 = vrot.slane %v6382_v18, 1  ;;  %v6556_v47 = vrot.slane %v6385_v52, 1  ;;  %v6547_v54 = vrot.slane %v6376_v43, 1 }
0x10cd   :  { %6354 = vst.msk [vmem:[#allocation3 + $0x110] sm:$0xff] %vm102_vm5, %v6338_v57  ;;  %v13493_v29 = vld [vmem:[#allocation3 + $0x38] sm:$0xff]  ;;  %v9173_v56 = vpack.i.bf16 %v13489_v8, %v13483_v19  ;;  %v6537_v22 = vrot.slane %v13489_v8, 1  ;;  %v6536_v4 = vsel %vm352_vm4, %v6534_v21, %v6535_v63  ;;  %v6550_v44 = vrot.slane %v6379_v34, 1  ;;  %v6380_v37 = vld [vmem:[#allocation3 + $0x90] sm:$0xff] }
0x10ce   :  { %6355 = vst.msk [vmem:[#allocation3 + $0x128] sm:$0xff] %vm102_vm5, %v6339_v60  ;;  %v13499_v25 = vld [vmem:[#allocation3 + $0x50] sm:$0xff]  ;;  %v6540_v41 = vrot.slane %v13493_v29, 1 }
0x10cf   :  { %6356 = vst.msk [vmem:[#allocation3 + $0x140] sm:$0xff] %vm102_vm5, %v6340_v32  ;;  %v13504_v62 = vld [vmem:[#allocation3 + $0x68] sm:$0xff]  ;;  %v6543_v14 = vrot.slane %v13499_v25, 1  ;;  %v13509_v6 = vpack.i.bf16 %v13499_v25, %v13493_v29  ;;  %9174 = vrot.lane.b32.xlu2 %v9173_v56, %s9469_s28  ;;  %v13556_v23 = vsel %vm352_vm4, %v6537_v22, %v6538_v28  ;;  %v6472_v22 = vrot.slane %v6380_v37, 7  ;;  %v8064_v18 = vld [vmem:[%s14196_s15 + $0x30] sm:$0xff]  ;;  %v13671_v37 = vld [vmem:[#allocation3 + $0xe0] sm:$0xff] }
0x10d0   :  { %6357 = vst.msk [vmem:[#allocation3 + $0x158] sm:$0xff] %vm102_vm5, %v6341_v55  ;;  %v13514_v17 = vld [vmem:[#allocation3 + $0x80] sm:$0xff]  ;;  %v13517_v38 = vsel %vm352_vm4, %v6540_v41, %v6541_v36  ;;  %v9213_v7 = vpack.i.bf16 %v13556_v23, %v6536_v4  ;;  %v6546_v20 = vrot.slane %v13504_v62, 1  ;;  %v6371_v32 = vld [vmem:[#allocation3 + $0x48] sm:$0xff]  ;;  %v6368_v4 = vld [vmem:[#allocation3 + $0x30] sm:$0xff]  ;;  %7215 = vmatpush.bf16.msra.mxu1 %v8064_v18 }
0x10d1   :  { %6358 = vst.msk [vmem:[#allocation3 + $0x170] sm:$0xff] %vm102_vm5, %v6342_v48  ;;  %v13522_v1 = vpack.i.bf16 %v13514_v17, %v13504_v62  ;;  %9179 = vrot.lane.b32.xlu1 %v13509_v6, %s9469_s28  ;;  %v13528_v30 = vsel %vm352_vm4, %v6543_v14, %v6544_v42  ;;  %v13533_v0 = vld [vmem:[#allocation3 + $0x98] sm:$0xff]  ;;  %v6549_v57 = vrot.slane %v13514_v17, 1  ;;  %v6374_v36 = vld [vmem:[#allocation3 + $0x60] sm:$0xff]  ;;  %v6463_v48 = vrot.slane %v6371_v32, 7 }
0x10d2   :  { %6359 = vst.msk [vmem:[#allocation3 + $0x188] sm:$0xff] %vm102_vm5, %v6343_v26  ;;  %v7020_v39 = vpack.c.bf16 %v13528_v30, %v13517_v38  ;;  %v13535_v45 = vld [vmem:[#allocation3 + $0xb0] sm:$0xff]  ;;  %v6552_v5 = vrot.slane %v13533_v0, 1  ;;  %v13595_v33 = vsel %vm352_vm4, %v6546_v20, %v6547_v54  ;;  %v6464_v42 = vrot.slane %v13499_v25, 7  ;;  %v6386_v32 = vld [vmem:[#allocation3 + $0xc0] sm:$0xff] }
0x10d3   :  { %6360 = vst.msk [vmem:[#allocation3 + $0x1a0] sm:$0xff] %vm102_vm5, %v6344_v51  ;;  %9184 = vrot.lane.b32.xlu0 %v13522_v1, %s9469_s28  ;;  %v13552_v35 = vpack.i.bf16 %v13535_v45, %v13533_v0  ;;  %v6555_v53 = vrot.slane %v13535_v45, 1  ;;  %v6551_v55 = vsel %vm352_vm4, %v6549_v57, %v6550_v44  ;;  %v6466_v2 = vrot.slane %v6374_v36, 7  ;;  %v8072_v51 = vld [vmem:[%s14196_s15 + $0x70] sm:$0xff]  ;;  %v13657_v36 = vld [vmem:[#allocation3 + $0xc8] sm:$0xff] }
0x10d4   :  { %6361 = vst.msk [vmem:[#allocation3 + $0x1b8] sm:$0xff] %vm102_vm5, %v6345_v16  ;;  %7942 = vmatmul.msk.bf16.vlgmr.msra.gmra.mxu3 %vm102_vm5, %v7020_v39  ;;  %v13545_v59 = vld [vmem:[#allocation3 + $0x110] sm:$0xff]  ;;  %v6554_v49 = vsel %vm352_vm4, %v6552_v5, %v6553_v3  ;;  %v7023_v56 = vpack.c.bf16 %v6551_v55, %v13595_v33  ;;  %v6467_v26 = vrot.slane %v13504_v62, 7  ;;  %v13618_v46 = vsel %vm271_vm3, %v6463_v48, %v6464_v42 }
0x10d5   :  { %v9193_v11 = vpack.i.bf16 %v13545_v59, %v13543_v12  ;;  %v13566_v40 = vld [vmem:[#allocation3 + $0x128] sm:$0xff]  ;;  %v13586_v31 = vsel %vm352_vm4, %v6555_v53, %v6556_v47  ;;  %7264 = vmatpush.bf16.msra.mxu2 %v8072_v51  ;;  %v9218_v21 = vpack.i.bf16 %v13528_v30, %v13517_v38  ;;  %v6469_v39 = vrot.slane %v6377_v10, 7 }
0x10d6   :  { %v13568_v9 = vld [vmem:[#allocation3 + $0x140] sm:$0xff]  ;;  %v9228_v13 = vpack.i.bf16 %v13586_v31, %v6554_v49  ;;  %v13621_v16 = vsel %vm271_vm3, %v6466_v2, %v6467_v26  ;;  %v6470_v63 = vrot.slane %v13514_v17, 7  ;;  %v6473_v28 = vrot.slane %v13533_v0, 7 }
0x10d7   :  { %9189 = vrot.lane.b32.xlu2 %v13552_v35, %s9469_s28  ;;  %v13576_v15 = vld [vmem:[#allocation3 + $0x158] sm:$0xff]  ;;  %v13582_v61 = vpack.i.bf16 %v13568_v9, %v13566_v40  ;;  %v9238_v50 = vpack.i.bf16 %v13621_v16, %v13618_v46  ;;  %v9223_v34 = vpack.i.bf16 %v6551_v55, %v13595_v33  ;;  %v6461_v5 = vrot.slane %v13493_v29, 7 }
0x10d8   :  { %v13578_v60 = vld [vmem:[#allocation3 + $0x170] sm:$0xff]  ;;  %v13637_v52 = vsel %vm271_vm3, %v6469_v39, %v6470_v63  ;;  %v13640_v43 = vsel %vm271_vm3, %v6472_v22, %v6473_v28  ;;  %v6458_v53 = vrot.slane %v13489_v8, 7  ;;  %v9263_v20 = vpack.i.bf16 %v6554_v49, %v6551_v55  ;;  %v8071_v55 = vld [vmem:[%s14196_s15 + $0x68] sm:$0xff] }
0x10d9   :  { %9194 = vrot.lane.b32.xlu1 %v9193_v11, %s9469_s28  ;;  %v13592_v24 = vpack.i.bf16 %v13578_v60, %v13576_v15  ;;  %v13604_v41 = vld [vmem:[#allocation3 + $0x188] sm:$0xff]  ;;  %v6365_v11 = vld [vmem:[#allocation3 + $0x18] sm:$0xff]  ;;  %v9243_v47 = vpack.i.bf16 %v13640_v43, %v13637_v52  ;;  %v7026_v54 = vpack.c.bf16 %v13586_v31, %v6554_v49  ;;  %v6475_v48 = vrot.slane %v6383_v27, 7  ;;  %7265 = vmatpush.bf16.msra.mxu2 %v8071_v55 }
0x10da   :  { %v13606_v58 = vld [vmem:[#allocation3 + $0x1a0] sm:$0xff]  ;;  %v6457_v3 = vrot.slane %v6365_v11, 7  ;;  %v6586_v42 = vrot.slane %v6386_v32, 7  ;;  %v6587_v2 = vrot.slane %v13657_v36, 7  ;;  %v9253_v26 = vpack.i.bf16 %v13517_v38, %v13556_v23  ;;  %v8063_v28 = vld [vmem:[%s14196_s15 + $0x28] sm:$0xff] }
0x10db   :  { %9214 = vrot.lane.b32.xlu0 %v9213_v7, %s9468_s24  ;;  %v13615_v14 = vpack.i.bf16 %v13606_v58, %v13604_v41  ;;  %v6460_v7 = vrot.slane %v6368_v4, 7  ;;  %v6594_v51 = vrot.slane %v13657_v36, 1  ;;  %v6612_v38 = vrot.slane %v13671_v37, 1  ;;  %7216 = vmatpush.bf16.msra.mxu1 %v8063_v28  ;;  %v6403_v27 = vld [vmem:[#allocation3 + $0x148] sm:$0xff]  ;;  %v6398_v28 = vld [vmem:[#allocation3 + $0x120] sm:$0xff] }
0x10dc   :  { %v13654_v44 = vsel %vm271_vm3, %v6457_v3, %v6458_v53  ;;  %v6588_v22 = vsel %vm271_vm3, %v6586_v42, %v6587_v2  ;;  %v6389_v3 = vld [vmem:[#allocation3 + $0xd8] sm:$0xff]  ;;  %v6406_v53 = vld [vmem:[#allocation3 + $0x160] sm:$0xff]  ;;  %v6570_v32 = vrot.slane %v13576_v15, 1 }
0x10dd   :  { %v13651_v57 = vsel %vm271_vm3, %v6460_v7, %v6461_v5  ;;  %v8070_v7 = vld [vmem:[%s14196_s15 + $0x60] sm:$0xff]  ;;  %v9258_v5 = vpack.i.bf16 %v13595_v33, %v13528_v30  ;;  %v6571_v55 = vrot.slane %v6406_v53, 1  ;;  %v6573_v30 = vrot.slane %v13578_v60, 1 }
0x10de   :  { %v9233_v49 = vpack.i.bf16 %v13651_v57, %v13654_v44  ;;  %v9273_v39 = vpack.i.bf16 %v13618_v46, %v13651_v57  ;;  %7266 = vmatpush.bf16.msra.mxu2 %v8070_v7  ;;  %v8062_v2 = vld [vmem:[%s14196_s15 + $0x20] sm:$0xff]  ;;  %v6482_v7 = vrot.slane %v13545_v59, 7 }
0x10df   :  { %9199 = vrot.lane.b32.xlu2 %v13582_v61, %s9469_s28  ;;  %7217 = vmatpush.bf16.msra.mxu1 %v8062_v2 }
0x10e1   :  { %9204 = vrot.lane.b32.xlu1 %v13592_v24, %s9469_s28 }
0x10e3   :  { %9229 = vrot.lane.b32.xlu0 %v9228_v13, %s9468_s24  ;;  %v6388_v13 = vld [vmem:[#allocation3 + $0xd0] sm:$0xff] }
0x10e4   :  { %7943 = vmatmul.msk.bf16.gmra.mxu3 %vm102_vm5, %v7023_v56  ;;  %v6476_v56 = vrot.slane %v13535_v45, 7  ;;  %v6595_v10 = vrot.slane %v6388_v13, 1 }
0x10e6   :  { %v13677_v63 = vsel %vm271_vm3, %v6475_v48, %v6476_v56  ;;  %v6567_v48 = vrot.slane %v13568_v9, 1  ;;  %v6568_v56 = vrot.slane %v6403_v27, 1 }
0x10e7   :  { %9209 = vrot.lane.b32.xlu2 %v13615_v14, %s9469_s28  ;;  %v9248_v4 = vpack.i.bf16 %v6588_v22, %v13677_v63 }
0x10e9   :  { %9219 = vrot.lane.b32.xlu1 %v9218_v21, %s9468_s24  ;;  %v6391_v21 = vld [vmem:[#allocation3 + $0xe8] sm:$0xff] }
0x10ea   :  { %v6613_v23 = vrot.slane %v6391_v21, 1 }
0x10eb   :  { %9239 = vrot.lane.b32.xlu0 %v9238_v50, %s9470_s30  ;;  %v6596_v50 = vsel %vm352_vm4, %v6594_v51, %v6595_v10  ;;  %v6397_v51 = vld [vmem:[#allocation3 + $0x118] sm:$0xff]  ;;  %v13715_v10 = vsel %vm352_vm4, %v6570_v32, %v6571_v55 }
0x10ec   :  { %v9268_v11 = vpack.i.bf16 %v6596_v50, %v13586_v31  ;;  %v6614_v18 = vsel %vm352_vm4, %v6612_v38, %v6613_v23  ;;  %v9278_v31 = vpack.i.bf16 %v13637_v52, %v13621_v16  ;;  %v13726_v23 = vsel %vm352_vm4, %v6567_v48, %v6568_v56  ;;  %v6413_v55 = vld [vmem:[#allocation3 + $0x198] sm:$0xff] }
0x10ed   :  { %v6579_v56 = vrot.slane %v13606_v58, 1 }
0x10ef   :  { %9224 = vrot.lane.b32.xlu2 %v9223_v34, %s9468_s24  ;;  %v7029_v34 = vpack.c.bf16 %v6614_v18, %v6596_v50  ;;  %v6558_v50 = vrot.slane %v13543_v12, 1  ;;  %v6562_v18 = vrot.slane %v6397_v51, 1  ;;  %v6500_v51 = vrot.slane %v13606_v58, 7 }
0x10f1   :  { %9244 = vrot.lane.b32.xlu1 %v9243_v47, %s9470_s30  ;;  %v6409_v47 = vld [vmem:[#allocation3 + $0x178] sm:$0xff] }
0x10f2   :  { %v6574_v33 = vrot.slane %v6409_v47, 1  ;;  %v8069_v47 = vld [vmem:[%s14196_s15 + $0x58] sm:$0xff] }
0x10f3   :  { %9264 = vrot.lane.b32.xlu0 %v9263_v20, %s9469_s28  ;;  %v6604_v20 = vrot.slane %v6389_v3, 7  ;;  %v6485_v3 = vrot.slane %v13566_v40, 7  ;;  %7267 = vmatpush.bf16.msra.mxu2 %v8069_v47  ;;  %v6497_v47 = vrot.slane %v13604_v41, 7 }
0x10f4   :  { %7944 = vmatmul.msk.bf16.gmra.mxu3 %vm102_vm5, %v7026_v54  ;;  %v6400_v54 = vld [vmem:[#allocation3 + $0x130] sm:$0xff]  ;;  %v13718_v21 = vsel %vm352_vm4, %v6573_v30, %v6574_v33 }
0x10f5   :  { %v6565_v13 = vrot.slane %v6400_v54, 1  ;;  %v6415_v54 = vld [vmem:[#allocation3 + $0x1a8] sm:$0xff]  ;;  %v6416_v33 = vld [vmem:[#allocation3 + $0x1b0] sm:$0xff] }
0x10f7   :  { %9234 = vrot.lane.b32.xlu2 %v9233_v49, %s9470_s30  ;;  %v6564_v49 = vrot.slane %v13566_v40, 1 }
0x10f9   :  { %9254 = vrot.lane.b32.xlu1 %v9253_v26, %s9469_s28  ;;  %v6394_v26 = vld [vmem:[#allocation3 + $0x100] sm:$0xff]  ;;  %v13723_v38 = vsel %vm352_vm4, %v6564_v49, %v6565_v13  ;;  %v13756_v49 = vld [vmem:[#allocation3 + $0x1b8] sm:$0xff]  ;;  %v6576_v13 = vrot.slane %v13604_v41, 1 }
0x10fb   :  { %9274 = vrot.lane.b32.xlu0 %v9273_v39, %s9468_s24 }
0x10ff   :  { %9249 = vrot.lane.b32.xlu2 %v9248_v4, %s9470_s30  ;;  %v6559_v4 = vrot.slane %v6394_v26, 1  ;;  %v6499_v26 = vrot.slane %v6413_v55, 7 }
0x1101   :  { %9269 = vrot.lane.b32.xlu1 %v9268_v11, %s9469_s28  ;;  %v6561_v11 = vrot.slane %v13545_v59, 1  ;;  %v13774_v58 = vsel %vm271_vm3, %v6499_v26, %v6500_v51  ;;  %v8068_v51 = vld [vmem:[%s14196_s15 + $0x50] sm:$0xff] }
0x1102   :  { %7268 = vmatpush.bf16.msra.mxu2 %v8068_v51 }
0x1103   :  { %9284 = vrot.lane.b32.xlu0 %v13509_v6, %s9470_s30  ;;  %v6605_v6 = vrot.slane %v13671_v37, 7  ;;  %v13741_v53 = vsel %vm352_vm4, %v6561_v11, %v6562_v18  ;;  %v8061_v18 = vld [vmem:[%s14196_s15 + $0x18] sm:$0xff] }
0x1104   :  { %7945 = vmatmul.msk.bf16.gmra.mxu3 %vm102_vm5, %v7029_v34  ;;  %v9318_v34 = vpack.i.bf16 %v13718_v21, %v13715_v10  ;;  %7218 = vmatpush.bf16.msra.mxu1 %v8061_v18  ;;  %v6597_v18 = vrot.slane %v13756_v49, 1 }
0x1105   :  { %v6606_v42 = vsel %vm271_vm3, %v6604_v20, %v6605_v6  ;;  %v9298_v20 = vpack.i.bf16 %v13677_v63, %v13640_v43  ;;  %v6412_v6 = vld [vmem:[#allocation3 + $0x190] sm:$0xff] }
0x1106   :  { %v9303_v39 = vpack.i.bf16 %v6606_v42, %v6588_v22  ;;  %v7032_v22 = vpack.c.bf16 %v13726_v23, %v13723_v38  ;;  %v6577_v48 = vrot.slane %v6412_v6, 1  ;;  %v6580_v42 = vrot.slane %v6415_v54, 1 }
0x1107   :  { %9259 = vrot.lane.b32.xlu2 %v9258_v5, %s9469_s28  ;;  %v6484_v5 = vrot.slane %v6398_v28, 7  ;;  %v6407_v28 = vld [vmem:[#allocation3 + $0x168] sm:$0xff]  ;;  %v6488_v54 = vrot.slane %v13568_v9, 7 }
0x1108   :  { %v6581_v11 = vsel %vm352_vm4, %v6579_v56, %v6580_v42 }
0x1109   :  { %9279 = vrot.lane.b32.xlu1 %v9278_v31, %s9468_s24  ;;  %v6560_v31 = vsel %vm352_vm4, %v6558_v50, %v6559_v4  ;;  %v13752_v32 = vsel %vm271_vm3, %v6484_v5, %v6485_v3  ;;  %v6410_v50 = vld [vmem:[#allocation3 + $0x180] sm:$0xff]  ;;  %v6578_v4 = vsel %vm352_vm4, %v6576_v13, %v6577_v48  ;;  %v6494_v3 = vrot.slane %v13578_v60, 7 }
0x110a   :  { %v9308_v30 = vpack.i.bf16 %v13741_v53, %v6560_v31  ;;  %v6496_v31 = vrot.slane %v6410_v50, 7  ;;  %v7035_v60 = vpack.c.bf16 %v13718_v21, %v13715_v10  ;;  %v9348_v50 = vpack.i.bf16 %v13723_v38, %v13741_v53  ;;  %v8059_v53 = vld [vmem:[%s14196_s15 + $0x8] sm:$0xff] }
0x110b   :  { %9289 = vrot.lane.b32.xlu0 %v13522_v1, %s9470_s30  ;;  %v6395_v1 = vld [vmem:[#allocation3 + $0x108] sm:$0xff] }
0x110c   :  { %v13793_v48 = vsel %vm271_vm3, %v6496_v31, %v6497_v47  ;;  %v6420_v31 = vld [vmem:[#allocation3 + $0x1d0] sm:$0xff] }
0x110f   :  { %9294 = vrot.lane.b32.xlu2 %v13552_v35, %s9470_s30  ;;  %v6481_v35 = vrot.slane %v6395_v1, 7  ;;  %v6589_v1 = vrot.slane %v6416_v33, 7 }
0x1111   :  { %9304 = vrot.lane.b32.xlu1 %v9303_v39, %s9468_s24  ;;  %v13749_v27 = vsel %vm271_vm3, %v6481_v35, %v6482_v7  ;;  %v6590_v39 = vrot.slane %v13756_v49, 7  ;;  %v6493_v35 = vrot.slane %v6407_v28, 7  ;;  %v6404_v7 = vld [vmem:[#allocation3 + $0x150] sm:$0xff]  ;;  %v6418_v28 = vld [vmem:[#allocation3 + $0x1c0] sm:$0xff] }
0x1112   :  { %v9328_v2 = vpack.i.bf16 %v13752_v32, %v13749_v27  ;;  %v6490_v55 = vrot.slane %v6404_v7, 7  ;;  %v7038_v7 = vpack.c.bf16 %v6581_v11, %v6578_v4 }
0x1113   :  { %9319 = vrot.lane.b32.xlu0 %v9318_v34, %s9468_s24  ;;  %v9313_v34 = vpack.i.bf16 %v13726_v23, %v13723_v38  ;;  %v13777_v5 = vsel %vm271_vm3, %v6589_v1, %v6590_v39  ;;  %v13790_v13 = vsel %vm271_vm3, %v6493_v35, %v6494_v3  ;;  %v9353_v1 = vpack.i.bf16 %v13715_v10, %v13726_v23  ;;  %v8060_v10 = vld [vmem:[%s14196_s15 + $0x10] sm:$0xff]  ;;  %v6419_v3 = vld [vmem:[#allocation3 + $0x1c8] sm:$0xff] }
0x1114   :  { %7946 = vmatmul.msk.bf16.gmra.mxu3 %vm102_vm5, %v7032_v22  ;;  %v6401_v22 = vld [vmem:[#allocation3 + $0x138] sm:$0xff]  ;;  %v9343_v33 = vpack.i.bf16 %v13777_v5, %v13774_v58  ;;  %v9358_v35 = vpack.i.bf16 %v6578_v4, %v13718_v21  ;;  %v9383_v23 = vpack.i.bf16 %v13774_v58, %v13793_v48  ;;  %7219 = vmatpush.bf16.msra.mxu1 %v8060_v10  ;;  %v6607_v47 = vrot.slane %v6419_v3, 7 }
0x1115   :  { %v6487_v6 = vrot.slane %v6401_v22, 7 }
0x1117   :  { %9299 = vrot.lane.b32.xlu2 %v9298_v20, %s9468_s24  ;;  %v9323_v20 = vpack.i.bf16 %v6581_v11, %v6578_v4  ;;  %v13798_v56 = vsel %vm271_vm3, %v6487_v6, %v6488_v54  ;;  %v6421_v6 = vld [vmem:[#allocation3 + $0x1d8] sm:$0xff]  ;;  %v8058_v54 = vld [vmem:[%s14196_s15] sm:$0xff] }
0x1118   :  { %7220 = vmatpush.bf16.msra.mxu1 %v8059_v53 }
0x1119   :  { %9309 = vrot.lane.b32.xlu1 %v9308_v30, %s9468_s24  ;;  %v6491_v30 = vrot.slane %v13576_v15, 7 }
0x111b   :  { %9329 = vrot.lane.b32.xlu0 %v9328_v2, %s9470_s30  ;;  %v13801_v42 = vsel %vm271_vm3, %v6490_v55, %v6491_v30  ;;  %v9338_v2 = vpack.i.bf16 %v13793_v48, %v13790_v13  ;;  %v8067_v55 = vld [vmem:[%s14196_s15 + $0x48] sm:$0xff]  ;;  %v6615_v30 = vrot.slane %v6420_v31, 1 }
0x111c   :  { %v9333_v26 = vpack.i.bf16 %v13801_v42, %v13798_v56  ;;  %v9378_v4 = vpack.i.bf16 %v13790_v13, %v13801_v42  ;;  %7221 = vmatpush.bf16.msra.mxu1 %v8058_v54  ;;  %7269 = vmatpush.bf16.msra.mxu2 %v8067_v55 }
0x111f   :  { %9314 = vrot.lane.b32.xlu2 %v9313_v34, %s9468_s24  ;;  %v6598_v34 = vrot.slane %v6418_v28, 1 }
0x1121   :  { %9324 = vrot.lane.b32.xlu1 %v9323_v20, %s9468_s24  ;;  %v6599_v38 = vsel %vm352_vm4, %v6597_v18, %v6598_v34  ;;  %v6608_v20 = vrot.slane %v6420_v31, 7  ;;  %v9373_v34 = vpack.i.bf16 %v13671_v37, %v13657_v36 }
0x1122   :  { %v9363_v21 = vpack.i.bf16 %v6599_v38, %v6581_v11 }
0x1123   :  { %9344 = vrot.lane.b32.xlu0 %v9343_v33, %s9470_s30  ;;  %v6616_v33 = vrot.slane %v6421_v6, 1 }
0x1124   :  { %7947 = vmatmul.msk.bf16.gmra.mxu3 %vm102_vm5, %v7035_v60  ;;  %v6609_v60 = vsel %vm271_vm3, %v6607_v47, %v6608_v20 }
0x1125   :  { %v6617_v51 = vsel %vm352_vm4, %v6615_v30, %v6616_v33 }
0x1127   :  { %9339 = vrot.lane.b32.xlu2 %v9338_v2, %s9470_s30  ;;  %v9368_v2 = vpack.i.bf16 %v13798_v56, %v13752_v32 }
0x1129   :  { %9334 = vrot.lane.b32.xlu1 %v9333_v26, %s9470_s30  ;;  %v13814_v39 = vpop.permute.xlu2 %9174  ;;  %v9393_v26 = vpack.i.bf16 %v6609_v60, %v13777_v5  ;;  %v6362_v5 = vld [vmem:[#allocation3] sm:$0xff] }
0x112a   :  { %v9177_v37 = vunpack.i.h.bf16 %v13814_v39 }
0x112b   :  { %9354 = vrot.lane.b32.xlu0 %v9353_v1, %s9469_s28  ;;  %v9408_v1 = vpack.i.bf16 %v6420_v31, %v13756_v49 }
0x112f   :  { %9349 = vrot.lane.b32.xlu2 %v9348_v50, %s9469_s28 }
0x1131   :  { %9359 = vrot.lane.b32.xlu1 %v9358_v35, %s9469_s28  ;;  %v13828_v22 = vpop.permute.xlu2 %9189  ;;  %v8066_v35 = vld [vmem:[%s14196_s15 + $0x40] sm:$0xff] }
0x1132   :  { %7270 = vmatpush.bf16.msra.mxu2 %v8066_v35 }
0x1133   :  { %9384 = vrot.lane.b32.xlu0 %v9383_v23, %s9468_s24  ;;  %v6455_v23 = vrot.slane %v13483_v19, 7  ;;  %v6923_v19 = vsel %vm102_vm5, %v13654_v44, %v9177_v37 }
0x1134   :  { %7948 = vmatmul.msk.bf16.gmra.mxu3 %vm102_vm5, %v7038_v7  ;;  %v6454_v7 = vrot.slane %v6362_v5, 7 }
0x1136   :  { %v6456_v3 = vsel %vm271_vm3, %v6454_v7, %v6455_v23 }
0x1137   :  { %9364 = vrot.lane.b32.xlu2 %v9363_v21, %s9469_s28  ;;  %v9176_v21 = vunpack.i.l.bf16 %v13814_v39 }
0x1139   :  { %9379 = vrot.lane.b32.xlu1 %v9378_v4, %s9468_s24  ;;  %v13846_v11 = vpop.permute.xlu2 %9199  ;;  %v6922_v47 = vsel %vm102_vm5, %v6456_v3, %v9176_v21 }
0x113b   :  { %9389 = vrot.lane.b32.xlu0 %v13582_v61, %s9470_s30  ;;  %v7041_v61 = vpack.c.bf16 %v6617_v51, %v6599_v38 }
0x113f   :  { %9369 = vrot.lane.b32.xlu2 %v9368_v2, %s9468_s24 }
0x1141   :  { %9394 = vrot.lane.b32.xlu1 %v9393_v26, %s9468_s24  ;;  %v13858_v28 = vpop.permute.xlu2 %9209 }
0x1143   :  { %9409 = vrot.lane.b32.xlu0 %v9408_v1, %s9470_s30  ;;  %v9180_v50 = vpop.permute.xlu1 %9179 }
0x1144   :  { %7949 = vmatmul.msk.bf16.gmra.mxu3 %vm102_vm5, %v7041_v61  ;;  %v9182_v26 = vunpack.i.h.bf16 %v9180_v50  ;;  %v9181_v44 = vunpack.i.l.bf16 %v9180_v50 }
0x1145   :  { %v13862_v18 = vpop.permute.xlu0 %9184 }
0x1146   :  { %v6925_v5 = vsel %vm102_vm5, %v13618_v46, %v9182_v26  ;;  %v6924_v35 = vsel %vm102_vm5, %v13651_v57, %v9181_v44 }
0x1147   :  { %9374 = vrot.lane.b32.xlu2 %v9373_v34, %s9470_s30 }
0x1149   :  { %9399 = vrot.lane.b32.xlu1 %v13592_v24, %s9470_s30  ;;  %v9225_v10 = vpop.permute.xlu2 %9224 }
0x114b   :  { %v13873_v38 = vpop.permute.xlu1 %9194 }
0x114d   :  { %v9215_v53 = vpop.permute.xlu0 %9214 }
0x114e   :  { %v9217_v31 = vunpack.i.h.bf16 %v9215_v53  ;;  %v9216_v4 = vunpack.i.l.bf16 %v9215_v53 }
0x114f   :  { %9404 = vrot.lane.b32.xlu2 %v13615_v14, %s9470_s30 }
0x1150   :  { %v6938_v54 = vsel %vm57_vm0, %v6922_v47, %v9216_v4  ;;  %v6939_v55 = vsel %vm57_vm0, %v6923_v19, %v9217_v31  ;;  %v9187_v47 = vunpack.i.h.bf16 %v13862_v18  ;;  %v9186_v19 = vunpack.i.l.bf16 %v13862_v18 }
0x1151   :  { %v9235_v24 = vpop.permute.xlu2 %9234 }
0x1152   :  { %v9237_v20 = vunpack.i.h.bf16 %v9235_v24  ;;  %v9236_v6 = vunpack.i.l.bf16 %v9235_v24 }
0x1153   :  { %v13885_v39 = vpop.permute.xlu1 %9204 }
0x1154   :  { %v6955_v30 = vsel %vm1888_vm8, %v6939_v55, %v9237_v20  ;;  %v6954_v33 = vsel %vm1888_vm8, %v6938_v54, %v9236_v6  ;;  %v9227_v20 = vunpack.i.h.bf16 %v9225_v10  ;;  %v9226_v6 = vunpack.i.l.bf16 %v9225_v10 }
0x1155   :  { %v13889_v60 = vpop.permute.xlu0 %9229  ;;  %v7018_v14 = vpack.c.bf16 %v6955_v30, %v6954_v33  ;;  %v6927_v33 = vsel %vm102_vm5, %v13637_v52, %v9187_v47 }
0x1157   :  { %7222 = vmatmul.bf16.vlgmr.msra.gmra.mxu1 %v7018_v14  ;;  %v6926_v14 = vsel %vm102_vm5, %v13621_v16, %v9186_v19 }
0x1159   :  { %v13891_v2 = vpop.permute.xlu2 %9249 }
0x115b   :  { %v9220_v51 = vpop.permute.xlu1 %9219 }
0x115c   :  { %v9222_v1 = vunpack.i.h.bf16 %v9220_v51  ;;  %v9221_v61 = vunpack.i.l.bf16 %v9220_v51  ;;  %v6943_v51 = vsel %vm57_vm0, %v6927_v33, %v9227_v20  ;;  %v9232_v20 = vunpack.i.h.bf16 %v13889_v60 }
0x115d   :  { %v9240_v34 = vpop.permute.xlu0 %9239 }
0x115e   :  { %v9242_v23 = vunpack.i.h.bf16 %v9240_v34  ;;  %v9241_v7 = vunpack.i.l.bf16 %v9240_v34  ;;  %v6941_v53 = vsel %vm57_vm0, %v6925_v5, %v9222_v1  ;;  %v6940_v37 = vsel %vm57_vm0, %v6924_v35, %v9221_v61 }
0x115f   :  { %v6942_v1 = vsel %vm57_vm0, %v6926_v14, %v9226_v6  ;;  %v9231_v6 = vunpack.i.l.bf16 %v13889_v60 }
0x1160   :  { %v6956_v50 = vsel %vm1888_vm8, %v6940_v37, %v9241_v7  ;;  %v6957_v3 = vsel %vm1888_vm8, %v6941_v53, %v9242_v23 }
0x1161   :  { %v13899_v21 = vpop.permute.xlu2 %9259  ;;  %v7021_v24 = vpack.c.bf16 %v6957_v3, %v6956_v50 }
0x1162   :  { %v9262_v33 = vunpack.i.h.bf16 %v13899_v21  ;;  %v9261_v14 = vunpack.i.l.bf16 %v13899_v21 }
0x1163   :  { %v9245_v31 = vpop.permute.xlu1 %9244 }
0x1164   :  { %v9247_v55 = vunpack.i.h.bf16 %v9245_v31  ;;  %v9246_v30 = vunpack.i.l.bf16 %v9245_v31  ;;  %v6973_v21 = vsel %vm102_vm5, %v13504_v62, %v9262_v33 }
0x1165   :  { %v13903_v4 = vpop.permute.xlu0 %9264 }
0x1166   :  { %v6958_v18 = vsel %vm1888_vm8, %v6942_v1, %v9246_v30  ;;  %v6959_v10 = vsel %vm1888_vm8, %v6943_v51, %v9247_v55  ;;  %v9251_v55 = vunpack.i.l.bf16 %v13891_v2 }
0x1167   :  { %7227 = vmatmul.bf16.gmra.mxu1 %v7021_v24  ;;  %v7024_v7 = vpack.c.bf16 %v6959_v10, %v6958_v18 }
0x1169   :  { %v13905_v46 = vpop.permute.xlu2 %9294 }
0x116b   :  { %v9255_v57 = vpop.permute.xlu1 %9254 }
0x116c   :  { %v9257_v26 = vunpack.i.h.bf16 %v9255_v57  ;;  %v9256_v44 = vunpack.i.l.bf16 %v9255_v57 }
0x116d   :  { %v9275_v54 = vpop.permute.xlu0 %9274 }
0x116e   :  { %v9277_v34 = vunpack.i.h.bf16 %v9275_v54  ;;  %v9276_v5 = vunpack.i.l.bf16 %v9275_v54  ;;  %v6971_v52 = vsel %vm102_vm5, %v13493_v29, %v9257_v26  ;;  %v6970_v16 = vsel %vm102_vm5, %v13489_v8, %v9256_v44 }
0x116f   :  { %v9192_v29 = vunpack.i.h.bf16 %v13828_v22  ;;  %v9191_v8 = vunpack.i.l.bf16 %v13828_v22  ;;  %v9252_v54 = vunpack.i.h.bf16 %v13891_v2 }
0x1170   :  { %v6986_v50 = vsel %vm57_vm0, %v6970_v16, %v9276_v5  ;;  %v6987_v3 = vsel %vm57_vm0, %v6971_v52, %v9277_v34  ;;  %v6392_v5 = vld [vmem:[#allocation3 + $0xf0] sm:$0xff] }
0x1171   :  { %v13915_v61 = vpop.permute.xlu2 %9299  ;;  %v6929_v26 = vsel %vm102_vm5, %v13677_v63, %v9192_v29  ;;  %v6928_v22 = vsel %vm102_vm5, %v13640_v43, %v9191_v8  ;;  %v6972_v63 = vsel %vm102_vm5, %v13499_v25, %v9261_v14  ;;  %v9197_v25 = vunpack.i.h.bf16 %v13873_v38 }
0x1172   :  { %v6945_v1 = vsel %vm57_vm0, %v6929_v26, %v9232_v20  ;;  %v6944_v60 = vsel %vm57_vm0, %v6928_v22, %v9231_v6  ;;  %v9302_v14 = vunpack.i.h.bf16 %v13915_v61  ;;  %v9301_v26 = vunpack.i.l.bf16 %v13915_v61 }
0x1173   :  { %v13919_v35 = vpop.permute.xlu1 %9269  ;;  %v6960_v2 = vsel %vm1888_vm8, %v6944_v60, %v9251_v55  ;;  %v6961_v10 = vsel %vm1888_vm8, %v6945_v1, %v9252_v54  ;;  %v6931_v6 = vsel %vm102_vm5, %v13749_v27, %v9197_v25  ;;  %v9267_v55 = vunpack.i.h.bf16 %v13903_v4 }
0x1175   :  { %v9285_v23 = vpop.permute.xlu0 %9284  ;;  %v6975_v27 = vsel %vm102_vm5, %v13533_v0, %v9267_v55 }
0x1176   :  { %v9287_v53 = vunpack.i.h.bf16 %v9285_v23  ;;  %v9286_v37 = vunpack.i.l.bf16 %v9285_v23 }
0x1177   :  { %7232 = vmatmul.bf16.gmra.mxu1 %v7024_v7 }
0x1178   :  { %v7002_v31 = vsel %vm1888_vm8, %v6986_v50, %v9286_v37  ;;  %v7003_v24 = vsel %vm1888_vm8, %v6987_v3, %v9287_v53  ;;  %v7027_v53 = vpack.c.bf16 %v6961_v10, %v6960_v2  ;;  %v6479_v37 = vrot.slane %v13543_v12, 7 }
0x1179   :  { %v7019_v57 = vpack.c.bf16 %v7003_v24, %v7002_v31  ;;  %v13929_v47 = vpop.permute.xlu2 %9314  ;;  %v6478_v50 = vrot.slane %v6392_v5, 7  ;;  %v9196_v31 = vunpack.i.l.bf16 %v13873_v38  ;;  %v6991_v2 = vsel %vm57_vm0, %v6975_v27, %v9302_v14 }
0x117b   :  { %7271 = vmatmul.bf16.vlgmr.msra.gmra.mxu2 %v7019_v57  ;;  %v9280_v19 = vpop.permute.xlu1 %9279  ;;  %v6480_v29 = vsel %vm271_vm3, %v6478_v50, %v6479_v37  ;;  %v9201_v37 = vunpack.i.l.bf16 %v13846_v11  ;;  %v9272_v50 = vunpack.i.h.bf16 %v13919_v35 }
0x117c   :  { %v9282_v44 = vunpack.i.h.bf16 %v9280_v19  ;;  %v9281_v51 = vunpack.i.l.bf16 %v9280_v19  ;;  %v6930_v12 = vsel %vm102_vm5, %v6480_v29, %v9196_v31 }
0x117d   :  { %v9290_v30 = vpop.permute.xlu0 %9289 }
0x117e   :  { %v9292_v34 = vunpack.i.h.bf16 %v9290_v30  ;;  %v9291_v43 = vunpack.i.l.bf16 %v9290_v30  ;;  %v6989_v52 = vsel %vm57_vm0, %v6973_v21, %v9282_v44  ;;  %v6988_v16 = vsel %vm57_vm0, %v6972_v63, %v9281_v51 }
0x117f   :  { %v9266_v30 = vunpack.i.l.bf16 %v13903_v4  ;;  %v9297_v21 = vunpack.i.h.bf16 %v13905_v46  ;;  %v9296_v63 = vunpack.i.l.bf16 %v13905_v46  ;;  %v9271_v46 = vunpack.i.l.bf16 %v13919_v35 }
0x1180   :  { %v7004_v62 = vsel %vm1888_vm8, %v6988_v16, %v9291_v43  ;;  %v7005_v3 = vsel %vm1888_vm8, %v6989_v52, %v9292_v34  ;;  %v6977_v35 = vsel %vm102_vm5, %v13657_v36, %v9272_v50 }
0x1181   :  { %v13945_v18 = vpop.permute.xlu2 %9339  ;;  %v7022_v24 = vpack.c.bf16 %v7005_v3, %v7004_v62  ;;  %v6974_v1 = vsel %vm102_vm5, %v13514_v17, %v9266_v30  ;;  %v7007_v17 = vsel %vm1888_vm8, %v6991_v2, %v9297_v21  ;;  %v9317_v62 = vunpack.i.h.bf16 %v13929_v47 }
0x1182   :  { %v6990_v61 = vsel %vm57_vm0, %v6974_v1, %v9301_v26  ;;  %v9316_v3 = vunpack.i.l.bf16 %v13929_v47  ;;  %v6976_v47 = vsel %vm102_vm5, %v13535_v45, %v9271_v46  ;;  %v9341_v21 = vunpack.i.l.bf16 %v13945_v18 }
0x1183   :  { %v13955_v23 = vpop.permute.xlu1 %9304  ;;  %v7006_v43 = vsel %vm1888_vm8, %v6990_v61, %v9296_v63  ;;  %v9342_v61 = vunpack.i.h.bf16 %v13945_v18 }
0x1184   :  { %v7025_v5 = vpack.c.bf16 %v7007_v17, %v7006_v43  ;;  %v9307_v29 = vunpack.i.h.bf16 %v13955_v23 }
0x1185   :  { %v13957_v7 = vpop.permute.xlu0 %9319 }
0x1186   :  { %v9322_v27 = vunpack.i.h.bf16 %v13957_v7  ;;  %v9321_v1 = vunpack.i.l.bf16 %v13957_v7 }
0x1187   :  { %7237 = vmatmul.bf16.gmra.mxu1 %v7027_v53  ;;  %v9202_v53 = vunpack.i.h.bf16 %v13846_v11  ;;  %v6932_v11 = vsel %vm102_vm5, %v13752_v32, %v9201_v37  ;;  %v6993_v32 = vsel %vm57_vm0, %v6977_v35, %v9307_v29 }
0x1189   :  { %v13964_v57 = vpop.permute.xlu2 %9349 }
0x118a   :  { %v9352_v43 = vunpack.i.h.bf16 %v13964_v57  ;;  %v9351_v7 = vunpack.i.l.bf16 %v13964_v57 }
0x118b   :  { %7276 = vmatmul.bf16.gmra.mxu2 %v7022_v24  ;;  %v9310_v8 = vpop.permute.xlu1 %9309 }
0x118c   :  { %v9312_v19 = vunpack.i.h.bf16 %v9310_v8  ;;  %v9311_v20 = vunpack.i.l.bf16 %v9310_v8  ;;  %v9306_v8 = vunpack.i.l.bf16 %v13955_v23  ;;  %v6979_v18 = vsel %vm102_vm5, %v13566_v40, %v9352_v43 }
0x118d   :  { %v9330_v54 = vpop.permute.xlu0 %9329  ;;  %v6978_v37 = vsel %vm102_vm5, %v13545_v59, %v9351_v7  ;;  %v9211_v40 = vunpack.i.l.bf16 %v13858_v28 }
0x118e   :  { %v9332_v38 = vunpack.i.h.bf16 %v9330_v54  ;;  %v9331_v33 = vunpack.i.l.bf16 %v9330_v54  ;;  %v6946_v22 = vsel %vm57_vm0, %v6930_v12, %v9311_v20  ;;  %v6947_v44 = vsel %vm57_vm0, %v6931_v6, %v9312_v19 }
0x118f   :  { %v6933_v19 = vsel %vm102_vm5, %v13798_v56, %v9202_v53  ;;  %v6948_v12 = vsel %vm57_vm0, %v6932_v11, %v9316_v3  ;;  %v6992_v30 = vsel %vm57_vm0, %v6976_v47, %v9306_v8 }
0x1190   :  { %v6962_v4 = vsel %vm1888_vm8, %v6946_v22, %v9331_v33  ;;  %v6963_v60 = vsel %vm1888_vm8, %v6947_v44, %v9332_v38  ;;  %v6949_v20 = vsel %vm57_vm0, %v6933_v19, %v9317_v62  ;;  %v9207_v22 = vunpack.i.h.bf16 %v13885_v39 }
0x1191   :  { %v13976_v51 = vpop.permute.xlu2 %9364  ;;  %v7030_v0 = vpack.c.bf16 %v6963_v60, %v6962_v4  ;;  %v9206_v44 = vunpack.i.l.bf16 %v13885_v39  ;;  %v6936_v19 = vsel %vm102_vm5, %v13793_v48, %v9211_v40 }
0x1192   :  { %v6935_v60 = vsel %vm102_vm5, %v13790_v13, %v9207_v22 }
0x1193   :  { %v13986_v10 = vpop.permute.xlu1 %9324  ;;  %v6934_v2 = vsel %vm102_vm5, %v13801_v42, %v9206_v44  ;;  %v6951_v39 = vsel %vm57_vm0, %v6935_v60, %v9322_v27 }
0x1194   :  { %v6950_v63 = vsel %vm57_vm0, %v6934_v2, %v9321_v1  ;;  %v6967_v42 = vsel %vm1888_vm8, %v6951_v39, %v9342_v61  ;;  %v9327_v29 = vunpack.i.h.bf16 %v13986_v10  ;;  %v9326_v59 = vunpack.i.l.bf16 %v13986_v10  ;;  %v9465_v1 = vld [vmem:[#allocation3 + $0x170] sm:$0xff] }
0x1195   :  { %v13990_v34 = vpop.permute.xlu0 %9344  ;;  %v6966_v53 = vsel %vm1888_vm8, %v6950_v63, %v9341_v21 }
0x1196   :  { %v7036_v57 = vpack.c.bf16 %v6967_v42, %v6966_v53  ;;  %v9347_v11 = vunpack.i.h.bf16 %v13990_v34  ;;  %v9346_v35 = vunpack.i.l.bf16 %v13990_v34 }
0x1197   :  { %7242 = vmatmul.bf16.gmra.mxu1 %v7030_v0 }
0x1199   :  { %v9370_v52 = vpop.permute.xlu2 %9369 }
0x119a   :  { %v9372_v17 = vunpack.i.h.bf16 %v9370_v52 }
0x119b   :  { %7281 = vmatmul.bf16.gmra.mxu2 %v7025_v5  ;;  %v9335_v16 = vpop.permute.xlu1 %9334  ;;  %v9371_v5 = vunpack.i.l.bf16 %v9370_v52 }
0x119c   :  { %v9337_v31 = vunpack.i.h.bf16 %v9335_v16  ;;  %v9336_v24 = vunpack.i.l.bf16 %v9335_v16  ;;  %v6995_v46 = vsel %vm57_vm0, %v6979_v18, %v9372_v17 }
0x119d   :  { %v14000_v25 = vpop.permute.xlu0 %9354  ;;  %v6994_v50 = vsel %vm57_vm0, %v6978_v37, %v9371_v5  ;;  %v7321_v5 = vpop.f32.mrf.mxu3 }
0x119e   :  { %v6964_v23 = vsel %vm1888_vm8, %v6948_v12, %v9336_v24  ;;  %v6965_v56 = vsel %vm1888_vm8, %v6949_v20, %v9337_v31  ;;  %v9212_v24 = vunpack.i.h.bf16 %v13858_v28  ;;  %v6952_v20 = vsel %vm57_vm0, %v6936_v19, %v9326_v59 }
0x119f   :  { %v7033_v14 = vpack.c.bf16 %v6965_v56, %v6964_v23  ;;  %v9357_v12 = vunpack.i.h.bf16 %v14000_v25  ;;  %v9356_v10 = vunpack.i.l.bf16 %v14000_v25  ;;  %v6968_v23 = vsel %vm1888_vm8, %v6952_v20, %v9346_v35 }
0x11a0   :  { %v6937_v8 = vsel %vm102_vm5, %v13774_v58, %v9212_v24 }
0x11a1   :  { %v9375_v6 = vpop.permute.xlu2 %9374  ;;  %v6953_v47 = vsel %vm57_vm0, %v6937_v8, %v9327_v29  ;;  %v6981_v34 = vsel %vm102_vm5, %v13576_v15, %v9357_v12  ;;  %v6980_v56 = vsel %vm102_vm5, %v13568_v9, %v9356_v10 }
0x11a2   :  { %v9377_v54 = vunpack.i.h.bf16 %v9375_v6  ;;  %v9376_v55 = vunpack.i.l.bf16 %v9375_v6  ;;  %v6969_v48 = vsel %vm1888_vm8, %v6953_v47, %v9347_v11 }
0x11a3   :  { %v14018_v38 = vpop.permute.xlu1 %9359 }
0x11a4   :  { %v7008_v36 = vsel %vm1888_vm8, %v6992_v30, %v9376_v55  ;;  %v7009_v45 = vsel %vm1888_vm8, %v6993_v32, %v9377_v54  ;;  %v9361_v22 = vunpack.i.l.bf16 %v14018_v38 }
0x11a5   :  { %v14022_v33 = vpop.permute.xlu0 %9384  ;;  %v7028_v26 = vpack.c.bf16 %v7009_v45, %v7008_v36  ;;  %v7039_v36 = vpack.c.bf16 %v6969_v48, %v6968_v23 }
0x11a6   :  { %v9387_v44 = vunpack.i.h.bf16 %v14022_v33  ;;  %v9386_v9 = vunpack.i.l.bf16 %v14022_v33  ;;  %v9367_v33 = vunpack.i.h.bf16 %v13976_v51 }
0x11a7   :  { %7247 = vmatmul.bf16.gmra.mxu1 %v7033_v14 }
0x11a9   :  { %v9405_v15 = vpop.permute.xlu2 %9404 }
0x11aa   :  { %v9407_v60 = vunpack.i.h.bf16 %v9405_v15  ;;  %v9406_v2 = vunpack.i.l.bf16 %v9405_v15 }
0x11ab   :  { %7286 = vmatmul.bf16.gmra.mxu2 %v7028_v26  ;;  %v9380_v4 = vpop.permute.xlu1 %9379  ;;  %v9362_v26 = vunpack.i.h.bf16 %v14018_v38 }
0x11ac   :  { %v9382_v6 = vunpack.i.h.bf16 %v9380_v4  ;;  %v9381_v54 = vunpack.i.l.bf16 %v9380_v4  ;;  %v6982_v4 = vsel %vm102_vm5, %v9465_v1, %v9361_v22 }
0x11ad   :  { %v9390_v0 = vpop.permute.xlu0 %9389  ;;  %v6983_v27 = vsel %vm102_vm5, %v13604_v41, %v9362_v26  ;;  %v6998_v21 = vsel %vm57_vm0, %v6982_v4, %v9386_v9  ;;  %v9366_v41 = vunpack.i.l.bf16 %v13976_v51 }
0x11ae   :  { %v9392_v16 = vunpack.i.h.bf16 %v9390_v0  ;;  %v9391_v13 = vunpack.i.l.bf16 %v9390_v0  ;;  %v6996_v30 = vsel %vm57_vm0, %v6980_v56, %v9381_v54  ;;  %v6997_v32 = vsel %vm57_vm0, %v6981_v34, %v9382_v6 }
0x11af   :  { %v6999_v61 = vsel %vm57_vm0, %v6983_v27, %v9387_v44  ;;  %v7014_v63 = vsel %vm1888_vm8, %v6998_v21, %v9406_v2 }
0x11b0   :  { %v7010_v52 = vsel %vm1888_vm8, %v6994_v50, %v9391_v13  ;;  %v7011_v3 = vsel %vm1888_vm8, %v6995_v46, %v9392_v16  ;;  %v7015_v38 = vsel %vm1888_vm8, %v6999_v61, %v9407_v60  ;;  %v6985_v16 = vsel %vm102_vm5, %v13756_v49, %v9367_v33  ;;  %v9466_v13 = vld [vmem:[#allocation3 + $0x1a0] sm:$0xff] }
0x11b1   :  { %v7031_v31 = vpack.c.bf16 %v7011_v3, %v7010_v52  ;;  %v7037_v39 = vpack.c.bf16 %v7015_v38, %v7014_v63  ;;  %v6984_v53 = vsel %vm102_vm5, %v9466_v13, %v9366_v41  ;;  %v7323_v52 = vpop.f32.mrf.mxu3  ;;  %v14099_v49 = vld [vmem:[%s14197_s16] ss:$0 sm:$0xff] }
0x11b3   :  { %v14046_v62 = vpop.permute.xlu1 %9394 }
0x11b4   :  { %v9397_v43 = vunpack.i.h.bf16 %v14046_v62  ;;  %v9396_v7 = vunpack.i.l.bf16 %v14046_v62 }
0x11b5   :  { %v9410_v17 = vpop.permute.xlu0 %9409 }
0x11b6   :  { %v9412_v42 = vunpack.i.h.bf16 %v9410_v17  ;;  %v9411_v18 = vunpack.i.l.bf16 %v9410_v17  ;;  %v7001_v37 = vsel %vm57_vm0, %v6985_v16, %v9397_v43  ;;  %v7000_v50 = vsel %vm57_vm0, %v6984_v53, %v9396_v7 }
0x11b7   :  { %7252 = vmatmul.bf16.gmra.mxu1 %v7036_v57  ;;  %vm7377_vm0 = vcmask 97280  }
0x11b8   :  { %v7016_v51 = vsel %vm1888_vm8, %v7000_v50, %v9411_v18  ;;  %v7017_v57 = vsel %vm1888_vm8, %v7001_v37, %v9412_v42 }
0x11b9   :  { %v7040_v62 = vpack.c.bf16 %v7017_v57, %v7016_v51 }
0x11bb   :  { %7291 = vmatmul.bf16.gmra.mxu2 %v7031_v31  ;;  %v9400_v28 = vpop.permute.xlu1 %9399  ;;  %v7326_v31 = vpop.f32.mrf.mxu3 }
0x11bc   :  { %v9402_v55 = vunpack.i.h.bf16 %v9400_v28  ;;  %v9401_v58 = vunpack.i.l.bf16 %v9400_v28 }
0x11be   :  { %v7012_v25 = vsel %vm1888_vm8, %v6996_v30, %v9401_v58  ;;  %v7013_v45 = vsel %vm1888_vm8, %v6997_v32, %v9402_v55 }
0x11bf   :  { %v7034_v14 = vpack.c.bf16 %v7013_v45, %v7012_v25 }
0x11c3   :  { %v7328_v8 = vpop.f32.mrf.mxu3 }
0x11c7   :  { %7257 = vmatmul.bf16.gmra.mxu1 %v7039_v36 }
0x11cb   :  { %7296 = vmatmul.bf16.gmra.mxu2 %v7034_v14  ;;  %v7331_v10 = vpop.f32.mrf.mxu3 }
0x11d3   :  { %v7333_v34 = vpop.f32.mrf.mxu3 }
0x11d4   :  { %v7223_v0 = vpop.f32.mrf.mxu1 }
0x11d5   :  { %v7224_v40 = vadd.f32 %v14099_v49, %v7223_v0 }
0x11db   :  { %7301 = vmatmul.bf16.gmra.mxu2 %v7037_v39  ;;  %v7336_v26 = vpop.f32.mrf.mxu3 }
0x11dc   :  { %v7225_v46 = vpop.f32.mrf.mxu1 }
0x11dd   :  { %v7226_v35 = vadd.f32 %v14099_v49, %v7225_v46 }
0x11e3   :  { %v7338_v2 = vpop.f32.mrf.mxu3 }
0x11e4   :  { %v7228_v3 = vpop.f32.mrf.mxu1 }
0x11e5   :  { %v7229_v6 = vadd.f32 %v14099_v49, %v7228_v3 }
0x11eb   :  { %7306 = vmatmul.bf16.gmra.mxu2 %v7040_v62  ;;  %v7341_v43 = vpop.f32.mrf.mxu3 }
0x11ec   :  { %v7230_v24 = vpop.f32.mrf.mxu1 }
0x11ed   :  { %v7231_v56 = vadd.f32 %v14099_v49, %v7230_v24 }
0x11f3   :  { %v7343_v42 = vpop.f32.mrf.mxu3 }
0x11f4   :  { %v7233_v11 = vpop.f32.mrf.mxu1 }
0x11f5   :  { %v7234_v14 = vadd.f32 %v14099_v49, %v7233_v11 }
0x11fc   :  { %v7235_v54 = vpop.f32.mrf.mxu1 }
0x11fd   :  { %v7236_v1 = vadd.f32 %v14099_v49, %v7235_v54 }
0x11fe   :  { %v7272_v29 = vpop.f32.mrf.mxu2 }
0x11ff   :  { %v7273_v59 = vadd.f32 %v7272_v29, %v7224_v40 }
0x1201   :  { %v7322_v19 = vadd.f32 %v7321_v5, %v7273_v59 }
0x1203   :  { %9431 = vtanh.f32 %v7322_v19 }
0x1204   :  { %v7238_v36 = vpop.f32.mrf.mxu1 }
0x1205   :  { %v7239_v38 = vadd.f32 %v14099_v49, %v7238_v36 }
0x1206   :  { %v7274_v47 = vpop.f32.mrf.mxu2 }
0x1207   :  { %v7275_v20 = vadd.f32 %v7274_v47, %v7226_v35 }
0x1209   :  { %v9432_v28 = vpop.eup %9431  ;;  %v7324_v12 = vadd.f32 %v7323_v52, %v7275_v20  ;;  %v7346_v52 = vpop.f32.mrf.mxu3 }
0x120a   :  { %7378 = vst.msk [vmem:[%s14198_s17] sm:$0xff] %vm7377_vm0, %v9432_v28 }
0x120b   :  { %9433 = vtanh.f32 %v7324_v12 }
0x120c   :  { %v7240_v27 = vpop.f32.mrf.mxu1 }
0x120d   :  { %v7241_v7 = vadd.f32 %v14099_v49, %v7240_v27 }
0x120e   :  { %v7277_v55 = vpop.f32.mrf.mxu2 }
0x120f   :  { %v7278_v58 = vadd.f32 %v7277_v55, %v7229_v6 }
0x1211   :  { %v9434_v23 = vpop.eup %9433  ;;  %v7327_v48 = vadd.f32 %v7326_v31, %v7278_v58  ;;  %v7348_v11 = vpop.f32.mrf.mxu3 }
0x1212   :  { %7379 = vst.msk [vmem:[%s14198_s17 + $0x8] sm:$0xff] %vm7377_vm0, %v9434_v23 }
0x1213   :  { %9435 = vtanh.f32 %v7327_v48 }
0x1214   :  { %v7243_v63 = vpop.f32.mrf.mxu1 }
0x1215   :  { %v7244_v18 = vadd.f32 %v14099_v49, %v7243_v63 }
0x1216   :  { %v7279_v30 = vpop.f32.mrf.mxu2 }
0x1217   :  { %v7280_v32 = vadd.f32 %v7279_v30, %v7231_v56 }
0x1219   :  { %v9436_v25 = vpop.eup %9435  ;;  %v7329_v45 = vadd.f32 %v7328_v8, %v7280_v32  ;;  %v7351_v55 = vpop.f32.mrf.mxu3 }
0x121a   :  { %7380 = vst.msk [vmem:[%s14198_s17 + $0x10] sm:$0xff] %vm7377_vm0, %v9436_v25 }
0x121b   :  { %9437 = vtanh.f32 %v7329_v45 }
0x121c   :  { %v7245_v17 = vpop.f32.mrf.mxu1 }
0x121d   :  { %v7246_v62 = vadd.f32 %v14099_v49, %v7245_v17 }
0x121e   :  { %v7282_v22 = vpop.f32.mrf.mxu2 }
0x121f   :  { %v7283_v15 = vadd.f32 %v7282_v22, %v7234_v14 }
0x1221   :  { %v9438_v44 = vpop.eup %9437  ;;  %v7332_v9 = vadd.f32 %v7331_v10, %v7283_v15  ;;  %v7353_v32 = vpop.f32.mrf.mxu3 }
0x1222   :  { %7381 = vst.msk [vmem:[%s14198_s17 + $0x18] sm:$0xff] %vm7377_vm0, %v9438_v44 }
0x1223   :  { %9439 = vtanh.f32 %v7332_v9 }
0x1224   :  { %v7248_v46 = vpop.f32.mrf.mxu1 }
0x1225   :  { %v7249_v59 = vadd.f32 %v14099_v49, %v7248_v46 }
0x1226   :  { %v7284_v4 = vpop.f32.mrf.mxu2 }
0x1227   :  { %v7285_v60 = vadd.f32 %v7284_v4, %v7236_v1 }
0x1229   :  { %v9440_v61 = vpop.eup %9439  ;;  %v7334_v21 = vadd.f32 %v7333_v34, %v7285_v60  ;;  %v7356_v44 = vpop.f32.mrf.mxu3 }
0x122a   :  { %7382 = vst.msk [vmem:[%s14198_s17 + $0x20] sm:$0xff] %vm7377_vm0, %v9440_v61 }
0x122b   :  { %9441 = vtanh.f32 %v7334_v21 }
0x122c   :  { %v7250_v29 = vpop.f32.mrf.mxu1 }
0x122d   :  { %v7251_v28 = vadd.f32 %v14099_v49, %v7250_v29 }
0x122e   :  { %v7287_v39 = vpop.f32.mrf.mxu2 }
0x122f   :  { %v7288_v0 = vadd.f32 %v7287_v39, %v7239_v38 }
0x1231   :  { %v9442_v33 = vpop.eup %9441  ;;  %v7337_v41 = vadd.f32 %v7336_v26, %v7288_v0  ;;  %v7358_v63 = vpop.f32.mrf.mxu3 }
0x1232   :  { %7383 = vst.msk [vmem:[%s14198_s17 + $0x28] sm:$0xff] %vm7377_vm0, %v9442_v33 }
0x1233   :  { %9443 = vtanh.f32 %v7337_v41 }
0x1234   :  { %v7253_v20 = vpop.f32.mrf.mxu1 }
0x1235   :  { %v7254_v58 = vadd.f32 %v14099_v49, %v7253_v20 }
0x1236   :  { %v7289_v5 = vpop.f32.mrf.mxu2 }
0x1237   :  { %v7290_v16 = vadd.f32 %v7289_v5, %v7241_v7 }
0x1239   :  { %v9444_v13 = vpop.eup %9443  ;;  %v7339_v53 = vadd.f32 %v7338_v2, %v7290_v16 }
0x123a   :  { %7384 = vst.msk [vmem:[%s14198_s17 + $0x30] sm:$0xff] %vm7377_vm0, %v9444_v13 }
0x123b   :  { %9445 = vtanh.f32 %v7339_v53 }
0x123c   :  { %v7255_v23 = vpop.f32.mrf.mxu1 }
0x123d   :  { %v7256_v36 = vadd.f32 %v14099_v49, %v7255_v23 }
0x123e   :  { %v7292_v37 = vpop.f32.mrf.mxu2 }
0x123f   :  { %v7293_v50 = vadd.f32 %v7292_v37, %v7244_v18 }
0x1241   :  { %v9446_v51 = vpop.eup %9445  ;;  %v7342_v57 = vadd.f32 %v7341_v43, %v7293_v50 }
0x1242   :  { %7385 = vst.msk [vmem:[%s14198_s17 + $0x38] sm:$0xff] %vm7377_vm0, %v9446_v51 }
0x1243   :  { %9447 = vtanh.f32 %v7342_v57 }
0x1244   :  { %v7258_v14 = vpop.f32.mrf.mxu1 }
0x1245   :  { %v7259_v15 = vadd.f32 %v14099_v49, %v7258_v14 }
0x1246   :  { %v7294_v3 = vpop.f32.mrf.mxu2 }
0x1247   :  { %v7295_v31 = vadd.f32 %v7294_v3, %v7246_v62 }
0x1249   :  { %v9448_v24 = vpop.eup %9447  ;;  %v7344_v40 = vadd.f32 %v7343_v42, %v7295_v31 }
0x124a   :  { %7386 = vst.msk [vmem:[%s14198_s17 + $0x40] sm:$0xff] %vm7377_vm0, %v9448_v24 }
0x124b   :  { %9449 = vtanh.f32 %v7344_v40 }
0x124c   :  { %v7260_v60 = vpop.f32.mrf.mxu1 }
0x124d   :  { %v7261_v2 = vadd.f32 %v14099_v49, %v7260_v60 }
0x124e   :  { %v7297_v8 = vpop.f32.mrf.mxu2 }
0x124f   :  { %v7298_v19 = vadd.f32 %v7297_v8, %v7249_v59 }
0x1251   :  { %v9450_v35 = vpop.eup %9449  ;;  %v7347_v47 = vadd.f32 %v7346_v52, %v7298_v19 }
0x1252   :  { %7387 = vst.msk [vmem:[%s14198_s17 + $0x48] sm:$0xff] %vm7377_vm0, %v9450_v35 }
0x1253   :  { %9451 = vtanh.f32 %v7347_v47 }
0x1256   :  { %v7299_v12 = vpop.f32.mrf.mxu2 }
0x1257   :  { %v7300_v10 = vadd.f32 %v7299_v12, %v7251_v28 }
0x1259   :  { %v9452_v6 = vpop.eup %9451  ;;  %v7349_v54 = vadd.f32 %v7348_v11, %v7300_v10 }
0x125a   :  { %7388 = vst.msk [vmem:[%s14198_s17 + $0x50] sm:$0xff] %vm7377_vm0, %v9452_v6 }
0x125b   :  { %9453 = vtanh.f32 %v7349_v54 }
0x125e   :  { %v7302_v48 = vpop.f32.mrf.mxu2 }
0x125f   :  { %v7303_v34 = vadd.f32 %v7302_v48, %v7254_v58 }
0x1261   :  { %v9454_v56 = vpop.eup %9453  ;;  %v7352_v30 = vadd.f32 %v7351_v55, %v7303_v34 }
0x1262   :  { %7389 = vst.msk [vmem:[%s14198_s17 + $0x58] sm:$0xff] %vm7377_vm0, %v9454_v56 }
0x1263   :  { %9455 = vtanh.f32 %v7352_v30 }
0x1266   :  { %v7304_v25 = vpop.f32.mrf.mxu2 }
0x1267   :  { %v7305_v45 = vadd.f32 %v7304_v25, %v7256_v36 }
0x1269   :  { %v9456_v26 = vpop.eup %9455  ;;  %v7354_v22 = vadd.f32 %v7353_v32, %v7305_v45 }
0x126a   :  { %7390 = vst.msk [vmem:[%s14198_s17 + $0x60] sm:$0xff] %vm7377_vm0, %v9456_v26 }
0x126b   :  { %9457 = vtanh.f32 %v7354_v22 }
0x126e   :  { %v7307_v9 = vpop.f32.mrf.mxu2 }
0x126f   :  { %v7308_v27 = vadd.f32 %v7307_v9, %v7259_v15 }
0x1271   :  { %v9458_v1 = vpop.eup %9457  ;;  %v7357_v4 = vadd.f32 %v7356_v44, %v7308_v27 }
0x1272   :  { %7391 = vst.msk [vmem:[%s14198_s17 + $0x68] sm:$0xff] %vm7377_vm0, %v9458_v1 }
0x1273   :  { %9459 = vtanh.f32 %v7357_v4 }
0x1276   :  { %v7309_v61 = vpop.f32.mrf.mxu2 }
0x1277   :  { %v7310_v21 = vadd.f32 %v7309_v61, %v7261_v2 }
0x1279   :  { %v9460_v38 = vpop.eup %9459  ;;  %v7359_v39 = vadd.f32 %v7358_v63, %v7310_v21 }
0x127a   :  { %7392 = vst.msk [vmem:[%s14198_s17 + $0x70] sm:$0xff] %vm7377_vm0, %v9460_v38 }
0x127b   :  { %9461 = vtanh.f32 %v7359_v39 }
0x1281   :  { %v9462_v0 = vpop.eup %9461 }
0x1282   :  { %7393 = vst.msk [vmem:[%s14198_s17 + $0x78] sm:$0xff] %vm7377_vm0, %v9462_v0 }

</bundles_post_ra>
